<compile_context>
chip_gen: v6e
topology: v6e:2x2x1
jax: 0.10.0
libtpu: 0.0.40
codegen_flags: <defaults>
</compile_context>

<pallas_src>
import functools

import jax
import jax.numpy as jnp
from jax.experimental import pallas as pl
from jax.experimental.pallas import tpu as pltpu

LEAKY_SLOPE = 0.2
BN_EPS = 1e-5


def _leaky(x):
    return jnp.where(x > 0, x, LEAKY_SLOPE * x)


# ---------------------------------------------------------------------------
# Pallas kernels
# ---------------------------------------------------------------------------
def _conv_matmul_kernel(a_ref, b_ref, o_ref, *, act):
    """(tm,K) @ (K,tn) on the MXU (bf16 inputs, f32 accumulate) + epilogue."""
    acc = jnp.dot(a_ref[...], b_ref[...], preferred_element_type=jnp.float32)
    if act == "leaky":
        acc = _leaky(acc)
    o_ref[...] = acc.astype(o_ref.dtype)


def _bn_leaky_kernel(x_ref, mean_ref, scale_ref, o_ref):
    """Per-element BatchNorm normalize (precomputed mean / 1/sqrt(var+eps))
    + LeakyReLU on the compact (N*H*W, C) activation, emitted as bf16."""
    y = (x_ref[...].astype(jnp.float32) - mean_ref[...]) * scale_ref[...]
    o_ref[...] = _leaky(y).astype(o_ref.dtype)


def _final_kernel(a_ref, w_ref, o_ref):
    """Last layer: Cout=1 conv as a VPU multiply + lane reduction, fused
    sigmoid (an M=2, N=1 MXU matmul would be idle hardware + masked stores)."""
    prod = a_ref[...].astype(jnp.float32) * w_ref[...].astype(jnp.float32)
    logits = jnp.sum(prod, axis=-1, keepdims=True)
    o_ref[...] = jax.nn.sigmoid(logits)


# ---------------------------------------------------------------------------
# Pallas wrappers
# ---------------------------------------------------------------------------
def _preferred_tn():
    """Generation-aware Cout tile: 256 fills v6e/v7x's 256-wide MXU; v5e's
    MXUs are 128-wide so 128 already matches (and halves per-step B bytes)."""
    try:
        kind = jax.devices()[0].device_kind.lower()
    except Exception:
        return 128
    if any(tag in kind for tag in ("v6", "v7", "7x")):
        return 256
    return 128


def matmul_fused(a, b, act="none", out_dtype=jnp.float32):
    """Tiled (M,K)@(K,N) with bf16 MXU inputs and f32 accumulation.

    Optional fused epilogue (act="leaky").  Output dtype selectable so a
    consumer that wants bf16 (the next conv's im2col) gets it straight from
    the kernel store instead of a separate XLA cast pass.
    """
    M, K = a.shape
    K2, Nc = b.shape
    assert K == K2

    tn_pref = _preferred_tn()
    if Nc % tn_pref == 0:
        tn = tn_pref
    elif Nc % 128 == 0:
        tn = 128
    else:
        tn = Nc                                 # e.g. conv1 Cout=64
    grid_n = Nc // tn

    tm = M
    for cand in (1024, 512, 256):               # big M tiles amortize per-step overhead
        if M > cand and M % cand == 0:
            tm = cand
            break
    grid_m = M // tm
    # Keep >= 2 grid steps on a "parallel" axis so v7x's second TensorCore
    # gets work and the BlockSpec pipeline has something to overlap.
    if grid_m * grid_n == 1 and M % 16 == 0:
        tm = M // 2
        grid_m = 2
    assert M % tm == 0 and Nc % tn == 0

    a = a.astype(jnp.bfloat16)
    b = b.astype(jnp.bfloat16)

    kernel = functools.partial(_conv_matmul_kernel, act=act)
    return pl.pallas_call(
        kernel,
        out_shape=jax.ShapeDtypeStruct((M, Nc), out_dtype),
        grid_spec=pltpu.PrefetchScalarGridSpec(
            num_scalar_prefetch=0,
            grid=(grid_m, grid_n),
            in_specs=[
                pl.BlockSpec((tm, K), lambda i, j: (i, 0)),
                pl.BlockSpec((K, tn), lambda i, j: (0, j)),
            ],
            out_specs=pl.BlockSpec((tm, tn), lambda i, j: (i, j)),
        ),
        compiler_params=pltpu.CompilerParams(
            dimension_semantics=("parallel", "parallel")),
    )(a, b)


def bn_leaky(x_nhwc, eps=BN_EPS):
    """Train-mode BatchNorm2d (gamma=1, beta=0) + LeakyReLU -> bf16.

    Biased batch stats over (N,H,W) (torch train-mode normalization) are
    reduced in plain-JAX glue; the per-element normalize + leaky runs as a
    Pallas VPU kernel on the compact NHWC activation (16x fewer elements than
    doing it on im2col patches, no f32 temps inside the matmul kernels).
    """
    # TODO(synk): batch-statistic reductions left as plain-JAX glue.
    N, H, W, C = x_nhwc.shape
    x32 = x_nhwc.astype(jnp.float32)
    mean = jnp.mean(x32, axis=(0, 1, 2)).reshape(1, C)
    var = jnp.var(x32, axis=(0, 1, 2)).reshape(1, C)      # biased, torch train mode
    scale = (1.0 / jnp.sqrt(var + eps)).astype(jnp.float32)

    x2d = x_nhwc.reshape(N * H * W, C)
    y = pl.pallas_call(
        _bn_leaky_kernel,
        out_shape=jax.ShapeDtypeStruct((N * H * W, C), jnp.bfloat16),
        in_specs=[
            pl.BlockSpec(memory_space=pltpu.MemorySpace.VMEM),
            pl.BlockSpec(memory_space=pltpu.MemorySpace.VMEM),
            pl.BlockSpec(memory_space=pltpu.MemorySpace.VMEM),
        ],
        out_specs=pl.BlockSpec(memory_space=pltpu.MemorySpace.VMEM),
    )(x2d, mean, scale)
    return y.reshape(N, H, W, C)


def final_layer(patches, w_oihw):
    """Final 4x4 valid conv with Cout=1, fused sigmoid epilogue."""
    M, K = patches.shape
    _, Cin, KH, KW = w_oihw.shape
    # (KH, KW, Cin) order to match the im2col K order.
    w_row = jnp.transpose(w_oihw, (2, 3, 1, 0)).reshape(1, KH * KW * Cin)
    return pl.pallas_call(
        _final_kernel,
        out_shape=jax.ShapeDtypeStruct((M, 1), jnp.float32),
        in_specs=[
            pl.BlockSpec(memory_space=pltpu.MemorySpace.VMEM),
            pl.BlockSpec(memory_space=pltpu.MemorySpace.VMEM),
        ],
        out_specs=pl.BlockSpec(memory_space=pltpu.MemorySpace.VMEM),
    )(patches.astype(jnp.bfloat16), w_row.astype(jnp.bfloat16))


# ---------------------------------------------------------------------------
# Glue: im2col + layer wrappers (plain JAX between Pallas calls)
# ---------------------------------------------------------------------------
def im2col(x_nhwc, k, stride, pad):
    """Patches ordered (KH, KW, Cin) -> (N*OH*OW, KH*KW*Cin).

    No transpose of the 16x-inflated patch tensor: kernel-position slices are
    stacked just before the channel axis and reshaped contiguously."""
    # TODO(synk): fuse patch extraction into the Pallas kernel (index_map over
    # output rows) to avoid materializing the inflated patch matrix in HBM.
    N, H, W, C = x_nhwc.shape
    if pad:
        x_nhwc = jnp.pad(x_nhwc, ((0, 0), (pad, pad), (pad, pad), (0, 0)))
    OH = (H + 2 * pad - k) // stride + 1
    OW = (W + 2 * pad - k) // stride + 1
    cols = []
    for kh in range(k):
        for kw in range(k):
            cols.append(x_nhwc[:, kh:kh + OH * stride:stride,
                               kw:kw + OW * stride:stride, :])
    p = jnp.stack(cols, axis=3)                 # (N, OH, OW, KH*KW, C)
    return p.reshape(N * OH * OW, k * k * C), OH, OW


def conv_layer(x_nhwc, w_oihw, stride, pad, act="none", out_dtype=jnp.float32):
    """nn.Conv2d(bias=False) via im2col + Pallas MXU matmul."""
    Cout, Cin, KH, KW = w_oihw.shape
    patches, OH, OW = im2col(x_nhwc, KH, stride, pad)
    # OIHW -> (KH, KW, Cin, Cout) -> (K, Cout); matches the im2col K order.
    w2 = jnp.transpose(w_oihw, (2, 3, 1, 0)).reshape(KH * KW * Cin, Cout)
    y = matmul_fused(patches, w2, act=act, out_dtype=out_dtype)
    N = x_nhwc.shape[0]
    return y.reshape(N, OH, OW, Cout)


def discriminator_forward(x_nchw, params):
    x = jnp.transpose(x_nchw, (0, 2, 3, 1)).astype(jnp.bfloat16)   # NCHW -> NHWC
    # conv1 + fused LeakyReLU, bf16 output straight from the kernel store.
    x = conv_layer(x, params["w1"], 2, 1, act="leaky",
                   out_dtype=jnp.bfloat16)                          # (N,32,32, 64)
    x = conv_layer(x, params["w2"], 2, 1)                           # (N,16,16,128) f32
    x = bn_leaky(x)
    x = conv_layer(x, params["w3"], 2, 1)                           # (N, 8, 8,256) f32
    x = bn_leaky(x)
    x = conv_layer(x, params["w4"], 2, 1)                           # (N, 4, 4,512) f32
    x = bn_leaky(x)
    kh = params["w5"].shape[2]
    patches, _, _ = im2col(x, kh, 1, 0)                             # (N, 512*16)
    out = final_layer(patches, params["w5"])
    return out.reshape(-1)                                          # == .view(-1)


# ---------------------------------------------------------------------------
# Params, reference, self-check
# ---------------------------------------------------------------------------
def init_params(key):
    # DCGAN-style init N(0, 0.02), torch Conv2d (Cout, Cin, KH, KW) layout.
    shapes = {
        "w1": (64, 3, 4, 4),
        "w2": (128, 64, 4, 4),
        "w3": (256, 128, 4, 4),
        "w4": (512, 256, 4, 4),
        "w5": (1, 512, 4, 4),
    }
    keys = jax.random.split(key, len(shapes))
    return {name: 0.02 * jax.random.normal(k, shape, dtype=jnp.float32)
            for k, (name, shape) in zip(keys, shapes.items())}


def reference_forward(x_nchw, params, eps=BN_EPS):
    """Plain-JAX f32 reference (XLA convs). Returns pre-sigmoid logits."""
    x = jnp.transpose(x_nchw, (0, 2, 3, 1))

    def conv(x, w, stride, pad):
        return jax.lax.conv_general_dilated(
            x, jnp.transpose(w, (2, 3, 1, 0)),            # OIHW -> HWIO
            window_strides=(stride, stride),
            padding=[(pad, pad), (pad, pad)],
            dimension_numbers=("NHWC", "HWIO", "NHWC"))

    def bn_act(x):
        mean = jnp.mean(x, axis=(0, 1, 2))
        var = jnp.var(x, axis=(0, 1, 2))
        y = (x - mean) / jnp.sqrt(var + eps)
        return jnp.where(y > 0, y, LEAKY_SLOPE * y)

    x = conv(x, params["w1"], 2, 1)
    x = jnp.where(x > 0, x, LEAKY_SLOPE * x)
    x = bn_act(conv(x, params["w2"], 2, 1))
    x = bn_act(conv(x, params["w3"], 2, 1))
    x = bn_act(conv(x, params["w4"], 2, 1))
    x = conv(x, params["w5"], 1, 0)
    return x.reshape(-1)                                   # logits


if __name__ == "__main__":
    key = jax.random.PRNGKey(0)
    pkey, xkey = jax.random.split(key)
    params = init_params(pkey)
    # DCGAN discriminator expects 3x64x64 images (so the final 4x4 valid conv
    # yields a 1x1 output).  Batch kept small.
    x = jax.random.normal(xkey, (2, 3, 64, 64), dtype=jnp.float32)

    out = jax.block_until_ready(jax.jit(discriminator_forward)(x, params))
    ref_logits = jax.block_until_ready(jax.jit(reference_forward)(x, params))
    ref = jax.nn.sigmoid(ref_logits)

    assert out.shape == (2,), out.shape
    assert bool(jnp.all(jnp.isfinite(out)))
    assert bool(jnp.all((out >= 0.0) & (out <= 1.0)))
    # bf16 MXU inputs vs. f32 XLA reference -> generous post-sigmoid tolerance.
    assert float(jnp.max(jnp.abs(out - ref))) < 0.1, (out, ref)
    # Tighter pre-sigmoid check: catches weight-layout / K-order bugs that the
    # loose post-sigmoid tolerance could hide, while allowing bf16 noise.
    out_logits = jnp.log(out) - jnp.log1p(-out)
    tol = 0.1 + 0.15 * float(jnp.max(jnp.abs(ref_logits)))
    assert float(jnp.max(jnp.abs(out_logits - ref_logits))) < tol, (
        out_logits, ref_logits)
    print("KERNEL_OK")
</pallas_src>

<mosaic_0001>
module attributes {stable_mosaic.version = 11 : i64} {
  func.func @_conv_matmul_kernel(%arg0: i32, %arg1: i32, %arg2: memref<1024x48xbf16, #tpu.memory_space<vmem>>, %arg3: memref<48x64xbf16, #tpu.memory_space<vmem>>, %arg4: memref<1024x64xbf16, #tpu.memory_space<vmem>>) attributes {dimension_semantics = [#tpu.dimension_semantics<parallel>, #tpu.dimension_semantics<parallel>], iteration_bounds = array<i64: 2, 1>, scalar_prefetch = 0 : i64, scratch_operands = 0 : i64, tpu.core_type = #tpu.core_type<tc>, window_params = [{transform_indices = @transform_0, window_bounds = array<i64: 1024, 48>}, {transform_indices = @transform_1, window_bounds = array<i64: 48, 64>}, {transform_indices = @transform_2, window_bounds = array<i64: 1024, 64>}]} {
    %c0 = arith.constant 0 : index
    %c0_0 = arith.constant 0 : index
    %0 = vector.load %arg2[%c0, %c0_0] : memref<1024x48xbf16, #tpu.memory_space<vmem>>, vector<1024x48xbf16>
    %c0_1 = arith.constant 0 : index
    %c0_2 = arith.constant 0 : index
    %1 = vector.load %arg3[%c0_1, %c0_2] : memref<48x64xbf16, #tpu.memory_space<vmem>>, vector<48x64xbf16>
    %cst = arith.constant dense<0.000000e+00> : vector<1024x64xf32>
    %2 = tpu.matmul %0, %1, %cst {dimension_numbers = #tpu.dot_dimension_numbers<[1], [0], [0], [1], [0, 0, 1, 1], [], []>} : vector<1024x48xbf16>, vector<48x64xbf16>, vector<1024x64xf32> -> vector<1024x64xf32>
    %cst_3 = arith.constant 0.000000e+00 : f32
    %3 = vector.broadcast %cst_3 : f32 to vector<1024x64xf32>
    %4 = arith.cmpf ogt, %2, %3 : vector<1024x64xf32>
    %cst_4 = arith.constant 2.000000e-01 : f32
    %5 = vector.broadcast %cst_4 : f32 to vector<1024x64xf32>
    %6 = arith.mulf %5, %2 : vector<1024x64xf32>
    %7 = arith.select %4, %2, %6 : vector<1024x64xi1>, vector<1024x64xf32>
    %8 = arith.truncf %7 : vector<1024x64xf32> to vector<1024x64xbf16>
    %c0_5 = arith.constant 0 : index
    %c0_6 = arith.constant 0 : index
    %9 = vector.load %arg4[%c0_5, %c0_6] : memref<1024x64xbf16, #tpu.memory_space<vmem>>, vector<1024x64xbf16>
    tpu.vector_store %arg4[%c0_5, %c0_6], %8 {strides = array<i32>} : memref<1024x64xbf16, #tpu.memory_space<vmem>>, vector<1024x64xbf16>,
    return
  }
  func.func @transform_0(%arg0: i32, %arg1: i32) -> (i32, i32) {
    %c0_i32 = arith.constant 0 : i32
    %c0_i32_0 = arith.constant 0 : i32
    return %arg0, %c0_i32 : i32, i32
  }
  func.func @transform_1(%arg0: i32, %arg1: i32) -> (i32, i32) {
    %c0_i32 = arith.constant 0 : i32
    %c0_i32_0 = arith.constant 0 : i32
    return %c0_i32, %arg1 : i32, i32
  }
  func.func @transform_2(%arg0: i32, %arg1: i32) -> (i32, i32) {
    %c0_i32 = arith.constant 0 : i32
    return %arg0, %arg1 : i32, i32
  }
}

module attributes {stable_mosaic.version = 11 : i64} {
  func.func @_conv_matmul_kernel(%arg0: i32, %arg1: i32, %arg2: memref<256x1024xbf16, #tpu.memory_space<vmem>>, %arg3: memref<1024x128xbf16, #tpu.memory_space<vmem>>, %arg4: memref<256x128xf32, #tpu.memory_space<vmem>>) attributes {dimension_semantics = [#tpu.dimension_semantics<parallel>, #tpu.dimension_semantics<parallel>], iteration_bounds = array<i64: 2, 1>, scalar_prefetch = 0 : i64, scratch_operands = 0 : i64, tpu.core_type = #tpu.core_type<tc>, window_params = [{transform_indices = @transform_0, window_bounds = array<i64: 256, 1024>}, {transform_indices = @transform_1, window_bounds = array<i64: 1024, 128>}, {transform_indices = @transform_2, window_bounds = array<i64: 256, 128>}]} {
    %c0 = arith.constant 0 : index
    %c0_0 = arith.constant 0 : index
    %0 = vector.load %arg2[%c0, %c0_0] : memref<256x1024xbf16, #tpu.memory_space<vmem>>, vector<256x1024xbf16>
    %c0_1 = arith.constant 0 : index
    %c0_2 = arith.constant 0 : index
    %1 = vector.load %arg3[%c0_1, %c0_2] : memref<1024x128xbf16, #tpu.memory_space<vmem>>, vector<1024x128xbf16>
    %cst = arith.constant dense<0.000000e+00> : vector<256x128xf32>
    %2 = tpu.matmul %0, %1, %cst {dimension_numbers = #tpu.dot_dimension_numbers<[1], [0], [0], [1], [0, 0, 1, 1], [], []>} : vector<256x1024xbf16>, vector<1024x128xbf16>, vector<256x128xf32> -> vector<256x128xf32>
    %c0_3 = arith.constant 0 : index
    %c0_4 = arith.constant 0 : index
    %3 = vector.load %arg4[%c0_3, %c0_4] : memref<256x128xf32, #tpu.memory_space<vmem>>, vector<256x128xf32>
    tpu.vector_store %arg4[%c0_3, %c0_4], %2 {strides = array<i32>} : memref<256x128xf32, #tpu.memory_space<vmem>>, vector<256x128xf32>,
    return
  }
  func.func @transform_0(%arg0: i32, %arg1: i32) -> (i32, i32) {
    %c0_i32 = arith.constant 0 : i32
    %c0_i32_0 = arith.constant 0 : i32
    return %arg0, %c0_i32 : i32, i32
  }
  func.func @transform_1(%arg0: i32, %arg1: i32) -> (i32, i32) {
    %c0_i32 = arith.constant 0 : i32
    %c0_i32_0 = arith.constant 0 : i32
    return %c0_i32, %arg1 : i32, i32
  }
  func.func @transform_2(%arg0: i32, %arg1: i32) -> (i32, i32) {
    %c0_i32 = arith.constant 0 : i32
    return %arg0, %arg1 : i32, i32
  }
}

module attributes {stable_mosaic.version = 11 : i64} {
  func.func @_bn_leaky_kernel(%arg0: memref<512x128xf32, #tpu.memory_space<vmem>>, %arg1: memref<1x128xf32, #tpu.memory_space<vmem>>, %arg2: memref<1x128xf32, #tpu.memory_space<vmem>>, %arg3: memref<512x128xbf16, #tpu.memory_space<vmem>>) attributes {dimension_semantics = [], scalar_prefetch = 0 : i64, scratch_operands = 0 : i64, tpu.core_type = #tpu.core_type<tc>} {
    %c0 = arith.constant 0 : index
    %c0_0 = arith.constant 0 : index
    %0 = vector.load %arg0[%c0, %c0_0] : memref<512x128xf32, #tpu.memory_space<vmem>>, vector<512x128xf32>
    %c0_1 = arith.constant 0 : index
    %c0_2 = arith.constant 0 : index
    %1 = vector.load %arg1[%c0_1, %c0_2] : memref<1x128xf32, #tpu.memory_space<vmem>>, vector<1x128xf32>
    %2 = vector.broadcast %1 : vector<1x128xf32> to vector<512x128xf32>
    %3 = arith.subf %0, %2 : vector<512x128xf32>
    %c0_3 = arith.constant 0 : index
    %c0_4 = arith.constant 0 : index
    %4 = vector.load %arg2[%c0_3, %c0_4] : memref<1x128xf32, #tpu.memory_space<vmem>>, vector<1x128xf32>
    %5 = vector.broadcast %4 : vector<1x128xf32> to vector<512x128xf32>
    %6 = arith.mulf %3, %5 : vector<512x128xf32>
    %cst = arith.constant 0.000000e+00 : f32
    %7 = vector.broadcast %cst : f32 to vector<512x128xf32>
    %8 = arith.cmpf ogt, %6, %7 : vector<512x128xf32>
    %cst_5 = arith.constant 2.000000e-01 : f32
    %9 = vector.broadcast %cst_5 : f32 to vector<512x128xf32>
    %10 = arith.mulf %9, %6 : vector<512x128xf32>
    %11 = arith.select %8, %6, %10 : vector<512x128xi1>, vector<512x128xf32>
    %12 = arith.truncf %11 : vector<512x128xf32> to vector<512x128xbf16>
    %c0_6 = arith.constant 0 : index
    %c0_7 = arith.constant 0 : index
    %13 = vector.load %arg3[%c0_6, %c0_7] : memref<512x128xbf16, #tpu.memory_space<vmem>>, vector<512x128xbf16>
    tpu.vector_store %arg3[%c0_6, %c0_7], %12 {strides = array<i32>} : memref<512x128xbf16, #tpu.memory_space<vmem>>, vector<512x128xbf16>,
    return
  }
}

module attributes {stable_mosaic.version = 11 : i64} {
  func.func @_conv_matmul_kernel(%arg0: i32, %arg1: i32, %arg2: memref<128x2048xbf16, #tpu.memory_space<vmem>>, %arg3: memref<2048x128xbf16, #tpu.memory_space<vmem>>, %arg4: memref<128x128xf32, #tpu.memory_space<vmem>>) attributes {dimension_semantics = [#tpu.dimension_semantics<parallel>, #tpu.dimension_semantics<parallel>], iteration_bounds = array<i64: 1, 2>, scalar_prefetch = 0 : i64, scratch_operands = 0 : i64, tpu.core_type = #tpu.core_type<tc>, window_params = [{transform_indices = @transform_0, window_bounds = array<i64: 128, 2048>}, {transform_indices = @transform_1, window_bounds = array<i64: 2048, 128>}, {transform_indices = @transform_2, window_bounds = array<i64: 128, 128>}]} {
    %c0 = arith.constant 0 : index
    %c0_0 = arith.constant 0 : index
    %0 = vector.load %arg2[%c0, %c0_0] : memref<128x2048xbf16, #tpu.memory_space<vmem>>, vector<128x2048xbf16>
    %c0_1 = arith.constant 0 : index
    %c0_2 = arith.constant 0 : index
    %1 = vector.load %arg3[%c0_1, %c0_2] : memref<2048x128xbf16, #tpu.memory_space<vmem>>, vector<2048x128xbf16>
    %cst = arith.constant dense<0.000000e+00> : vector<128x128xf32>
    %2 = tpu.matmul %0, %1, %cst {dimension_numbers = #tpu.dot_dimension_numbers<[1], [0], [0], [1], [0, 0, 1, 1], [], []>} : vector<128x2048xbf16>, vector<2048x128xbf16>, vector<128x128xf32> -> vector<128x128xf32>
    %c0_3 = arith.constant 0 : index
    %c0_4 = arith.constant 0 : index
    %3 = vector.load %arg4[%c0_3, %c0_4] : memref<128x128xf32, #tpu.memory_space<vmem>>, vector<128x128xf32>
    tpu.vector_store %arg4[%c0_3, %c0_4], %2 {strides = array<i32>} : memref<128x128xf32, #tpu.memory_space<vmem>>, vector<128x128xf32>,
    return
  }
  func.func @transform_0(%arg0: i32, %arg1: i32) -> (i32, i32) {
    %c0_i32 = arith.constant 0 : i32
    %c0_i32_0 = arith.constant 0 : i32
    return %arg0, %c0_i32 : i32, i32
  }
  func.func @transform_1(%arg0: i32, %arg1: i32) -> (i32, i32) {
    %c0_i32 = arith.constant 0 : i32
    %c0_i32_0 = arith.constant 0 : i32
    return %c0_i32, %arg1 : i32, i32
  }
  func.func @transform_2(%arg0: i32, %arg1: i32) -> (i32, i32) {
    %c0_i32 = arith.constant 0 : i32
    return %arg0, %arg1 : i32, i32
  }
}

module attributes {stable_mosaic.version = 11 : i64} {
  func.func @_bn_leaky_kernel(%arg0: memref<128x256xf32, #tpu.memory_space<vmem>>, %arg1: memref<1x256xf32, #tpu.memory_space<vmem>>, %arg2: memref<1x256xf32, #tpu.memory_space<vmem>>, %arg3: memref<128x256xbf16, #tpu.memory_space<vmem>>) attributes {dimension_semantics = [], scalar_prefetch = 0 : i64, scratch_operands = 0 : i64, tpu.core_type = #tpu.core_type<tc>} {
    %c0 = arith.constant 0 : index
    %c0_0 = arith.constant 0 : index
    %0 = vector.load %arg0[%c0, %c0_0] : memref<128x256xf32, #tpu.memory_space<vmem>>, vector<128x256xf32>
    %c0_1 = arith.constant 0 : index
    %c0_2 = arith.constant 0 : index
    %1 = vector.load %arg1[%c0_1, %c0_2] : memref<1x256xf32, #tpu.memory_space<vmem>>, vector<1x256xf32>
    %2 = vector.broadcast %1 : vector<1x256xf32> to vector<128x256xf32>
    %3 = arith.subf %0, %2 : vector<128x256xf32>
    %c0_3 = arith.constant 0 : index
    %c0_4 = arith.constant 0 : index
    %4 = vector.load %arg2[%c0_3, %c0_4] : memref<1x256xf32, #tpu.memory_space<vmem>>, vector<1x256xf32>
    %5 = vector.broadcast %4 : vector<1x256xf32> to vector<128x256xf32>
    %6 = arith.mulf %3, %5 : vector<128x256xf32>
    %cst = arith.constant 0.000000e+00 : f32
    %7 = vector.broadcast %cst : f32 to vector<128x256xf32>
    %8 = arith.cmpf ogt, %6, %7 : vector<128x256xf32>
    %cst_5 = arith.constant 2.000000e-01 : f32
    %9 = vector.broadcast %cst_5 : f32 to vector<128x256xf32>
    %10 = arith.mulf %9, %6 : vector<128x256xf32>
    %11 = arith.select %8, %6, %10 : vector<128x256xi1>, vector<128x256xf32>
    %12 = arith.truncf %11 : vector<128x256xf32> to vector<128x256xbf16>
    %c0_6 = arith.constant 0 : index
    %c0_7 = arith.constant 0 : index
    %13 = vector.load %arg3[%c0_6, %c0_7] : memref<128x256xbf16, #tpu.memory_space<vmem>>, vector<128x256xbf16>
    tpu.vector_store %arg3[%c0_6, %c0_7], %12 {strides = array<i32>} : memref<128x256xbf16, #tpu.memory_space<vmem>>, vector<128x256xbf16>,
    return
  }
}

module attributes {stable_mosaic.version = 11 : i64} {
  func.func @_conv_matmul_kernel(%arg0: i32, %arg1: i32, %arg2: memref<32x4096xbf16, #tpu.memory_space<vmem>>, %arg3: memref<4096x128xbf16, #tpu.memory_space<vmem>>, %arg4: memref<32x128xf32, #tpu.memory_space<vmem>>) attributes {dimension_semantics = [#tpu.dimension_semantics<parallel>, #tpu.dimension_semantics<parallel>], iteration_bounds = array<i64: 1, 4>, scalar_prefetch = 0 : i64, scratch_operands = 0 : i64, tpu.core_type = #tpu.core_type<tc>, window_params = [{transform_indices = @transform_0, window_bounds = array<i64: 32, 4096>}, {transform_indices = @transform_1, window_bounds = array<i64: 4096, 128>}, {transform_indices = @transform_2, window_bounds = array<i64: 32, 128>}]} {
    %c0 = arith.constant 0 : index
    %c0_0 = arith.constant 0 : index
    %0 = vector.load %arg2[%c0, %c0_0] : memref<32x4096xbf16, #tpu.memory_space<vmem>>, vector<32x4096xbf16>
    %c0_1 = arith.constant 0 : index
    %c0_2 = arith.constant 0 : index
    %1 = vector.load %arg3[%c0_1, %c0_2] : memref<4096x128xbf16, #tpu.memory_space<vmem>>, vector<4096x128xbf16>
    %cst = arith.constant dense<0.000000e+00> : vector<32x128xf32>
    %2 = tpu.matmul %0, %1, %cst {dimension_numbers = #tpu.dot_dimension_numbers<[1], [0], [0], [1], [0, 0, 1, 1], [], []>} : vector<32x4096xbf16>, vector<4096x128xbf16>, vector<32x128xf32> -> vector<32x128xf32>
    %c0_3 = arith.constant 0 : index
    %c0_4 = arith.constant 0 : index
    %3 = vector.load %arg4[%c0_3, %c0_4] : memref<32x128xf32, #tpu.memory_space<vmem>>, vector<32x128xf32>
    tpu.vector_store %arg4[%c0_3, %c0_4], %2 {strides = array<i32>} : memref<32x128xf32, #tpu.memory_space<vmem>>, vector<32x128xf32>,
    return
  }
  func.func @transform_0(%arg0: i32, %arg1: i32) -> (i32, i32) {
    %c0_i32 = arith.constant 0 : i32
    %c0_i32_0 = arith.constant 0 : i32
    return %arg0, %c0_i32 : i32, i32
  }
  func.func @transform_1(%arg0: i32, %arg1: i32) -> (i32, i32) {
    %c0_i32 = arith.constant 0 : i32
    %c0_i32_0 = arith.constant 0 : i32
    return %c0_i32, %arg1 : i32, i32
  }
  func.func @transform_2(%arg0: i32, %arg1: i32) -> (i32, i32) {
    %c0_i32 = arith.constant 0 : i32
    return %arg0, %arg1 : i32, i32
  }
}

module attributes {stable_mosaic.version = 11 : i64} {
  func.func @_bn_leaky_kernel(%arg0: memref<32x512xf32, #tpu.memory_space<vmem>>, %arg1: memref<1x512xf32, #tpu.memory_space<vmem>>, %arg2: memref<1x512xf32, #tpu.memory_space<vmem>>, %arg3: memref<32x512xbf16, #tpu.memory_space<vmem>>) attributes {dimension_semantics = [], scalar_prefetch = 0 : i64, scratch_operands = 0 : i64, tpu.core_type = #tpu.core_type<tc>} {
    %c0 = arith.constant 0 : index
    %c0_0 = arith.constant 0 : index
    %0 = vector.load %arg0[%c0, %c0_0] : memref<32x512xf32, #tpu.memory_space<vmem>>, vector<32x512xf32>
    %c0_1 = arith.constant 0 : index
    %c0_2 = arith.constant 0 : index
    %1 = vector.load %arg1[%c0_1, %c0_2] : memref<1x512xf32, #tpu.memory_space<vmem>>, vector<1x512xf32>
    %2 = vector.broadcast %1 : vector<1x512xf32> to vector<32x512xf32>
    %3 = arith.subf %0, %2 : vector<32x512xf32>
    %c0_3 = arith.constant 0 : index
    %c0_4 = arith.constant 0 : index
    %4 = vector.load %arg2[%c0_3, %c0_4] : memref<1x512xf32, #tpu.memory_space<vmem>>, vector<1x512xf32>
    %5 = vector.broadcast %4 : vector<1x512xf32> to vector<32x512xf32>
    %6 = arith.mulf %3, %5 : vector<32x512xf32>
    %cst = arith.constant 0.000000e+00 : f32
    %7 = vector.broadcast %cst : f32 to vector<32x512xf32>
    %8 = arith.cmpf ogt, %6, %7 : vector<32x512xf32>
    %cst_5 = arith.constant 2.000000e-01 : f32
    %9 = vector.broadcast %cst_5 : f32 to vector<32x512xf32>
    %10 = arith.mulf %9, %6 : vector<32x512xf32>
    %11 = arith.select %8, %6, %10 : vector<32x512xi1>, vector<32x512xf32>
    %12 = arith.truncf %11 : vector<32x512xf32> to vector<32x512xbf16>
    %c0_6 = arith.constant 0 : index
    %c0_7 = arith.constant 0 : index
    %13 = vector.load %arg3[%c0_6, %c0_7] : memref<32x512xbf16, #tpu.memory_space<vmem>>, vector<32x512xbf16>
    tpu.vector_store %arg3[%c0_6, %c0_7], %12 {strides = array<i32>} : memref<32x512xbf16, #tpu.memory_space<vmem>>, vector<32x512xbf16>,
    return
  }
}

module attributes {stable_mosaic.version = 11 : i64} {
  func.func @_final_kernel(%arg0: memref<2x8192xbf16, #tpu.memory_space<vmem>>, %arg1: memref<1x8192xbf16, #tpu.memory_space<vmem>>, %arg2: memref<2x1xf32, #tpu.memory_space<vmem>>) attributes {dimension_semantics = [], scalar_prefetch = 0 : i64, scratch_operands = 0 : i64, tpu.core_type = #tpu.core_type<tc>} {
    %c0 = arith.constant 0 : index
    %c0_0 = arith.constant 0 : index
    %0 = vector.load %arg0[%c0, %c0_0] : memref<2x8192xbf16, #tpu.memory_space<vmem>>, vector<2x8192xbf16>
    %1 = arith.extf %0 : vector<2x8192xbf16> to vector<2x8192xf32>
    %c0_1 = arith.constant 0 : index
    %c0_2 = arith.constant 0 : index
    %2 = vector.load %arg1[%c0_1, %c0_2] : memref<1x8192xbf16, #tpu.memory_space<vmem>>, vector<1x8192xbf16>
    %3 = arith.extf %2 : vector<1x8192xbf16> to vector<1x8192xf32>
    %4 = vector.broadcast %3 : vector<1x8192xf32> to vector<2x8192xf32>
    %5 = arith.mulf %1, %4 : vector<2x8192xf32>
    %cst = arith.constant dense<0.000000e+00> : vector<2xf32>
    %6 = vector.multi_reduction <add>, %5, %cst [1] : vector<2x8192xf32> to vector<2xf32>
    %7 = vector.shape_cast %6 : vector<2xf32> to vector<2x1xf32>
    %8 = arith.negf %7 : vector<2x1xf32>
    %9 = math.exp %8 : vector<2x1xf32>
    %cst_3 = arith.constant 1.000000e+00 : f32
    %10 = vector.broadcast %cst_3 : f32 to vector<2x1xf32>
    %11 = arith.addf %10, %9 : vector<2x1xf32>
    %12 = arith.divf %10, %11 : vector<2x1xf32>
    %c0_4 = arith.constant 0 : index
    %c0_5 = arith.constant 0 : index
    %13 = vector.load %arg2[%c0_4, %c0_5] : memref<2x1xf32, #tpu.memory_space<vmem>>, vector<2x1xf32>
    tpu.vector_store %arg2[%c0_4, %c0_5], %12 {strides = array<i32>} : memref<2x1xf32, #tpu.memory_space<vmem>>, vector<2x1xf32>,
    return
  }
}

</mosaic_0001>

<bundles_post_ra>
// kernel: discriminator_forward.8
= control target key start
LH: loop header
LB: loop body
LE: loop exit
PB: predicated region body
PF: predicated region fallthrough
CT: control target
= control target key end

     0   :  { %s3246_s9 = smov 0   ;;  %s3248_s10 = smov 0   ;;  %s3683_s0 = inlined_call_operand.vmem [shape: bf16[2048,48], index: 0, kind: input, shape index: {}]   ;;  %s3684_s1 = inlined_call_operand.vmem [shape: bf16[48,64], index: 1, kind: input, shape index: {}]   ;;  %s3685_s2 = inlined_call_operand.vmem [shape: bf16[2048,64], index: 2, kind: output, shape index: {}]  }
   0x1   :  { %s3250_s11 = smov 0  }
   0x2 LB: > { %s24_s12 = sadd.s32 1, %s3225_s10  ;;  %p2515_p0 = scmp.ge.s32.totalorder %s3229_s11, 1  ;;  %s3229_s11 = sphi %s3250_s11, %s12_s11   ;;  %s3225_s10 = sphi %s3248_s10, %s3687_s10   ;;  %s3221_s9 = sphi %s3246_s9, %s3686_s9  }
   0x3   : > { %p26_p1 = scmp.ge.s32.totalorder %s24_s12, 2  ;;  %p136_p2 = scmp.lt.s32.totalorder %s3229_s11, 3 }
   0x5   : > { %s3689_s12 = smov (%p26_p1, %s24_s12), 0  ;;  %p137_p3 = pnand %p2515_p0, %p136_p2 }
   0x6   : > { %s2516_s15 = sshll.u32 (!%p137_p3), %s3221_s9, 7 }
   0x7   : > { %140 = sbr.rel (%p137_p3) target bundleno = 351 (0x15f), region = 28  ;;  %p166_p4 = scmp.lt.s32.totalorder (!%p137_p3), %s2516_s15, 255 }
   0xc   : > { %v3140_v0 = vld [vmem:[%s3684_s1 + $0x10] sm:$0xff]   ;;  %v3141_v1 = vld [vmem:[%s3684_s1 + $0x8] sm:$0xff]   ;;  %s3691_s15 = smov (!%p166_p4, %s2516_s15), 255  ;;  %v3142_v2 = vld [vmem:[%s3684_s1] sm:$0xff]   ;;  %vm657_vm0 = vcmask 392192   ;;  %vm2291_vm3 = vcmask 519168  }
   0xd   : > { %2976 = vmatprep.subr.bf16.mxu0 %v3140_v0  ;;  %3110 = vmatprep.subr.bf16.mxu1 %v3140_v0  ;;  %s2517_s20 = sshll.u32 %s3691_s15, 2 }
   0xe   : > { %2977 = vmatpush3.bf16.msra.mxu0 %v3140_v0  ;;  %3113 = vmatpush3.bf16.msra.mxu1 %v3140_v0  ;;  %s3281_s23 = scalar_lea.vmem %s3683_s0, %s2517_s20  ;;  %s3416_s26 = scalar_lea.vmem %s3685_s2, %s2517_s20 }
   0xf   : > { %2978 = vmatprep.subr.bf16.mxu0 %v3141_v1  ;;  %3111 = vmatprep.subr.bf16.mxu1 %v3141_v1  ;;  %v3143_v3 = vld [vmem:[%s3281_s23] sm:$0xff]   ;;  %v3145_v5 = vld [vmem:[%s3281_s23 + $0x8] sm:$0xff]   ;;  %v3147_v7 = vld [vmem:[%s3281_s23 + $0x10] sm:$0xff]  }
  0x10   : > { %v3144_v4 = vld [vmem:[%s3281_s23 + $0x100] sm:$0xff]   ;;  %2982 = vmatprep.mubr.msk.bf16.mxu0 %vm657_vm0, %v3143_v3  ;;  %v3146_v6 = vld [vmem:[%s3281_s23 + $0x108] sm:$0xff]   ;;  %v3148_v8 = vld [vmem:[%s3281_s23 + $0x110] sm:$0xff]  }
  0x11   : > { %3046 = vmatprep.mubr.msk.bf16.mxu1 %vm657_vm0, %v3144_v4  ;;  %v3149_v9 = vld [vmem:[%s3281_s23 + $0x18] sm:$0xff]   ;;  %v3151_v11 = vld [vmem:[%s3281_s23 + $0x20] sm:$0xff]   ;;  %v3153_v13 = vld [vmem:[%s3281_s23 + $0x28] sm:$0xff]  }
  0x12   : > { %2979 = vmatpush3.bf16.msra.mxu0 %v3141_v1  ;;  %3114 = vmatpush3.bf16.msra.mxu1 %v3141_v1  ;;  %v3150_v10 = vld [vmem:[%s3281_s23 + $0x118] sm:$0xff]   ;;  %v3152_v12 = vld [vmem:[%s3281_s23 + $0x120] sm:$0xff]   ;;  %v3154_v14 = vld [vmem:[%s3281_s23 + $0x128] sm:$0xff]  }
  0x13   : > { %2980 = vmatprep.subr.bf16.mxu0 %v3142_v2  ;;  %3112 = vmatprep.subr.bf16.mxu1 %v3142_v2  ;;  %v3155_v15 = vld [vmem:[%s3281_s23 + $0x30] sm:$0xff]   ;;  %v3157_v17 = vld [vmem:[%s3281_s23 + $0x38] sm:$0xff]   ;;  %v3159_v19 = vld [vmem:[%s3281_s23 + $0x40] sm:$0xff]  }
  0x14   : > { %v3156_v16 = vld [vmem:[%s3281_s23 + $0x130] sm:$0xff]   ;;  %v3158_v18 = vld [vmem:[%s3281_s23 + $0x138] sm:$0xff]   ;;  %v3160_v20 = vld [vmem:[%s3281_s23 + $0x140] sm:$0xff]  }
  0x15   : > { %v3161_v21 = vld [vmem:[%s3281_s23 + $0x48] sm:$0xff]   ;;  %v3163_v23 = vld [vmem:[%s3281_s23 + $0x50] sm:$0xff]   ;;  %v3165_v25 = vld [vmem:[%s3281_s23 + $0x58] sm:$0xff]  }
  0x16   : > { %2981 = vmatpush3.bf16.msra.mxu0 %v3142_v2  ;;  %3115 = vmatpush3.bf16.msra.mxu1 %v3142_v2  ;;  %v3162_v22 = vld [vmem:[%s3281_s23 + $0x148] sm:$0xff]   ;;  %v3164_v24 = vld [vmem:[%s3281_s23 + $0x150] sm:$0xff]   ;;  %v3166_v26 = vld [vmem:[%s3281_s23 + $0x158] sm:$0xff]  }
  0x17   : > { %v3167_v27 = vld [vmem:[%s3281_s23 + $0x60] sm:$0xff]   ;;  %v3169_v29 = vld [vmem:[%s3281_s23 + $0x68] sm:$0xff]   ;;  %v3171_v31 = vld [vmem:[%s3281_s23 + $0x70] sm:$0xff]  }
  0x18   : > { %v3168_v28 = vld [vmem:[%s3281_s23 + $0x160] sm:$0xff]   ;;  %v3170_v30 = vld [vmem:[%s3281_s23 + $0x168] sm:$0xff]   ;;  %v3172_v32 = vld [vmem:[%s3281_s23 + $0x170] sm:$0xff]  }
  0x19   : > { %2983 = vmatmul.mubr.msk.bf16.vlgmr.msra.gmra.mxu0 %vm657_vm0, %v3145_v5  ;;  %3047 = vmatmul.mubr.msk.bf16.vlgmr.msra.gmra.mxu1 %vm657_vm0, %v3146_v6  ;;  %v3173_v33 = vld [vmem:[%s3281_s23 + $0x78] sm:$0xff]   ;;  %v3175_v35 = vld [vmem:[%s3281_s23 + $0x80] sm:$0xff]   ;;  %v3177_v37 = vld [vmem:[%s3281_s23 + $0x88] sm:$0xff]  }
  0x1a   : > { %2986 = vmatprep.mubr.msk.bf16.mxu0 %vm657_vm0, %v3147_v7  ;;  %3050 = vmatprep.mubr.msk.bf16.mxu1 %vm657_vm0, %v3148_v8  ;;  %v3174_v34 = vld [vmem:[%s3281_s23 + $0x178] sm:$0xff]   ;;  %v3176_v36 = vld [vmem:[%s3281_s23 + $0x180] sm:$0xff]   ;;  %v3178_v38 = vld [vmem:[%s3281_s23 + $0x188] sm:$0xff]  }
  0x1b   : > { %v3179_v39 = vld [vmem:[%s3281_s23 + $0x90] sm:$0xff]   ;;  %v3181_v41 = vld [vmem:[%s3281_s23 + $0x98] sm:$0xff]   ;;  %v3183_v43 = vld [vmem:[%s3281_s23 + $0xa0] sm:$0xff]  }
  0x1c   : > { %v3180_v40 = vld [vmem:[%s3281_s23 + $0x190] sm:$0xff]   ;;  %v3182_v42 = vld [vmem:[%s3281_s23 + $0x198] sm:$0xff]   ;;  %v3184_v44 = vld [vmem:[%s3281_s23 + $0x1a0] sm:$0xff]  }
  0x1d   : > { %v3185_v45 = vld [vmem:[%s3281_s23 + $0xa8] sm:$0xff]   ;;  %v3187_v47 = vld [vmem:[%s3281_s23 + $0xb0] sm:$0xff]   ;;  %v3189_v49 = vld [vmem:[%s3281_s23 + $0xb8] sm:$0xff]  }
  0x1e   : > { %v3186_v46 = vld [vmem:[%s3281_s23 + $0x1a8] sm:$0xff]   ;;  %v3188_v48 = vld [vmem:[%s3281_s23 + $0x1b0] sm:$0xff]   ;;  %v3190_v50 = vld [vmem:[%s3281_s23 + $0x1b8] sm:$0xff]  }
  0x1f   : > { %v3191_v51 = vld [vmem:[%s3281_s23 + $0xc0] sm:$0xff]   ;;  %v3193_v53 = vld [vmem:[%s3281_s23 + $0xc8] sm:$0xff]   ;;  %v3195_v55 = vld [vmem:[%s3281_s23 + $0xd0] sm:$0xff]  }
  0x20   : > { %v3192_v52 = vld [vmem:[%s3281_s23 + $0x1c0] sm:$0xff]   ;;  %v3194_v54 = vld [vmem:[%s3281_s23 + $0x1c8] sm:$0xff]   ;;  %v3196_v56 = vld [vmem:[%s3281_s23 + $0x1d0] sm:$0xff]  }
  0x21   : > { %2987 = vmatmul.mubr.msk.bf16.gmra.mxu0 %vm657_vm0, %v3149_v9  ;;  %3051 = vmatmul.mubr.msk.bf16.gmra.mxu1 %vm657_vm0, %v3150_v10  ;;  %v3197_v57 = vld [vmem:[%s3281_s23 + $0xd8] sm:$0xff]   ;;  %v3199_v59 = vld [vmem:[%s3281_s23 + $0xe0] sm:$0xff]   ;;  %v3201_v61 = vld [vmem:[%s3281_s23 + $0xe8] sm:$0xff]  }
  0x22   : > { %2990 = vmatprep.mubr.msk.bf16.mxu0 %vm657_vm0, %v3151_v11  ;;  %3054 = vmatprep.mubr.msk.bf16.mxu1 %vm657_vm0, %v3152_v12  ;;  %v3198_v58 = vld [vmem:[%s3281_s23 + $0x1d8] sm:$0xff]   ;;  %v3200_v60 = vld [vmem:[%s3281_s23 + $0x1e0] sm:$0xff]   ;;  %v3202_v62 = vld [vmem:[%s3281_s23 + $0x1e8] sm:$0xff]  }
  0x23   : > { %v3203_v63 = vld [vmem:[%s3281_s23 + $0xf0] sm:$0xff]   ;;  %v3205_v1 = vld [vmem:[%s3281_s23 + $0xf8] sm:$0xff]  }
  0x24   : > { %v3204_v0 = vld [vmem:[%s3281_s23 + $0x1f0] sm:$0xff]   ;;  %v3206_v2 = vld [vmem:[%s3281_s23 + $0x1f8] sm:$0xff]  }
  0x29   : > { %2991 = vmatmul.mubr.msk.bf16.gmra.mxu0 %vm657_vm0, %v3153_v13  ;;  %3055 = vmatmul.mubr.msk.bf16.gmra.mxu1 %vm657_vm0, %v3154_v14 }
  0x2a   : > { %2994 = vmatprep.mubr.msk.bf16.mxu0 %vm657_vm0, %v3155_v15  ;;  %3058 = vmatprep.mubr.msk.bf16.mxu1 %vm657_vm0, %v3156_v16 }
  0x31   : > { %2995 = vmatmul.mubr.msk.bf16.gmra.mxu0 %vm657_vm0, %v3157_v17  ;;  %3059 = vmatmul.mubr.msk.bf16.gmra.mxu1 %vm657_vm0, %v3158_v18 }
  0x32   : > { %2998 = vmatprep.mubr.msk.bf16.mxu0 %vm657_vm0, %v3159_v19  ;;  %3062 = vmatprep.mubr.msk.bf16.mxu1 %vm657_vm0, %v3160_v20 }
  0x39   : > { %2999 = vmatmul.mubr.msk.bf16.gmra.mxu0 %vm657_vm0, %v3161_v21  ;;  %3063 = vmatmul.mubr.msk.bf16.gmra.mxu1 %vm657_vm0, %v3162_v22 }
  0x3a   : > { %3002 = vmatprep.mubr.msk.bf16.mxu0 %vm657_vm0, %v3163_v23  ;;  %3066 = vmatprep.mubr.msk.bf16.mxu1 %vm657_vm0, %v3164_v24 }
  0x41   : > { %3003 = vmatmul.mubr.msk.bf16.gmra.mxu0 %vm657_vm0, %v3165_v25  ;;  %3067 = vmatmul.mubr.msk.bf16.gmra.mxu1 %vm657_vm0, %v3166_v26 }
  0x42   : > { %3006 = vmatprep.mubr.msk.bf16.mxu0 %vm657_vm0, %v3167_v27  ;;  %3070 = vmatprep.mubr.msk.bf16.mxu1 %vm657_vm0, %v3168_v28 }
  0x49   : > { %3007 = vmatmul.mubr.msk.bf16.gmra.mxu0 %vm657_vm0, %v3169_v29  ;;  %3071 = vmatmul.mubr.msk.bf16.gmra.mxu1 %vm657_vm0, %v3170_v30 }
  0x4a   : > { %3010 = vmatprep.mubr.msk.bf16.mxu0 %vm657_vm0, %v3171_v31  ;;  %3074 = vmatprep.mubr.msk.bf16.mxu1 %vm657_vm0, %v3172_v32 }
  0x51   : > { %3011 = vmatmul.mubr.msk.bf16.gmra.mxu0 %vm657_vm0, %v3173_v33  ;;  %3075 = vmatmul.mubr.msk.bf16.gmra.mxu1 %vm657_vm0, %v3174_v34 }
  0x52   : > { %3014 = vmatprep.mubr.msk.bf16.mxu0 %vm657_vm0, %v3175_v35  ;;  %3078 = vmatprep.mubr.msk.bf16.mxu1 %vm657_vm0, %v3176_v36 }
  0x59   : > { %3015 = vmatmul.mubr.msk.bf16.gmra.mxu0 %vm657_vm0, %v3177_v37  ;;  %3079 = vmatmul.mubr.msk.bf16.gmra.mxu1 %vm657_vm0, %v3178_v38 }
  0x5a   : > { %3018 = vmatprep.mubr.msk.bf16.mxu0 %vm657_vm0, %v3179_v39  ;;  %3082 = vmatprep.mubr.msk.bf16.mxu1 %vm657_vm0, %v3180_v40 }
  0x61   : > { %3019 = vmatmul.mubr.msk.bf16.gmra.mxu0 %vm657_vm0, %v3181_v41  ;;  %3083 = vmatmul.mubr.msk.bf16.gmra.mxu1 %vm657_vm0, %v3182_v42 }
  0x62   : > { %3022 = vmatprep.mubr.msk.bf16.mxu0 %vm657_vm0, %v3183_v43  ;;  %3086 = vmatprep.mubr.msk.bf16.mxu1 %vm657_vm0, %v3184_v44 }
  0x69   : > { %3023 = vmatmul.mubr.msk.bf16.gmra.mxu0 %vm657_vm0, %v3185_v45  ;;  %3087 = vmatmul.mubr.msk.bf16.gmra.mxu1 %vm657_vm0, %v3186_v46 }
  0x6a   : > { %3026 = vmatprep.mubr.msk.bf16.mxu0 %vm657_vm0, %v3187_v47  ;;  %3090 = vmatprep.mubr.msk.bf16.mxu1 %vm657_vm0, %v3188_v48 }
  0x71   : > { %3027 = vmatmul.mubr.msk.bf16.gmra.mxu0 %vm657_vm0, %v3189_v49  ;;  %3091 = vmatmul.mubr.msk.bf16.gmra.mxu1 %vm657_vm0, %v3190_v50 }
  0x72   : > { %3030 = vmatprep.mubr.msk.bf16.mxu0 %vm657_vm0, %v3191_v51  ;;  %3094 = vmatprep.mubr.msk.bf16.mxu1 %vm657_vm0, %v3192_v52 }
  0x79   : > { %3031 = vmatmul.mubr.msk.bf16.gmra.mxu0 %vm657_vm0, %v3193_v53  ;;  %3095 = vmatmul.mubr.msk.bf16.gmra.mxu1 %vm657_vm0, %v3194_v54 }
  0x7a   : > { %3034 = vmatprep.mubr.msk.bf16.mxu0 %vm657_vm0, %v3195_v55  ;;  %3098 = vmatprep.mubr.msk.bf16.mxu1 %vm657_vm0, %v3196_v56 }
  0x81   : > { %3035 = vmatmul.mubr.msk.bf16.gmra.mxu0 %vm657_vm0, %v3197_v57  ;;  %3099 = vmatmul.mubr.msk.bf16.gmra.mxu1 %vm657_vm0, %v3198_v58 }
  0x82   : > { %3038 = vmatprep.mubr.msk.bf16.mxu0 %vm657_vm0, %v3199_v59  ;;  %3102 = vmatprep.mubr.msk.bf16.mxu1 %vm657_vm0, %v3200_v60 }
  0x89   : > { %3039 = vmatmul.mubr.msk.bf16.gmra.mxu0 %vm657_vm0, %v3201_v61  ;;  %3103 = vmatmul.mubr.msk.bf16.gmra.mxu1 %vm657_vm0, %v3202_v62 }
  0x8a   : > { %3042 = vmatprep.mubr.msk.bf16.mxu0 %vm657_vm0, %v3203_v63  ;;  %3106 = vmatprep.mubr.msk.bf16.mxu1 %vm657_vm0, %v3204_v0 }
  0x91   : > { %3043 = vmatmul.mubr.msk.bf16.gmra.mxu0 %vm657_vm0, %v3205_v1  ;;  %3107 = vmatmul.mubr.msk.bf16.gmra.mxu1 %vm657_vm0, %v3206_v2 }
  0xd9   : > { %v2984_v3 = vpop.f32.mrf.mxu0  ;;  %v3048_v4 = vpop.f32.mrf.mxu1 }
  0xda   : > { %vm1397_vm1 = vcmp.gt.f32.partialorder %v2984_v3, 0.0  ;;  %v1525_v5 = vmul.f32 0.2, %v2984_v3  ;;  %vm1461_vm2 = vcmp.gt.f32.partialorder %v3048_v4, 0.0  ;;  %v1589_v6 = vmul.f32 0.2, %v3048_v4 }
  0xdb   : > { %v884_v7 = vpop.f32.mrf.mxu0  ;;  %v1140_v8 = vpop.f32.mrf.mxu1 }
  0xdc   : > { %v1653_v9 = vsel %vm1397_vm1, %v2984_v3, %v1525_v5  ;;  %v1717_v10 = vsel %vm1461_vm2, %v3048_v4, %v1589_v6  ;;  %vm1395_vm4 = vcmp.gt.f32.partialorder %v884_v7, 0.0  ;;  %v1523_v11 = vmul.f32 0.2, %v884_v7 }
  0xdd   : > { %v2783_v12 = vpack.c.bf16 %v1653_v9, %v1653_v9  ;;  %v2847_v13 = vpack.c.bf16 %v1717_v10, %v1717_v10  ;;  %vm1459_vm5 = vcmp.gt.f32.partialorder %v1140_v8, 0.0  ;;  %v1587_v14 = vmul.f32 0.2, %v1140_v8  ;;  %v2985_v15 = vpop.f32.mrf.mxu0  ;;  %v3049_v16 = vpop.f32.mrf.mxu1 }
  0xde   : > { %v1651_v17 = vsel %vm1395_vm4, %v884_v7, %v1523_v11  ;;  %vm1398_vm6 = vcmp.gt.f32.partialorder %v2985_v15, 0.0  ;;  %v1526_v18 = vmul.f32 0.2, %v2985_v15  ;;  %vm1462_vm7 = vcmp.gt.f32.partialorder %v3049_v16, 0.0 }
  0xdf   : > { %2294 = vst.msk [vmem:[%s3416_s26 + $0x8] sm:$0xf] %vm2291_vm3, %v2783_v12  ;;  %2358 = vst.msk [vmem:[%s3416_s26 + $0x108] sm:$0xf] %vm2291_vm3, %v2847_v13  ;;  %v2781_v19 = vpack.c.bf16 %v1651_v17, %v1651_v17  ;;  %v1715_v20 = vsel %vm1459_vm5, %v1140_v8, %v1587_v14  ;;  %v1590_v21 = vmul.f32 0.2, %v3049_v16  ;;  %v887_v22 = vpop.f32.mrf.mxu0  ;;  %v1143_v23 = vpop.f32.mrf.mxu1 }
  0xe0   : > { %v2845_v24 = vpack.c.bf16 %v1715_v20, %v1715_v20  ;;  %v1654_v25 = vsel %vm1398_vm6, %v2985_v15, %v1526_v18  ;;  %vm1396_vm8 = vcmp.gt.f32.partialorder %v887_v22, 0.0  ;;  %v1524_v26 = vmul.f32 0.2, %v887_v22 }
  0xe1   : > { %2292 = vst.msk [vmem:[%s3416_s26] sm:$0xf] %vm2291_vm3, %v2781_v19  ;;  %v2784_v27 = vpack.c.bf16 %v1654_v25, %v1654_v25  ;;  %v1718_v28 = vsel %vm1462_vm7, %v3049_v16, %v1590_v21  ;;  %vm1460_vm9 = vcmp.gt.f32.partialorder %v1143_v23, 0.0  ;;  %v1588_v29 = vmul.f32 0.2, %v1143_v23  ;;  %v2988_v30 = vpop.f32.mrf.mxu0  ;;  %v3052_v31 = vpop.f32.mrf.mxu1 }
  0xe2   : > { %2356 = vst.msk [vmem:[%s3416_s26 + $0x100] sm:$0xf] %vm2291_vm3, %v2845_v24  ;;  %v2848_v32 = vpack.c.bf16 %v1718_v28, %v1718_v28  ;;  %v1652_v33 = vsel %vm1396_vm8, %v887_v22, %v1524_v26  ;;  %vm1401_vm10 = vcmp.gt.f32.partialorder %v2988_v30, 0.0  ;;  %v1529_v34 = vmul.f32 0.2, %v2988_v30 }
  0xe3   : > { %2295 = vst.msk [vmem:[%s3416_s26 + $0xc] sm:$0xf] %vm2291_vm3, %v2784_v27  ;;  %v2782_v35 = vpack.c.bf16 %v1652_v33, %v1652_v33  ;;  %v1716_v36 = vsel %vm1460_vm9, %v1143_v23, %v1588_v29  ;;  %vm1465_vm11 = vcmp.gt.f32.partialorder %v3052_v31, 0.0  ;;  %v1593_v37 = vmul.f32 0.2, %v3052_v31  ;;  %v900_v38 = vpop.f32.mrf.mxu0  ;;  %v1156_v39 = vpop.f32.mrf.mxu1 }
  0xe4   : > { %2359 = vst.msk [vmem:[%s3416_s26 + $0x10c] sm:$0xf] %vm2291_vm3, %v2848_v32  ;;  %v2846_v40 = vpack.c.bf16 %v1716_v36, %v1716_v36  ;;  %v1657_v41 = vsel %vm1401_vm10, %v2988_v30, %v1529_v34  ;;  %vm1399_vm12 = vcmp.gt.f32.partialorder %v900_v38, 0.0  ;;  %v1527_v42 = vmul.f32 0.2, %v900_v38 }
  0xe5   : > { %2293 = vst.msk [vmem:[%s3416_s26 + $0x4] sm:$0xf] %vm2291_vm3, %v2782_v35  ;;  %v2787_v43 = vpack.c.bf16 %v1657_v41, %v1657_v41  ;;  %v1721_v44 = vsel %vm1465_vm11, %v3052_v31, %v1593_v37  ;;  %vm1463_vm13 = vcmp.gt.f32.partialorder %v1156_v39, 0.0  ;;  %v1591_v45 = vmul.f32 0.2, %v1156_v39  ;;  %v2989_v46 = vpop.f32.mrf.mxu0  ;;  %v3053_v47 = vpop.f32.mrf.mxu1 }
  0xe6   : > { %2357 = vst.msk [vmem:[%s3416_s26 + $0x104] sm:$0xf] %vm2291_vm3, %v2846_v40  ;;  %v2851_v48 = vpack.c.bf16 %v1721_v44, %v1721_v44  ;;  %v1655_v49 = vsel %vm1399_vm12, %v900_v38, %v1527_v42  ;;  %vm1402_vm14 = vcmp.gt.f32.partialorder %v2989_v46, 0.0  ;;  %v1530_v50 = vmul.f32 0.2, %v2989_v46 }
  0xe7   : > { %2298 = vst.msk [vmem:[%s3416_s26 + $0x18] sm:$0xf] %vm2291_vm3, %v2787_v43  ;;  %v2785_v51 = vpack.c.bf16 %v1655_v49, %v1655_v49  ;;  %v1719_v52 = vsel %vm1463_vm13, %v1156_v39, %v1591_v45  ;;  %vm1466_vm15 = vcmp.gt.f32.partialorder %v3053_v47, 0.0  ;;  %v1594_v53 = vmul.f32 0.2, %v3053_v47  ;;  %v903_v54 = vpop.f32.mrf.mxu0  ;;  %v1159_v55 = vpop.f32.mrf.mxu1 }
  0xe8   : > { %2362 = vst.msk [vmem:[%s3416_s26 + $0x118] sm:$0xf] %vm2291_vm3, %v2851_v48  ;;  %v2849_v56 = vpack.c.bf16 %v1719_v52, %v1719_v52  ;;  %v1658_v57 = vsel %vm1402_vm14, %v2989_v46, %v1530_v50  ;;  %vm1400_vm0 = vcmp.gt.f32.partialorder %v903_v54, 0.0  ;;  %v1528_v58 = vmul.f32 0.2, %v903_v54 }
  0xe9   : > { %2296 = vst.msk [vmem:[%s3416_s26 + $0x10] sm:$0xf] %vm2291_vm3, %v2785_v51  ;;  %v2788_v59 = vpack.c.bf16 %v1658_v57, %v1658_v57  ;;  %v1722_v60 = vsel %vm1466_vm15, %v3053_v47, %v1594_v53  ;;  %vm1464_vm1 = vcmp.gt.f32.partialorder %v1159_v55, 0.0  ;;  %v1592_v61 = vmul.f32 0.2, %v1159_v55  ;;  %v2992_v62 = vpop.f32.mrf.mxu0  ;;  %v3056_v63 = vpop.f32.mrf.mxu1 }
  0xea   : > { %2360 = vst.msk [vmem:[%s3416_s26 + $0x110] sm:$0xf] %vm2291_vm3, %v2849_v56  ;;  %v2852_v0 = vpack.c.bf16 %v1722_v60, %v1722_v60  ;;  %v1656_v1 = vsel %vm1400_vm0, %v903_v54, %v1528_v58  ;;  %vm1405_vm2 = vcmp.gt.f32.partialorder %v2992_v62, 0.0  ;;  %v1533_v2 = vmul.f32 0.2, %v2992_v62 }
  0xeb   : > { %2299 = vst.msk [vmem:[%s3416_s26 + $0x1c] sm:$0xf] %vm2291_vm3, %v2788_v59  ;;  %v2786_v3 = vpack.c.bf16 %v1656_v1, %v1656_v1  ;;  %v1720_v4 = vsel %vm1464_vm1, %v1159_v55, %v1592_v61  ;;  %vm1469_vm4 = vcmp.gt.f32.partialorder %v3056_v63, 0.0  ;;  %v1597_v5 = vmul.f32 0.2, %v3056_v63  ;;  %v916_v6 = vpop.f32.mrf.mxu0  ;;  %v1172_v7 = vpop.f32.mrf.mxu1 }
  0xec   : > { %2363 = vst.msk [vmem:[%s3416_s26 + $0x11c] sm:$0xf] %vm2291_vm3, %v2852_v0  ;;  %v2850_v8 = vpack.c.bf16 %v1720_v4, %v1720_v4  ;;  %v1661_v9 = vsel %vm1405_vm2, %v2992_v62, %v1533_v2  ;;  %vm1403_vm5 = vcmp.gt.f32.partialorder %v916_v6, 0.0  ;;  %v1531_v10 = vmul.f32 0.2, %v916_v6 }
  0xed   : > { %2297 = vst.msk [vmem:[%s3416_s26 + $0x14] sm:$0xf] %vm2291_vm3, %v2786_v3  ;;  %v2791_v11 = vpack.c.bf16 %v1661_v9, %v1661_v9  ;;  %v1725_v12 = vsel %vm1469_vm4, %v3056_v63, %v1597_v5  ;;  %vm1467_vm6 = vcmp.gt.f32.partialorder %v1172_v7, 0.0  ;;  %v1595_v13 = vmul.f32 0.2, %v1172_v7  ;;  %v2993_v14 = vpop.f32.mrf.mxu0  ;;  %v3057_v15 = vpop.f32.mrf.mxu1 }
  0xee   : > { %2361 = vst.msk [vmem:[%s3416_s26 + $0x114] sm:$0xf] %vm2291_vm3, %v2850_v8  ;;  %v2855_v16 = vpack.c.bf16 %v1725_v12, %v1725_v12  ;;  %v1659_v17 = vsel %vm1403_vm5, %v916_v6, %v1531_v10  ;;  %vm1406_vm7 = vcmp.gt.f32.partialorder %v2993_v14, 0.0  ;;  %v1534_v18 = vmul.f32 0.2, %v2993_v14 }
  0xef   : > { %2302 = vst.msk [vmem:[%s3416_s26 + $0x28] sm:$0xf] %vm2291_vm3, %v2791_v11  ;;  %v2789_v19 = vpack.c.bf16 %v1659_v17, %v1659_v17  ;;  %v1723_v20 = vsel %vm1467_vm6, %v1172_v7, %v1595_v13  ;;  %vm1470_vm8 = vcmp.gt.f32.partialorder %v3057_v15, 0.0  ;;  %v1598_v21 = vmul.f32 0.2, %v3057_v15  ;;  %v919_v22 = vpop.f32.mrf.mxu0  ;;  %v1175_v23 = vpop.f32.mrf.mxu1 }
  0xf0   : > { %2366 = vst.msk [vmem:[%s3416_s26 + $0x128] sm:$0xf] %vm2291_vm3, %v2855_v16  ;;  %v2853_v24 = vpack.c.bf16 %v1723_v20, %v1723_v20  ;;  %v1662_v25 = vsel %vm1406_vm7, %v2993_v14, %v1534_v18  ;;  %vm1404_vm9 = vcmp.gt.f32.partialorder %v919_v22, 0.0  ;;  %v1532_v26 = vmul.f32 0.2, %v919_v22 }
  0xf1   : > { %2300 = vst.msk [vmem:[%s3416_s26 + $0x20] sm:$0xf] %vm2291_vm3, %v2789_v19  ;;  %v2792_v27 = vpack.c.bf16 %v1662_v25, %v1662_v25  ;;  %v1726_v28 = vsel %vm1470_vm8, %v3057_v15, %v1598_v21  ;;  %vm1468_vm10 = vcmp.gt.f32.partialorder %v1175_v23, 0.0  ;;  %v1596_v29 = vmul.f32 0.2, %v1175_v23  ;;  %v2996_v30 = vpop.f32.mrf.mxu0  ;;  %v3060_v31 = vpop.f32.mrf.mxu1 }
  0xf2   : > { %2364 = vst.msk [vmem:[%s3416_s26 + $0x120] sm:$0xf] %vm2291_vm3, %v2853_v24  ;;  %v2856_v32 = vpack.c.bf16 %v1726_v28, %v1726_v28  ;;  %v1660_v33 = vsel %vm1404_vm9, %v919_v22, %v1532_v26  ;;  %vm1409_vm11 = vcmp.gt.f32.partialorder %v2996_v30, 0.0  ;;  %v1537_v34 = vmul.f32 0.2, %v2996_v30 }
  0xf3   : > { %2303 = vst.msk [vmem:[%s3416_s26 + $0x2c] sm:$0xf] %vm2291_vm3, %v2792_v27  ;;  %v2790_v35 = vpack.c.bf16 %v1660_v33, %v1660_v33  ;;  %v1724_v36 = vsel %vm1468_vm10, %v1175_v23, %v1596_v29  ;;  %vm1473_vm12 = vcmp.gt.f32.partialorder %v3060_v31, 0.0  ;;  %v1601_v37 = vmul.f32 0.2, %v3060_v31  ;;  %v932_v38 = vpop.f32.mrf.mxu0  ;;  %v1188_v39 = vpop.f32.mrf.mxu1 }
  0xf4   : > { %2367 = vst.msk [vmem:[%s3416_s26 + $0x12c] sm:$0xf] %vm2291_vm3, %v2856_v32  ;;  %v2854_v40 = vpack.c.bf16 %v1724_v36, %v1724_v36  ;;  %v1665_v41 = vsel %vm1409_vm11, %v2996_v30, %v1537_v34  ;;  %vm1407_vm13 = vcmp.gt.f32.partialorder %v932_v38, 0.0  ;;  %v1535_v42 = vmul.f32 0.2, %v932_v38 }
  0xf5   : > { %2301 = vst.msk [vmem:[%s3416_s26 + $0x24] sm:$0xf] %vm2291_vm3, %v2790_v35  ;;  %v2795_v43 = vpack.c.bf16 %v1665_v41, %v1665_v41  ;;  %v1729_v44 = vsel %vm1473_vm12, %v3060_v31, %v1601_v37  ;;  %vm1471_vm14 = vcmp.gt.f32.partialorder %v1188_v39, 0.0  ;;  %v1599_v45 = vmul.f32 0.2, %v1188_v39  ;;  %v2997_v46 = vpop.f32.mrf.mxu0  ;;  %v3061_v47 = vpop.f32.mrf.mxu1 }
  0xf6   : > { %2365 = vst.msk [vmem:[%s3416_s26 + $0x124] sm:$0xf] %vm2291_vm3, %v2854_v40  ;;  %v2859_v48 = vpack.c.bf16 %v1729_v44, %v1729_v44  ;;  %v1663_v49 = vsel %vm1407_vm13, %v932_v38, %v1535_v42  ;;  %vm1410_vm15 = vcmp.gt.f32.partialorder %v2997_v46, 0.0  ;;  %v1538_v50 = vmul.f32 0.2, %v2997_v46 }
  0xf7   : > { %2306 = vst.msk [vmem:[%s3416_s26 + $0x38] sm:$0xf] %vm2291_vm3, %v2795_v43  ;;  %v2793_v51 = vpack.c.bf16 %v1663_v49, %v1663_v49  ;;  %v1727_v52 = vsel %vm1471_vm14, %v1188_v39, %v1599_v45  ;;  %vm1474_vm0 = vcmp.gt.f32.partialorder %v3061_v47, 0.0  ;;  %v1602_v53 = vmul.f32 0.2, %v3061_v47  ;;  %v935_v54 = vpop.f32.mrf.mxu0  ;;  %v1191_v55 = vpop.f32.mrf.mxu1 }
  0xf8   : > { %2370 = vst.msk [vmem:[%s3416_s26 + $0x138] sm:$0xf] %vm2291_vm3, %v2859_v48  ;;  %v2857_v56 = vpack.c.bf16 %v1727_v52, %v1727_v52  ;;  %v1666_v57 = vsel %vm1410_vm15, %v2997_v46, %v1538_v50  ;;  %vm1408_vm1 = vcmp.gt.f32.partialorder %v935_v54, 0.0  ;;  %v1536_v58 = vmul.f32 0.2, %v935_v54 }
  0xf9   : > { %2304 = vst.msk [vmem:[%s3416_s26 + $0x30] sm:$0xf] %vm2291_vm3, %v2793_v51  ;;  %v2796_v59 = vpack.c.bf16 %v1666_v57, %v1666_v57  ;;  %v1730_v60 = vsel %vm1474_vm0, %v3061_v47, %v1602_v53  ;;  %vm1472_vm2 = vcmp.gt.f32.partialorder %v1191_v55, 0.0  ;;  %v1600_v61 = vmul.f32 0.2, %v1191_v55  ;;  %v3000_v62 = vpop.f32.mrf.mxu0  ;;  %v3064_v63 = vpop.f32.mrf.mxu1 }
  0xfa   : > { %2368 = vst.msk [vmem:[%s3416_s26 + $0x130] sm:$0xf] %vm2291_vm3, %v2857_v56  ;;  %v2860_v0 = vpack.c.bf16 %v1730_v60, %v1730_v60  ;;  %v1664_v1 = vsel %vm1408_vm1, %v935_v54, %v1536_v58  ;;  %vm1413_vm4 = vcmp.gt.f32.partialorder %v3000_v62, 0.0  ;;  %v1541_v2 = vmul.f32 0.2, %v3000_v62 }
  0xfb   : > { %2307 = vst.msk [vmem:[%s3416_s26 + $0x3c] sm:$0xf] %vm2291_vm3, %v2796_v59  ;;  %v2794_v3 = vpack.c.bf16 %v1664_v1, %v1664_v1  ;;  %v1728_v4 = vsel %vm1472_vm2, %v1191_v55, %v1600_v61  ;;  %vm1477_vm5 = vcmp.gt.f32.partialorder %v3064_v63, 0.0  ;;  %v1605_v5 = vmul.f32 0.2, %v3064_v63  ;;  %v948_v6 = vpop.f32.mrf.mxu0  ;;  %v1204_v7 = vpop.f32.mrf.mxu1 }
  0xfc   : > { %2371 = vst.msk [vmem:[%s3416_s26 + $0x13c] sm:$0xf] %vm2291_vm3, %v2860_v0  ;;  %v2858_v8 = vpack.c.bf16 %v1728_v4, %v1728_v4  ;;  %v1669_v9 = vsel %vm1413_vm4, %v3000_v62, %v1541_v2  ;;  %vm1411_vm6 = vcmp.gt.f32.partialorder %v948_v6, 0.0  ;;  %v1539_v10 = vmul.f32 0.2, %v948_v6 }
  0xfd   : > { %2305 = vst.msk [vmem:[%s3416_s26 + $0x34] sm:$0xf] %vm2291_vm3, %v2794_v3  ;;  %v2799_v11 = vpack.c.bf16 %v1669_v9, %v1669_v9  ;;  %v1733_v12 = vsel %vm1477_vm5, %v3064_v63, %v1605_v5  ;;  %vm1475_vm7 = vcmp.gt.f32.partialorder %v1204_v7, 0.0  ;;  %v1603_v13 = vmul.f32 0.2, %v1204_v7  ;;  %v3001_v14 = vpop.f32.mrf.mxu0  ;;  %v3065_v15 = vpop.f32.mrf.mxu1 }
  0xfe   : > { %2369 = vst.msk [vmem:[%s3416_s26 + $0x134] sm:$0xf] %vm2291_vm3, %v2858_v8  ;;  %v2863_v16 = vpack.c.bf16 %v1733_v12, %v1733_v12  ;;  %v1667_v17 = vsel %vm1411_vm6, %v948_v6, %v1539_v10  ;;  %vm1414_vm8 = vcmp.gt.f32.partialorder %v3001_v14, 0.0  ;;  %v1542_v18 = vmul.f32 0.2, %v3001_v14 }
  0xff   : > { %2310 = vst.msk [vmem:[%s3416_s26 + $0x48] sm:$0xf] %vm2291_vm3, %v2799_v11  ;;  %v2797_v19 = vpack.c.bf16 %v1667_v17, %v1667_v17  ;;  %v1731_v20 = vsel %vm1475_vm7, %v1204_v7, %v1603_v13  ;;  %vm1478_vm9 = vcmp.gt.f32.partialorder %v3065_v15, 0.0  ;;  %v1606_v21 = vmul.f32 0.2, %v3065_v15  ;;  %v951_v22 = vpop.f32.mrf.mxu0  ;;  %v1207_v23 = vpop.f32.mrf.mxu1 }
 0x100   : > { %2374 = vst.msk [vmem:[%s3416_s26 + $0x148] sm:$0xf] %vm2291_vm3, %v2863_v16  ;;  %v2861_v24 = vpack.c.bf16 %v1731_v20, %v1731_v20  ;;  %v1670_v25 = vsel %vm1414_vm8, %v3001_v14, %v1542_v18  ;;  %vm1412_vm10 = vcmp.gt.f32.partialorder %v951_v22, 0.0  ;;  %v1540_v26 = vmul.f32 0.2, %v951_v22 }
 0x101   : > { %2308 = vst.msk [vmem:[%s3416_s26 + $0x40] sm:$0xf] %vm2291_vm3, %v2797_v19  ;;  %v2800_v27 = vpack.c.bf16 %v1670_v25, %v1670_v25  ;;  %v1734_v28 = vsel %vm1478_vm9, %v3065_v15, %v1606_v21  ;;  %vm1476_vm11 = vcmp.gt.f32.partialorder %v1207_v23, 0.0  ;;  %v1604_v29 = vmul.f32 0.2, %v1207_v23  ;;  %v3004_v30 = vpop.f32.mrf.mxu0  ;;  %v3068_v31 = vpop.f32.mrf.mxu1 }
 0x102   : > { %2372 = vst.msk [vmem:[%s3416_s26 + $0x140] sm:$0xf] %vm2291_vm3, %v2861_v24  ;;  %v2864_v32 = vpack.c.bf16 %v1734_v28, %v1734_v28  ;;  %v1668_v33 = vsel %vm1412_vm10, %v951_v22, %v1540_v26  ;;  %vm1417_vm12 = vcmp.gt.f32.partialorder %v3004_v30, 0.0  ;;  %v1545_v34 = vmul.f32 0.2, %v3004_v30 }
 0x103   : > { %2311 = vst.msk [vmem:[%s3416_s26 + $0x4c] sm:$0xf] %vm2291_vm3, %v2800_v27  ;;  %v2798_v35 = vpack.c.bf16 %v1668_v33, %v1668_v33  ;;  %v1732_v36 = vsel %vm1476_vm11, %v1207_v23, %v1604_v29  ;;  %vm1481_vm13 = vcmp.gt.f32.partialorder %v3068_v31, 0.0  ;;  %v1609_v37 = vmul.f32 0.2, %v3068_v31  ;;  %v964_v38 = vpop.f32.mrf.mxu0  ;;  %v1220_v39 = vpop.f32.mrf.mxu1 }
 0x104   : > { %2375 = vst.msk [vmem:[%s3416_s26 + $0x14c] sm:$0xf] %vm2291_vm3, %v2864_v32  ;;  %v2862_v40 = vpack.c.bf16 %v1732_v36, %v1732_v36  ;;  %v1673_v41 = vsel %vm1417_vm12, %v3004_v30, %v1545_v34  ;;  %vm1415_vm14 = vcmp.gt.f32.partialorder %v964_v38, 0.0  ;;  %v1543_v42 = vmul.f32 0.2, %v964_v38 }
 0x105   : > { %2309 = vst.msk [vmem:[%s3416_s26 + $0x44] sm:$0xf] %vm2291_vm3, %v2798_v35  ;;  %v2803_v43 = vpack.c.bf16 %v1673_v41, %v1673_v41  ;;  %v1737_v44 = vsel %vm1481_vm13, %v3068_v31, %v1609_v37  ;;  %vm1479_vm15 = vcmp.gt.f32.partialorder %v1220_v39, 0.0  ;;  %v1607_v45 = vmul.f32 0.2, %v1220_v39  ;;  %v3005_v46 = vpop.f32.mrf.mxu0  ;;  %v3069_v47 = vpop.f32.mrf.mxu1 }
 0x106   : > { %2373 = vst.msk [vmem:[%s3416_s26 + $0x144] sm:$0xf] %vm2291_vm3, %v2862_v40  ;;  %v2867_v48 = vpack.c.bf16 %v1737_v44, %v1737_v44  ;;  %v1671_v49 = vsel %vm1415_vm14, %v964_v38, %v1543_v42  ;;  %vm1418_vm0 = vcmp.gt.f32.partialorder %v3005_v46, 0.0  ;;  %v1546_v50 = vmul.f32 0.2, %v3005_v46 }
 0x107   : > { %2314 = vst.msk [vmem:[%s3416_s26 + $0x58] sm:$0xf] %vm2291_vm3, %v2803_v43  ;;  %v2801_v51 = vpack.c.bf16 %v1671_v49, %v1671_v49  ;;  %v1735_v52 = vsel %vm1479_vm15, %v1220_v39, %v1607_v45  ;;  %vm1482_vm1 = vcmp.gt.f32.partialorder %v3069_v47, 0.0  ;;  %v1610_v53 = vmul.f32 0.2, %v3069_v47  ;;  %v967_v54 = vpop.f32.mrf.mxu0  ;;  %v1223_v55 = vpop.f32.mrf.mxu1 }
 0x108   : > { %2378 = vst.msk [vmem:[%s3416_s26 + $0x158] sm:$0xf] %vm2291_vm3, %v2867_v48  ;;  %v2865_v56 = vpack.c.bf16 %v1735_v52, %v1735_v52  ;;  %v1674_v57 = vsel %vm1418_vm0, %v3005_v46, %v1546_v50  ;;  %vm1416_vm2 = vcmp.gt.f32.partialorder %v967_v54, 0.0  ;;  %v1544_v58 = vmul.f32 0.2, %v967_v54 }
 0x109   : > { %2312 = vst.msk [vmem:[%s3416_s26 + $0x50] sm:$0xf] %vm2291_vm3, %v2801_v51  ;;  %v2804_v59 = vpack.c.bf16 %v1674_v57, %v1674_v57  ;;  %v1738_v60 = vsel %vm1482_vm1, %v3069_v47, %v1610_v53  ;;  %vm1480_vm4 = vcmp.gt.f32.partialorder %v1223_v55, 0.0  ;;  %v1608_v61 = vmul.f32 0.2, %v1223_v55  ;;  %v3008_v62 = vpop.f32.mrf.mxu0  ;;  %v3072_v63 = vpop.f32.mrf.mxu1 }
 0x10a   : > { %2376 = vst.msk [vmem:[%s3416_s26 + $0x150] sm:$0xf] %vm2291_vm3, %v2865_v56  ;;  %v2868_v0 = vpack.c.bf16 %v1738_v60, %v1738_v60  ;;  %v1672_v1 = vsel %vm1416_vm2, %v967_v54, %v1544_v58  ;;  %vm1421_vm5 = vcmp.gt.f32.partialorder %v3008_v62, 0.0  ;;  %v1549_v2 = vmul.f32 0.2, %v3008_v62 }
 0x10b   : > { %2315 = vst.msk [vmem:[%s3416_s26 + $0x5c] sm:$0xf] %vm2291_vm3, %v2804_v59  ;;  %v2802_v3 = vpack.c.bf16 %v1672_v1, %v1672_v1  ;;  %v1736_v4 = vsel %vm1480_vm4, %v1223_v55, %v1608_v61  ;;  %vm1485_vm6 = vcmp.gt.f32.partialorder %v3072_v63, 0.0  ;;  %v1613_v5 = vmul.f32 0.2, %v3072_v63  ;;  %v980_v6 = vpop.f32.mrf.mxu0  ;;  %v1236_v7 = vpop.f32.mrf.mxu1 }
 0x10c   : > { %2379 = vst.msk [vmem:[%s3416_s26 + $0x15c] sm:$0xf] %vm2291_vm3, %v2868_v0  ;;  %v2866_v8 = vpack.c.bf16 %v1736_v4, %v1736_v4  ;;  %v1677_v9 = vsel %vm1421_vm5, %v3008_v62, %v1549_v2  ;;  %vm1419_vm7 = vcmp.gt.f32.partialorder %v980_v6, 0.0  ;;  %v1547_v10 = vmul.f32 0.2, %v980_v6 }
 0x10d   : > { %2313 = vst.msk [vmem:[%s3416_s26 + $0x54] sm:$0xf] %vm2291_vm3, %v2802_v3  ;;  %v2807_v11 = vpack.c.bf16 %v1677_v9, %v1677_v9  ;;  %v1741_v12 = vsel %vm1485_vm6, %v3072_v63, %v1613_v5  ;;  %vm1483_vm8 = vcmp.gt.f32.partialorder %v1236_v7, 0.0  ;;  %v1611_v13 = vmul.f32 0.2, %v1236_v7  ;;  %v3009_v14 = vpop.f32.mrf.mxu0  ;;  %v3073_v15 = vpop.f32.mrf.mxu1 }
 0x10e   : > { %2377 = vst.msk [vmem:[%s3416_s26 + $0x154] sm:$0xf] %vm2291_vm3, %v2866_v8  ;;  %v2871_v16 = vpack.c.bf16 %v1741_v12, %v1741_v12  ;;  %v1675_v17 = vsel %vm1419_vm7, %v980_v6, %v1547_v10  ;;  %vm1422_vm9 = vcmp.gt.f32.partialorder %v3009_v14, 0.0  ;;  %v1550_v18 = vmul.f32 0.2, %v3009_v14 }
 0x10f   : > { %2318 = vst.msk [vmem:[%s3416_s26 + $0x68] sm:$0xf] %vm2291_vm3, %v2807_v11  ;;  %v2805_v19 = vpack.c.bf16 %v1675_v17, %v1675_v17  ;;  %v1739_v20 = vsel %vm1483_vm8, %v1236_v7, %v1611_v13  ;;  %vm1486_vm10 = vcmp.gt.f32.partialorder %v3073_v15, 0.0  ;;  %v1614_v21 = vmul.f32 0.2, %v3073_v15  ;;  %v983_v22 = vpop.f32.mrf.mxu0  ;;  %v1239_v23 = vpop.f32.mrf.mxu1 }
 0x110   : > { %2382 = vst.msk [vmem:[%s3416_s26 + $0x168] sm:$0xf] %vm2291_vm3, %v2871_v16  ;;  %v2869_v24 = vpack.c.bf16 %v1739_v20, %v1739_v20  ;;  %v1678_v25 = vsel %vm1422_vm9, %v3009_v14, %v1550_v18  ;;  %vm1420_vm11 = vcmp.gt.f32.partialorder %v983_v22, 0.0  ;;  %v1548_v26 = vmul.f32 0.2, %v983_v22 }
 0x111   : > { %2316 = vst.msk [vmem:[%s3416_s26 + $0x60] sm:$0xf] %vm2291_vm3, %v2805_v19  ;;  %v2808_v27 = vpack.c.bf16 %v1678_v25, %v1678_v25  ;;  %v1742_v28 = vsel %vm1486_vm10, %v3073_v15, %v1614_v21  ;;  %vm1484_vm12 = vcmp.gt.f32.partialorder %v1239_v23, 0.0  ;;  %v1612_v29 = vmul.f32 0.2, %v1239_v23  ;;  %v3012_v30 = vpop.f32.mrf.mxu0  ;;  %v3076_v31 = vpop.f32.mrf.mxu1 }
 0x112   : > { %2380 = vst.msk [vmem:[%s3416_s26 + $0x160] sm:$0xf] %vm2291_vm3, %v2869_v24  ;;  %v2872_v32 = vpack.c.bf16 %v1742_v28, %v1742_v28  ;;  %v1676_v33 = vsel %vm1420_vm11, %v983_v22, %v1548_v26  ;;  %vm1425_vm13 = vcmp.gt.f32.partialorder %v3012_v30, 0.0  ;;  %v1553_v34 = vmul.f32 0.2, %v3012_v30 }
 0x113   : > { %2319 = vst.msk [vmem:[%s3416_s26 + $0x6c] sm:$0xf] %vm2291_vm3, %v2808_v27  ;;  %v2806_v35 = vpack.c.bf16 %v1676_v33, %v1676_v33  ;;  %v1740_v36 = vsel %vm1484_vm12, %v1239_v23, %v1612_v29  ;;  %vm1489_vm14 = vcmp.gt.f32.partialorder %v3076_v31, 0.0  ;;  %v1617_v37 = vmul.f32 0.2, %v3076_v31  ;;  %v996_v38 = vpop.f32.mrf.mxu0  ;;  %v1252_v39 = vpop.f32.mrf.mxu1 }
 0x114   : > { %2383 = vst.msk [vmem:[%s3416_s26 + $0x16c] sm:$0xf] %vm2291_vm3, %v2872_v32  ;;  %v2870_v40 = vpack.c.bf16 %v1740_v36, %v1740_v36  ;;  %v1681_v41 = vsel %vm1425_vm13, %v3012_v30, %v1553_v34  ;;  %vm1423_vm15 = vcmp.gt.f32.partialorder %v996_v38, 0.0  ;;  %v1551_v42 = vmul.f32 0.2, %v996_v38 }
 0x115   : > { %2317 = vst.msk [vmem:[%s3416_s26 + $0x64] sm:$0xf] %vm2291_vm3, %v2806_v35  ;;  %v2811_v43 = vpack.c.bf16 %v1681_v41, %v1681_v41  ;;  %v1745_v44 = vsel %vm1489_vm14, %v3076_v31, %v1617_v37  ;;  %vm1487_vm0 = vcmp.gt.f32.partialorder %v1252_v39, 0.0  ;;  %v1615_v45 = vmul.f32 0.2, %v1252_v39  ;;  %v3013_v46 = vpop.f32.mrf.mxu0  ;;  %v3077_v47 = vpop.f32.mrf.mxu1 }
 0x116   : > { %2381 = vst.msk [vmem:[%s3416_s26 + $0x164] sm:$0xf] %vm2291_vm3, %v2870_v40  ;;  %v2875_v48 = vpack.c.bf16 %v1745_v44, %v1745_v44  ;;  %v1679_v49 = vsel %vm1423_vm15, %v996_v38, %v1551_v42  ;;  %vm1426_vm1 = vcmp.gt.f32.partialorder %v3013_v46, 0.0  ;;  %v1554_v50 = vmul.f32 0.2, %v3013_v46 }
 0x117   : > { %2322 = vst.msk [vmem:[%s3416_s26 + $0x78] sm:$0xf] %vm2291_vm3, %v2811_v43  ;;  %v2809_v51 = vpack.c.bf16 %v1679_v49, %v1679_v49  ;;  %v1743_v52 = vsel %vm1487_vm0, %v1252_v39, %v1615_v45  ;;  %vm1490_vm2 = vcmp.gt.f32.partialorder %v3077_v47, 0.0  ;;  %v1618_v53 = vmul.f32 0.2, %v3077_v47  ;;  %v999_v54 = vpop.f32.mrf.mxu0  ;;  %v1255_v55 = vpop.f32.mrf.mxu1 }
 0x118   : > { %2386 = vst.msk [vmem:[%s3416_s26 + $0x178] sm:$0xf] %vm2291_vm3, %v2875_v48  ;;  %v2873_v56 = vpack.c.bf16 %v1743_v52, %v1743_v52  ;;  %v1682_v57 = vsel %vm1426_vm1, %v3013_v46, %v1554_v50  ;;  %vm1424_vm4 = vcmp.gt.f32.partialorder %v999_v54, 0.0  ;;  %v1552_v58 = vmul.f32 0.2, %v999_v54 }
 0x119   : > { %2320 = vst.msk [vmem:[%s3416_s26 + $0x70] sm:$0xf] %vm2291_vm3, %v2809_v51  ;;  %v2812_v59 = vpack.c.bf16 %v1682_v57, %v1682_v57  ;;  %v1746_v60 = vsel %vm1490_vm2, %v3077_v47, %v1618_v53  ;;  %vm1488_vm5 = vcmp.gt.f32.partialorder %v1255_v55, 0.0  ;;  %v1616_v61 = vmul.f32 0.2, %v1255_v55  ;;  %v3016_v62 = vpop.f32.mrf.mxu0  ;;  %v3080_v63 = vpop.f32.mrf.mxu1 }
 0x11a   : > { %2384 = vst.msk [vmem:[%s3416_s26 + $0x170] sm:$0xf] %vm2291_vm3, %v2873_v56  ;;  %v2876_v0 = vpack.c.bf16 %v1746_v60, %v1746_v60  ;;  %v1680_v1 = vsel %vm1424_vm4, %v999_v54, %v1552_v58  ;;  %vm1429_vm6 = vcmp.gt.f32.partialorder %v3016_v62, 0.0  ;;  %v1557_v2 = vmul.f32 0.2, %v3016_v62 }
 0x11b   : > { %2323 = vst.msk [vmem:[%s3416_s26 + $0x7c] sm:$0xf] %vm2291_vm3, %v2812_v59  ;;  %v2810_v3 = vpack.c.bf16 %v1680_v1, %v1680_v1  ;;  %v1744_v4 = vsel %vm1488_vm5, %v1255_v55, %v1616_v61  ;;  %vm1493_vm7 = vcmp.gt.f32.partialorder %v3080_v63, 0.0  ;;  %v1621_v5 = vmul.f32 0.2, %v3080_v63  ;;  %v1012_v6 = vpop.f32.mrf.mxu0  ;;  %v1268_v7 = vpop.f32.mrf.mxu1 }
 0x11c   : > { %2387 = vst.msk [vmem:[%s3416_s26 + $0x17c] sm:$0xf] %vm2291_vm3, %v2876_v0  ;;  %v2874_v8 = vpack.c.bf16 %v1744_v4, %v1744_v4  ;;  %v1685_v9 = vsel %vm1429_vm6, %v3016_v62, %v1557_v2  ;;  %vm1427_vm8 = vcmp.gt.f32.partialorder %v1012_v6, 0.0  ;;  %v1555_v10 = vmul.f32 0.2, %v1012_v6 }
 0x11d   : > { %2321 = vst.msk [vmem:[%s3416_s26 + $0x74] sm:$0xf] %vm2291_vm3, %v2810_v3  ;;  %v2815_v11 = vpack.c.bf16 %v1685_v9, %v1685_v9  ;;  %v1749_v12 = vsel %vm1493_vm7, %v3080_v63, %v1621_v5  ;;  %vm1491_vm9 = vcmp.gt.f32.partialorder %v1268_v7, 0.0  ;;  %v1619_v13 = vmul.f32 0.2, %v1268_v7  ;;  %v3017_v14 = vpop.f32.mrf.mxu0  ;;  %v3081_v15 = vpop.f32.mrf.mxu1 }
 0x11e   : > { %2385 = vst.msk [vmem:[%s3416_s26 + $0x174] sm:$0xf] %vm2291_vm3, %v2874_v8  ;;  %v2879_v16 = vpack.c.bf16 %v1749_v12, %v1749_v12  ;;  %v1683_v17 = vsel %vm1427_vm8, %v1012_v6, %v1555_v10  ;;  %vm1430_vm10 = vcmp.gt.f32.partialorder %v3017_v14, 0.0  ;;  %v1558_v18 = vmul.f32 0.2, %v3017_v14 }
 0x11f   : > { %2326 = vst.msk [vmem:[%s3416_s26 + $0x88] sm:$0xf] %vm2291_vm3, %v2815_v11  ;;  %v2813_v19 = vpack.c.bf16 %v1683_v17, %v1683_v17  ;;  %v1747_v20 = vsel %vm1491_vm9, %v1268_v7, %v1619_v13  ;;  %vm1494_vm11 = vcmp.gt.f32.partialorder %v3081_v15, 0.0  ;;  %v1622_v21 = vmul.f32 0.2, %v3081_v15  ;;  %v1015_v22 = vpop.f32.mrf.mxu0  ;;  %v1271_v23 = vpop.f32.mrf.mxu1 }
 0x120   : > { %2390 = vst.msk [vmem:[%s3416_s26 + $0x188] sm:$0xf] %vm2291_vm3, %v2879_v16  ;;  %v2877_v24 = vpack.c.bf16 %v1747_v20, %v1747_v20  ;;  %v1686_v25 = vsel %vm1430_vm10, %v3017_v14, %v1558_v18  ;;  %vm1428_vm12 = vcmp.gt.f32.partialorder %v1015_v22, 0.0  ;;  %v1556_v26 = vmul.f32 0.2, %v1015_v22 }
 0x121   : > { %2324 = vst.msk [vmem:[%s3416_s26 + $0x80] sm:$0xf] %vm2291_vm3, %v2813_v19  ;;  %v2816_v27 = vpack.c.bf16 %v1686_v25, %v1686_v25  ;;  %v1750_v28 = vsel %vm1494_vm11, %v3081_v15, %v1622_v21  ;;  %vm1492_vm13 = vcmp.gt.f32.partialorder %v1271_v23, 0.0  ;;  %v1620_v29 = vmul.f32 0.2, %v1271_v23  ;;  %v3020_v30 = vpop.f32.mrf.mxu0  ;;  %v3084_v31 = vpop.f32.mrf.mxu1 }
 0x122   : > { %2388 = vst.msk [vmem:[%s3416_s26 + $0x180] sm:$0xf] %vm2291_vm3, %v2877_v24  ;;  %v2880_v32 = vpack.c.bf16 %v1750_v28, %v1750_v28  ;;  %v1684_v33 = vsel %vm1428_vm12, %v1015_v22, %v1556_v26  ;;  %vm1433_vm14 = vcmp.gt.f32.partialorder %v3020_v30, 0.0  ;;  %v1561_v34 = vmul.f32 0.2, %v3020_v30 }
 0x123   : > { %2327 = vst.msk [vmem:[%s3416_s26 + $0x8c] sm:$0xf] %vm2291_vm3, %v2816_v27  ;;  %v2814_v35 = vpack.c.bf16 %v1684_v33, %v1684_v33  ;;  %v1748_v36 = vsel %vm1492_vm13, %v1271_v23, %v1620_v29  ;;  %vm1497_vm15 = vcmp.gt.f32.partialorder %v3084_v31, 0.0  ;;  %v1625_v37 = vmul.f32 0.2, %v3084_v31  ;;  %v1028_v38 = vpop.f32.mrf.mxu0  ;;  %v1284_v39 = vpop.f32.mrf.mxu1 }
 0x124   : > { %2391 = vst.msk [vmem:[%s3416_s26 + $0x18c] sm:$0xf] %vm2291_vm3, %v2880_v32  ;;  %v2878_v40 = vpack.c.bf16 %v1748_v36, %v1748_v36  ;;  %v1689_v41 = vsel %vm1433_vm14, %v3020_v30, %v1561_v34  ;;  %vm1431_vm0 = vcmp.gt.f32.partialorder %v1028_v38, 0.0  ;;  %v1559_v42 = vmul.f32 0.2, %v1028_v38 }
 0x125   : > { %2325 = vst.msk [vmem:[%s3416_s26 + $0x84] sm:$0xf] %vm2291_vm3, %v2814_v35  ;;  %v2819_v43 = vpack.c.bf16 %v1689_v41, %v1689_v41  ;;  %v1753_v44 = vsel %vm1497_vm15, %v3084_v31, %v1625_v37  ;;  %vm1495_vm1 = vcmp.gt.f32.partialorder %v1284_v39, 0.0  ;;  %v1623_v45 = vmul.f32 0.2, %v1284_v39  ;;  %v3021_v46 = vpop.f32.mrf.mxu0  ;;  %v3085_v47 = vpop.f32.mrf.mxu1 }
 0x126   : > { %2389 = vst.msk [vmem:[%s3416_s26 + $0x184] sm:$0xf] %vm2291_vm3, %v2878_v40  ;;  %v2883_v48 = vpack.c.bf16 %v1753_v44, %v1753_v44  ;;  %v1687_v49 = vsel %vm1431_vm0, %v1028_v38, %v1559_v42  ;;  %vm1434_vm2 = vcmp.gt.f32.partialorder %v3021_v46, 0.0  ;;  %v1562_v50 = vmul.f32 0.2, %v3021_v46 }
 0x127   : > { %2330 = vst.msk [vmem:[%s3416_s26 + $0x98] sm:$0xf] %vm2291_vm3, %v2819_v43  ;;  %v2817_v51 = vpack.c.bf16 %v1687_v49, %v1687_v49  ;;  %v1751_v52 = vsel %vm1495_vm1, %v1284_v39, %v1623_v45  ;;  %vm1498_vm4 = vcmp.gt.f32.partialorder %v3085_v47, 0.0  ;;  %v1626_v53 = vmul.f32 0.2, %v3085_v47  ;;  %v1031_v54 = vpop.f32.mrf.mxu0  ;;  %v1287_v55 = vpop.f32.mrf.mxu1 }
 0x128   : > { %2394 = vst.msk [vmem:[%s3416_s26 + $0x198] sm:$0xf] %vm2291_vm3, %v2883_v48  ;;  %v2881_v56 = vpack.c.bf16 %v1751_v52, %v1751_v52  ;;  %v1690_v57 = vsel %vm1434_vm2, %v3021_v46, %v1562_v50  ;;  %vm1432_vm5 = vcmp.gt.f32.partialorder %v1031_v54, 0.0  ;;  %v1560_v58 = vmul.f32 0.2, %v1031_v54 }
 0x129   : > { %2328 = vst.msk [vmem:[%s3416_s26 + $0x90] sm:$0xf] %vm2291_vm3, %v2817_v51  ;;  %v2820_v59 = vpack.c.bf16 %v1690_v57, %v1690_v57  ;;  %v1754_v60 = vsel %vm1498_vm4, %v3085_v47, %v1626_v53  ;;  %vm1496_vm6 = vcmp.gt.f32.partialorder %v1287_v55, 0.0  ;;  %v1624_v61 = vmul.f32 0.2, %v1287_v55  ;;  %v3024_v62 = vpop.f32.mrf.mxu0  ;;  %v3088_v63 = vpop.f32.mrf.mxu1 }
 0x12a   : > { %2392 = vst.msk [vmem:[%s3416_s26 + $0x190] sm:$0xf] %vm2291_vm3, %v2881_v56  ;;  %v2884_v0 = vpack.c.bf16 %v1754_v60, %v1754_v60  ;;  %v1688_v1 = vsel %vm1432_vm5, %v1031_v54, %v1560_v58  ;;  %vm1437_vm7 = vcmp.gt.f32.partialorder %v3024_v62, 0.0  ;;  %v1565_v2 = vmul.f32 0.2, %v3024_v62 }
 0x12b   : > { %2331 = vst.msk [vmem:[%s3416_s26 + $0x9c] sm:$0xf] %vm2291_vm3, %v2820_v59  ;;  %v2818_v3 = vpack.c.bf16 %v1688_v1, %v1688_v1  ;;  %v1752_v4 = vsel %vm1496_vm6, %v1287_v55, %v1624_v61  ;;  %vm1501_vm8 = vcmp.gt.f32.partialorder %v3088_v63, 0.0  ;;  %v1629_v5 = vmul.f32 0.2, %v3088_v63  ;;  %v1044_v6 = vpop.f32.mrf.mxu0  ;;  %v1300_v7 = vpop.f32.mrf.mxu1 }
 0x12c   : > { %2395 = vst.msk [vmem:[%s3416_s26 + $0x19c] sm:$0xf] %vm2291_vm3, %v2884_v0  ;;  %v2882_v8 = vpack.c.bf16 %v1752_v4, %v1752_v4  ;;  %v1693_v9 = vsel %vm1437_vm7, %v3024_v62, %v1565_v2  ;;  %vm1435_vm9 = vcmp.gt.f32.partialorder %v1044_v6, 0.0  ;;  %v1563_v10 = vmul.f32 0.2, %v1044_v6 }
 0x12d   : > { %2329 = vst.msk [vmem:[%s3416_s26 + $0x94] sm:$0xf] %vm2291_vm3, %v2818_v3  ;;  %v2823_v11 = vpack.c.bf16 %v1693_v9, %v1693_v9  ;;  %v1757_v12 = vsel %vm1501_vm8, %v3088_v63, %v1629_v5  ;;  %vm1499_vm10 = vcmp.gt.f32.partialorder %v1300_v7, 0.0  ;;  %v1627_v13 = vmul.f32 0.2, %v1300_v7  ;;  %v3025_v14 = vpop.f32.mrf.mxu0  ;;  %v3089_v15 = vpop.f32.mrf.mxu1 }
 0x12e   : > { %2393 = vst.msk [vmem:[%s3416_s26 + $0x194] sm:$0xf] %vm2291_vm3, %v2882_v8  ;;  %v2887_v16 = vpack.c.bf16 %v1757_v12, %v1757_v12  ;;  %v1691_v17 = vsel %vm1435_vm9, %v1044_v6, %v1563_v10  ;;  %vm1438_vm11 = vcmp.gt.f32.partialorder %v3025_v14, 0.0  ;;  %v1566_v18 = vmul.f32 0.2, %v3025_v14 }
 0x12f   : > { %2334 = vst.msk [vmem:[%s3416_s26 + $0xa8] sm:$0xf] %vm2291_vm3, %v2823_v11  ;;  %v2821_v19 = vpack.c.bf16 %v1691_v17, %v1691_v17  ;;  %v1755_v20 = vsel %vm1499_vm10, %v1300_v7, %v1627_v13  ;;  %vm1502_vm12 = vcmp.gt.f32.partialorder %v3089_v15, 0.0  ;;  %v1630_v21 = vmul.f32 0.2, %v3089_v15  ;;  %v1047_v22 = vpop.f32.mrf.mxu0  ;;  %v1303_v23 = vpop.f32.mrf.mxu1 }
 0x130   : > { %2398 = vst.msk [vmem:[%s3416_s26 + $0x1a8] sm:$0xf] %vm2291_vm3, %v2887_v16  ;;  %v2885_v24 = vpack.c.bf16 %v1755_v20, %v1755_v20  ;;  %v1694_v25 = vsel %vm1438_vm11, %v3025_v14, %v1566_v18  ;;  %vm1436_vm13 = vcmp.gt.f32.partialorder %v1047_v22, 0.0  ;;  %v1564_v26 = vmul.f32 0.2, %v1047_v22 }
 0x131   : > { %2332 = vst.msk [vmem:[%s3416_s26 + $0xa0] sm:$0xf] %vm2291_vm3, %v2821_v19  ;;  %v2824_v27 = vpack.c.bf16 %v1694_v25, %v1694_v25  ;;  %v1758_v28 = vsel %vm1502_vm12, %v3089_v15, %v1630_v21  ;;  %vm1500_vm14 = vcmp.gt.f32.partialorder %v1303_v23, 0.0  ;;  %v1628_v29 = vmul.f32 0.2, %v1303_v23  ;;  %v3028_v30 = vpop.f32.mrf.mxu0  ;;  %v3092_v31 = vpop.f32.mrf.mxu1 }
 0x132   : > { %2396 = vst.msk [vmem:[%s3416_s26 + $0x1a0] sm:$0xf] %vm2291_vm3, %v2885_v24  ;;  %v2888_v32 = vpack.c.bf16 %v1758_v28, %v1758_v28  ;;  %v1692_v33 = vsel %vm1436_vm13, %v1047_v22, %v1564_v26  ;;  %vm1441_vm15 = vcmp.gt.f32.partialorder %v3028_v30, 0.0  ;;  %v1569_v34 = vmul.f32 0.2, %v3028_v30 }
 0x133   : > { %2335 = vst.msk [vmem:[%s3416_s26 + $0xac] sm:$0xf] %vm2291_vm3, %v2824_v27  ;;  %v2822_v35 = vpack.c.bf16 %v1692_v33, %v1692_v33  ;;  %v1756_v36 = vsel %vm1500_vm14, %v1303_v23, %v1628_v29  ;;  %vm1505_vm0 = vcmp.gt.f32.partialorder %v3092_v31, 0.0  ;;  %v1633_v37 = vmul.f32 0.2, %v3092_v31  ;;  %v1060_v38 = vpop.f32.mrf.mxu0  ;;  %v1316_v39 = vpop.f32.mrf.mxu1 }
 0x134   : > { %2399 = vst.msk [vmem:[%s3416_s26 + $0x1ac] sm:$0xf] %vm2291_vm3, %v2888_v32  ;;  %v2886_v40 = vpack.c.bf16 %v1756_v36, %v1756_v36  ;;  %v1697_v41 = vsel %vm1441_vm15, %v3028_v30, %v1569_v34  ;;  %vm1439_vm1 = vcmp.gt.f32.partialorder %v1060_v38, 0.0  ;;  %v1567_v42 = vmul.f32 0.2, %v1060_v38 }
 0x135   : > { %2333 = vst.msk [vmem:[%s3416_s26 + $0xa4] sm:$0xf] %vm2291_vm3, %v2822_v35  ;;  %v2827_v43 = vpack.c.bf16 %v1697_v41, %v1697_v41  ;;  %v1761_v44 = vsel %vm1505_vm0, %v3092_v31, %v1633_v37  ;;  %vm1503_vm2 = vcmp.gt.f32.partialorder %v1316_v39, 0.0  ;;  %v1631_v45 = vmul.f32 0.2, %v1316_v39  ;;  %v3029_v46 = vpop.f32.mrf.mxu0  ;;  %v3093_v47 = vpop.f32.mrf.mxu1 }
 0x136   : > { %2397 = vst.msk [vmem:[%s3416_s26 + $0x1a4] sm:$0xf] %vm2291_vm3, %v2886_v40  ;;  %v2891_v48 = vpack.c.bf16 %v1761_v44, %v1761_v44  ;;  %v1695_v49 = vsel %vm1439_vm1, %v1060_v38, %v1567_v42  ;;  %vm1442_vm4 = vcmp.gt.f32.partialorder %v3029_v46, 0.0  ;;  %v1570_v50 = vmul.f32 0.2, %v3029_v46 }
 0x137   : > { %2338 = vst.msk [vmem:[%s3416_s26 + $0xb8] sm:$0xf] %vm2291_vm3, %v2827_v43  ;;  %v2825_v51 = vpack.c.bf16 %v1695_v49, %v1695_v49  ;;  %v1759_v52 = vsel %vm1503_vm2, %v1316_v39, %v1631_v45  ;;  %vm1506_vm5 = vcmp.gt.f32.partialorder %v3093_v47, 0.0  ;;  %v1634_v53 = vmul.f32 0.2, %v3093_v47  ;;  %v1063_v54 = vpop.f32.mrf.mxu0  ;;  %v1319_v55 = vpop.f32.mrf.mxu1 }
 0x138   : > { %2402 = vst.msk [vmem:[%s3416_s26 + $0x1b8] sm:$0xf] %vm2291_vm3, %v2891_v48  ;;  %v2889_v56 = vpack.c.bf16 %v1759_v52, %v1759_v52  ;;  %v1698_v57 = vsel %vm1442_vm4, %v3029_v46, %v1570_v50  ;;  %vm1440_vm6 = vcmp.gt.f32.partialorder %v1063_v54, 0.0  ;;  %v1568_v58 = vmul.f32 0.2, %v1063_v54 }
 0x139   : > { %2336 = vst.msk [vmem:[%s3416_s26 + $0xb0] sm:$0xf] %vm2291_vm3, %v2825_v51  ;;  %v2828_v59 = vpack.c.bf16 %v1698_v57, %v1698_v57  ;;  %v1762_v60 = vsel %vm1506_vm5, %v3093_v47, %v1634_v53  ;;  %vm1504_vm7 = vcmp.gt.f32.partialorder %v1319_v55, 0.0  ;;  %v1632_v61 = vmul.f32 0.2, %v1319_v55  ;;  %v3032_v62 = vpop.f32.mrf.mxu0  ;;  %v3096_v63 = vpop.f32.mrf.mxu1 }
 0x13a   : > { %2400 = vst.msk [vmem:[%s3416_s26 + $0x1b0] sm:$0xf] %vm2291_vm3, %v2889_v56  ;;  %v2892_v0 = vpack.c.bf16 %v1762_v60, %v1762_v60  ;;  %v1696_v1 = vsel %vm1440_vm6, %v1063_v54, %v1568_v58  ;;  %vm1445_vm8 = vcmp.gt.f32.partialorder %v3032_v62, 0.0  ;;  %v1573_v2 = vmul.f32 0.2, %v3032_v62 }
 0x13b   : > { %2339 = vst.msk [vmem:[%s3416_s26 + $0xbc] sm:$0xf] %vm2291_vm3, %v2828_v59  ;;  %v2826_v3 = vpack.c.bf16 %v1696_v1, %v1696_v1  ;;  %v1760_v4 = vsel %vm1504_vm7, %v1319_v55, %v1632_v61  ;;  %vm1509_vm9 = vcmp.gt.f32.partialorder %v3096_v63, 0.0  ;;  %v1637_v5 = vmul.f32 0.2, %v3096_v63  ;;  %v1076_v6 = vpop.f32.mrf.mxu0  ;;  %v1332_v7 = vpop.f32.mrf.mxu1 }
 0x13c   : > { %2403 = vst.msk [vmem:[%s3416_s26 + $0x1bc] sm:$0xf] %vm2291_vm3, %v2892_v0  ;;  %v2890_v8 = vpack.c.bf16 %v1760_v4, %v1760_v4  ;;  %v1701_v9 = vsel %vm1445_vm8, %v3032_v62, %v1573_v2  ;;  %vm1443_vm10 = vcmp.gt.f32.partialorder %v1076_v6, 0.0  ;;  %v1571_v10 = vmul.f32 0.2, %v1076_v6 }
 0x13d   : > { %2337 = vst.msk [vmem:[%s3416_s26 + $0xb4] sm:$0xf] %vm2291_vm3, %v2826_v3  ;;  %v2831_v11 = vpack.c.bf16 %v1701_v9, %v1701_v9  ;;  %v1765_v12 = vsel %vm1509_vm9, %v3096_v63, %v1637_v5  ;;  %vm1507_vm11 = vcmp.gt.f32.partialorder %v1332_v7, 0.0  ;;  %v1635_v13 = vmul.f32 0.2, %v1332_v7  ;;  %v3033_v14 = vpop.f32.mrf.mxu0  ;;  %v3097_v15 = vpop.f32.mrf.mxu1 }
 0x13e   : > { %2401 = vst.msk [vmem:[%s3416_s26 + $0x1b4] sm:$0xf] %vm2291_vm3, %v2890_v8  ;;  %v2895_v16 = vpack.c.bf16 %v1765_v12, %v1765_v12  ;;  %v1699_v17 = vsel %vm1443_vm10, %v1076_v6, %v1571_v10  ;;  %vm1446_vm12 = vcmp.gt.f32.partialorder %v3033_v14, 0.0  ;;  %v1574_v18 = vmul.f32 0.2, %v3033_v14 }
 0x13f   : > { %2342 = vst.msk [vmem:[%s3416_s26 + $0xc8] sm:$0xf] %vm2291_vm3, %v2831_v11  ;;  %v2829_v19 = vpack.c.bf16 %v1699_v17, %v1699_v17  ;;  %v1763_v20 = vsel %vm1507_vm11, %v1332_v7, %v1635_v13  ;;  %vm1510_vm13 = vcmp.gt.f32.partialorder %v3097_v15, 0.0  ;;  %v1638_v21 = vmul.f32 0.2, %v3097_v15  ;;  %v1079_v22 = vpop.f32.mrf.mxu0  ;;  %v1335_v23 = vpop.f32.mrf.mxu1 }
 0x140   : > { %2406 = vst.msk [vmem:[%s3416_s26 + $0x1c8] sm:$0xf] %vm2291_vm3, %v2895_v16  ;;  %v2893_v24 = vpack.c.bf16 %v1763_v20, %v1763_v20  ;;  %v1702_v25 = vsel %vm1446_vm12, %v3033_v14, %v1574_v18  ;;  %vm1444_vm14 = vcmp.gt.f32.partialorder %v1079_v22, 0.0  ;;  %v1572_v26 = vmul.f32 0.2, %v1079_v22 }
 0x141   : > { %2340 = vst.msk [vmem:[%s3416_s26 + $0xc0] sm:$0xf] %vm2291_vm3, %v2829_v19  ;;  %v2832_v27 = vpack.c.bf16 %v1702_v25, %v1702_v25  ;;  %v1766_v28 = vsel %vm1510_vm13, %v3097_v15, %v1638_v21  ;;  %vm1508_vm15 = vcmp.gt.f32.partialorder %v1335_v23, 0.0  ;;  %v1636_v29 = vmul.f32 0.2, %v1335_v23  ;;  %v3036_v30 = vpop.f32.mrf.mxu0  ;;  %v3100_v31 = vpop.f32.mrf.mxu1 }
 0x142   : > { %2404 = vst.msk [vmem:[%s3416_s26 + $0x1c0] sm:$0xf] %vm2291_vm3, %v2893_v24  ;;  %v2896_v32 = vpack.c.bf16 %v1766_v28, %v1766_v28  ;;  %v1700_v33 = vsel %vm1444_vm14, %v1079_v22, %v1572_v26  ;;  %vm1449_vm0 = vcmp.gt.f32.partialorder %v3036_v30, 0.0  ;;  %v1577_v34 = vmul.f32 0.2, %v3036_v30 }
 0x143   : > { %2343 = vst.msk [vmem:[%s3416_s26 + $0xcc] sm:$0xf] %vm2291_vm3, %v2832_v27  ;;  %v2830_v35 = vpack.c.bf16 %v1700_v33, %v1700_v33  ;;  %v1764_v36 = vsel %vm1508_vm15, %v1335_v23, %v1636_v29  ;;  %vm1513_vm1 = vcmp.gt.f32.partialorder %v3100_v31, 0.0  ;;  %v1641_v37 = vmul.f32 0.2, %v3100_v31  ;;  %v1092_v38 = vpop.f32.mrf.mxu0  ;;  %v1348_v39 = vpop.f32.mrf.mxu1 }
 0x144   : > { %2407 = vst.msk [vmem:[%s3416_s26 + $0x1cc] sm:$0xf] %vm2291_vm3, %v2896_v32  ;;  %v2894_v40 = vpack.c.bf16 %v1764_v36, %v1764_v36  ;;  %v1705_v41 = vsel %vm1449_vm0, %v3036_v30, %v1577_v34  ;;  %vm1447_vm2 = vcmp.gt.f32.partialorder %v1092_v38, 0.0  ;;  %v1575_v42 = vmul.f32 0.2, %v1092_v38 }
 0x145   : > { %2341 = vst.msk [vmem:[%s3416_s26 + $0xc4] sm:$0xf] %vm2291_vm3, %v2830_v35  ;;  %v2835_v43 = vpack.c.bf16 %v1705_v41, %v1705_v41  ;;  %v1769_v44 = vsel %vm1513_vm1, %v3100_v31, %v1641_v37  ;;  %vm1511_vm4 = vcmp.gt.f32.partialorder %v1348_v39, 0.0  ;;  %v1639_v45 = vmul.f32 0.2, %v1348_v39  ;;  %v3037_v46 = vpop.f32.mrf.mxu0  ;;  %v3101_v47 = vpop.f32.mrf.mxu1 }
 0x146   : > { %2405 = vst.msk [vmem:[%s3416_s26 + $0x1c4] sm:$0xf] %vm2291_vm3, %v2894_v40  ;;  %v2899_v48 = vpack.c.bf16 %v1769_v44, %v1769_v44  ;;  %v1703_v49 = vsel %vm1447_vm2, %v1092_v38, %v1575_v42  ;;  %vm1450_vm5 = vcmp.gt.f32.partialorder %v3037_v46, 0.0  ;;  %v1578_v50 = vmul.f32 0.2, %v3037_v46 }
 0x147   : > { %2346 = vst.msk [vmem:[%s3416_s26 + $0xd8] sm:$0xf] %vm2291_vm3, %v2835_v43  ;;  %v2833_v51 = vpack.c.bf16 %v1703_v49, %v1703_v49  ;;  %v1767_v52 = vsel %vm1511_vm4, %v1348_v39, %v1639_v45  ;;  %vm1514_vm6 = vcmp.gt.f32.partialorder %v3101_v47, 0.0  ;;  %v1642_v53 = vmul.f32 0.2, %v3101_v47  ;;  %v1095_v54 = vpop.f32.mrf.mxu0  ;;  %v1351_v55 = vpop.f32.mrf.mxu1 }
 0x148   : > { %2410 = vst.msk [vmem:[%s3416_s26 + $0x1d8] sm:$0xf] %vm2291_vm3, %v2899_v48  ;;  %v2897_v56 = vpack.c.bf16 %v1767_v52, %v1767_v52  ;;  %v1706_v57 = vsel %vm1450_vm5, %v3037_v46, %v1578_v50  ;;  %vm1448_vm7 = vcmp.gt.f32.partialorder %v1095_v54, 0.0  ;;  %v1576_v58 = vmul.f32 0.2, %v1095_v54 }
 0x149   : > { %2344 = vst.msk [vmem:[%s3416_s26 + $0xd0] sm:$0xf] %vm2291_vm3, %v2833_v51  ;;  %v2836_v59 = vpack.c.bf16 %v1706_v57, %v1706_v57  ;;  %v1770_v60 = vsel %vm1514_vm6, %v3101_v47, %v1642_v53  ;;  %vm1512_vm8 = vcmp.gt.f32.partialorder %v1351_v55, 0.0  ;;  %v1640_v61 = vmul.f32 0.2, %v1351_v55  ;;  %v3040_v62 = vpop.f32.mrf.mxu0  ;;  %v3104_v63 = vpop.f32.mrf.mxu1 }
 0x14a   : > { %2408 = vst.msk [vmem:[%s3416_s26 + $0x1d0] sm:$0xf] %vm2291_vm3, %v2897_v56  ;;  %v2900_v0 = vpack.c.bf16 %v1770_v60, %v1770_v60  ;;  %v1704_v1 = vsel %vm1448_vm7, %v1095_v54, %v1576_v58  ;;  %vm1453_vm9 = vcmp.gt.f32.partialorder %v3040_v62, 0.0  ;;  %v1581_v2 = vmul.f32 0.2, %v3040_v62 }
 0x14b   : > { %2347 = vst.msk [vmem:[%s3416_s26 + $0xdc] sm:$0xf] %vm2291_vm3, %v2836_v59  ;;  %v2834_v3 = vpack.c.bf16 %v1704_v1, %v1704_v1  ;;  %v1768_v4 = vsel %vm1512_vm8, %v1351_v55, %v1640_v61  ;;  %vm1517_vm10 = vcmp.gt.f32.partialorder %v3104_v63, 0.0  ;;  %v1645_v5 = vmul.f32 0.2, %v3104_v63  ;;  %v1108_v6 = vpop.f32.mrf.mxu0  ;;  %v1364_v7 = vpop.f32.mrf.mxu1 }
 0x14c   : > { %2411 = vst.msk [vmem:[%s3416_s26 + $0x1dc] sm:$0xf] %vm2291_vm3, %v2900_v0  ;;  %v2898_v8 = vpack.c.bf16 %v1768_v4, %v1768_v4  ;;  %v1709_v9 = vsel %vm1453_vm9, %v3040_v62, %v1581_v2  ;;  %vm1451_vm11 = vcmp.gt.f32.partialorder %v1108_v6, 0.0  ;;  %v1579_v10 = vmul.f32 0.2, %v1108_v6 }
 0x14d   : > { %2345 = vst.msk [vmem:[%s3416_s26 + $0xd4] sm:$0xf] %vm2291_vm3, %v2834_v3  ;;  %v2839_v11 = vpack.c.bf16 %v1709_v9, %v1709_v9  ;;  %v1773_v12 = vsel %vm1517_vm10, %v3104_v63, %v1645_v5  ;;  %vm1515_vm12 = vcmp.gt.f32.partialorder %v1364_v7, 0.0  ;;  %v1643_v13 = vmul.f32 0.2, %v1364_v7  ;;  %v3041_v14 = vpop.f32.mrf.mxu0  ;;  %v3105_v15 = vpop.f32.mrf.mxu1 }
 0x14e   : > { %2409 = vst.msk [vmem:[%s3416_s26 + $0x1d4] sm:$0xf] %vm2291_vm3, %v2898_v8  ;;  %v2903_v16 = vpack.c.bf16 %v1773_v12, %v1773_v12  ;;  %v1707_v17 = vsel %vm1451_vm11, %v1108_v6, %v1579_v10  ;;  %vm1454_vm13 = vcmp.gt.f32.partialorder %v3041_v14, 0.0  ;;  %v1582_v18 = vmul.f32 0.2, %v3041_v14 }
 0x14f   : > { %2350 = vst.msk [vmem:[%s3416_s26 + $0xe8] sm:$0xf] %vm2291_vm3, %v2839_v11  ;;  %v2837_v19 = vpack.c.bf16 %v1707_v17, %v1707_v17  ;;  %v1771_v20 = vsel %vm1515_vm12, %v1364_v7, %v1643_v13  ;;  %vm1518_vm14 = vcmp.gt.f32.partialorder %v3105_v15, 0.0  ;;  %v1646_v21 = vmul.f32 0.2, %v3105_v15  ;;  %v1111_v22 = vpop.f32.mrf.mxu0  ;;  %v1367_v23 = vpop.f32.mrf.mxu1 }
 0x150   : > { %2414 = vst.msk [vmem:[%s3416_s26 + $0x1e8] sm:$0xf] %vm2291_vm3, %v2903_v16  ;;  %v2901_v24 = vpack.c.bf16 %v1771_v20, %v1771_v20  ;;  %v1710_v25 = vsel %vm1454_vm13, %v3041_v14, %v1582_v18  ;;  %vm1452_vm15 = vcmp.gt.f32.partialorder %v1111_v22, 0.0  ;;  %v1580_v26 = vmul.f32 0.2, %v1111_v22 }
 0x151   : > { %2348 = vst.msk [vmem:[%s3416_s26 + $0xe0] sm:$0xf] %vm2291_vm3, %v2837_v19  ;;  %v2840_v27 = vpack.c.bf16 %v1710_v25, %v1710_v25  ;;  %v1774_v28 = vsel %vm1518_vm14, %v3105_v15, %v1646_v21  ;;  %vm1516_vm0 = vcmp.gt.f32.partialorder %v1367_v23, 0.0  ;;  %v1644_v29 = vmul.f32 0.2, %v1367_v23  ;;  %v3044_v30 = vpop.f32.mrf.mxu0  ;;  %v3108_v31 = vpop.f32.mrf.mxu1 }
 0x152   : > { %2412 = vst.msk [vmem:[%s3416_s26 + $0x1e0] sm:$0xf] %vm2291_vm3, %v2901_v24  ;;  %v2904_v32 = vpack.c.bf16 %v1774_v28, %v1774_v28  ;;  %v1708_v33 = vsel %vm1452_vm15, %v1111_v22, %v1580_v26  ;;  %vm1457_vm1 = vcmp.gt.f32.partialorder %v3044_v30, 0.0  ;;  %v1585_v34 = vmul.f32 0.2, %v3044_v30 }
 0x153   : > { %2351 = vst.msk [vmem:[%s3416_s26 + $0xec] sm:$0xf] %vm2291_vm3, %v2840_v27  ;;  %v2838_v35 = vpack.c.bf16 %v1708_v33, %v1708_v33  ;;  %v1772_v36 = vsel %vm1516_vm0, %v1367_v23, %v1644_v29  ;;  %vm1521_vm2 = vcmp.gt.f32.partialorder %v3108_v31, 0.0  ;;  %v1649_v37 = vmul.f32 0.2, %v3108_v31  ;;  %v1124_v38 = vpop.f32.mrf.mxu0  ;;  %v1380_v39 = vpop.f32.mrf.mxu1 }
 0x154   : > { %2415 = vst.msk [vmem:[%s3416_s26 + $0x1ec] sm:$0xf] %vm2291_vm3, %v2904_v32  ;;  %v2902_v40 = vpack.c.bf16 %v1772_v36, %v1772_v36  ;;  %v1713_v41 = vsel %vm1457_vm1, %v3044_v30, %v1585_v34  ;;  %vm1455_vm4 = vcmp.gt.f32.partialorder %v1124_v38, 0.0  ;;  %v1583_v42 = vmul.f32 0.2, %v1124_v38 }
 0x155   : > { %2349 = vst.msk [vmem:[%s3416_s26 + $0xe4] sm:$0xf] %vm2291_vm3, %v2838_v35  ;;  %v2843_v43 = vpack.c.bf16 %v1713_v41, %v1713_v41  ;;  %v1777_v44 = vsel %vm1521_vm2, %v3108_v31, %v1649_v37  ;;  %vm1519_vm5 = vcmp.gt.f32.partialorder %v1380_v39, 0.0  ;;  %v1647_v45 = vmul.f32 0.2, %v1380_v39  ;;  %v3045_v46 = vpop.f32.mrf.mxu0  ;;  %v3109_v47 = vpop.f32.mrf.mxu1 }
 0x156   : > { %2413 = vst.msk [vmem:[%s3416_s26 + $0x1e4] sm:$0xf] %vm2291_vm3, %v2902_v40  ;;  %v2907_v48 = vpack.c.bf16 %v1777_v44, %v1777_v44  ;;  %v1711_v49 = vsel %vm1455_vm4, %v1124_v38, %v1583_v42  ;;  %vm1458_vm6 = vcmp.gt.f32.partialorder %v3045_v46, 0.0  ;;  %v1586_v50 = vmul.f32 0.2, %v3045_v46 }
 0x157   : > { %2354 = vst.msk [vmem:[%s3416_s26 + $0xf8] sm:$0xf] %vm2291_vm3, %v2843_v43  ;;  %v2841_v51 = vpack.c.bf16 %v1711_v49, %v1711_v49  ;;  %v1775_v52 = vsel %vm1519_vm5, %v1380_v39, %v1647_v45  ;;  %vm1522_vm7 = vcmp.gt.f32.partialorder %v3109_v47, 0.0  ;;  %v1650_v53 = vmul.f32 0.2, %v3109_v47  ;;  %v1127_v54 = vpop.f32.mrf.mxu0  ;;  %v1383_v55 = vpop.f32.mrf.mxu1 }
 0x158   : > { %2418 = vst.msk [vmem:[%s3416_s26 + $0x1f8] sm:$0xf] %vm2291_vm3, %v2907_v48  ;;  %v2905_v56 = vpack.c.bf16 %v1775_v52, %v1775_v52  ;;  %v1714_v57 = vsel %vm1458_vm6, %v3045_v46, %v1586_v50  ;;  %vm1456_vm8 = vcmp.gt.f32.partialorder %v1127_v54, 0.0  ;;  %v1584_v58 = vmul.f32 0.2, %v1127_v54 }
 0x159   : > { %2352 = vst.msk [vmem:[%s3416_s26 + $0xf0] sm:$0xf] %vm2291_vm3, %v2841_v51  ;;  %v2844_v59 = vpack.c.bf16 %v1714_v57, %v1714_v57  ;;  %v1778_v60 = vsel %vm1522_vm7, %v3109_v47, %v1650_v53  ;;  %vm1520_vm9 = vcmp.gt.f32.partialorder %v1383_v55, 0.0  ;;  %v1648_v61 = vmul.f32 0.2, %v1383_v55 }
 0x15a   : > { %2416 = vst.msk [vmem:[%s3416_s26 + $0x1f0] sm:$0xf] %vm2291_vm3, %v2905_v56  ;;  %v2908_v62 = vpack.c.bf16 %v1778_v60, %v1778_v60  ;;  %v1712_v63 = vsel %vm1456_vm8, %v1127_v54, %v1584_v58 }
 0x15b   : > { %2355 = vst.msk [vmem:[%s3416_s26 + $0xfc] sm:$0xf] %vm2291_vm3, %v2844_v59  ;;  %v2842_v0 = vpack.c.bf16 %v1712_v63, %v1712_v63  ;;  %v1776_v1 = vsel %vm1520_vm9, %v1383_v55, %v1648_v61 }
 0x15c   : > { %2419 = vst.msk [vmem:[%s3416_s26 + $0x1fc] sm:$0xf] %vm2291_vm3, %v2908_v62  ;;  %v2906_v2 = vpack.c.bf16 %v1776_v1, %v1776_v1 }
 0x15d   : > { %2353 = vst.msk [vmem:[%s3416_s26 + $0xf4] sm:$0xf] %vm2291_vm3, %v2842_v0 }
 0x15e   : > { %2417 = vst.msk [vmem:[%s3416_s26 + $0x1f4] sm:$0xf] %vm2291_vm3, %v2906_v2 }
 0x15f PF: > { %s12_s11 = sadd.s32 1, %s3229_s11   ;;  %s3686_s9 = smov %s3225_s10 }
 0x160   : > { %p9_p5 = scmp.ge.s32.totalorder %s12_s11, 4   ;;  %s3687_s10 = smov %s3689_s12 }
 0x162   :  { %11 = sbr.rel (!%p9_p5) target bundleno = 2 (0x2), region = 61 }

// kernel: discriminator_forward.9
= control target key start
LH: loop header
LB: loop body
LE: loop exit
PB: predicated region body
PF: predicated region fallthrough
CT: control target
= control target key end

     0   :  { %s3015_s9 = smov 0   ;;  %s3017_s10 = smov 0   ;;  %s3507_s0 = inlined_call_operand.vmem [shape: bf16[512,1024], index: 0, kind: input, shape index: {}]   ;;  %s3508_s1 = inlined_call_operand.vmem [shape: bf16[1024,128], index: 1, kind: input, shape index: {}]   ;;  %s3509_s2 = inlined_call_operand.vmem [shape: f32[512,128], index: 2, kind: output, shape index: {}]  }
   0x1   :  { %s3019_s11 = smov 0  }
   0x2 LB: > { %s24_s12 = sadd.s32 1, %s2994_s10  ;;  %p2239_p0 = scmp.ge.s32.totalorder %s2998_s11, 1  ;;  %s2998_s11 = sphi %s3019_s11, %s12_s11   ;;  %s2994_s10 = sphi %s3017_s10, %s3511_s10   ;;  %s2990_s9 = sphi %s3015_s9, %s3510_s9  }
   0x3   : > { %p26_p1 = scmp.ge.s32.totalorder %s24_s12, 2  ;;  %p137_p2 = scmp.lt.s32.totalorder %s2998_s11, 3 }
   0x5   : > { %s3513_s12 = smov (%p26_p1, %s24_s12), 0  ;;  %p138_p3 = pnand %p2239_p0, %p137_p2 }
   0x6   : > { %s2240_s21 = sshll.u32 (!%p138_p3), %s2990_s9, 5 }
   0x7   : > { %141 = sbr.rel (%p138_p3) target bundleno = 500 (0x1f4), region = 28  ;;  %p168_p4 = scmp.lt.s32.totalorder (!%p138_p3), %s2240_s21, 63 }
   0xc   : > { %v2912_v0 = vld [vmem:[%s3508_s1 + $0x78] sm:$0xff]   ;;  %v2916_v4 = vld [vmem:[%s3508_s1 + $0x70] sm:$0xff]   ;;  %v2920_v8 = vld [vmem:[%s3508_s1 + $0x68] sm:$0xff]   ;;  %s3515_s21 = smov (!%p168_p4, %s2240_s21), 63 }
   0xd   : > { %v2913_v1 = vld [vmem:[%s3508_s1 + $0xf8] sm:$0xff]   ;;  %2440 = vmatprep.subr.bf16.mxu0 %v2912_v0  ;;  %v2917_v5 = vld [vmem:[%s3508_s1 + $0xf0] sm:$0xff]   ;;  %v2921_v9 = vld [vmem:[%s3508_s1 + $0xe8] sm:$0xff]   ;;  %s2439_s19 = sshll.u32 %s3515_s21, 5 }
   0xe   : > { %v2914_v2 = vld [vmem:[%s3508_s1 + $0x38] sm:$0xff]   ;;  %2552 = vmatprep.subr.bf16.mxu1 %v2913_v1  ;;  %v2918_v6 = vld [vmem:[%s3508_s1 + $0x30] sm:$0xff]   ;;  %v2922_v10 = vld [vmem:[%s3508_s1 + $0x28] sm:$0xff]   ;;  %s3132_s29 = scalar_lea.vmem %s3507_s0, %s2439_s19 }
   0xf   : > { %v2915_v3 = vld [vmem:[%s3508_s1 + $0xb8] sm:$0xff]   ;;  %2441 = vmatpush3.bf16.msra.mxu0 %v2914_v2  ;;  %v2919_v7 = vld [vmem:[%s3508_s1 + $0xb0] sm:$0xff]   ;;  %v2923_v11 = vld [vmem:[%s3508_s1 + $0xa8] sm:$0xff]  }
  0x10   : > { %2553 = vmatpush3.bf16.msra.mxu1 %v2915_v3  ;;  %2442 = vmatprep.subr.bf16.mxu0 %v2916_v4  ;;  %v2924_v12 = vld [vmem:[%s3508_s1 + $0x60] sm:$0xff]   ;;  %v2928_v16 = vld [vmem:[%s3508_s1 + $0x58] sm:$0xff]   ;;  %v2932_v20 = vld [vmem:[%s3508_s1 + $0x50] sm:$0xff]  }
  0x11   : > { %2554 = vmatprep.subr.bf16.mxu1 %v2917_v5  ;;  %v2925_v13 = vld [vmem:[%s3508_s1 + $0xe0] sm:$0xff]   ;;  %v2929_v17 = vld [vmem:[%s3508_s1 + $0xd8] sm:$0xff]   ;;  %v2933_v21 = vld [vmem:[%s3508_s1 + $0xd0] sm:$0xff]  }
  0x12   : > { %v2926_v14 = vld [vmem:[%s3508_s1 + $0x20] sm:$0xff]   ;;  %v2930_v18 = vld [vmem:[%s3508_s1 + $0x18] sm:$0xff]   ;;  %v2934_v22 = vld [vmem:[%s3508_s1 + $0x10] sm:$0xff]  }
  0x13   : > { %2443 = vmatpush3.bf16.msra.mxu0 %v2918_v6  ;;  %v2927_v15 = vld [vmem:[%s3508_s1 + $0xa0] sm:$0xff]   ;;  %v2931_v19 = vld [vmem:[%s3508_s1 + $0x98] sm:$0xff]   ;;  %v2935_v23 = vld [vmem:[%s3508_s1 + $0x90] sm:$0xff]  }
  0x14   : > { %2555 = vmatpush3.bf16.msra.mxu1 %v2919_v7  ;;  %2444 = vmatprep.subr.bf16.mxu0 %v2920_v8  ;;  %v2936_v24 = vld [vmem:[%s3508_s1 + $0x48] sm:$0xff]   ;;  %v2940_v28 = vld [vmem:[%s3508_s1 + $0x40] sm:$0xff]   ;;  %v2944_v40 = vld [vmem:[%s3508_s1 + $0x178] sm:$0xff]  }
  0x15   : > { %2556 = vmatprep.subr.bf16.mxu1 %v2921_v9  ;;  %v2937_v25 = vld [vmem:[%s3508_s1 + $0xc8] sm:$0xff]   ;;  %v2941_v29 = vld [vmem:[%s3508_s1 + $0xc0] sm:$0xff]   ;;  %v2945_v41 = vld [vmem:[%s3508_s1 + $0x138] sm:$0xff]  }
  0x16   : > { %v2938_v26 = vld [vmem:[%s3508_s1 + $0x8] sm:$0xff]   ;;  %v2942_v30 = vld [vmem:[%s3508_s1] sm:$0xff]   ;;  %v2946_v42 = vld [vmem:[%s3508_s1 + $0x1f8] sm:$0xff]  }
  0x17   : > { %2445 = vmatpush3.bf16.msra.mxu0 %v2922_v10  ;;  %v2939_v27 = vld [vmem:[%s3508_s1 + $0x88] sm:$0xff]   ;;  %v2943_v31 = vld [vmem:[%s3508_s1 + $0x80] sm:$0xff]   ;;  %v2947_v43 = vld [vmem:[%s3508_s1 + $0x1b8] sm:$0xff]  }
  0x18   : > { %2557 = vmatpush3.bf16.msra.mxu1 %v2923_v11  ;;  %2446 = vmatprep.subr.bf16.mxu0 %v2924_v12  ;;  %v188_v32 = vld [vmem:[%s3132_s29] sm:$0xff]  ;;  %v189_v34 = vld [vmem:[%s3132_s29 + $0x8] sm:$0xff]  ;;  %v2948_v55 = vld [vmem:[%s3508_s1 + $0x170] sm:$0xff]  }
  0x19   : > { %2558 = vmatprep.subr.bf16.mxu1 %v2925_v13  ;;  %v192_v33 = vld [vmem:[%s3132_s29 + $0x20] sm:$0xff]  ;;  %v193_v37 = vld [vmem:[%s3132_s29 + $0x28] sm:$0xff]  ;;  %v2949_v58 = vld [vmem:[%s3508_s1 + $0x130] sm:$0xff]  }
  0x1a   : > { %v2245_v35 = vcombine.low %v188_v32, %v192_v33  ;;  %v2246_v36 = vcombine.high %v188_v32, %v192_v33  ;;  %v2247_v38 = vcombine.low %v189_v34, %v193_v37  ;;  %v2248_v39 = vcombine.high %v189_v34, %v193_v37  ;;  %v196_v44 = vld [vmem:[%s3132_s29 + $0x40] sm:$0xff]  ;;  %v197_v47 = vld [vmem:[%s3132_s29 + $0x48] sm:$0xff]  ;;  %v2950_v60 = vld [vmem:[%s3508_s1 + $0x1f0] sm:$0xff]  }
  0x1b   : > { %2447 = vmatpush3.bf16.msra.mxu0 %v2926_v14  ;;  %v200_v45 = vld [vmem:[%s3132_s29 + $0x60] sm:$0xff]  ;;  %v201_v48 = vld [vmem:[%s3132_s29 + $0x68] sm:$0xff]  ;;  %v2951_v61 = vld [vmem:[%s3508_s1 + $0x1b0] sm:$0xff]  }
  0x1c   : > { %2559 = vmatpush3.bf16.msra.mxu1 %v2927_v15  ;;  %2448 = vmatprep.subr.bf16.mxu0 %v2928_v16  ;;  %v2254_v46 = vcombine.high %v196_v44, %v200_v45  ;;  %v204_v49 = vld [vmem:[%s3132_s29 + $0x80] sm:$0xff]  ;;  %v2256_v50 = vcombine.high %v197_v47, %v201_v48  ;;  %v205_v52 = vld [vmem:[%s3132_s29 + $0x88] sm:$0xff]  ;;  %v2253_v54 = vcombine.low %v196_v44, %v200_v45  ;;  %v2964_v34 = vld [vmem:[%s3508_s1 + $0x150] sm:$0xff]  }
  0x1d   : > { %2560 = vmatprep.subr.bf16.mxu1 %v2929_v17  ;;  %1500 = vmatprep.mubr.bf16.mxu0 %v2246_v36  ;;  %v208_v51 = vld [vmem:[%s3132_s29 + $0xa0] sm:$0xff]  ;;  %v209_v53 = vld [vmem:[%s3132_s29 + $0xa8] sm:$0xff]  ;;  %v2255_v56 = vcombine.low %v197_v47, %v201_v48  ;;  %v2965_v36 = vld [vmem:[%s3508_s1 + $0x110] sm:$0xff]  }
  0x1e   : > { %1661 = vmatprep.mubr.bf16.mxu1 %v2248_v39  ;;  %v2262_v57 = vcombine.high %v204_v49, %v208_v51  ;;  %v2264_v59 = vcombine.high %v205_v52, %v209_v53  ;;  %v212_v62 = vld [vmem:[%s3132_s29 + $0xc0] sm:$0xff]  ;;  %v213_v0 = vld [vmem:[%s3132_s29 + $0xc8] sm:$0xff]  ;;  %v2261_v3 = vcombine.low %v204_v49, %v208_v51  ;;  %v2263_v5 = vcombine.low %v205_v52, %v209_v53  ;;  %v2966_v37 = vld [vmem:[%s3508_s1 + $0x1d0] sm:$0xff]  }
  0x1f   : > { %2449 = vmatpush3.bf16.msra.mxu0 %v2930_v18  ;;  %v216_v63 = vld [vmem:[%s3132_s29 + $0xe0] sm:$0xff]  ;;  %v217_v1 = vld [vmem:[%s3132_s29 + $0xe8] sm:$0xff]  ;;  %v2967_v39 = vld [vmem:[%s3508_s1 + $0x190] sm:$0xff]  }
  0x20   : > { %2561 = vmatpush3.bf16.msra.mxu1 %v2931_v19  ;;  %2450 = vmatprep.subr.bf16.mxu0 %v2932_v20  ;;  %v2952_v2 = vld [vmem:[%s3508_s1 + $0x168] sm:$0xff]   ;;  %v2270_v6 = vcombine.high %v212_v62, %v216_v63  ;;  %v2272_v8 = vcombine.high %v213_v0, %v217_v1  ;;  %v220_v10 = vld [vmem:[%s3132_s29 + $0x100] sm:$0xff]  ;;  %v2269_v16 = vcombine.low %v212_v62, %v216_v63 }
  0x21   : > { %2562 = vmatprep.subr.bf16.mxu1 %v2933_v21  ;;  %v2953_v4 = vld [vmem:[%s3508_s1 + $0x128] sm:$0xff]   ;;  %v224_v11 = vld [vmem:[%s3132_s29 + $0x120] sm:$0xff]  ;;  %v2271_v18 = vcombine.low %v213_v0, %v217_v1 }
  0x22   : > { %v2954_v7 = vld [vmem:[%s3508_s1 + $0x1e8] sm:$0xff]   ;;  %v2956_v14 = vld [vmem:[%s3508_s1 + $0x160] sm:$0xff]   ;;  %v2278_v19 = vcombine.high %v220_v10, %v224_v11 }
  0x23   : > { %2451 = vmatpush3.bf16.msra.mxu0 %v2934_v22  ;;  %v2955_v9 = vld [vmem:[%s3508_s1 + $0x1a8] sm:$0xff]   ;;  %v2957_v15 = vld [vmem:[%s3508_s1 + $0x120] sm:$0xff]  }
  0x24   : > { %2563 = vmatpush3.bf16.msra.mxu1 %v2935_v23  ;;  %2452 = vmatprep.subr.bf16.mxu0 %v2936_v24  ;;  %v221_v12 = vld [vmem:[%s3132_s29 + $0x108] sm:$0xff]  ;;  %v2958_v17 = vld [vmem:[%s3508_s1 + $0x1e0] sm:$0xff]   ;;  %v2960_v24 = vld [vmem:[%s3508_s1 + $0x158] sm:$0xff]  }
  0x25   : > { %2564 = vmatprep.subr.bf16.mxu1 %v2937_v25  ;;  %v225_v13 = vld [vmem:[%s3132_s29 + $0x128] sm:$0xff]  ;;  %v2959_v20 = vld [vmem:[%s3508_s1 + $0x1a0] sm:$0xff]  }
  0x26   : > { %v2280_v21 = vcombine.high %v221_v12, %v225_v13  ;;  %v228_v22 = vld [vmem:[%s3132_s29 + $0x140] sm:$0xff]  ;;  %v229_v25 = vld [vmem:[%s3132_s29 + $0x148] sm:$0xff] }
  0x27   : > { %2453 = vmatpush3.bf16.msra.mxu0 %v2938_v26  ;;  %v232_v23 = vld [vmem:[%s3132_s29 + $0x160] sm:$0xff]  ;;  %v233_v26 = vld [vmem:[%s3132_s29 + $0x168] sm:$0xff] }
  0x28   : > { %2565 = vmatpush3.bf16.msra.mxu1 %v2939_v27  ;;  %2454 = vmatprep.subr.bf16.mxu0 %v2940_v28  ;;  %v2961_v27 = vld [vmem:[%s3508_s1 + $0x118] sm:$0xff]   ;;  %v2286_v32 = vcombine.high %v228_v22, %v232_v23  ;;  %v2288_v33 = vcombine.high %v229_v25, %v233_v26  ;;  %v2969_v47 = vld [vmem:[%s3508_s1 + $0x108] sm:$0xff]   ;;  %v248_v51 = vld [vmem:[%s3132_s29 + $0x1e0] sm:$0xff] }
  0x29   : > { %2566 = vmatprep.subr.bf16.mxu1 %v2941_v29  ;;  %v2962_v28 = vld [vmem:[%s3508_s1 + $0x1d8] sm:$0xff]   ;;  %v2970_v48 = vld [vmem:[%s3508_s1 + $0x1c8] sm:$0xff]   ;;  %v252_v62 = vld [vmem:[%s3132_s29 + $0x200] sm:$0xff] }
  0x2a   : > { %v2963_v29 = vld [vmem:[%s3508_s1 + $0x198] sm:$0xff]   ;;  %v2971_v49 = vld [vmem:[%s3508_s1 + $0x188] sm:$0xff]   ;;  %v256_v63 = vld [vmem:[%s3132_s29 + $0x220] sm:$0xff] }
  0x2b   : > { %2455 = vmatpush3.bf16.msra.mxu0 %v2942_v30  ;;  %v2277_v30 = vcombine.low %v220_v10, %v224_v11  ;;  %v245_v52 = vld [vmem:[%s3132_s29 + $0x1c8] sm:$0xff]  ;;  %v2309_v10 = vcombine.low %v252_v62, %v256_v63 }
  0x2c   : > { %2567 = vmatpush3.bf16.msra.mxu1 %v2943_v31  ;;  %2664 = vmatprep.subr.bf16.mxu0 %v2944_v40  ;;  %v2279_v31 = vcombine.low %v221_v12, %v225_v13  ;;  %v237_v40 = vld [vmem:[%s3132_s29 + $0x188] sm:$0xff] }
  0x2d   : > { %2776 = vmatprep.subr.bf16.mxu1 %v2946_v42  ;;  %v2285_v42 = vcombine.low %v228_v22, %v232_v23  ;;  %v249_v53 = vld [vmem:[%s3132_s29 + $0x1e8] sm:$0xff]  ;;  %v276_v22 = vld [vmem:[%s3132_s29 + $0x2c0] sm:$0xff] }
  0x2e   : > { %1501 = vmatmul.mubr.bf16.vlgmr.msra.gmra.mxu0 %v2245_v35  ;;  %v236_v35 = vld [vmem:[%s3132_s29 + $0x180] sm:$0xff]  ;;  %v253_v0 = vld [vmem:[%s3132_s29 + $0x208] sm:$0xff] }
  0x2f   : > { %1662 = vmatmul.mubr.bf16.vlgmr.msra.gmra.mxu1 %v2247_v38  ;;  %2665 = vmatpush3.bf16.msra.mxu0 %v2945_v41  ;;  %v240_v38 = vld [vmem:[%s3132_s29 + $0x1a0] sm:$0xff]  ;;  %v241_v41 = vld [vmem:[%s3132_s29 + $0x1a8] sm:$0xff] }
  0x30   : > { %2777 = vmatpush3.bf16.msra.mxu1 %v2947_v43  ;;  %1508 = vmatprep.mubr.bf16.mxu0 %v2254_v46  ;;  %v2287_v43 = vcombine.low %v229_v25, %v233_v26  ;;  %v2294_v44 = vcombine.high %v236_v35, %v240_v38  ;;  %v2296_v45 = vcombine.high %v237_v40, %v241_v41  ;;  %v2968_v46 = vld [vmem:[%s3508_s1 + $0x148] sm:$0xff]   ;;  %v280_v23 = vld [vmem:[%s3132_s29 + $0x2e0] sm:$0xff] }
  0x31   : > { %1669 = vmatprep.mubr.bf16.mxu1 %v2256_v50  ;;  %2666 = vmatprep.subr.bf16.mxu0 %v2948_v55  ;;  %v244_v50 = vld [vmem:[%s3132_s29 + $0x1c0] sm:$0xff]  ;;  %v257_v1 = vld [vmem:[%s3132_s29 + $0x228] sm:$0xff] }
  0x32   : > { %2778 = vmatprep.subr.bf16.mxu1 %v2950_v60  ;;  %v2972_v55 = vld [vmem:[%s3508_s1 + $0x140] sm:$0xff]   ;;  %v2311_v11 = vcombine.low %v253_v0, %v257_v1  ;;  %v281_v25 = vld [vmem:[%s3132_s29 + $0x2e8] sm:$0xff] }
  0x33   : > { %2667 = vmatpush3.bf16.msra.mxu0 %v2949_v58  ;;  %v2973_v58 = vld [vmem:[%s3508_s1 + $0x100] sm:$0xff]  }
  0x34   : > { %2779 = vmatpush3.bf16.msra.mxu1 %v2951_v61  ;;  %2668 = vmatprep.subr.bf16.mxu0 %v2952_v2  ;;  %v2974_v60 = vld [vmem:[%s3508_s1 + $0x1c0] sm:$0xff]   ;;  %v2301_v2 = vcombine.low %v244_v50, %v248_v51 }
  0x35   : > { %2780 = vmatprep.subr.bf16.mxu1 %v2954_v7  ;;  %v2975_v61 = vld [vmem:[%s3508_s1 + $0x180] sm:$0xff]  }
  0x36   : > { %1509 = vmatmul.mubr.bf16.gmra.mxu0 %v2253_v54  ;;  %v2293_v54 = vcombine.low %v236_v35, %v240_v38  ;;  %v264_v7 = vld [vmem:[%s3132_s29 + $0x260] sm:$0xff] }
  0x37   : > { %1670 = vmatmul.mubr.bf16.gmra.mxu1 %v2255_v56  ;;  %1516 = vmatprep.mubr.bf16.mxu0 %v2262_v57  ;;  %v2295_v56 = vcombine.low %v237_v40, %v241_v41  ;;  %v2302_v57 = vcombine.high %v244_v50, %v248_v51  ;;  %v292_v38 = vld [vmem:[%s3132_s29 + $0x340] sm:$0xff]  ;;  %v293_v40 = vld [vmem:[%s3132_s29 + $0x348] sm:$0xff] }
  0x38   : > { %1677 = vmatprep.mubr.bf16.mxu1 %v2264_v59  ;;  %2669 = vmatpush3.bf16.msra.mxu0 %v2953_v4  ;;  %v2304_v59 = vcombine.high %v245_v52, %v249_v53  ;;  %v2310_v4 = vcombine.high %v252_v62, %v256_v63  ;;  %v297_v41 = vld [vmem:[%s3132_s29 + $0x368] sm:$0xff]  ;;  %v190_v62 = vld [vmem:[%s3132_s29 + $0x10] sm:$0xff] }
  0x39   : > { %2781 = vmatpush3.bf16.msra.mxu1 %v2955_v9  ;;  %2670 = vmatprep.subr.bf16.mxu0 %v2956_v14  ;;  %v265_v9 = vld [vmem:[%s3132_s29 + $0x268] sm:$0xff]  ;;  %v268_v14 = vld [vmem:[%s3132_s29 + $0x280] sm:$0xff]  ;;  %v2351_v51 = vcombine.low %v293_v40, %v297_v41  ;;  %v194_v63 = vld [vmem:[%s3132_s29 + $0x30] sm:$0xff] }
  0x3a   : > { %2782 = vmatprep.subr.bf16.mxu1 %v2958_v17  ;;  %v273_v17 = vld [vmem:[%s3132_s29 + $0x2a8] sm:$0xff] }
  0x3c   : > { %2671 = vmatpush3.bf16.msra.mxu0 %v2957_v15  ;;  %v272_v15 = vld [vmem:[%s3132_s29 + $0x2a0] sm:$0xff] }
  0x3d   : > { %2783 = vmatpush3.bf16.msra.mxu1 %v2959_v20  ;;  %2672 = vmatprep.subr.bf16.mxu0 %v2960_v24  ;;  %v2326_v20 = vcombine.high %v268_v14, %v272_v15  ;;  %v277_v24 = vld [vmem:[%s3132_s29 + $0x2c8] sm:$0xff]  ;;  %v2325_v26 = vcombine.low %v268_v14, %v272_v15  ;;  %v206_v14 = vld [vmem:[%s3132_s29 + $0x90] sm:$0xff] }
  0x3e   : > { %1517 = vmatmul.mubr.bf16.gmra.mxu0 %v2261_v3  ;;  %2784 = vmatprep.subr.bf16.mxu1 %v2962_v28  ;;  %v2303_v3 = vcombine.low %v245_v52, %v249_v53  ;;  %v2334_v28 = vcombine.high %v276_v22, %v280_v23  ;;  %v2335_v35 = vcombine.low %v277_v24, %v281_v25  ;;  %v210_v15 = vld [vmem:[%s3132_s29 + $0xb0] sm:$0xff] }
  0x3f   : > { %1678 = vmatmul.mubr.bf16.gmra.mxu1 %v2263_v5  ;;  %1524 = vmatprep.mubr.bf16.mxu0 %v2270_v6  ;;  %v2312_v5 = vcombine.high %v253_v0, %v257_v1  ;;  %v260_v6 = vld [vmem:[%s3132_s29 + $0x240] sm:$0xff]  ;;  %v191_v0 = vld [vmem:[%s3132_s29 + $0x18] sm:$0xff] }
  0x40   : > { %1685 = vmatprep.mubr.bf16.mxu1 %v2272_v8  ;;  %2673 = vmatpush3.bf16.msra.mxu0 %v2961_v27  ;;  %v261_v8 = vld [vmem:[%s3132_s29 + $0x248] sm:$0xff]  ;;  %v2318_v12 = vcombine.high %v260_v6, %v264_v7  ;;  %v195_v1 = vld [vmem:[%s3132_s29 + $0x38] sm:$0xff] }
  0x41   : > { %2785 = vmatpush3.bf16.msra.mxu1 %v2963_v29  ;;  %2674 = vmatprep.subr.bf16.mxu0 %v2964_v34  ;;  %v2320_v13 = vcombine.high %v261_v8, %v265_v9  ;;  %v2336_v29 = vcombine.high %v277_v24, %v281_v25  ;;  %v2333_v34 = vcombine.low %v276_v22, %v280_v23  ;;  %v214_v22 = vld [vmem:[%s3132_s29 + $0xd0] sm:$0xff]  ;;  %v215_v24 = vld [vmem:[%s3132_s29 + $0xd8] sm:$0xff] }
  0x42   : > { %2786 = vmatprep.subr.bf16.mxu1 %v2966_v37  ;;  %v218_v23 = vld [vmem:[%s3132_s29 + $0xf0] sm:$0xff]  ;;  %v219_v25 = vld [vmem:[%s3132_s29 + $0xf8] sm:$0xff] }
  0x44   : > { %2675 = vmatpush3.bf16.msra.mxu0 %v2965_v36 }
  0x45   : > { %2787 = vmatpush3.bf16.msra.mxu1 %v2967_v39  ;;  %2676 = vmatprep.subr.bf16.mxu0 %v2968_v46  ;;  %v296_v39 = vld [vmem:[%s3132_s29 + $0x360] sm:$0xff] }
  0x46   : > { %1525 = vmatmul.mubr.bf16.gmra.mxu0 %v2269_v16  ;;  %2788 = vmatprep.subr.bf16.mxu1 %v2970_v48  ;;  %v269_v16 = vld [vmem:[%s3132_s29 + $0x288] sm:$0xff]  ;;  %v300_v46 = vld [vmem:[%s3132_s29 + $0x380] sm:$0xff]  ;;  %v2349_v50 = vcombine.low %v292_v38, %v296_v39 }
  0x47   : > { %1686 = vmatmul.mubr.bf16.gmra.mxu1 %v2271_v18  ;;  %1532 = vmatprep.mubr.bf16.mxu0 %v2278_v19  ;;  %v2317_v18 = vcombine.low %v260_v6, %v264_v7  ;;  %v2319_v19 = vcombine.low %v261_v8, %v265_v9  ;;  %v2327_v27 = vcombine.low %v269_v16, %v273_v17  ;;  %v301_v48 = vld [vmem:[%s3132_s29 + $0x388] sm:$0xff]  ;;  %v198_v6 = vld [vmem:[%s3132_s29 + $0x50] sm:$0xff]  ;;  %v199_v8 = vld [vmem:[%s3132_s29 + $0x58] sm:$0xff] }
  0x48   : > { %1693 = vmatprep.mubr.bf16.mxu1 %v2280_v21  ;;  %2677 = vmatpush3.bf16.msra.mxu0 %v2969_v47  ;;  %v2328_v21 = vcombine.high %v269_v16, %v273_v17  ;;  %v304_v47 = vld [vmem:[%s3132_s29 + $0x3a0] sm:$0xff]  ;;  %v202_v7 = vld [vmem:[%s3132_s29 + $0x70] sm:$0xff]  ;;  %v203_v9 = vld [vmem:[%s3132_s29 + $0x78] sm:$0xff] }
  0x49   : > { %2789 = vmatpush3.bf16.msra.mxu1 %v2971_v49  ;;  %2678 = vmatprep.subr.bf16.mxu0 %v2972_v55  ;;  %v305_v49 = vld [vmem:[%s3132_s29 + $0x3a8] sm:$0xff]  ;;  %v2358_v52 = vcombine.high %v300_v46, %v304_v47  ;;  %v312_v55 = vld [vmem:[%s3132_s29 + $0x3e0] sm:$0xff]  ;;  %v207_v16 = vld [vmem:[%s3132_s29 + $0x98] sm:$0xff] }
  0x4a   : > { %2790 = vmatprep.subr.bf16.mxu1 %v2974_v60  ;;  %v2360_v53 = vcombine.high %v301_v48, %v305_v49  ;;  %v211_v17 = vld [vmem:[%s3132_s29 + $0xb8] sm:$0xff] }
  0x4c   : > { %2679 = vmatpush3.bf16.msra.mxu0 %v2973_v58  ;;  %v2357_v58 = vcombine.low %v300_v46, %v304_v47  ;;  %v238_v46 = vld [vmem:[%s3132_s29 + $0x190] sm:$0xff] }
  0x4d   : > { %2791 = vmatpush3.bf16.msra.mxu1 %v2975_v61  ;;  %v242_v47 = vld [vmem:[%s3132_s29 + $0x1b0] sm:$0xff] }
  0x4e   : > { %1533 = vmatmul.mubr.bf16.gmra.mxu0 %v2277_v30  ;;  %v284_v30 = vld [vmem:[%s3132_s29 + $0x300] sm:$0xff] }
  0x4f   : > { %1694 = vmatmul.mubr.bf16.gmra.mxu1 %v2279_v31  ;;  %1540 = vmatprep.mubr.bf16.mxu0 %v2286_v32  ;;  %v288_v31 = vld [vmem:[%s3132_s29 + $0x320] sm:$0xff]  ;;  %v285_v32 = vld [vmem:[%s3132_s29 + $0x308] sm:$0xff] }
  0x50   : > { %1701 = vmatprep.mubr.bf16.mxu1 %v2288_v33  ;;  %v289_v33 = vld [vmem:[%s3132_s29 + $0x328] sm:$0xff]  ;;  %v2342_v36 = vcombine.high %v284_v30, %v288_v31 }
  0x51   : > { %v2344_v37 = vcombine.high %v285_v32, %v289_v33 }
  0x56   : > { %1541 = vmatmul.mubr.bf16.gmra.mxu0 %v2285_v42  ;;  %v2341_v42 = vcombine.low %v284_v30, %v288_v31  ;;  %v222_v30 = vld [vmem:[%s3132_s29 + $0x110] sm:$0xff] }
  0x57   : > { %1702 = vmatmul.mubr.bf16.gmra.mxu1 %v2287_v43  ;;  %1548 = vmatprep.mubr.bf16.mxu0 %v2294_v44  ;;  %v2343_v43 = vcombine.low %v285_v32, %v289_v33  ;;  %v2350_v44 = vcombine.high %v292_v38, %v296_v39  ;;  %v226_v31 = vld [vmem:[%s3132_s29 + $0x130] sm:$0xff]  ;;  %v223_v32 = vld [vmem:[%s3132_s29 + $0x118] sm:$0xff] }
  0x58   : > { %1709 = vmatprep.mubr.bf16.mxu1 %v2296_v45  ;;  %v2352_v45 = vcombine.high %v293_v40, %v297_v41  ;;  %v227_v33 = vld [vmem:[%s3132_s29 + $0x138] sm:$0xff]  ;;  %v230_v38 = vld [vmem:[%s3132_s29 + $0x150] sm:$0xff] }
  0x59   : > { %v234_v39 = vld [vmem:[%s3132_s29 + $0x170] sm:$0xff]  ;;  %v231_v40 = vld [vmem:[%s3132_s29 + $0x158] sm:$0xff] }
  0x5a   : > { %v235_v41 = vld [vmem:[%s3132_s29 + $0x178] sm:$0xff] }
  0x5e   : > { %1549 = vmatmul.mubr.bf16.gmra.mxu0 %v2293_v54  ;;  %v308_v54 = vld [vmem:[%s3132_s29 + $0x3c0] sm:$0xff] }
  0x5f   : > { %1710 = vmatmul.mubr.bf16.gmra.mxu1 %v2295_v56  ;;  %1556 = vmatprep.mubr.bf16.mxu0 %v2302_v57  ;;  %v309_v56 = vld [vmem:[%s3132_s29 + $0x3c8] sm:$0xff]  ;;  %v2366_v60 = vcombine.high %v308_v54, %v312_v55 }
  0x60   : > { %1717 = vmatprep.mubr.bf16.mxu1 %v2304_v59  ;;  %v313_v57 = vld [vmem:[%s3132_s29 + $0x3e8] sm:$0xff]  ;;  %v2359_v59 = vcombine.low %v301_v48, %v305_v49  ;;  %v239_v48 = vld [vmem:[%s3132_s29 + $0x198] sm:$0xff] }
  0x61   : > { %v2368_v61 = vcombine.high %v309_v56, %v313_v57  ;;  %v243_v49 = vld [vmem:[%s3132_s29 + $0x1b8] sm:$0xff] }
  0x66   : > { %1557 = vmatmul.mubr.bf16.gmra.mxu0 %v2301_v2  ;;  %v2365_v2 = vcombine.low %v308_v54, %v312_v55  ;;  %v246_v54 = vld [vmem:[%s3132_s29 + $0x1d0] sm:$0xff] }
  0x67   : > { %1718 = vmatmul.mubr.bf16.gmra.mxu1 %v2303_v3  ;;  %1564 = vmatprep.mubr.bf16.mxu0 %v2310_v4  ;;  %v2367_v3 = vcombine.low %v309_v56, %v313_v57  ;;  %v2250_v4 = vcombine.high %v190_v62, %v194_v63  ;;  %v250_v55 = vld [vmem:[%s3132_s29 + $0x1f0] sm:$0xff]  ;;  %v247_v56 = vld [vmem:[%s3132_s29 + $0x1d8] sm:$0xff] }
  0x68   : > { %1725 = vmatprep.mubr.bf16.mxu1 %v2312_v5  ;;  %v2252_v5 = vcombine.high %v191_v0, %v195_v1  ;;  %v251_v57 = vld [vmem:[%s3132_s29 + $0x1f8] sm:$0xff] }
  0x6e   : > { %1565 = vmatmul.mubr.bf16.gmra.mxu0 %v2309_v10  ;;  %v2249_v10 = vcombine.low %v190_v62, %v194_v63  ;;  %v254_v62 = vld [vmem:[%s3132_s29 + $0x210] sm:$0xff] }
  0x6f   : > { %1726 = vmatmul.mubr.bf16.gmra.mxu1 %v2311_v11  ;;  %1572 = vmatprep.mubr.bf16.mxu0 %v2318_v12  ;;  %v2251_v11 = vcombine.low %v191_v0, %v195_v1  ;;  %v2258_v12 = vcombine.high %v198_v6, %v202_v7  ;;  %v258_v63 = vld [vmem:[%s3132_s29 + $0x230] sm:$0xff]  ;;  %v255_v0 = vld [vmem:[%s3132_s29 + $0x218] sm:$0xff] }
  0x70   : > { %1733 = vmatprep.mubr.bf16.mxu1 %v2320_v13  ;;  %v2260_v13 = vcombine.high %v199_v8, %v203_v9  ;;  %v259_v1 = vld [vmem:[%s3132_s29 + $0x238] sm:$0xff] }
  0x76   : > { %1573 = vmatmul.mubr.bf16.gmra.mxu0 %v2317_v18  ;;  %v2257_v18 = vcombine.low %v198_v6, %v202_v7  ;;  %v262_v6 = vld [vmem:[%s3132_s29 + $0x250] sm:$0xff] }
  0x77   : > { %1734 = vmatmul.mubr.bf16.gmra.mxu1 %v2319_v19  ;;  %1580 = vmatprep.mubr.bf16.mxu0 %v2326_v20  ;;  %v2259_v19 = vcombine.low %v199_v8, %v203_v9  ;;  %v2266_v20 = vcombine.high %v206_v14, %v210_v15  ;;  %v266_v7 = vld [vmem:[%s3132_s29 + $0x270] sm:$0xff]  ;;  %v263_v8 = vld [vmem:[%s3132_s29 + $0x258] sm:$0xff] }
  0x78   : > { %1741 = vmatprep.mubr.bf16.mxu1 %v2328_v21  ;;  %v2268_v21 = vcombine.high %v207_v16, %v211_v17  ;;  %v267_v9 = vld [vmem:[%s3132_s29 + $0x278] sm:$0xff] }
  0x7e   : > { %1581 = vmatmul.mubr.bf16.gmra.mxu0 %v2325_v26  ;;  %v2265_v26 = vcombine.low %v206_v14, %v210_v15 }
  0x7f   : > { %1742 = vmatmul.mubr.bf16.gmra.mxu1 %v2327_v27  ;;  %1588 = vmatprep.mubr.bf16.mxu0 %v2334_v28  ;;  %v2267_v27 = vcombine.low %v207_v16, %v211_v17  ;;  %v2274_v28 = vcombine.high %v214_v22, %v218_v23  ;;  %v270_v17 = vld [vmem:[%s3132_s29 + $0x290] sm:$0xff] }
  0x80   : > { %1749 = vmatprep.mubr.bf16.mxu1 %v2336_v29  ;;  %v2276_v29 = vcombine.high %v215_v24, %v219_v25 }
  0x86   : > { %1589 = vmatmul.mubr.bf16.gmra.mxu0 %v2333_v34  ;;  %v2273_v34 = vcombine.low %v214_v22, %v218_v23  ;;  %v275_v22 = vld [vmem:[%s3132_s29 + $0x2b8] sm:$0xff] }
  0x87   : > { %1750 = vmatmul.mubr.bf16.gmra.mxu1 %v2335_v35  ;;  %1596 = vmatprep.mubr.bf16.mxu0 %v2342_v36  ;;  %v2275_v35 = vcombine.low %v215_v24, %v219_v25  ;;  %v2282_v36 = vcombine.high %v222_v30, %v226_v31  ;;  %v2321_v25 = vcombine.low %v262_v6, %v266_v7 }
  0x88   : > { %1757 = vmatprep.mubr.bf16.mxu1 %v2344_v37  ;;  %v2284_v37 = vcombine.high %v223_v32, %v227_v33 }
  0x8e   : > { %1597 = vmatmul.mubr.bf16.gmra.mxu0 %v2341_v42  ;;  %v2281_v42 = vcombine.low %v222_v30, %v226_v31 }
  0x8f   : > { %1758 = vmatmul.mubr.bf16.gmra.mxu1 %v2343_v43  ;;  %1604 = vmatprep.mubr.bf16.mxu0 %v2350_v44  ;;  %v2283_v43 = vcombine.low %v223_v32, %v227_v33  ;;  %v2290_v44 = vcombine.high %v230_v38, %v234_v39 }
  0x90   : > { %1765 = vmatprep.mubr.bf16.mxu1 %v2352_v45  ;;  %v2292_v45 = vcombine.high %v231_v40, %v235_v41 }
  0x96   : > { %1605 = vmatmul.mubr.bf16.gmra.mxu0 %v2349_v50  ;;  %v2289_v50 = vcombine.low %v230_v38, %v234_v39  ;;  %v278_v39 = vld [vmem:[%s3132_s29 + $0x2d0] sm:$0xff] }
  0x97   : > { %1766 = vmatmul.mubr.bf16.gmra.mxu1 %v2351_v51  ;;  %1612 = vmatprep.mubr.bf16.mxu0 %v2358_v52  ;;  %v2291_v51 = vcombine.low %v231_v40, %v235_v41  ;;  %v2298_v52 = vcombine.high %v238_v46, %v242_v47  ;;  %v282_v40 = vld [vmem:[%s3132_s29 + $0x2f0] sm:$0xff] }
  0x98   : > { %1773 = vmatprep.mubr.bf16.mxu1 %v2360_v53  ;;  %v2300_v53 = vcombine.high %v239_v48, %v243_v49 }
  0x9e   : > { %1613 = vmatmul.mubr.bf16.gmra.mxu0 %v2357_v58  ;;  %v2297_v58 = vcombine.low %v238_v46, %v242_v47 }
  0x9f   : > { %1774 = vmatmul.mubr.bf16.gmra.mxu1 %v2359_v59  ;;  %1620 = vmatprep.mubr.bf16.mxu0 %v2366_v60  ;;  %v2299_v59 = vcombine.low %v239_v48, %v243_v49  ;;  %v2306_v60 = vcombine.high %v246_v54, %v250_v55 }
  0xa0   : > { %1781 = vmatprep.mubr.bf16.mxu1 %v2368_v61  ;;  %v2308_v61 = vcombine.high %v247_v56, %v251_v57 }
  0xa6   : > { %1621 = vmatmul.mubr.bf16.gmra.mxu0 %v2365_v2  ;;  %v2305_v2 = vcombine.low %v246_v54, %v250_v55 }
  0xa7   : > { %1782 = vmatmul.mubr.bf16.gmra.mxu1 %v2367_v3  ;;  %1822 = vmatprep.mubr.bf16.mxu0 %v2250_v4  ;;  %v2307_v3 = vcombine.low %v247_v56, %v251_v57  ;;  %v2314_v4 = vcombine.high %v254_v62, %v258_v63 }
  0xa8   : > { %1983 = vmatprep.mubr.bf16.mxu1 %v2252_v5  ;;  %v2316_v5 = vcombine.high %v255_v0, %v259_v1 }
  0xae   : > { %1823 = vmatmul.mubr.bf16.vlgmr.msra.gmra.mxu0 %v2249_v10  ;;  %v2313_v10 = vcombine.low %v254_v62, %v258_v63  ;;  %v290_v62 = vld [vmem:[%s3132_s29 + $0x330] sm:$0xff] }
  0xaf   : > { %1984 = vmatmul.mubr.bf16.vlgmr.msra.gmra.mxu1 %v2251_v11  ;;  %1830 = vmatprep.mubr.bf16.mxu0 %v2258_v12  ;;  %v2315_v11 = vcombine.low %v255_v0, %v259_v1  ;;  %v2322_v12 = vcombine.high %v262_v6, %v266_v7  ;;  %v287_v1 = vld [vmem:[%s3132_s29 + $0x318] sm:$0xff] }
  0xb0   : > { %1991 = vmatprep.mubr.bf16.mxu1 %v2260_v13  ;;  %v2324_v13 = vcombine.high %v263_v8, %v267_v9 }
  0xb6   : > { %1831 = vmatmul.mubr.bf16.gmra.mxu0 %v2257_v18  ;;  %v274_v18 = vld [vmem:[%s3132_s29 + $0x2b0] sm:$0xff] }
  0xb7   : > { %1992 = vmatmul.mubr.bf16.gmra.mxu1 %v2259_v19  ;;  %1838 = vmatprep.mubr.bf16.mxu0 %v2266_v20  ;;  %v2329_v47 = vcombine.low %v270_v17, %v274_v18 }
  0xb8   : > { %1999 = vmatprep.mubr.bf16.mxu1 %v2268_v21  ;;  %v271_v21 = vld [vmem:[%s3132_s29 + $0x298] sm:$0xff] }
  0xb9   : > { %v2332_v31 = vcombine.high %v271_v21, %v275_v22  ;;  %v2331_v49 = vcombine.low %v271_v21, %v275_v22 }
  0xbe   : > { %1839 = vmatmul.mubr.bf16.gmra.mxu0 %v2265_v26 }
  0xbf   : > { %2000 = vmatmul.mubr.bf16.gmra.mxu1 %v2267_v27  ;;  %1846 = vmatprep.mubr.bf16.mxu0 %v2274_v28  ;;  %v2323_v27 = vcombine.low %v263_v8, %v267_v9  ;;  %v2330_v28 = vcombine.high %v270_v17, %v274_v18 }
  0xc0   : > { %2007 = vmatprep.mubr.bf16.mxu1 %v2276_v29 }
  0xc6   : > { %1847 = vmatmul.mubr.bf16.gmra.mxu0 %v2273_v34 }
  0xc7   : > { %2008 = vmatmul.mubr.bf16.gmra.mxu1 %v2275_v35  ;;  %1854 = vmatprep.mubr.bf16.mxu0 %v2282_v36 }
  0xc8   : > { %2015 = vmatprep.mubr.bf16.mxu1 %v2284_v37 }
  0xce   : > { %1855 = vmatmul.mubr.bf16.gmra.mxu0 %v2281_v42 }
  0xcf   : > { %2016 = vmatmul.mubr.bf16.gmra.mxu1 %v2283_v43  ;;  %1862 = vmatprep.mubr.bf16.mxu0 %v2290_v44  ;;  %v279_v43 = vld [vmem:[%s3132_s29 + $0x2d8] sm:$0xff] }
  0xd0   : > { %2023 = vmatprep.mubr.bf16.mxu1 %v2292_v45  ;;  %v283_v44 = vld [vmem:[%s3132_s29 + $0x2f8] sm:$0xff] }
  0xd1   : > { %v2339_v7 = vcombine.low %v279_v43, %v283_v44 }
  0xd6   : > { %1863 = vmatmul.mubr.bf16.gmra.mxu0 %v2289_v50  ;;  %v2338_v50 = vcombine.high %v278_v39, %v282_v40 }
  0xd7   : > { %2024 = vmatmul.mubr.bf16.gmra.mxu1 %v2291_v51  ;;  %1870 = vmatprep.mubr.bf16.mxu0 %v2298_v52 }
  0xd8   : > { %2031 = vmatprep.mubr.bf16.mxu1 %v2300_v53  ;;  %v2340_v53 = vcombine.high %v279_v43, %v283_v44  ;;  %v302_v43 = vld [vmem:[%s3132_s29 + $0x390] sm:$0xff] }
  0xd9   : > { %v306_v44 = vld [vmem:[%s3132_s29 + $0x3b0] sm:$0xff] }
  0xde   : > { %1871 = vmatmul.mubr.bf16.gmra.mxu0 %v2297_v58 }
  0xdf   : > { %2032 = vmatmul.mubr.bf16.gmra.mxu1 %v2299_v59  ;;  %1878 = vmatprep.mubr.bf16.mxu0 %v2306_v60 }
  0xe0   : > { %2039 = vmatprep.mubr.bf16.mxu1 %v2308_v61  ;;  %v286_v61 = vld [vmem:[%s3132_s29 + $0x310] sm:$0xff] }
  0xe1   : > { %v2346_v8 = vcombine.high %v286_v61, %v290_v62 }
  0xe6   : > { %1879 = vmatmul.mubr.bf16.gmra.mxu0 %v2305_v2  ;;  %v291_v2 = vld [vmem:[%s3132_s29 + $0x338] sm:$0xff] }
  0xe7   : > { %2040 = vmatmul.mubr.bf16.gmra.mxu1 %v2307_v3  ;;  %1886 = vmatprep.mubr.bf16.mxu0 %v2314_v4 }
  0xe8   : > { %2047 = vmatprep.mubr.bf16.mxu1 %v2316_v5  ;;  %v2337_v5 = vcombine.low %v278_v39, %v282_v40 }
  0xee   : > { %v2456_v14 = vpop.f32.mrf.mxu0  ;;  %1887 = vmatmul.mubr.bf16.gmra.mxu0 %v2313_v10 }
  0xef   : > { %v2568_v15 = vpop.f32.mrf.mxu1  ;;  %2048 = vmatmul.mubr.bf16.gmra.mxu1 %v2315_v11  ;;  %1894 = vmatprep.mubr.bf16.mxu0 %v2322_v12  ;;  %v2348_v11 = vcombine.high %v287_v1, %v291_v2 }
  0xf0   : > { %v2457_v16 = vpop.f32.mrf.mxu0  ;;  %2055 = vmatprep.mubr.bf16.mxu1 %v2324_v13 }
  0xf1   : > { %v2458_v19 = vadd.f32 %v2457_v16, %v2456_v14  ;;  %v2569_v20 = vpop.f32.mrf.mxu1 }
  0xf2   : > { %v2570_v23 = vadd.f32 %v2569_v20, %v2568_v15  ;;  %v2459_v24 = vpop.f32.mrf.mxu0  ;;  %v298_v20 = vld [vmem:[%s3132_s29 + $0x370] sm:$0xff] }
  0xf3   : > { %v2571_v26 = vpop.f32.mrf.mxu1 }
  0xf4   : > { %v3344_v29 = vadd.f32 %v2570_v23, %v2458_v19  ;;  %v2460_v30 = vpop.f32.mrf.mxu0  ;;  %v294_v19 = vld [vmem:[%s3132_s29 + $0x350] sm:$0xff]  ;;  %v295_v23 = vld [vmem:[%s3132_s29 + $0x358] sm:$0xff] }
  0xf5   : > { %v2461_v32 = vadd.f32 %v2460_v30, %v2459_v24  ;;  %v2572_v33 = vpop.f32.mrf.mxu1  ;;  %v299_v24 = vld [vmem:[%s3132_s29 + $0x378] sm:$0xff]  ;;  %v2347_v30 = vcombine.low %v287_v1, %v291_v2 }
  0xf6   : > { %v2573_v34 = vadd.f32 %v2572_v33, %v2571_v26  ;;  %v2462_v35 = vpop.f32.mrf.mxu0  ;;  %1895 = vmatmul.mubr.bf16.gmra.mxu0 %v2321_v25 }
  0xf7   : > { %v2574_v36 = vpop.f32.mrf.mxu1  ;;  %2056 = vmatmul.mubr.bf16.gmra.mxu1 %v2323_v27  ;;  %1902 = vmatprep.mubr.bf16.mxu0 %v2330_v28  ;;  %v2345_v27 = vcombine.low %v286_v61, %v290_v62 }
  0xf8   : > { %v3346_v37 = vadd.f32 %v2573_v34, %v2461_v32  ;;  %v2463_v38 = vpop.f32.mrf.mxu0  ;;  %2063 = vmatprep.mubr.bf16.mxu1 %v2332_v31  ;;  %v2354_v31 = vcombine.high %v294_v19, %v298_v20  ;;  %v2356_v34 = vcombine.high %v295_v23, %v299_v24 }
  0xf9   : > { %v2464_v41 = vadd.f32 %v2463_v38, %v2462_v35  ;;  %v2575_v42 = vpop.f32.mrf.mxu1 }
  0xfa   : > { %v2576_v45 = vadd.f32 %v2575_v42, %v2574_v36  ;;  %v2465_v46 = vpop.f32.mrf.mxu0 }
  0xfb   : > { %v2577_v48 = vpop.f32.mrf.mxu1 }
  0xfc   : > { %v3352_v51 = vadd.f32 %v2576_v45, %v2464_v41  ;;  %v2466_v52 = vpop.f32.mrf.mxu0 }
  0xfd   : > { %v2467_v54 = vadd.f32 %v2466_v52, %v2465_v46  ;;  %v2578_v55 = vpop.f32.mrf.mxu1  ;;  %v2353_v52 = vcombine.low %v294_v19, %v298_v20 }
  0xfe   : > { %v2579_v56 = vadd.f32 %v2578_v55, %v2577_v48  ;;  %v2468_v57 = vpop.f32.mrf.mxu0  ;;  %1903 = vmatmul.mubr.bf16.gmra.mxu0 %v2329_v47  ;;  %v303_v47 = vld [vmem:[%s3132_s29 + $0x398] sm:$0xff]  ;;  %v2362_v55 = vcombine.high %v302_v43, %v306_v44 }
  0xff   : > { %v2580_v58 = vpop.f32.mrf.mxu1  ;;  %2064 = vmatmul.mubr.bf16.gmra.mxu1 %v2331_v49  ;;  %1910 = vmatprep.mubr.bf16.mxu0 %v2338_v50  ;;  %v307_v48 = vld [vmem:[%s3132_s29 + $0x3b8] sm:$0xff] }
 0x100   : > { %v3354_v59 = vadd.f32 %v2579_v56, %v2467_v54  ;;  %v2469_v60 = vpop.f32.mrf.mxu0  ;;  %2071 = vmatprep.mubr.bf16.mxu1 %v2340_v53  ;;  %v2355_v54 = vcombine.low %v295_v23, %v299_v24 }
 0x101   : > { %v2470_v63 = vadd.f32 %v2469_v60, %v2468_v57  ;;  %v2581_v0 = vpop.f32.mrf.mxu1 }
 0x102   : > { %v2582_v3 = vadd.f32 %v2581_v0, %v2580_v58  ;;  %v2471_v4 = vpop.f32.mrf.mxu0  ;;  %v2364_v58 = vcombine.high %v303_v47, %v307_v48 }
 0x103   : > { %v2583_v6 = vpop.f32.mrf.mxu1 }
 0x104   : > { %v3360_v9 = vadd.f32 %v2582_v3, %v2470_v63  ;;  %v2472_v10 = vpop.f32.mrf.mxu0  ;;  %v310_v3 = vld [vmem:[%s3132_s29 + $0x3d0] sm:$0xff] }
 0x105   : > { %v2473_v12 = vadd.f32 %v2472_v10, %v2471_v4  ;;  %v2584_v13 = vpop.f32.mrf.mxu1  ;;  %v314_v4 = vld [vmem:[%s3132_s29 + $0x3f0] sm:$0xff] }
 0x106   : > { %v2585_v14 = vadd.f32 %v2584_v13, %v2583_v6  ;;  %v2474_v15 = vpop.f32.mrf.mxu0  ;;  %1911 = vmatmul.mubr.bf16.gmra.mxu0 %v2337_v5 }
 0x107   : > { %v2586_v16 = vpop.f32.mrf.mxu1  ;;  %2072 = vmatmul.mubr.bf16.gmra.mxu1 %v2339_v7  ;;  %1918 = vmatprep.mubr.bf16.mxu0 %v2346_v8  ;;  %v311_v7 = vld [vmem:[%s3132_s29 + $0x3d8] sm:$0xff] }
 0x108   : > { %v3362_v17 = vadd.f32 %v2585_v14, %v2473_v12  ;;  %v2475_v18 = vpop.f32.mrf.mxu0  ;;  %2079 = vmatprep.mubr.bf16.mxu1 %v2348_v11  ;;  %v315_v8 = vld [vmem:[%s3132_s29 + $0x3f8] sm:$0xff]  ;;  %v2361_v12 = vcombine.low %v302_v43, %v306_v44  ;;  %v2363_v14 = vcombine.low %v303_v47, %v307_v48  ;;  %s2244_s29 = sshll.u32 %s3515_s21, 3 }
 0x109   : > { %v2476_v21 = vadd.f32 %v2475_v18, %v2474_v15  ;;  %v2587_v22 = vpop.f32.mrf.mxu1  ;;  %v2370_v15 = vcombine.high %v310_v3, %v314_v4  ;;  %v2372_v19 = vcombine.high %v311_v7, %v315_v8  ;;  %s3433_s30 = scalar_lea.vmem %s3509_s2, %s2244_s29 }
 0x10a   : > { %v2588_v25 = vadd.f32 %v2587_v22, %v2586_v16  ;;  %v2477_v26 = vpop.f32.mrf.mxu0 }
 0x10b   : > { %v2589_v28 = vpop.f32.mrf.mxu1 }
 0x10c   : > { %v3368_v32 = vadd.f32 %v2588_v25, %v2476_v21  ;;  %v2478_v33 = vpop.f32.mrf.mxu0 }
 0x10d   : > { %v2479_v35 = vadd.f32 %v2478_v33, %v2477_v26  ;;  %v2590_v36 = vpop.f32.mrf.mxu1  ;;  %v2369_v33 = vcombine.low %v310_v3, %v314_v4 }
 0x10e   : > { %v2591_v38 = vadd.f32 %v2590_v36, %v2589_v28  ;;  %v2480_v39 = vpop.f32.mrf.mxu0  ;;  %1919 = vmatmul.mubr.bf16.gmra.mxu0 %v2345_v27 }
 0x10f   : > { %v2592_v40 = vpop.f32.mrf.mxu1  ;;  %2080 = vmatmul.mubr.bf16.gmra.mxu1 %v2347_v30  ;;  %1926 = vmatprep.mubr.bf16.mxu0 %v2354_v31 }
 0x110   : > { %v3370_v41 = vadd.f32 %v2591_v38, %v2479_v35  ;;  %v2481_v42 = vpop.f32.mrf.mxu0  ;;  %2087 = vmatprep.mubr.bf16.mxu1 %v2356_v34  ;;  %v2371_v35 = vcombine.low %v311_v7, %v315_v8 }
 0x111   : > { %v2482_v45 = vadd.f32 %v2481_v42, %v2480_v39  ;;  %v2593_v46 = vpop.f32.mrf.mxu1 }
 0x112   : > { %v2594_v49 = vadd.f32 %v2593_v46, %v2592_v40  ;;  %v2483_v50 = vpop.f32.mrf.mxu0 }
 0x113   : > { %v2595_v53 = vpop.f32.mrf.mxu1 }
 0x114   : > { %v3376_v56 = vadd.f32 %v2594_v49, %v2482_v45  ;;  %v2484_v57 = vpop.f32.mrf.mxu0 }
 0x115   : > { %v2485_v60 = vadd.f32 %v2484_v57, %v2483_v50  ;;  %v2596_v61 = vpop.f32.mrf.mxu1 }
 0x116   : > { %v2597_v62 = vadd.f32 %v2596_v61, %v2595_v53  ;;  %v2486_v63 = vpop.f32.mrf.mxu0  ;;  %1927 = vmatmul.mubr.bf16.gmra.mxu0 %v2353_v52 }
 0x117   : > { %v2598_v0 = vpop.f32.mrf.mxu1  ;;  %2088 = vmatmul.mubr.bf16.gmra.mxu1 %v2355_v54  ;;  %1934 = vmatprep.mubr.bf16.mxu0 %v2362_v55 }
 0x118   : > { %v3378_v1 = vadd.f32 %v2597_v62, %v2485_v60  ;;  %v2487_v2 = vpop.f32.mrf.mxu0  ;;  %2095 = vmatprep.mubr.bf16.mxu1 %v2364_v58 }
 0x119   : > { %v2488_v5 = vadd.f32 %v2487_v2, %v2486_v63  ;;  %v2599_v6 = vpop.f32.mrf.mxu1 }
 0x11a   : > { %v2600_v10 = vadd.f32 %v2599_v6, %v2598_v0  ;;  %v2489_v11 = vpop.f32.mrf.mxu0 }
 0x11b   : > { %v2601_v13 = vpop.f32.mrf.mxu1 }
 0x11c   : > { %v3384_v16 = vadd.f32 %v2600_v10, %v2488_v5  ;;  %v2490_v18 = vpop.f32.mrf.mxu0 }
 0x11d   : > { %v2491_v20 = vadd.f32 %v2490_v18, %v2489_v11  ;;  %v2602_v21 = vpop.f32.mrf.mxu1 }
 0x11e   : > { %v2603_v22 = vadd.f32 %v2602_v21, %v2601_v13  ;;  %v2492_v23 = vpop.f32.mrf.mxu0  ;;  %1935 = vmatmul.mubr.bf16.gmra.mxu0 %v2361_v12 }
 0x11f   : > { %v2604_v24 = vpop.f32.mrf.mxu1  ;;  %2096 = vmatmul.mubr.bf16.gmra.mxu1 %v2363_v14  ;;  %1942 = vmatprep.mubr.bf16.mxu0 %v2370_v15 }
 0x120   : > { %v3386_v25 = vadd.f32 %v2603_v22, %v2491_v20  ;;  %v2493_v26 = vpop.f32.mrf.mxu0  ;;  %2103 = vmatprep.mubr.bf16.mxu1 %v2372_v19 }
 0x121   : > { %v2494_v27 = vadd.f32 %v2493_v26, %v2492_v23  ;;  %v2605_v28 = vpop.f32.mrf.mxu1 }
 0x122   : > { %v2606_v30 = vadd.f32 %v2605_v28, %v2604_v24  ;;  %v2495_v31 = vpop.f32.mrf.mxu0 }
 0x123   : > { %v2607_v34 = vpop.f32.mrf.mxu1 }
 0x124   : > { %v3388_v36 = vadd.f32 %v2606_v30, %v2494_v27  ;;  %v2496_v38 = vpop.f32.mrf.mxu0 }
 0x125   : > { %v2497_v39 = vadd.f32 %v2496_v38, %v2495_v31  ;;  %v2608_v40 = vpop.f32.mrf.mxu1 }
 0x126   : > { %v2609_v42 = vadd.f32 %v2608_v40, %v2607_v34  ;;  %v2498_v43 = vpop.f32.mrf.mxu0  ;;  %1943 = vmatmul.mubr.bf16.gmra.mxu0 %v2369_v33 }
 0x127   : > { %v2610_v44 = vpop.f32.mrf.mxu1  ;;  %2104 = vmatmul.mubr.bf16.gmra.mxu1 %v2371_v35 }
 0x128   : > { %v3390_v45 = vadd.f32 %v2609_v42, %v2497_v39  ;;  %v2499_v46 = vpop.f32.mrf.mxu0 }
 0x129   : > { %v2500_v47 = vadd.f32 %v2499_v46, %v2498_v43  ;;  %v2611_v48 = vpop.f32.mrf.mxu1 }
 0x12a   : > { %v2612_v49 = vadd.f32 %v2611_v48, %v2610_v44  ;;  %v2501_v50 = vpop.f32.mrf.mxu0 }
 0x12b   : > { %v2613_v52 = vpop.f32.mrf.mxu1 }
 0x12c   : > { %v3392_v53 = vadd.f32 %v2612_v49, %v2500_v47  ;;  %v2502_v54 = vpop.f32.mrf.mxu0 }
 0x12d   : > { %v2503_v55 = vadd.f32 %v2502_v54, %v2501_v50  ;;  %v2614_v57 = vpop.f32.mrf.mxu1 }
 0x12e   : > { %v2615_v58 = vadd.f32 %v2614_v57, %v2613_v52  ;;  %v2504_v60 = vpop.f32.mrf.mxu0 }
 0x12f   : > { %v2616_v61 = vpop.f32.mrf.mxu1 }
 0x130   : > { %v3394_v62 = vadd.f32 %v2615_v58, %v2503_v55  ;;  %v2505_v63 = vpop.f32.mrf.mxu0 }
 0x131   : > { %v2506_v0 = vadd.f32 %v2505_v63, %v2504_v60  ;;  %v2617_v2 = vpop.f32.mrf.mxu1 }
 0x132   : > { %v2618_v3 = vadd.f32 %v2617_v2, %v2616_v61  ;;  %v2507_v4 = vpop.f32.mrf.mxu0 }
 0x133   : > { %v2619_v5 = vpop.f32.mrf.mxu1 }
 0x134   : > { %v3396_v6 = vadd.f32 %v2618_v3, %v2506_v0  ;;  %v2508_v7 = vpop.f32.mrf.mxu0 }
 0x135   : > { %v2509_v8 = vadd.f32 %v2508_v7, %v2507_v4  ;;  %v2620_v10 = vpop.f32.mrf.mxu1 }
 0x136   : > { %v2621_v11 = vadd.f32 %v2620_v10, %v2619_v5  ;;  %v2510_v12 = vpop.f32.mrf.mxu0 }
 0x137   : > { %v2622_v13 = vpop.f32.mrf.mxu1 }
 0x138   : > { %v3398_v14 = vadd.f32 %v2621_v11, %v2509_v8  ;;  %v2511_v15 = vpop.f32.mrf.mxu0 }
 0x139   : > { %v2512_v18 = vadd.f32 %v2511_v15, %v2510_v12  ;;  %v2623_v19 = vpop.f32.mrf.mxu1 }
 0x13a   : > { %v2624_v20 = vadd.f32 %v2623_v19, %v2622_v13  ;;  %v2513_v21 = vpop.f32.mrf.mxu0 }
 0x13b   : > { %v2625_v22 = vpop.f32.mrf.mxu1 }
 0x13c   : > { %v3400_v23 = vadd.f32 %v2624_v20, %v2512_v18  ;;  %v2514_v24 = vpop.f32.mrf.mxu0 }
 0x13d   : > { %v2515_v26 = vadd.f32 %v2514_v24, %v2513_v21  ;;  %v2626_v27 = vpop.f32.mrf.mxu1 }
 0x13e   : > { %v2627_v28 = vadd.f32 %v2626_v27, %v2625_v22  ;;  %v2516_v30 = vpop.f32.mrf.mxu0 }
 0x13f   : > { %v2628_v31 = vpop.f32.mrf.mxu1 }
 0x140   : > { %v3402_v33 = vadd.f32 %v2627_v28, %v2515_v26  ;;  %v2517_v34 = vpop.f32.mrf.mxu0 }
 0x141   : > { %v2518_v35 = vadd.f32 %v2517_v34, %v2516_v30  ;;  %v2629_v38 = vpop.f32.mrf.mxu1 }
 0x142   : > { %v2630_v39 = vadd.f32 %v2629_v38, %v2628_v31  ;;  %v2519_v40 = vpop.f32.mrf.mxu0 }
 0x143   : > { %v2631_v42 = vpop.f32.mrf.mxu1 }
 0x144   : > { %v3404_v43 = vadd.f32 %v2630_v39, %v2518_v35  ;;  %v2520_v44 = vpop.f32.mrf.mxu0 }
 0x145   : > { %v2521_v46 = vadd.f32 %v2520_v44, %v2519_v40  ;;  %v2632_v47 = vpop.f32.mrf.mxu1 }
 0x146   : > { %v2633_v48 = vadd.f32 %v2632_v47, %v2631_v42  ;;  %v2522_v49 = vpop.f32.mrf.mxu0 }
 0x147   : > { %v2634_v50 = vpop.f32.mrf.mxu1 }
 0x148   : > { %v3406_v52 = vadd.f32 %v2633_v48, %v2521_v46  ;;  %v2523_v54 = vpop.f32.mrf.mxu0 }
 0x149   : > { %v2524_v55 = vadd.f32 %v2523_v54, %v2522_v49  ;;  %v2635_v57 = vpop.f32.mrf.mxu1 }
 0x14a   : > { %v2636_v58 = vadd.f32 %v2635_v57, %v2634_v50  ;;  %v2525_v60 = vpop.f32.mrf.mxu0 }
 0x14b   : > { %v2637_v61 = vpop.f32.mrf.mxu1 }
 0x14c   : > { %v3408_v63 = vadd.f32 %v2636_v58, %v2524_v55  ;;  %v2526_v0 = vpop.f32.mrf.mxu0 }
 0x14d   : > { %v2527_v2 = vadd.f32 %v2526_v0, %v2525_v60  ;;  %v2638_v3 = vpop.f32.mrf.mxu1 }
 0x14e   : > { %v2639_v4 = vadd.f32 %v2638_v3, %v2637_v61  ;;  %v2528_v5 = vpop.f32.mrf.mxu0 }
 0x14f   : > { %v2640_v7 = vpop.f32.mrf.mxu1 }
 0x150   : > { %v3410_v8 = vadd.f32 %v2639_v4, %v2527_v2  ;;  %v2529_v10 = vpop.f32.mrf.mxu0 }
 0x151   : > { %v2530_v11 = vadd.f32 %v2529_v10, %v2528_v5  ;;  %v2641_v12 = vpop.f32.mrf.mxu1 }
 0x152   : > { %v2642_v13 = vadd.f32 %v2641_v12, %v2640_v7  ;;  %v2531_v15 = vpop.f32.mrf.mxu0 }
 0x153   : > { %v2643_v18 = vpop.f32.mrf.mxu1 }
 0x154   : > { %v3412_v19 = vadd.f32 %v2642_v13, %v2530_v11  ;;  %v2532_v20 = vpop.f32.mrf.mxu0 }
 0x155   : > { %v2533_v21 = vadd.f32 %v2532_v20, %v2531_v15  ;;  %v2644_v22 = vpop.f32.mrf.mxu1 }
 0x156   : > { %v2645_v24 = vadd.f32 %v2644_v22, %v2643_v18  ;;  %v2534_v26 = vpop.f32.mrf.mxu0 }
 0x157   : > { %v2646_v27 = vpop.f32.mrf.mxu1 }
 0x158   : > { %v3414_v28 = vadd.f32 %v2645_v24, %v2533_v21  ;;  %v2535_v30 = vpop.f32.mrf.mxu0 }
 0x159   : > { %v2536_v31 = vadd.f32 %v2535_v30, %v2534_v26  ;;  %v2647_v34 = vpop.f32.mrf.mxu1 }
 0x15a   : > { %v2648_v35 = vadd.f32 %v2647_v34, %v2646_v27  ;;  %v2537_v38 = vpop.f32.mrf.mxu0 }
 0x15b   : > { %v2649_v39 = vpop.f32.mrf.mxu1 }
 0x15c   : > { %v3416_v40 = vadd.f32 %v2648_v35, %v2536_v31  ;;  %v2538_v42 = vpop.f32.mrf.mxu0 }
 0x15d   : > { %v2539_v44 = vadd.f32 %v2538_v42, %v2537_v38  ;;  %v2650_v46 = vpop.f32.mrf.mxu1 }
 0x15e   : > { %v2651_v47 = vadd.f32 %v2650_v46, %v2649_v39  ;;  %v2540_v48 = vpop.f32.mrf.mxu0 }
 0x15f   : > { %v2652_v49 = vpop.f32.mrf.mxu1 }
 0x160   : > { %v3418_v50 = vadd.f32 %v2651_v47, %v2539_v44  ;;  %v2541_v54 = vpop.f32.mrf.mxu0 }
 0x161   : > { %v2542_v55 = vadd.f32 %v2541_v54, %v2540_v48  ;;  %v2653_v57 = vpop.f32.mrf.mxu1 }
 0x162   : > { %v2654_v58 = vadd.f32 %v2653_v57, %v2652_v49  ;;  %v2543_v60 = vpop.f32.mrf.mxu0 }
 0x163   : > { %v2655_v61 = vpop.f32.mrf.mxu1 }
 0x164   : > { %v3420_v0 = vadd.f32 %v2654_v58, %v2542_v55  ;;  %v2544_v2 = vpop.f32.mrf.mxu0 }
 0x165   : > { %v2545_v3 = vadd.f32 %v2544_v2, %v2543_v60  ;;  %v2656_v4 = vpop.f32.mrf.mxu1 }
 0x166   : > { %v2657_v5 = vadd.f32 %v2656_v4, %v2655_v61  ;;  %v2546_v7 = vpop.f32.mrf.mxu0 }
 0x167   : > { %v2658_v10 = vpop.f32.mrf.mxu1 }
 0x168   : > { %v3422_v11 = vadd.f32 %v2657_v5, %v2545_v3  ;;  %v2547_v12 = vpop.f32.mrf.mxu0 }
 0x169   : > { %v2548_v13 = vadd.f32 %v2547_v12, %v2546_v7  ;;  %v2659_v15 = vpop.f32.mrf.mxu1 }
 0x16a   : > { %v2660_v18 = vadd.f32 %v2659_v15, %v2658_v10  ;;  %v2549_v20 = vpop.f32.mrf.mxu0 }
 0x16b   : > { %v2661_v21 = vpop.f32.mrf.mxu1 }
 0x16c   : > { %v3424_v22 = vadd.f32 %v2660_v18, %v2548_v13  ;;  %v2550_v24 = vpop.f32.mrf.mxu0 }
 0x16d   : > { %v2551_v26 = vadd.f32 %v2550_v24, %v2549_v20  ;;  %v2662_v27 = vpop.f32.mrf.mxu1 }
 0x16e   : > { %v2663_v30 = vadd.f32 %v2662_v27, %v2661_v21  ;;  %v2680_v31 = vpop.f32.mrf.mxu0 }
 0x16f   : > { %v2792_v34 = vpop.f32.mrf.mxu1 }
 0x170   : > { %v3426_v35 = vadd.f32 %v2663_v30, %v2551_v26  ;;  %v2681_v38 = vpop.f32.mrf.mxu0 }
 0x171   : > { %v2682_v39 = vadd.f32 %v2681_v38, %v2680_v31  ;;  %v2793_v42 = vpop.f32.mrf.mxu1 }
 0x172   : > { %v2683_v44 = vpop.f32.mrf.mxu0  ;;  %v2794_v47 = vadd.f32 %v2793_v42, %v2792_v34 }
 0x173   : > { %v1825_v46 = vadd.f32 %v2682_v39, %v3344_v29  ;;  %v2795_v48 = vpop.f32.mrf.mxu1 }
 0x174   : > { %v2684_v49 = vpop.f32.mrf.mxu0 }
 0x175   : > { %v1986_v54 = vadd.f32 %v2794_v47, %v1825_v46  ;;  %v2685_v55 = vadd.f32 %v2684_v49, %v2683_v44  ;;  %v2796_v57 = vpop.f32.mrf.mxu1 }
 0x176   : > { %v2686_v58 = vpop.f32.mrf.mxu0  ;;  %v2797_v61 = vadd.f32 %v2796_v57, %v2795_v48 }
 0x177   : > { %2112 = vst [vmem:[%s3433_s30] sm:$0xff] %v1986_v54  ;;  %v1828_v60 = vadd.f32 %v2685_v55, %v3346_v37  ;;  %v2798_v29 = vpop.f32.mrf.mxu1 }
 0x178   : > { %v2687_v2 = vpop.f32.mrf.mxu0 }
 0x179   : > { %v1989_v3 = vadd.f32 %v2797_v61, %v1828_v60  ;;  %v2688_v4 = vadd.f32 %v2687_v2, %v2686_v58  ;;  %v2799_v5 = vpop.f32.mrf.mxu1 }
 0x17a   : > { %v2689_v7 = vpop.f32.mrf.mxu0  ;;  %v2800_v12 = vadd.f32 %v2799_v5, %v2798_v29 }
 0x17b   : > { %2113 = vst [vmem:[%s3433_s30 + $0x8] sm:$0xff] %v1989_v3  ;;  %v1833_v10 = vadd.f32 %v2688_v4, %v3352_v51  ;;  %v2801_v13 = vpop.f32.mrf.mxu1 }
 0x17c   : > { %v2690_v15 = vpop.f32.mrf.mxu0 }
 0x17d   : > { %v1994_v18 = vadd.f32 %v2800_v12, %v1833_v10  ;;  %v2691_v20 = vadd.f32 %v2690_v15, %v2689_v7  ;;  %v2802_v21 = vpop.f32.mrf.mxu1 }
 0x17e   : > { %v2692_v24 = vpop.f32.mrf.mxu0  ;;  %v2803_v26 = vadd.f32 %v2802_v21, %v2801_v13 }
 0x17f   : > { %2114 = vst [vmem:[%s3433_s30 + $0x10] sm:$0xff] %v1994_v18  ;;  %v1836_v37 = vadd.f32 %v2691_v20, %v3354_v59  ;;  %v2804_v27 = vpop.f32.mrf.mxu1 }
 0x180   : > { %v2693_v30 = vpop.f32.mrf.mxu0 }
 0x181   : > { %v1997_v31 = vadd.f32 %v2803_v26, %v1836_v37  ;;  %v2694_v34 = vadd.f32 %v2693_v30, %v2692_v24  ;;  %v2805_v38 = vpop.f32.mrf.mxu1 }
 0x182   : > { %v2695_v39 = vpop.f32.mrf.mxu0  ;;  %v2806_v42 = vadd.f32 %v2805_v38, %v2804_v27 }
 0x183   : > { %2115 = vst [vmem:[%s3433_s30 + $0x18] sm:$0xff] %v1997_v31  ;;  %v1841_v51 = vadd.f32 %v2694_v34, %v3360_v9  ;;  %v2807_v44 = vpop.f32.mrf.mxu1 }
 0x184   : > { %v2696_v46 = vpop.f32.mrf.mxu0 }
 0x185   : > { %v2002_v47 = vadd.f32 %v2806_v42, %v1841_v51  ;;  %v2697_v48 = vadd.f32 %v2696_v46, %v2695_v39  ;;  %v2808_v49 = vpop.f32.mrf.mxu1 }
 0x186   : > { %v2698_v54 = vpop.f32.mrf.mxu0  ;;  %v2809_v55 = vadd.f32 %v2808_v49, %v2807_v44 }
 0x187   : > { %2116 = vst [vmem:[%s3433_s30 + $0x20] sm:$0xff] %v2002_v47  ;;  %v1844_v59 = vadd.f32 %v2697_v48, %v3362_v17  ;;  %v2810_v57 = vpop.f32.mrf.mxu1 }
 0x188   : > { %v2699_v58 = vpop.f32.mrf.mxu0 }
 0x189   : > { %v2005_v60 = vadd.f32 %v2809_v55, %v1844_v59  ;;  %v2700_v61 = vadd.f32 %v2699_v58, %v2698_v54  ;;  %v2811_v29 = vpop.f32.mrf.mxu1 }
 0x18a   : > { %v2701_v2 = vpop.f32.mrf.mxu0  ;;  %v2812_v3 = vadd.f32 %v2811_v29, %v2810_v57 }
 0x18b   : > { %2117 = vst [vmem:[%s3433_s30 + $0x28] sm:$0xff] %v2005_v60  ;;  %v1849_v9 = vadd.f32 %v2700_v61, %v3368_v32  ;;  %v2813_v4 = vpop.f32.mrf.mxu1 }
 0x18c   : > { %v2702_v5 = vpop.f32.mrf.mxu0 }
 0x18d   : > { %v2010_v7 = vadd.f32 %v2812_v3, %v1849_v9  ;;  %v2703_v10 = vadd.f32 %v2702_v5, %v2701_v2  ;;  %v2814_v12 = vpop.f32.mrf.mxu1 }
 0x18e   : > { %v2704_v13 = vpop.f32.mrf.mxu0  ;;  %v2815_v15 = vadd.f32 %v2814_v12, %v2813_v4 }
 0x18f   : > { %2118 = vst [vmem:[%s3433_s30 + $0x30] sm:$0xff] %v2010_v7  ;;  %v1852_v17 = vadd.f32 %v2703_v10, %v3370_v41  ;;  %v2816_v18 = vpop.f32.mrf.mxu1 }
 0x190   : > { %v2705_v20 = vpop.f32.mrf.mxu0 }
 0x191   : > { %v2013_v21 = vadd.f32 %v2815_v15, %v1852_v17  ;;  %v2706_v24 = vadd.f32 %v2705_v20, %v2704_v13  ;;  %v2817_v37 = vpop.f32.mrf.mxu1 }
 0x192   : > { %v2707_v26 = vpop.f32.mrf.mxu0  ;;  %v2818_v27 = vadd.f32 %v2817_v37, %v2816_v18 }
 0x193   : > { %2119 = vst [vmem:[%s3433_s30 + $0x38] sm:$0xff] %v2013_v21  ;;  %v1857_v32 = vadd.f32 %v2706_v24, %v3376_v56  ;;  %v2819_v30 = vpop.f32.mrf.mxu1 }
 0x194   : > { %v2708_v31 = vpop.f32.mrf.mxu0 }
 0x195   : > { %v2018_v34 = vadd.f32 %v2818_v27, %v1857_v32  ;;  %v2709_v38 = vadd.f32 %v2708_v31, %v2707_v26  ;;  %v2820_v39 = vpop.f32.mrf.mxu1 }
 0x196   : > { %v2710_v51 = vpop.f32.mrf.mxu0  ;;  %v2821_v42 = vadd.f32 %v2820_v39, %v2819_v30 }
 0x197   : > { %2120 = vst [vmem:[%s3433_s30 + $0x40] sm:$0xff] %v2018_v34  ;;  %v1860_v41 = vadd.f32 %v2709_v38, %v3378_v1  ;;  %v2822_v44 = vpop.f32.mrf.mxu1 }
 0x198   : > { %v2711_v46 = vpop.f32.mrf.mxu0 }
 0x199   : > { %v2021_v47 = vadd.f32 %v2821_v42, %v1860_v41  ;;  %v2712_v48 = vadd.f32 %v2711_v46, %v2710_v51  ;;  %v2823_v49 = vpop.f32.mrf.mxu1 }
 0x19a   : > { %v2713_v54 = vpop.f32.mrf.mxu0  ;;  %v2824_v59 = vadd.f32 %v2823_v49, %v2822_v44 }
 0x19b   : > { %2121 = vst [vmem:[%s3433_s30 + $0x48] sm:$0xff] %v2021_v47  ;;  %v1865_v56 = vadd.f32 %v2712_v48, %v3384_v16  ;;  %v2825_v55 = vpop.f32.mrf.mxu1 }
 0x19c   : > { %v2714_v57 = vpop.f32.mrf.mxu0 }
 0x19d   : > { %v2026_v58 = vadd.f32 %v2824_v59, %v1865_v56  ;;  %v2715_v60 = vadd.f32 %v2714_v57, %v2713_v54  ;;  %v2826_v61 = vpop.f32.mrf.mxu1 }
 0x19e   : > { %v2716_v29 = vpop.f32.mrf.mxu0  ;;  %v2827_v2 = vadd.f32 %v2826_v61, %v2825_v55 }
 0x19f   : > { %2122 = vst [vmem:[%s3433_s30 + $0x50] sm:$0xff] %v2026_v58  ;;  %v1868_v1 = vadd.f32 %v2715_v60, %v3386_v25  ;;  %v2828_v9 = vpop.f32.mrf.mxu1 }
 0x1a0   : > { %v2717_v3 = vpop.f32.mrf.mxu0 }
 0x1a1   : > { %v2029_v4 = vadd.f32 %v2827_v2, %v1868_v1  ;;  %v2718_v5 = vadd.f32 %v2717_v3, %v2716_v29  ;;  %v2829_v7 = vpop.f32.mrf.mxu1 }
 0x1a2   : > { %v2719_v10 = vpop.f32.mrf.mxu0  ;;  %v2830_v12 = vadd.f32 %v2829_v7, %v2828_v9 }
 0x1a3   : > { %2123 = vst [vmem:[%s3433_s30 + $0x58] sm:$0xff] %v2029_v4  ;;  %v1873_v16 = vadd.f32 %v2718_v5, %v3388_v36  ;;  %v2831_v13 = vpop.f32.mrf.mxu1 }
 0x1a4   : > { %v2720_v17 = vpop.f32.mrf.mxu0 }
 0x1a5   : > { %v2034_v15 = vadd.f32 %v2830_v12, %v1873_v16  ;;  %v2721_v18 = vadd.f32 %v2720_v17, %v2719_v10  ;;  %v2832_v20 = vpop.f32.mrf.mxu1 }
 0x1a6   : > { %v2722_v21 = vpop.f32.mrf.mxu0  ;;  %v2833_v24 = vadd.f32 %v2832_v20, %v2831_v13 }
 0x1a7   : > { %2124 = vst [vmem:[%s3433_s30 + $0x60] sm:$0xff] %v2034_v15  ;;  %v1876_v25 = vadd.f32 %v2721_v18, %v3390_v45  ;;  %v2834_v37 = vpop.f32.mrf.mxu1 }
 0x1a8   : > { %v2723_v26 = vpop.f32.mrf.mxu0 }
 0x1a9   : > { %v2037_v32 = vadd.f32 %v2833_v24, %v1876_v25  ;;  %v2724_v27 = vadd.f32 %v2723_v26, %v2722_v21  ;;  %v2835_v30 = vpop.f32.mrf.mxu1 }
 0x1aa   : > { %v2725_v31 = vpop.f32.mrf.mxu0  ;;  %v2836_v34 = vadd.f32 %v2835_v30, %v2834_v37 }
 0x1ab   : > { %2125 = vst [vmem:[%s3433_s30 + $0x68] sm:$0xff] %v2037_v32  ;;  %v1881_v36 = vadd.f32 %v2724_v27, %v3392_v53  ;;  %v2837_v38 = vpop.f32.mrf.mxu1 }
 0x1ac   : > { %v2726_v39 = vpop.f32.mrf.mxu0 }
 0x1ad   : > { %v2042_v51 = vadd.f32 %v2836_v34, %v1881_v36  ;;  %v2727_v41 = vadd.f32 %v2726_v39, %v2725_v31  ;;  %v2838_v42 = vpop.f32.mrf.mxu1 }
 0x1ae   : > { %v2728_v44 = vpop.f32.mrf.mxu0  ;;  %v2839_v46 = vadd.f32 %v2838_v42, %v2837_v38 }
 0x1af   : > { %2126 = vst [vmem:[%s3433_s30 + $0x70] sm:$0xff] %v2042_v51  ;;  %v1884_v45 = vadd.f32 %v2727_v41, %v3394_v62  ;;  %v2840_v47 = vpop.f32.mrf.mxu1 }
 0x1b0   : > { %v2729_v48 = vpop.f32.mrf.mxu0 }
 0x1b1   : > { %v2045_v49 = vadd.f32 %v2839_v46, %v1884_v45  ;;  %v2730_v54 = vadd.f32 %v2729_v48, %v2728_v44  ;;  %v2841_v56 = vpop.f32.mrf.mxu1 }
 0x1b2   : > { %v2731_v59 = vpop.f32.mrf.mxu0  ;;  %v2842_v55 = vadd.f32 %v2841_v56, %v2840_v47 }
 0x1b3   : > { %2127 = vst [vmem:[%s3433_s30 + $0x78] sm:$0xff] %v2045_v49  ;;  %v1889_v53 = vadd.f32 %v2730_v54, %v3396_v6  ;;  %v2843_v57 = vpop.f32.mrf.mxu1 }
 0x1b4   : > { %v2732_v58 = vpop.f32.mrf.mxu0 }
 0x1b5   : > { %v2050_v60 = vadd.f32 %v2842_v55, %v1889_v53  ;;  %v2733_v61 = vadd.f32 %v2732_v58, %v2731_v59  ;;  %v2844_v29 = vpop.f32.mrf.mxu1 }
 0x1b6   : > { %v2734_v1 = vpop.f32.mrf.mxu0  ;;  %v2845_v2 = vadd.f32 %v2844_v29, %v2843_v57 }
 0x1b7   : > { %2128 = vst [vmem:[%s3433_s30 + $0x80] sm:$0xff] %v2050_v60  ;;  %v1892_v62 = vadd.f32 %v2733_v61, %v3398_v14  ;;  %v2846_v9 = vpop.f32.mrf.mxu1 }
 0x1b8   : > { %v2735_v3 = vpop.f32.mrf.mxu0 }
 0x1b9   : > { %v2053_v4 = vadd.f32 %v2845_v2, %v1892_v62  ;;  %v2736_v5 = vadd.f32 %v2735_v3, %v2734_v1  ;;  %v2847_v7 = vpop.f32.mrf.mxu1 }
 0x1ba   : > { %v2737_v10 = vpop.f32.mrf.mxu0  ;;  %v2848_v16 = vadd.f32 %v2847_v7, %v2846_v9 }
 0x1bb   : > { %2129 = vst [vmem:[%s3433_s30 + $0x88] sm:$0xff] %v2053_v4  ;;  %v1897_v6 = vadd.f32 %v2736_v5, %v3400_v23  ;;  %v2849_v12 = vpop.f32.mrf.mxu1 }
 0x1bc   : > { %v2738_v13 = vpop.f32.mrf.mxu0 }
 0x1bd   : > { %v2058_v17 = vadd.f32 %v2848_v16, %v1897_v6  ;;  %v2739_v15 = vadd.f32 %v2738_v13, %v2737_v10  ;;  %v2850_v18 = vpop.f32.mrf.mxu1 }
 0x1be   : > { %v2740_v20 = vpop.f32.mrf.mxu0  ;;  %v2851_v21 = vadd.f32 %v2850_v18, %v2849_v12 }
 0x1bf   : > { %2130 = vst [vmem:[%s3433_s30 + $0x90] sm:$0xff] %v2058_v17  ;;  %v1900_v14 = vadd.f32 %v2739_v15, %v3402_v33  ;;  %v2852_v25 = vpop.f32.mrf.mxu1 }
 0x1c0   : > { %v2741_v24 = vpop.f32.mrf.mxu0 }
 0x1c1   : > { %v2061_v37 = vadd.f32 %v2851_v21, %v1900_v14  ;;  %v2742_v26 = vadd.f32 %v2741_v24, %v2740_v20  ;;  %v2853_v32 = vpop.f32.mrf.mxu1 }
 0x1c2   : > { %v2743_v27 = vpop.f32.mrf.mxu0  ;;  %v2854_v30 = vadd.f32 %v2853_v32, %v2852_v25 }
 0x1c3   : > { %2131 = vst [vmem:[%s3433_s30 + $0x98] sm:$0xff] %v2061_v37  ;;  %v1905_v23 = vadd.f32 %v2742_v26, %v3404_v43  ;;  %v2855_v31 = vpop.f32.mrf.mxu1 }
 0x1c4   : > { %v2744_v36 = vpop.f32.mrf.mxu0 }
 0x1c5   : > { %v2066_v34 = vadd.f32 %v2854_v30, %v1905_v23  ;;  %v2745_v38 = vadd.f32 %v2744_v36, %v2743_v27  ;;  %v2856_v39 = vpop.f32.mrf.mxu1 }
 0x1c6   : > { %v2746_v51 = vpop.f32.mrf.mxu0  ;;  %v2857_v41 = vadd.f32 %v2856_v39, %v2855_v31 }
 0x1c7   : > { %2132 = vst [vmem:[%s3433_s30 + $0xa0] sm:$0xff] %v2066_v34  ;;  %v1908_v33 = vadd.f32 %v2745_v38, %v3406_v52  ;;  %v2858_v42 = vpop.f32.mrf.mxu1 }
 0x1c8   : > { %v2747_v44 = vpop.f32.mrf.mxu0 }
 0x1c9   : > { %v2069_v45 = vadd.f32 %v2857_v41, %v1908_v33  ;;  %v2748_v46 = vadd.f32 %v2747_v44, %v2746_v51  ;;  %v2859_v47 = vpop.f32.mrf.mxu1 }
 0x1ca   : > { %v2749_v48 = vpop.f32.mrf.mxu0  ;;  %v2860_v49 = vadd.f32 %v2859_v47, %v2858_v42 }
 0x1cb   : > { %2133 = vst [vmem:[%s3433_s30 + $0xa8] sm:$0xff] %v2069_v45  ;;  %v1913_v43 = vadd.f32 %v2748_v46, %v3408_v63  ;;  %v2861_v54 = vpop.f32.mrf.mxu1 }
 0x1cc   : > { %v2750_v56 = vpop.f32.mrf.mxu0 }
 0x1cd   : > { %v2074_v59 = vadd.f32 %v2860_v49, %v1913_v43  ;;  %v2751_v53 = vadd.f32 %v2750_v56, %v2749_v48  ;;  %v2862_v55 = vpop.f32.mrf.mxu1 }
 0x1ce   : > { %v2752_v57 = vpop.f32.mrf.mxu0  ;;  %v2863_v58 = vadd.f32 %v2862_v55, %v2861_v54 }
 0x1cf   : > { %2134 = vst [vmem:[%s3433_s30 + $0xb0] sm:$0xff] %v2074_v59  ;;  %v1916_v52 = vadd.f32 %v2751_v53, %v3410_v8  ;;  %v2864_v60 = vpop.f32.mrf.mxu1 }
 0x1d0   : > { %v2753_v61 = vpop.f32.mrf.mxu0 }
 0x1d1   : > { %v2077_v29 = vadd.f32 %v2863_v58, %v1916_v52  ;;  %v2754_v1 = vadd.f32 %v2753_v61, %v2752_v57  ;;  %v2865_v62 = vpop.f32.mrf.mxu1 }
 0x1d2   : > { %v2755_v2 = vpop.f32.mrf.mxu0  ;;  %v2866_v9 = vadd.f32 %v2865_v62, %v2864_v60 }
 0x1d3   : > { %2135 = vst [vmem:[%s3433_s30 + $0xb8] sm:$0xff] %v2077_v29  ;;  %v1921_v63 = vadd.f32 %v2754_v1, %v3412_v19  ;;  %v2867_v3 = vpop.f32.mrf.mxu1 }
 0x1d4   : > { %v2756_v4 = vpop.f32.mrf.mxu0 }
 0x1d5   : > { %v2082_v5 = vadd.f32 %v2866_v9, %v1921_v63  ;;  %v2757_v7 = vadd.f32 %v2756_v4, %v2755_v2  ;;  %v2868_v10 = vpop.f32.mrf.mxu1 }
 0x1d6   : > { %v2758_v6 = vpop.f32.mrf.mxu0  ;;  %v2869_v16 = vadd.f32 %v2868_v10, %v2867_v3 }
 0x1d7   : > { %2136 = vst [vmem:[%s3433_s30 + $0xc0] sm:$0xff] %v2082_v5  ;;  %v1924_v8 = vadd.f32 %v2757_v7, %v3414_v28  ;;  %v2870_v12 = vpop.f32.mrf.mxu1 }
 0x1d8   : > { %v2759_v13 = vpop.f32.mrf.mxu0 }
 0x1d9   : > { %v2085_v17 = vadd.f32 %v2869_v16, %v1924_v8  ;;  %v2760_v15 = vadd.f32 %v2759_v13, %v2758_v6  ;;  %v2871_v18 = vpop.f32.mrf.mxu1 }
 0x1da   : > { %v2761_v20 = vpop.f32.mrf.mxu0  ;;  %v2872_v14 = vadd.f32 %v2871_v18, %v2870_v12 }
 0x1db   : > { %2137 = vst [vmem:[%s3433_s30 + $0xc8] sm:$0xff] %v2085_v17  ;;  %v1929_v19 = vadd.f32 %v2760_v15, %v3416_v40  ;;  %v2873_v21 = vpop.f32.mrf.mxu1 }
 0x1dc   : > { %v2762_v25 = vpop.f32.mrf.mxu0 }
 0x1dd   : > { %v2090_v24 = vadd.f32 %v2872_v14, %v1929_v19  ;;  %v2763_v37 = vadd.f32 %v2762_v25, %v2761_v20  ;;  %v2874_v26 = vpop.f32.mrf.mxu1 }
 0x1de   : > { %v2764_v32 = vpop.f32.mrf.mxu0  ;;  %v2875_v27 = vadd.f32 %v2874_v26, %v2873_v21 }
 0x1df   : > { %2138 = vst [vmem:[%s3433_s30 + $0xd0] sm:$0xff] %v2090_v24  ;;  %v1932_v28 = vadd.f32 %v2763_v37, %v3418_v50  ;;  %v2876_v23 = vpop.f32.mrf.mxu1 }
 0x1e0   : > { %v2765_v30 = vpop.f32.mrf.mxu0 }
 0x1e1   : > { %v2093_v31 = vadd.f32 %v2875_v27, %v1932_v28  ;;  %v2766_v36 = vadd.f32 %v2765_v30, %v2764_v32  ;;  %v2877_v34 = vpop.f32.mrf.mxu1 }
 0x1e2   : > { %v2767_v38 = vpop.f32.mrf.mxu0  ;;  %v2878_v39 = vadd.f32 %v2877_v34, %v2876_v23 }
 0x1e3   : > { %2139 = vst [vmem:[%s3433_s30 + $0xd8] sm:$0xff] %v2093_v31  ;;  %v1937_v40 = vadd.f32 %v2766_v36, %v3420_v0  ;;  %v2879_v51 = vpop.f32.mrf.mxu1 }
 0x1e4   : > { %v2768_v33 = vpop.f32.mrf.mxu0 }
 0x1e5   : > { %v2098_v41 = vadd.f32 %v2878_v39, %v1937_v40  ;;  %v2769_v42 = vadd.f32 %v2768_v33, %v2767_v38  ;;  %v2880_v44 = vpop.f32.mrf.mxu1 }
 0x1e6   : > { %v2770_v45 = vpop.f32.mrf.mxu0  ;;  %v2881_v46 = vadd.f32 %v2880_v44, %v2879_v51 }
 0x1e7   : > { %2140 = vst [vmem:[%s3433_s30 + $0xe0] sm:$0xff] %v2098_v41  ;;  %v1940_v50 = vadd.f32 %v2769_v42, %v3422_v11  ;;  %v2882_v47 = vpop.f32.mrf.mxu1 }
 0x1e8   : > { %v2771_v48 = vpop.f32.mrf.mxu0 }
 0x1e9   : > { %v2101_v43 = vadd.f32 %v2881_v46, %v1940_v50  ;;  %v2772_v49 = vadd.f32 %v2771_v48, %v2770_v45  ;;  %v2883_v54 = vpop.f32.mrf.mxu1 }
 0x1ea   : > { %v2773_v0 = vpop.f32.mrf.mxu0  ;;  %v2884_v59 = vadd.f32 %v2883_v54, %v2882_v47 }
 0x1eb   : > { %2141 = vst [vmem:[%s3433_s30 + $0xe8] sm:$0xff] %v2101_v43  ;;  %v1945_v56 = vadd.f32 %v2772_v49, %v3424_v22  ;;  %v2885_v53 = vpop.f32.mrf.mxu1 }
 0x1ec   : > { %v2774_v55 = vpop.f32.mrf.mxu0 }
 0x1ed   : > { %v2106_v57 = vadd.f32 %v2884_v59, %v1945_v56  ;;  %v2775_v52 = vadd.f32 %v2774_v55, %v2773_v0  ;;  %v2886_v58 = vpop.f32.mrf.mxu1 }
 0x1ee   : > { %v2887_v60 = vadd.f32 %v2886_v58, %v2885_v53 }
 0x1ef   : > { %2142 = vst [vmem:[%s3433_s30 + $0xf0] sm:$0xff] %v2106_v57  ;;  %v1948_v11 = vadd.f32 %v2775_v52, %v3426_v35 }
 0x1f1   : > { %v2109_v61 = vadd.f32 %v2887_v60, %v1948_v11 }
 0x1f3   : > { %2143 = vst [vmem:[%s3433_s30 + $0xf8] sm:$0xff] %v2109_v61 }
 0x1f4 PF: > { %s12_s11 = sadd.s32 1, %s2998_s11   ;;  %s3510_s9 = smov %s2994_s10 }
 0x1f5   : > { %p9_p5 = scmp.ge.s32.totalorder %s12_s11, 4   ;;  %s3511_s10 = smov %s3513_s12 }
 0x1f7   :  { %11 = sbr.rel (!%p9_p5) target bundleno = 2 (0x2), region = 61 }

// kernel: discriminator_forward.10
= control target key start
LH: loop header
LB: loop body
LE: loop exit
PB: predicated region body
PF: predicated region fallthrough
CT: control target
= control target key end

     0   :  { %s1503_s0 = inlined_call_operand.vmem [shape: f32[512,128], index: 0, kind: input, shape index: {}]   ;;  %s1504_s1 = inlined_call_operand.vmem [shape: f32[1,128], index: 1, kind: input, shape index: {}]   ;;  %s1505_s2 = inlined_call_operand.vmem [shape: f32[1,128], index: 2, kind: input, shape index: {}]   ;;  %s1506_s3 = inlined_call_operand.vmem [shape: bf16[512,128], index: 3, kind: output, shape index: {}]  }
   0x1   :  { %v14_v0 = vld [vmem:[%s1503_s0] sm:$0xff]  ;;  %v15_v1 = vld [vmem:[%s1503_s0 + $0x8] sm:$0xff]  ;;  %v16_v6 = vld [vmem:[%s1503_s0 + $0x10] sm:$0xff] }
   0x2   :  { %v1086_v2 = vld [vmem:[%s1504_s1] ss:$0 sm:$0xff]  ;;  %v17_v7 = vld [vmem:[%s1503_s0 + $0x18] sm:$0xff]  ;;  %v19_v11 = vld [vmem:[%s1503_s0 + $0x28] sm:$0xff] }
   0x3   :  { %v85_v3 = vsub.f32 %v14_v0, %v1086_v2  ;;  %v86_v4 = vsub.f32 %v15_v1, %v1086_v2  ;;  %v1093_v5 = vld [vmem:[%s1505_s2] ss:$0 sm:$0xff]  ;;  %v87_v8 = vsub.f32 %v16_v6, %v1086_v2  ;;  %v88_v9 = vsub.f32 %v17_v7, %v1086_v2  ;;  %v20_v12 = vld [vmem:[%s1503_s0 + $0x30] sm:$0xff]  ;;  %v21_v17 = vld [vmem:[%s1503_s0 + $0x38] sm:$0xff] }
   0x4   :  { %v18_v10 = vld [vmem:[%s1503_s0 + $0x20] sm:$0xff]  ;;  %v90_v16 = vsub.f32 %v19_v11, %v1086_v2  ;;  %v91_v20 = vsub.f32 %v20_v12, %v1086_v2  ;;  %v92_v21 = vsub.f32 %v21_v17, %v1086_v2  ;;  %v23_v35 = vld [vmem:[%s1503_s0 + $0x48] sm:$0xff]  ;;  %v24_v36 = vld [vmem:[%s1503_s0 + $0x50] sm:$0xff] }
   0x5   :  { %v156_v13 = vmul.f32 %v1093_v5, %v85_v3  ;;  %v157_v14 = vmul.f32 %v1093_v5, %v86_v4  ;;  %v89_v15 = vsub.f32 %v18_v10, %v1086_v2  ;;  %v158_v18 = vmul.f32 %v1093_v5, %v87_v8  ;;  %v22_v34 = vld [vmem:[%s1503_s0 + $0x40] sm:$0xff]  ;;  %v25_v42 = vld [vmem:[%s1503_s0 + $0x58] sm:$0xff]  ;;  %v27_v48 = vld [vmem:[%s1503_s0 + $0x68] sm:$0xff] }
   0x6   :  { %v159_v19 = vmul.f32 %v1093_v5, %v88_v9  ;;  %v161_v29 = vmul.f32 %v1093_v5, %v90_v16  ;;  %v162_v33 = vmul.f32 %v1093_v5, %v91_v20  ;;  %v163_v40 = vmul.f32 %v1093_v5, %v92_v21  ;;  %v26_v47 = vld [vmem:[%s1503_s0 + $0x60] sm:$0xff]  ;;  %v28_v60 = vld [vmem:[%s1503_s0 + $0x70] sm:$0xff]  ;;  %v29_v7 = vld [vmem:[%s1503_s0 + $0x78] sm:$0xff] }
   0x7   :  { %vm220_vm0 = vcmp.gt.f32.partialorder %v156_v13, 0.0  ;;  %vm221_vm1 = vcmp.gt.f32.partialorder %v157_v14, 0.0  ;;  %v284_v22 = vmul.f32 0.2, %v156_v13  ;;  %v285_v23 = vmul.f32 0.2, %v157_v14 }
   0x8   :  { %vm222_vm2 = vcmp.gt.f32.partialorder %v158_v18, 0.0  ;;  %vm223_vm3 = vcmp.gt.f32.partialorder %v159_v19, 0.0  ;;  %v286_v24 = vmul.f32 0.2, %v158_v18  ;;  %v287_v25 = vmul.f32 0.2, %v159_v19 }
   0x9   :  { %v348_v26 = vsel %vm220_vm0, %v156_v13, %v284_v22  ;;  %v349_v27 = vsel %vm221_vm1, %v157_v14, %v285_v23  ;;  %v160_v28 = vmul.f32 %v1093_v5, %v89_v15  ;;  %vm225_vm5 = vcmp.gt.f32.partialorder %v161_v29, 0.0  ;;  %v30_v12 = vld [vmem:[%s1503_s0 + $0x80] sm:$0xff]  ;;  %v31_v13 = vld [vmem:[%s1503_s0 + $0x88] sm:$0xff]  ;;  %v32_v20 = vld [vmem:[%s1503_s0 + $0x90] sm:$0xff] }
   0xa   :  { %v869_v30 = vpack.c.bf16 %v349_v27, %v348_v26  ;;  %v350_v31 = vsel %vm222_vm2, %v158_v18, %v286_v24  ;;  %v351_v32 = vsel %vm223_vm3, %v159_v19, %v287_v25  ;;  %v289_v39 = vmul.f32 0.2, %v161_v29  ;;  %v33_v25 = vld [vmem:[%s1503_s0 + $0x98] sm:$0xff] }
   0xb   :  { %v874_v37 = vpack.c.bf16 %v351_v32, %v350_v31  ;;  %vm224_vm4 = vcmp.gt.f32.partialorder %v160_v28, 0.0  ;;  %v288_v38 = vmul.f32 0.2, %v160_v28  ;;  %vm226_vm6 = vcmp.gt.f32.partialorder %v162_v33, 0.0 }
   0xc   :  { %870 = vst [vmem:[%s1506_s3] sm:$0xff] %v869_v30   ;;  %v290_v41 = vmul.f32 0.2, %v162_v33  ;;  %v93_v44 = vsub.f32 %v22_v34, %v1086_v2  ;;  %v94_v45 = vsub.f32 %v23_v35, %v1086_v2  ;;  %v95_v46 = vsub.f32 %v24_v36, %v1086_v2 }
   0xd   :  { %1026 = vst [vmem:[%s1506_s3 + $0x8] sm:$0xff] %v874_v37   ;;  %v352_v43 = vsel %vm224_vm4, %v160_v28, %v288_v38  ;;  %v353_v49 = vsel %vm225_vm5, %v161_v29, %v289_v39  ;;  %vm227_vm7 = vcmp.gt.f32.partialorder %v163_v40, 0.0  ;;  %v291_v50 = vmul.f32 0.2, %v163_v40  ;;  %v35_v37 = vld [vmem:[%s1503_s0 + $0xa8] sm:$0xff] }
   0xe   :  { %v354_v51 = vsel %vm226_vm6, %v162_v33, %v290_v41  ;;  %v879_v52 = vpack.c.bf16 %v353_v49, %v352_v43  ;;  %v164_v53 = vmul.f32 %v1093_v5, %v93_v44  ;;  %v165_v54 = vmul.f32 %v1093_v5, %v94_v45  ;;  %v34_v33 = vld [vmem:[%s1503_s0 + $0xa0] sm:$0xff]  ;;  %v36_v44 = vld [vmem:[%s1503_s0 + $0xb0] sm:$0xff]  ;;  %v37_v49 = vld [vmem:[%s1503_s0 + $0xb8] sm:$0xff] }
   0xf   :  { %v96_v55 = vsub.f32 %v25_v42, %v1086_v2  ;;  %v355_v56 = vsel %vm227_vm7, %v163_v40, %v291_v50  ;;  %v166_v57 = vmul.f32 %v1093_v5, %v95_v46  ;;  %v97_v58 = vsub.f32 %v26_v47, %v1086_v2  ;;  %v38_v50 = vld [vmem:[%s1503_s0 + $0xc0] sm:$0xff] }
  0x10   :  { %v98_v59 = vsub.f32 %v27_v48, %v1086_v2  ;;  %1027 = vst [vmem:[%s1506_s3 + $0x10] sm:$0xff] %v879_v52   ;;  %v884_v61 = vpack.c.bf16 %v355_v56, %v354_v51  ;;  %vm228_vm8 = vcmp.gt.f32.partialorder %v164_v53, 0.0  ;;  %vm229_vm9 = vcmp.gt.f32.partialorder %v165_v54, 0.0  ;;  %v39_v51 = vld [vmem:[%s1503_s0 + $0xc8] sm:$0xff] }
  0x11   :  { %v292_v62 = vmul.f32 0.2, %v164_v53  ;;  %v293_v63 = vmul.f32 0.2, %v165_v54  ;;  %v167_v0 = vmul.f32 %v1093_v5, %v96_v55  ;;  %vm230_vm10 = vcmp.gt.f32.partialorder %v166_v57, 0.0 }
  0x12   :  { %v294_v1 = vmul.f32 0.2, %v166_v57  ;;  %1028 = vst [vmem:[%s1506_s3 + $0x18] sm:$0xff] %v884_v61   ;;  %v168_v4 = vmul.f32 %v1093_v5, %v97_v58  ;;  %v169_v6 = vmul.f32 %v1093_v5, %v98_v59  ;;  %v99_v8 = vsub.f32 %v28_v60, %v1086_v2 }
  0x13   :  { %v356_v3 = vsel %vm228_vm8, %v164_v53, %v292_v62  ;;  %v357_v9 = vsel %vm229_vm9, %v165_v54, %v293_v63  ;;  %vm231_vm11 = vcmp.gt.f32.partialorder %v167_v0, 0.0  ;;  %v295_v10 = vmul.f32 0.2, %v167_v0  ;;  %v40_v62 = vld [vmem:[%s1503_s0 + $0xd0] sm:$0xff] }
  0x14   :  { %v358_v11 = vsel %vm230_vm10, %v166_v57, %v294_v1  ;;  %v889_v14 = vpack.c.bf16 %v357_v9, %v356_v3  ;;  %vm232_vm12 = vcmp.gt.f32.partialorder %v168_v4, 0.0  ;;  %vm233_vm13 = vcmp.gt.f32.partialorder %v169_v6, 0.0 }
  0x15   :  { %v296_v15 = vmul.f32 0.2, %v168_v4  ;;  %v359_v16 = vsel %vm231_vm11, %v167_v0, %v295_v10  ;;  %v297_v17 = vmul.f32 0.2, %v169_v6  ;;  %v100_v18 = vsub.f32 %v29_v7, %v1086_v2  ;;  %v41_v10 = vld [vmem:[%s1503_s0 + $0xd8] sm:$0xff] }
  0x16   :  { %v170_v19 = vmul.f32 %v1093_v5, %v99_v8  ;;  %1029 = vst [vmem:[%s1506_s3 + $0x20] sm:$0xff] %v889_v14   ;;  %v894_v21 = vpack.c.bf16 %v359_v16, %v358_v11  ;;  %v101_v23 = vsub.f32 %v30_v12, %v1086_v2  ;;  %v102_v24 = vsub.f32 %v31_v13, %v1086_v2  ;;  %v42_v14 = vld [vmem:[%s1503_s0 + $0xe0] sm:$0xff] }
  0x17   :  { %v360_v22 = vsel %vm232_vm12, %v168_v4, %v296_v15  ;;  %v361_v26 = vsel %vm233_vm13, %v169_v6, %v297_v17  ;;  %v171_v27 = vmul.f32 %v1093_v5, %v100_v18  ;;  %v103_v32 = vsub.f32 %v32_v20, %v1086_v2  ;;  %v43_v15 = vld [vmem:[%s1503_s0 + $0xe8] sm:$0xff] }
  0x18   :  { %vm234_vm14 = vcmp.gt.f32.partialorder %v170_v19, 0.0  ;;  %v298_v28 = vmul.f32 0.2, %v170_v19  ;;  %1030 = vst [vmem:[%s1506_s3 + $0x28] sm:$0xff] %v894_v21   ;;  %v899_v29 = vpack.c.bf16 %v361_v26, %v360_v22  ;;  %v172_v30 = vmul.f32 %v1093_v5, %v101_v23  ;;  %v44_v26 = vld [vmem:[%s1503_s0 + $0xf0] sm:$0xff] }
  0x19   :  { %v173_v31 = vmul.f32 %v1093_v5, %v102_v24  ;;  %vm235_vm15 = vcmp.gt.f32.partialorder %v171_v27, 0.0  ;;  %v299_v34 = vmul.f32 0.2, %v171_v27  ;;  %v104_v36 = vsub.f32 %v33_v25, %v1086_v2 }
  0x1a   :  { %v362_v35 = vsel %vm234_vm14, %v170_v19, %v298_v28  ;;  %1031 = vst [vmem:[%s1506_s3 + $0x30] sm:$0xff] %v899_v29   ;;  %vm236_vm0 = vcmp.gt.f32.partialorder %v172_v30, 0.0  ;;  %v300_v38 = vmul.f32 0.2, %v172_v30  ;;  %v174_v41 = vmul.f32 %v1093_v5, %v103_v32 }
  0x1b   :  { %vm237_vm1 = vcmp.gt.f32.partialorder %v173_v31, 0.0  ;;  %v301_v39 = vmul.f32 0.2, %v173_v31  ;;  %v363_v40 = vsel %vm235_vm15, %v171_v27, %v299_v34  ;;  %v175_v42 = vmul.f32 %v1093_v5, %v104_v36 }
  0x1c   :  { %v105_v43 = vsub.f32 %v34_v33, %v1086_v2  ;;  %v904_v45 = vpack.c.bf16 %v363_v40, %v362_v35  ;;  %v364_v46 = vsel %vm236_vm0, %v172_v30, %v300_v38  ;;  %v106_v48 = vsub.f32 %v35_v37, %v1086_v2  ;;  %v46_v38 = vld [vmem:[%s1503_s0 + $0x100] sm:$0xff] }
  0x1d   :  { %v365_v47 = vsel %vm237_vm1, %v173_v31, %v301_v39  ;;  %vm238_vm2 = vcmp.gt.f32.partialorder %v174_v41, 0.0  ;;  %vm239_vm3 = vcmp.gt.f32.partialorder %v175_v42, 0.0  ;;  %v302_v53 = vmul.f32 0.2, %v174_v41  ;;  %v45_v31 = vld [vmem:[%s1503_s0 + $0xf8] sm:$0xff] }
  0x1e   :  { %v909_v52 = vpack.c.bf16 %v365_v47, %v364_v46  ;;  %1032 = vst [vmem:[%s1506_s3 + $0x38] sm:$0xff] %v904_v45   ;;  %v303_v54 = vmul.f32 0.2, %v175_v42  ;;  %v176_v55 = vmul.f32 %v1093_v5, %v105_v43  ;;  %v177_v56 = vmul.f32 %v1093_v5, %v106_v48 }
  0x1f   :  { %v107_v57 = vsub.f32 %v36_v44, %v1086_v2  ;;  %v366_v58 = vsel %vm238_vm2, %v174_v41, %v302_v53  ;;  %v108_v59 = vsub.f32 %v37_v49, %v1086_v2  ;;  %v109_v60 = vsub.f32 %v38_v50, %v1086_v2  ;;  %v48_v50 = vld [vmem:[%s1503_s0 + $0x110] sm:$0xff] }
  0x20   :  { %1033 = vst [vmem:[%s1506_s3 + $0x40] sm:$0xff] %v909_v52   ;;  %v110_v61 = vsub.f32 %v39_v51, %v1086_v2  ;;  %v367_v63 = vsel %vm239_vm3, %v175_v42, %v303_v54  ;;  %vm240_vm4 = vcmp.gt.f32.partialorder %v176_v55, 0.0  ;;  %vm241_vm5 = vcmp.gt.f32.partialorder %v177_v56, 0.0  ;;  %v47_v42 = vld [vmem:[%s1503_s0 + $0x108] sm:$0xff]  ;;  %v49_v51 = vld [vmem:[%s1503_s0 + $0x118] sm:$0xff] }
  0x21   :  { %v304_v0 = vmul.f32 0.2, %v176_v55  ;;  %v914_v1 = vpack.c.bf16 %v367_v63, %v366_v58  ;;  %v305_v3 = vmul.f32 0.2, %v177_v56  ;;  %v178_v4 = vmul.f32 %v1093_v5, %v107_v57  ;;  %v51_v63 = vld [vmem:[%s1503_s0 + $0x128] sm:$0xff] }
  0x22   :  { %v179_v6 = vmul.f32 %v1093_v5, %v108_v59  ;;  %v180_v8 = vmul.f32 %v1093_v5, %v109_v60  ;;  %v181_v9 = vmul.f32 %v1093_v5, %v110_v61  ;;  %v111_v11 = vsub.f32 %v40_v62, %v1086_v2 }
  0x23   :  { %v368_v7 = vsel %vm240_vm4, %v176_v55, %v304_v0  ;;  %1034 = vst [vmem:[%s1506_s3 + $0x48] sm:$0xff] %v914_v1   ;;  %v369_v12 = vsel %vm241_vm5, %v177_v56, %v305_v3  ;;  %vm242_vm6 = vcmp.gt.f32.partialorder %v178_v4, 0.0  ;;  %v306_v13 = vmul.f32 0.2, %v178_v4  ;;  %v50_v55 = vld [vmem:[%s1503_s0 + $0x120] sm:$0xff] }
  0x24   :  { %vm243_vm7 = vcmp.gt.f32.partialorder %v179_v6, 0.0  ;;  %v919_v16 = vpack.c.bf16 %v369_v12, %v368_v7  ;;  %v307_v17 = vmul.f32 0.2, %v179_v6  ;;  %vm244_vm8 = vcmp.gt.f32.partialorder %v180_v8, 0.0 }
  0x25   :  { %vm245_vm9 = vcmp.gt.f32.partialorder %v181_v9, 0.0  ;;  %v370_v18 = vsel %vm242_vm6, %v178_v4, %v306_v13  ;;  %v308_v19 = vmul.f32 0.2, %v180_v8  ;;  %v309_v20 = vmul.f32 0.2, %v181_v9  ;;  %v52_v4 = vld [vmem:[%s1503_s0 + $0x130] sm:$0xff] }
  0x26   :  { %v112_v21 = vsub.f32 %v41_v10, %v1086_v2  ;;  %1035 = vst [vmem:[%s1506_s3 + $0x50] sm:$0xff] %v919_v16   ;;  %v371_v22 = vsel %vm243_vm7, %v179_v6, %v307_v17  ;;  %v182_v23 = vmul.f32 %v1093_v5, %v111_v11  ;;  %v113_v24 = vsub.f32 %v42_v14, %v1086_v2  ;;  %v53_v13 = vld [vmem:[%s1503_s0 + $0x138] sm:$0xff] }
  0x27   :  { %v114_v25 = vsub.f32 %v43_v15, %v1086_v2  ;;  %v924_v27 = vpack.c.bf16 %v371_v22, %v370_v18  ;;  %v372_v28 = vsel %vm244_vm8, %v180_v8, %v308_v19  ;;  %v373_v29 = vsel %vm245_vm9, %v181_v9, %v309_v20  ;;  %v54_v20 = vld [vmem:[%s1503_s0 + $0x140] sm:$0xff] }
  0x28   :  { %v183_v30 = vmul.f32 %v1093_v5, %v112_v21  ;;  %v929_v32 = vpack.c.bf16 %v373_v29, %v372_v28  ;;  %vm246_vm10 = vcmp.gt.f32.partialorder %v182_v23, 0.0  ;;  %v310_v33 = vmul.f32 0.2, %v182_v23 }
  0x29   :  { %v184_v34 = vmul.f32 %v1093_v5, %v113_v24  ;;  %1036 = vst [vmem:[%s1506_s3 + $0x58] sm:$0xff] %v924_v27   ;;  %v185_v36 = vmul.f32 %v1093_v5, %v114_v25  ;;  %v115_v37 = vsub.f32 %v44_v26, %v1086_v2  ;;  %v116_v41 = vsub.f32 %v45_v31, %v1086_v2  ;;  %v55_v24 = vld [vmem:[%s1503_s0 + $0x148] sm:$0xff] }
  0x2a   :  { %vm247_vm11 = vcmp.gt.f32.partialorder %v183_v30, 0.0  ;;  %v311_v35 = vmul.f32 0.2, %v183_v30  ;;  %1037 = vst [vmem:[%s1506_s3 + $0x60] sm:$0xff] %v929_v32   ;;  %v374_v39 = vsel %vm246_vm10, %v182_v23, %v310_v33  ;;  %v117_v49 = vsub.f32 %v46_v38, %v1086_v2  ;;  %v56_v32 = vld [vmem:[%s1503_s0 + $0x150] sm:$0xff]  ;;  %v57_v33 = vld [vmem:[%s1503_s0 + $0x158] sm:$0xff] }
  0x2b   :  { %vm248_vm12 = vcmp.gt.f32.partialorder %v184_v34, 0.0  ;;  %v312_v40 = vmul.f32 0.2, %v184_v34  ;;  %vm249_vm13 = vcmp.gt.f32.partialorder %v185_v36, 0.0  ;;  %v313_v44 = vmul.f32 0.2, %v185_v36 }
  0x2c   :  { %v375_v43 = vsel %vm247_vm11, %v183_v30, %v311_v35  ;;  %v186_v45 = vmul.f32 %v1093_v5, %v115_v37  ;;  %v187_v48 = vmul.f32 %v1093_v5, %v116_v41  ;;  %v118_v54 = vsub.f32 %v47_v42, %v1086_v2  ;;  %v58_v37 = vld [vmem:[%s1503_s0 + $0x160] sm:$0xff] }
  0x2d   :  { %v934_v46 = vpack.c.bf16 %v375_v43, %v374_v39  ;;  %v376_v47 = vsel %vm248_vm12, %v184_v34, %v312_v40  ;;  %v377_v52 = vsel %vm249_vm13, %v185_v36, %v313_v44  ;;  %v188_v58 = vmul.f32 %v1093_v5, %v117_v49  ;;  %v60_v49 = vld [vmem:[%s1503_s0 + $0x170] sm:$0xff] }
  0x2e   :  { %vm250_vm14 = vcmp.gt.f32.partialorder %v186_v45, 0.0  ;;  %v314_v53 = vmul.f32 0.2, %v186_v45  ;;  %v939_v56 = vpack.c.bf16 %v377_v52, %v376_v47  ;;  %vm251_vm15 = vcmp.gt.f32.partialorder %v187_v48, 0.0 }
  0x2f   :  { %1038 = vst [vmem:[%s1506_s3 + $0x68] sm:$0xff] %v934_v46   ;;  %v315_v57 = vmul.f32 0.2, %v187_v48  ;;  %v189_v60 = vmul.f32 %v1093_v5, %v118_v54  ;;  %v119_v61 = vsub.f32 %v48_v50, %v1086_v2  ;;  %v120_v62 = vsub.f32 %v49_v51, %v1086_v2 }
  0x30   :  { %v378_v59 = vsel %vm250_vm14, %v186_v45, %v314_v53  ;;  %1039 = vst [vmem:[%s1506_s3 + $0x70] sm:$0xff] %v939_v56   ;;  %vm252_vm0 = vcmp.gt.f32.partialorder %v188_v58, 0.0  ;;  %v316_v1 = vmul.f32 0.2, %v188_v58  ;;  %v121_v3 = vsub.f32 %v50_v55, %v1086_v2  ;;  %v59_v45 = vld [vmem:[%s1503_s0 + $0x168] sm:$0xff] }
  0x31   :  { %v379_v0 = vsel %vm251_vm15, %v187_v48, %v315_v57  ;;  %vm253_vm1 = vcmp.gt.f32.partialorder %v189_v60, 0.0  ;;  %v317_v7 = vmul.f32 0.2, %v189_v60  ;;  %v190_v8 = vmul.f32 %v1093_v5, %v119_v61  ;;  %v61_v57 = vld [vmem:[%s1503_s0 + $0x178] sm:$0xff] }
  0x32   :  { %v944_v6 = vpack.c.bf16 %v379_v0, %v378_v59  ;;  %v380_v9 = vsel %vm252_vm0, %v188_v58, %v316_v1  ;;  %v191_v10 = vmul.f32 %v1093_v5, %v120_v62  ;;  %v122_v11 = vsub.f32 %v51_v63, %v1086_v2  ;;  %v62_v0 = vld [vmem:[%s1503_s0 + $0x180] sm:$0xff] }
  0x33   :  { %v192_v12 = vmul.f32 %v1093_v5, %v121_v3  ;;  %v381_v14 = vsel %vm253_vm1, %v189_v60, %v317_v7  ;;  %vm254_vm2 = vcmp.gt.f32.partialorder %v190_v8, 0.0  ;;  %v318_v15 = vmul.f32 0.2, %v190_v8 }
  0x34   :  { %1040 = vst [vmem:[%s1506_s3 + $0x78] sm:$0xff] %v944_v6   ;;  %v123_v16 = vsub.f32 %v52_v4, %v1086_v2  ;;  %v949_v17 = vpack.c.bf16 %v381_v14, %v380_v9  ;;  %vm255_vm3 = vcmp.gt.f32.partialorder %v191_v10, 0.0  ;;  %v319_v18 = vmul.f32 0.2, %v191_v10  ;;  %v63_v6 = vld [vmem:[%s1503_s0 + $0x188] sm:$0xff]  ;;  %v64_v14 = vld [vmem:[%s1503_s0 + $0x190] sm:$0xff] }
  0x35   :  { %v193_v19 = vmul.f32 %v1093_v5, %v122_v11  ;;  %v382_v21 = vsel %vm254_vm2, %v190_v8, %v318_v15  ;;  %vm256_vm4 = vcmp.gt.f32.partialorder %v192_v12, 0.0  ;;  %v320_v22 = vmul.f32 0.2, %v192_v12  ;;  %v65_v15 = vld [vmem:[%s1503_s0 + $0x198] sm:$0xff] }
  0x36   :  { %v124_v23 = vsub.f32 %v53_v13, %v1086_v2  ;;  %1041 = vst [vmem:[%s1506_s3 + $0x80] sm:$0xff] %v949_v17   ;;  %v383_v25 = vsel %vm255_vm3, %v191_v10, %v319_v18  ;;  %v194_v27 = vmul.f32 %v1093_v5, %v123_v16  ;;  %v125_v31 = vsub.f32 %v54_v20, %v1086_v2 }
  0x37   :  { %vm257_vm5 = vcmp.gt.f32.partialorder %v193_v19, 0.0  ;;  %v321_v26 = vmul.f32 0.2, %v193_v19  ;;  %v954_v28 = vpack.c.bf16 %v383_v25, %v382_v21  ;;  %v384_v29 = vsel %vm256_vm4, %v192_v12, %v320_v22 }
  0x38   :  { %v195_v30 = vmul.f32 %v1093_v5, %v124_v23  ;;  %vm258_vm6 = vcmp.gt.f32.partialorder %v194_v27, 0.0  ;;  %v322_v35 = vmul.f32 0.2, %v194_v27  ;;  %v126_v36 = vsub.f32 %v55_v24, %v1086_v2 }
  0x39   :  { %v385_v34 = vsel %vm257_vm5, %v193_v19, %v321_v26  ;;  %1042 = vst [vmem:[%s1506_s3 + $0x88] sm:$0xff] %v954_v28   ;;  %v196_v40 = vmul.f32 %v1093_v5, %v125_v31  ;;  %v127_v43 = vsub.f32 %v56_v32, %v1086_v2  ;;  %v128_v44 = vsub.f32 %v57_v33, %v1086_v2  ;;  %v66_v19 = vld [vmem:[%s1503_s0 + $0x1a0] sm:$0xff]  ;;  %v68_v31 = vld [vmem:[%s1503_s0 + $0x1b0] sm:$0xff] }
  0x3a   :  { %v959_v38 = vpack.c.bf16 %v385_v34, %v384_v29  ;;  %vm259_vm7 = vcmp.gt.f32.partialorder %v195_v30, 0.0  ;;  %v323_v39 = vmul.f32 0.2, %v195_v30  ;;  %v386_v41 = vsel %vm258_vm6, %v194_v27, %v322_v35  ;;  %v67_v27 = vld [vmem:[%s1503_s0 + $0x1a8] sm:$0xff] }
  0x3b   :  { %v197_v42 = vmul.f32 %v1093_v5, %v126_v36  ;;  %vm260_vm8 = vcmp.gt.f32.partialorder %v196_v40, 0.0  ;;  %v324_v47 = vmul.f32 0.2, %v196_v40  ;;  %v129_v48 = vsub.f32 %v58_v37, %v1086_v2 }
  0x3c   :  { %1043 = vst [vmem:[%s1506_s3 + $0x90] sm:$0xff] %v959_v38   ;;  %v387_v46 = vsel %vm259_vm7, %v195_v30, %v323_v39  ;;  %v198_v52 = vmul.f32 %v1093_v5, %v127_v43  ;;  %v199_v54 = vmul.f32 %v1093_v5, %v128_v44  ;;  %v130_v55 = vsub.f32 %v59_v45, %v1086_v2  ;;  %v69_v39 = vld [vmem:[%s1503_s0 + $0x1b8] sm:$0xff] }
  0x3d   :  { %v964_v50 = vpack.c.bf16 %v387_v46, %v386_v41  ;;  %vm261_vm9 = vcmp.gt.f32.partialorder %v197_v42, 0.0  ;;  %v325_v51 = vmul.f32 0.2, %v197_v42  ;;  %v388_v53 = vsel %vm260_vm8, %v196_v40, %v324_v47  ;;  %v70_v46 = vld [vmem:[%s1503_s0 + $0x1c0] sm:$0xff] }
  0x3e   :  { %v200_v56 = vmul.f32 %v1093_v5, %v129_v48  ;;  %vm262_vm10 = vcmp.gt.f32.partialorder %v198_v52, 0.0  ;;  %v326_v59 = vmul.f32 0.2, %v198_v52  ;;  %v131_v60 = vsub.f32 %v60_v49, %v1086_v2 }
  0x3f   :  { %1044 = vst [vmem:[%s1506_s3 + $0x98] sm:$0xff] %v964_v50   ;;  %v389_v58 = vsel %vm261_vm9, %v197_v42, %v325_v51  ;;  %vm263_vm11 = vcmp.gt.f32.partialorder %v199_v54, 0.0  ;;  %v327_v62 = vmul.f32 0.2, %v199_v54  ;;  %v201_v63 = vmul.f32 %v1093_v5, %v130_v55  ;;  %v71_v50 = vld [vmem:[%s1503_s0 + $0x1c8] sm:$0xff] }
  0x40   :  { %v969_v61 = vpack.c.bf16 %v389_v58, %v388_v53  ;;  %v390_v1 = vsel %vm262_vm10, %v198_v52, %v326_v59  ;;  %vm264_vm12 = vcmp.gt.f32.partialorder %v200_v56, 0.0  ;;  %v328_v3 = vmul.f32 0.2, %v200_v56  ;;  %v72_v58 = vld [vmem:[%s1503_s0 + $0x1d0] sm:$0xff]  ;;  %v73_v59 = vld [vmem:[%s1503_s0 + $0x1d8] sm:$0xff] }
  0x41   :  { %v132_v4 = vsub.f32 %v61_v57, %v1086_v2  ;;  %v391_v7 = vsel %vm263_vm11, %v199_v54, %v327_v62  ;;  %vm265_vm13 = vcmp.gt.f32.partialorder %v201_v63, 0.0  ;;  %v329_v8 = vmul.f32 0.2, %v201_v63 }
  0x42   :  { %1045 = vst [vmem:[%s1506_s3 + $0xa0] sm:$0xff] %v969_v61   ;;  %v202_v9 = vmul.f32 %v1093_v5, %v131_v60  ;;  %v974_v10 = vpack.c.bf16 %v391_v7, %v390_v1  ;;  %v392_v11 = vsel %vm264_vm12, %v200_v56, %v328_v3  ;;  %v133_v13 = vsub.f32 %v62_v0, %v1086_v2 }
  0x43   :  { %v203_v12 = vmul.f32 %v1093_v5, %v132_v4  ;;  %v393_v16 = vsel %vm265_vm13, %v201_v63, %v329_v8  ;;  %v134_v18 = vsub.f32 %v63_v6, %v1086_v2  ;;  %v135_v25 = vsub.f32 %v64_v14, %v1086_v2  ;;  %v74_v63 = vld [vmem:[%s1503_s0 + $0x1e0] sm:$0xff] }
  0x44   :  { %vm266_vm14 = vcmp.gt.f32.partialorder %v202_v9, 0.0  ;;  %v330_v17 = vmul.f32 0.2, %v202_v9  ;;  %1046 = vst [vmem:[%s1506_s3 + $0xa8] sm:$0xff] %v974_v10   ;;  %v979_v20 = vpack.c.bf16 %v393_v16, %v392_v11  ;;  %v204_v22 = vmul.f32 %v1093_v5, %v133_v13  ;;  %v76_v13 = vld [vmem:[%s1503_s0 + $0x1f0] sm:$0xff] }
  0x45   :  { %vm267_vm15 = vcmp.gt.f32.partialorder %v203_v12, 0.0  ;;  %v331_v21 = vmul.f32 0.2, %v203_v12  ;;  %v205_v24 = vmul.f32 %v1093_v5, %v134_v18  ;;  %v136_v26 = vsub.f32 %v65_v15, %v1086_v2 }
  0x46   :  { %v394_v23 = vsel %vm266_vm14, %v202_v9, %v330_v17  ;;  %1047 = vst [vmem:[%s1506_s3 + $0xb0] sm:$0xff] %v979_v20   ;;  %vm268_vm0 = vcmp.gt.f32.partialorder %v204_v22, 0.0  ;;  %v332_v29 = vmul.f32 0.2, %v204_v22  ;;  %v137_v30 = vsub.f32 %v66_v19, %v1086_v2  ;;  %v75_v9 = vld [vmem:[%s1503_s0 + $0x1e8] sm:$0xff] }
  0x47   :  { %v395_v28 = vsel %vm267_vm15, %v203_v12, %v331_v21  ;;  %vm269_vm1 = vcmp.gt.f32.partialorder %v205_v24, 0.0  ;;  %v333_v33 = vmul.f32 0.2, %v205_v24  ;;  %v206_v34 = vmul.f32 %v1093_v5, %v135_v25  ;;  %v77_v21 = vld [vmem:[%s1503_s0 + $0x1f8] sm:$0xff] }
  0x48   :  { %v984_v32 = vpack.c.bf16 %v395_v28, %v394_v23  ;;  %v396_v35 = vsel %vm268_vm0, %v204_v22, %v332_v29  ;;  %v207_v36 = vmul.f32 %v1093_v5, %v136_v26  ;;  %v138_v37 = vsub.f32 %v67_v27, %v1086_v2 }
  0x49   :  { %v208_v38 = vmul.f32 %v1093_v5, %v137_v30  ;;  %v397_v40 = vsel %vm269_vm1, %v205_v24, %v333_v33  ;;  %vm270_vm2 = vcmp.gt.f32.partialorder %v206_v34, 0.0  ;;  %v334_v41 = vmul.f32 0.2, %v206_v34 }
  0x4a   :  { %1048 = vst [vmem:[%s1506_s3 + $0xb8] sm:$0xff] %v984_v32   ;;  %v139_v42 = vsub.f32 %v68_v31, %v1086_v2  ;;  %v989_v43 = vpack.c.bf16 %v397_v40, %v396_v35  ;;  %vm271_vm3 = vcmp.gt.f32.partialorder %v207_v36, 0.0  ;;  %v335_v44 = vmul.f32 0.2, %v207_v36 }
  0x4b   :  { %v209_v45 = vmul.f32 %v1093_v5, %v138_v37  ;;  %v398_v47 = vsel %vm270_vm2, %v206_v34, %v334_v41  ;;  %vm272_vm4 = vcmp.gt.f32.partialorder %v208_v38, 0.0  ;;  %v336_v48 = vmul.f32 0.2, %v208_v38 }
  0x4c   :  { %v140_v49 = vsub.f32 %v69_v39, %v1086_v2  ;;  %1049 = vst [vmem:[%s1506_s3 + $0xc0] sm:$0xff] %v989_v43   ;;  %v399_v51 = vsel %vm271_vm3, %v207_v36, %v335_v44  ;;  %v210_v53 = vmul.f32 %v1093_v5, %v139_v42  ;;  %v141_v57 = vsub.f32 %v70_v46, %v1086_v2 }
  0x4d   :  { %vm273_vm5 = vcmp.gt.f32.partialorder %v209_v45, 0.0  ;;  %v337_v52 = vmul.f32 0.2, %v209_v45  ;;  %v994_v54 = vpack.c.bf16 %v399_v51, %v398_v47  ;;  %v400_v55 = vsel %vm272_vm4, %v208_v38, %v336_v48 }
  0x4e   :  { %v211_v56 = vmul.f32 %v1093_v5, %v140_v49  ;;  %vm274_vm6 = vcmp.gt.f32.partialorder %v210_v53, 0.0  ;;  %v338_v61 = vmul.f32 0.2, %v210_v53  ;;  %v142_v62 = vsub.f32 %v71_v50, %v1086_v2 }
  0x4f   :  { %v401_v60 = vsel %vm273_vm5, %v209_v45, %v337_v52  ;;  %1050 = vst [vmem:[%s1506_s3 + $0xc8] sm:$0xff] %v994_v54   ;;  %v212_v3 = vmul.f32 %v1093_v5, %v141_v57  ;;  %v143_v7 = vsub.f32 %v72_v58, %v1086_v2  ;;  %v144_v8 = vsub.f32 %v73_v59, %v1086_v2 }
  0x50   :  { %v999_v0 = vpack.c.bf16 %v401_v60, %v400_v55  ;;  %vm275_vm7 = vcmp.gt.f32.partialorder %v211_v56, 0.0  ;;  %v339_v1 = vmul.f32 0.2, %v211_v56  ;;  %v402_v4 = vsel %vm274_vm6, %v210_v53, %v338_v61 }
  0x51   :  { %v213_v6 = vmul.f32 %v1093_v5, %v142_v62  ;;  %vm276_vm8 = vcmp.gt.f32.partialorder %v212_v3, 0.0  ;;  %v340_v11 = vmul.f32 0.2, %v212_v3  ;;  %v145_v12 = vsub.f32 %v74_v63, %v1086_v2 }
  0x52   :  { %1051 = vst [vmem:[%s1506_s3 + $0xd0] sm:$0xff] %v999_v0   ;;  %v403_v10 = vsel %vm275_vm7, %v211_v56, %v339_v1  ;;  %v214_v16 = vmul.f32 %v1093_v5, %v143_v7  ;;  %v215_v18 = vmul.f32 %v1093_v5, %v144_v8  ;;  %v146_v19 = vsub.f32 %v75_v9, %v1086_v2 }
  0x53   :  { %v1004_v14 = vpack.c.bf16 %v403_v10, %v402_v4  ;;  %vm277_vm9 = vcmp.gt.f32.partialorder %v213_v6, 0.0  ;;  %v341_v15 = vmul.f32 0.2, %v213_v6  ;;  %v404_v17 = vsel %vm276_vm8, %v212_v3, %v340_v11 }
  0x54   :  { %v216_v20 = vmul.f32 %v1093_v5, %v145_v12  ;;  %vm278_vm10 = vcmp.gt.f32.partialorder %v214_v16, 0.0  ;;  %v342_v23 = vmul.f32 0.2, %v214_v16  ;;  %v147_v24 = vsub.f32 %v76_v13, %v1086_v2 }
  0x55   :  { %1052 = vst [vmem:[%s1506_s3 + $0xd8] sm:$0xff] %v1004_v14   ;;  %v405_v22 = vsel %vm277_vm9, %v213_v6, %v341_v15  ;;  %vm279_vm11 = vcmp.gt.f32.partialorder %v215_v18, 0.0  ;;  %v343_v26 = vmul.f32 0.2, %v215_v18  ;;  %v217_v27 = vmul.f32 %v1093_v5, %v146_v19 }
  0x56   :  { %v1009_v25 = vpack.c.bf16 %v405_v22, %v404_v17  ;;  %v406_v28 = vsel %vm278_vm10, %v214_v16, %v342_v23  ;;  %vm280_vm12 = vcmp.gt.f32.partialorder %v216_v20, 0.0  ;;  %v344_v29 = vmul.f32 0.2, %v216_v20 }
  0x57   :  { %v148_v30 = vsub.f32 %v77_v21, %v1086_v2  ;;  %v407_v31 = vsel %vm279_vm11, %v215_v18, %v343_v26  ;;  %vm281_vm13 = vcmp.gt.f32.partialorder %v217_v27, 0.0  ;;  %v345_v32 = vmul.f32 0.2, %v217_v27 }
  0x58   :  { %1053 = vst [vmem:[%s1506_s3 + $0xe0] sm:$0xff] %v1009_v25   ;;  %v218_v33 = vmul.f32 %v1093_v5, %v147_v24  ;;  %v1014_v34 = vpack.c.bf16 %v407_v31, %v406_v28  ;;  %v408_v35 = vsel %vm280_vm12, %v216_v20, %v344_v29 }
  0x59   :  { %v219_v36 = vmul.f32 %v1093_v5, %v148_v30  ;;  %v409_v37 = vsel %vm281_vm13, %v217_v27, %v345_v32 }
  0x5a   :  { %vm282_vm14 = vcmp.gt.f32.partialorder %v218_v33, 0.0  ;;  %v346_v38 = vmul.f32 0.2, %v218_v33  ;;  %1054 = vst [vmem:[%s1506_s3 + $0xe8] sm:$0xff] %v1014_v34   ;;  %v1019_v2 = vpack.c.bf16 %v409_v37, %v408_v35 }
  0x5b   :  { %vm283_vm15 = vcmp.gt.f32.partialorder %v219_v36, 0.0  ;;  %v347_v39 = vmul.f32 0.2, %v219_v36 }
  0x5c   :  { %v410_v40 = vsel %vm282_vm14, %v218_v33, %v346_v38  ;;  %1055 = vst [vmem:[%s1506_s3 + $0xf0] sm:$0xff] %v1019_v2  }
  0x5d   :  { %v411_v41 = vsel %vm283_vm15, %v219_v36, %v347_v39 }
  0x5e   :  { %v1024_v42 = vpack.c.bf16 %v411_v41, %v410_v40 }
  0x60   :  { %1056 = vst [vmem:[%s1506_s3 + $0xf8] sm:$0xff] %v1024_v42  }

// kernel: discriminator_forward.11
= control target key start
LH: loop header
LB: loop body
LE: loop exit
PB: predicated region body
PF: predicated region fallthrough
CT: control target
= control target key end

     0   :  { %s5018_s9 = smov 0   ;;  %s5020_s10 = smov 0   ;;  %s6450_s0 = inlined_call_operand.vmem [shape: bf16[128,2048], index: 0, kind: input, shape index: {}]   ;;  %s6451_s1 = inlined_call_operand.vmem [shape: bf16[2048,256], index: 1, kind: input, shape index: {}]   ;;  %s6452_s2 = inlined_call_operand.vmem [shape: f32[128,256], index: 2, kind: output, shape index: {}]  }
   0x1   :  { %s5022_s11 = smov 0   ;;  %s5024_s12 = smov 0  }
   0x2   :  { %s5026_s13 = smov 0  }
   0x3 LB: > { %s21_s14 = sadd.s32 1, %s4997_s12  ;;  %s4013_s15 = sadd.s32 4294967295, %s5001_s13   ;;  %s5001_s13 = sphi %s5026_s13, %s12_s13   ;;  %s4997_s12 = sphi %s5024_s12, %s6511_s12   ;;  %s4993_s11 = sphi %s5022_s11, %s6510_s11   ;;  %s4989_s10 = sphi %s5020_s10, %s6509_s10   ;;  %s4985_s9 = sphi %s5018_s9, %s6508_s9  }
   0x4   : > { %p22_p0 = scmp.ge.s32.totalorder %s21_s14, 2  ;;  %p64_p1 = scmp.ne.s32.totalorder %s4989_s10, %s4985_s9 }
   0x5   : > { %p65_p2 = scmp.eq.s32.totalorder %s5001_s13, 0  ;;  %p96_p4 = scmp.eq.s32.totalorder %s4013_s15, 1 }
   0x6   : > { %s6513_s14 = smov (%p22_p0, %s21_s14), 0  ;;  %s57_s17 = sadd.s32 1, %s4989_s10 }
   0x7   : > { %p66_p3 = por %p65_p2, %p64_p1  ;;  %s54_s16 = ssub.s32 %s4997_s12, %s6513_s14 }
   0x8   : > { %p55_p5 = scmp.eq.s32.totalorder %s54_s16, 0  ;;  %p5053_p6 = por %p96_p4, %p64_p1 }
   0x9   : > { %p4017_p7 = scmp.ge.s32.totalorder %s5001_s13, 2 }
   0xa   : > { %s5058_s19 = scalar_select %p55_p5, %s4989_s10, %s57_s17  }
   0xb   : > { %128 = sbr.rel (%p4017_p7) target bundleno = 190 (0xbe), region = 20 }
  0x10   : > { %131 = sbr.rel (!%p66_p3) target bundleno = 190 (0xbe), region = 24  ;;  %s133_s20 = sand.u32 (%p66_p3), 1, %s4989_s10  }
  0x11   : > { %s4019_s21 = sshll.u32 (%p66_p3), %s4997_s12, 2  ;;  %s4018_s22 = sshll.u32 (%p66_p3), %s133_s20, 10 }
  0x12   : > { %s5066_s25 = scalar_lea.vmem (%p66_p3), %s6451_s1, %s4019_s21  ;;  %s5070_s26 = scalar_lea.vmem (%p66_p3), [#allocation2], %s4018_s22 }
  0x13   : > { %v154_v0 = vld [vmem:[%s5066_s25] sm:$0xf] (%p66_p3)  ;;  %v156_v1 = vld [vmem:[%s5066_s25 + $0x8] sm:$0xf] (%p66_p3)  ;;  %v158_v2 = vld [vmem:[%s5066_s25 + $0x10] sm:$0xf] (%p66_p3) }
  0x14   : > { %155 = vst [vmem:[%s5070_s26] sm:$0xf] (%p66_p3), %v154_v0  ;;  %157 = vst [vmem:[%s5070_s26 + $0x4] sm:$0xf] (%p66_p3), %v156_v1  ;;  %v160_v3 = vld [vmem:[%s5066_s25 + $0x18] sm:$0xf] (%p66_p3) }
  0x15   : > { %v162_v4 = vld [vmem:[%s5066_s25 + $0x20] sm:$0xf]  ;;  %159 = vst [vmem:[%s5070_s26 + $0x8] sm:$0xf] %v158_v2  ;;  %161 = vst [vmem:[%s5070_s26 + $0xc] sm:$0xf] %v160_v3 }
  0x16   : > { %163 = vst [vmem:[%s5070_s26 + $0x10] sm:$0xf] %v162_v4  ;;  %v164_v5 = vld [vmem:[%s5066_s25 + $0x28] sm:$0xf]  ;;  %v166_v6 = vld [vmem:[%s5066_s25 + $0x30] sm:$0xf] }
  0x17   : > { %v168_v7 = vld [vmem:[%s5066_s25 + $0x38] sm:$0xf]  ;;  %165 = vst [vmem:[%s5070_s26 + $0x14] sm:$0xf] %v164_v5  ;;  %167 = vst [vmem:[%s5070_s26 + $0x18] sm:$0xf] %v166_v6 }
  0x18   : > { %169 = vst [vmem:[%s5070_s26 + $0x1c] sm:$0xf] %v168_v7  ;;  %v170_v8 = vld [vmem:[%s5066_s25 + $0x40] sm:$0xf]  ;;  %v172_v9 = vld [vmem:[%s5066_s25 + $0x48] sm:$0xf] }
  0x19   : > { %v174_v10 = vld [vmem:[%s5066_s25 + $0x50] sm:$0xf]  ;;  %171 = vst [vmem:[%s5070_s26 + $0x20] sm:$0xf] %v170_v8  ;;  %173 = vst [vmem:[%s5070_s26 + $0x24] sm:$0xf] %v172_v9 }
  0x1a   : > { %175 = vst [vmem:[%s5070_s26 + $0x28] sm:$0xf] %v174_v10  ;;  %v176_v11 = vld [vmem:[%s5066_s25 + $0x58] sm:$0xf]  ;;  %v178_v12 = vld [vmem:[%s5066_s25 + $0x60] sm:$0xf] }
  0x1b   : > { %v180_v13 = vld [vmem:[%s5066_s25 + $0x68] sm:$0xf]  ;;  %177 = vst [vmem:[%s5070_s26 + $0x2c] sm:$0xf] %v176_v11  ;;  %179 = vst [vmem:[%s5070_s26 + $0x30] sm:$0xf] %v178_v12 }
  0x1c   : > { %181 = vst [vmem:[%s5070_s26 + $0x34] sm:$0xf] %v180_v13  ;;  %v182_v14 = vld [vmem:[%s5066_s25 + $0x70] sm:$0xf]  ;;  %v184_v15 = vld [vmem:[%s5066_s25 + $0x78] sm:$0xf] }
  0x1d   : > { %v186_v16 = vld [vmem:[%s5066_s25 + $0x80] sm:$0xf]  ;;  %183 = vst [vmem:[%s5070_s26 + $0x38] sm:$0xf] %v182_v14  ;;  %185 = vst [vmem:[%s5070_s26 + $0x3c] sm:$0xf] %v184_v15 }
  0x1e   : > { %187 = vst [vmem:[%s5070_s26 + $0x40] sm:$0xf] %v186_v16  ;;  %v188_v17 = vld [vmem:[%s5066_s25 + $0x88] sm:$0xf]  ;;  %v190_v18 = vld [vmem:[%s5066_s25 + $0x90] sm:$0xf] }
  0x1f   : > { %v192_v19 = vld [vmem:[%s5066_s25 + $0x98] sm:$0xf]  ;;  %189 = vst [vmem:[%s5070_s26 + $0x44] sm:$0xf] %v188_v17  ;;  %191 = vst [vmem:[%s5070_s26 + $0x48] sm:$0xf] %v190_v18 }
  0x20   : > { %193 = vst [vmem:[%s5070_s26 + $0x4c] sm:$0xf] %v192_v19  ;;  %v194_v20 = vld [vmem:[%s5066_s25 + $0xa0] sm:$0xf]  ;;  %v196_v21 = vld [vmem:[%s5066_s25 + $0xa8] sm:$0xf] }
  0x21   : > { %v198_v22 = vld [vmem:[%s5066_s25 + $0xb0] sm:$0xf]  ;;  %195 = vst [vmem:[%s5070_s26 + $0x50] sm:$0xf] %v194_v20  ;;  %197 = vst [vmem:[%s5070_s26 + $0x54] sm:$0xf] %v196_v21 }
  0x22   : > { %199 = vst [vmem:[%s5070_s26 + $0x58] sm:$0xf] %v198_v22  ;;  %v200_v23 = vld [vmem:[%s5066_s25 + $0xb8] sm:$0xf]  ;;  %v202_v24 = vld [vmem:[%s5066_s25 + $0xc0] sm:$0xf] }
  0x23   : > { %v204_v25 = vld [vmem:[%s5066_s25 + $0xc8] sm:$0xf]  ;;  %201 = vst [vmem:[%s5070_s26 + $0x5c] sm:$0xf] %v200_v23  ;;  %203 = vst [vmem:[%s5070_s26 + $0x60] sm:$0xf] %v202_v24 }
  0x24   : > { %205 = vst [vmem:[%s5070_s26 + $0x64] sm:$0xf] %v204_v25  ;;  %v206_v26 = vld [vmem:[%s5066_s25 + $0xd0] sm:$0xf]  ;;  %v208_v27 = vld [vmem:[%s5066_s25 + $0xd8] sm:$0xf] }
  0x25   : > { %v210_v28 = vld [vmem:[%s5066_s25 + $0xe0] sm:$0xf]  ;;  %207 = vst [vmem:[%s5070_s26 + $0x68] sm:$0xf] %v206_v26  ;;  %209 = vst [vmem:[%s5070_s26 + $0x6c] sm:$0xf] %v208_v27 }
  0x26   : > { %211 = vst [vmem:[%s5070_s26 + $0x70] sm:$0xf] %v210_v28  ;;  %v212_v29 = vld [vmem:[%s5066_s25 + $0xe8] sm:$0xf]  ;;  %v214_v30 = vld [vmem:[%s5066_s25 + $0xf0] sm:$0xf] }
  0x27   : > { %v216_v31 = vld [vmem:[%s5066_s25 + $0xf8] sm:$0xf]  ;;  %213 = vst [vmem:[%s5070_s26 + $0x74] sm:$0xf] %v212_v29  ;;  %215 = vst [vmem:[%s5070_s26 + $0x78] sm:$0xf] %v214_v30 }
  0x28   : > { %217 = vst [vmem:[%s5070_s26 + $0x7c] sm:$0xf] %v216_v31  ;;  %v218_v32 = vld [vmem:[%s5066_s25 + $0x100] sm:$0xf]  ;;  %v220_v33 = vld [vmem:[%s5066_s25 + $0x108] sm:$0xf] }
  0x29   : > { %v222_v34 = vld [vmem:[%s5066_s25 + $0x110] sm:$0xf]  ;;  %219 = vst [vmem:[%s5070_s26 + $0x80] sm:$0xf] %v218_v32  ;;  %221 = vst [vmem:[%s5070_s26 + $0x84] sm:$0xf] %v220_v33 }
  0x2a   : > { %223 = vst [vmem:[%s5070_s26 + $0x88] sm:$0xf] %v222_v34  ;;  %v224_v35 = vld [vmem:[%s5066_s25 + $0x118] sm:$0xf]  ;;  %v226_v36 = vld [vmem:[%s5066_s25 + $0x120] sm:$0xf] }
  0x2b   : > { %v228_v37 = vld [vmem:[%s5066_s25 + $0x128] sm:$0xf]  ;;  %225 = vst [vmem:[%s5070_s26 + $0x8c] sm:$0xf] %v224_v35  ;;  %227 = vst [vmem:[%s5070_s26 + $0x90] sm:$0xf] %v226_v36 }
  0x2c   : > { %229 = vst [vmem:[%s5070_s26 + $0x94] sm:$0xf] %v228_v37  ;;  %v230_v38 = vld [vmem:[%s5066_s25 + $0x130] sm:$0xf]  ;;  %v232_v39 = vld [vmem:[%s5066_s25 + $0x138] sm:$0xf] }
  0x2d   : > { %v234_v40 = vld [vmem:[%s5066_s25 + $0x140] sm:$0xf]  ;;  %231 = vst [vmem:[%s5070_s26 + $0x98] sm:$0xf] %v230_v38  ;;  %233 = vst [vmem:[%s5070_s26 + $0x9c] sm:$0xf] %v232_v39 }
  0x2e   : > { %235 = vst [vmem:[%s5070_s26 + $0xa0] sm:$0xf] %v234_v40  ;;  %v236_v41 = vld [vmem:[%s5066_s25 + $0x148] sm:$0xf]  ;;  %v238_v42 = vld [vmem:[%s5066_s25 + $0x150] sm:$0xf] }
  0x2f   : > { %v240_v43 = vld [vmem:[%s5066_s25 + $0x158] sm:$0xf]  ;;  %237 = vst [vmem:[%s5070_s26 + $0xa4] sm:$0xf] %v236_v41  ;;  %239 = vst [vmem:[%s5070_s26 + $0xa8] sm:$0xf] %v238_v42 }
  0x30   : > { %241 = vst [vmem:[%s5070_s26 + $0xac] sm:$0xf] %v240_v43  ;;  %v242_v44 = vld [vmem:[%s5066_s25 + $0x160] sm:$0xf]  ;;  %v244_v45 = vld [vmem:[%s5066_s25 + $0x168] sm:$0xf] }
  0x31   : > { %v246_v46 = vld [vmem:[%s5066_s25 + $0x170] sm:$0xf]  ;;  %243 = vst [vmem:[%s5070_s26 + $0xb0] sm:$0xf] %v242_v44  ;;  %245 = vst [vmem:[%s5070_s26 + $0xb4] sm:$0xf] %v244_v45 }
  0x32   : > { %247 = vst [vmem:[%s5070_s26 + $0xb8] sm:$0xf] %v246_v46  ;;  %v248_v47 = vld [vmem:[%s5066_s25 + $0x178] sm:$0xf]  ;;  %v250_v48 = vld [vmem:[%s5066_s25 + $0x180] sm:$0xf] }
  0x33   : > { %v252_v49 = vld [vmem:[%s5066_s25 + $0x188] sm:$0xf]  ;;  %249 = vst [vmem:[%s5070_s26 + $0xbc] sm:$0xf] %v248_v47  ;;  %251 = vst [vmem:[%s5070_s26 + $0xc0] sm:$0xf] %v250_v48 }
  0x34   : > { %253 = vst [vmem:[%s5070_s26 + $0xc4] sm:$0xf] %v252_v49  ;;  %v254_v50 = vld [vmem:[%s5066_s25 + $0x190] sm:$0xf]  ;;  %v256_v51 = vld [vmem:[%s5066_s25 + $0x198] sm:$0xf] }
  0x35   : > { %v258_v52 = vld [vmem:[%s5066_s25 + $0x1a0] sm:$0xf]  ;;  %255 = vst [vmem:[%s5070_s26 + $0xc8] sm:$0xf] %v254_v50  ;;  %257 = vst [vmem:[%s5070_s26 + $0xcc] sm:$0xf] %v256_v51 }
  0x36   : > { %259 = vst [vmem:[%s5070_s26 + $0xd0] sm:$0xf] %v258_v52  ;;  %v260_v53 = vld [vmem:[%s5066_s25 + $0x1a8] sm:$0xf]  ;;  %v262_v54 = vld [vmem:[%s5066_s25 + $0x1b0] sm:$0xf] }
  0x37   : > { %v264_v55 = vld [vmem:[%s5066_s25 + $0x1b8] sm:$0xf]  ;;  %261 = vst [vmem:[%s5070_s26 + $0xd4] sm:$0xf] %v260_v53  ;;  %263 = vst [vmem:[%s5070_s26 + $0xd8] sm:$0xf] %v262_v54 }
  0x38   : > { %265 = vst [vmem:[%s5070_s26 + $0xdc] sm:$0xf] %v264_v55  ;;  %v266_v56 = vld [vmem:[%s5066_s25 + $0x1c0] sm:$0xf]  ;;  %v268_v57 = vld [vmem:[%s5066_s25 + $0x1c8] sm:$0xf] }
  0x39   : > { %v270_v58 = vld [vmem:[%s5066_s25 + $0x1d0] sm:$0xf]  ;;  %267 = vst [vmem:[%s5070_s26 + $0xe0] sm:$0xf] %v266_v56  ;;  %269 = vst [vmem:[%s5070_s26 + $0xe4] sm:$0xf] %v268_v57 }
  0x3a   : > { %271 = vst [vmem:[%s5070_s26 + $0xe8] sm:$0xf] %v270_v58  ;;  %v272_v59 = vld [vmem:[%s5066_s25 + $0x1d8] sm:$0xf]  ;;  %v274_v60 = vld [vmem:[%s5066_s25 + $0x1e0] sm:$0xf] }
  0x3b   : > { %v276_v61 = vld [vmem:[%s5066_s25 + $0x1e8] sm:$0xf]  ;;  %273 = vst [vmem:[%s5070_s26 + $0xec] sm:$0xf] %v272_v59  ;;  %275 = vst [vmem:[%s5070_s26 + $0xf0] sm:$0xf] %v274_v60 }
  0x3c   : > { %277 = vst [vmem:[%s5070_s26 + $0xf4] sm:$0xf] %v276_v61  ;;  %v278_v62 = vld [vmem:[%s5066_s25 + $0x1f0] sm:$0xf]  ;;  %v280_v63 = vld [vmem:[%s5066_s25 + $0x1f8] sm:$0xf] }
  0x3d   : > { %v282_v0 = vld [vmem:[%s5066_s25 + $0x200] sm:$0xf]  ;;  %279 = vst [vmem:[%s5070_s26 + $0xf8] sm:$0xf] %v278_v62  ;;  %281 = vst [vmem:[%s5070_s26 + $0xfc] sm:$0xf] %v280_v63 }
  0x3e   : > { %283 = vst [vmem:[%s5070_s26 + $0x100] sm:$0xf] %v282_v0  ;;  %v284_v1 = vld [vmem:[%s5066_s25 + $0x208] sm:$0xf]  ;;  %v286_v2 = vld [vmem:[%s5066_s25 + $0x210] sm:$0xf] }
  0x3f   : > { %v288_v3 = vld [vmem:[%s5066_s25 + $0x218] sm:$0xf]  ;;  %285 = vst [vmem:[%s5070_s26 + $0x104] sm:$0xf] %v284_v1  ;;  %287 = vst [vmem:[%s5070_s26 + $0x108] sm:$0xf] %v286_v2 }
  0x40   : > { %289 = vst [vmem:[%s5070_s26 + $0x10c] sm:$0xf] %v288_v3  ;;  %v290_v4 = vld [vmem:[%s5066_s25 + $0x220] sm:$0xf]  ;;  %v292_v5 = vld [vmem:[%s5066_s25 + $0x228] sm:$0xf] }
  0x41   : > { %v294_v6 = vld [vmem:[%s5066_s25 + $0x230] sm:$0xf]  ;;  %291 = vst [vmem:[%s5070_s26 + $0x110] sm:$0xf] %v290_v4  ;;  %293 = vst [vmem:[%s5070_s26 + $0x114] sm:$0xf] %v292_v5 }
  0x42   : > { %295 = vst [vmem:[%s5070_s26 + $0x118] sm:$0xf] %v294_v6  ;;  %v296_v7 = vld [vmem:[%s5066_s25 + $0x238] sm:$0xf]  ;;  %v298_v8 = vld [vmem:[%s5066_s25 + $0x240] sm:$0xf] }
  0x43   : > { %v300_v9 = vld [vmem:[%s5066_s25 + $0x248] sm:$0xf]  ;;  %297 = vst [vmem:[%s5070_s26 + $0x11c] sm:$0xf] %v296_v7  ;;  %299 = vst [vmem:[%s5070_s26 + $0x120] sm:$0xf] %v298_v8 }
  0x44   : > { %301 = vst [vmem:[%s5070_s26 + $0x124] sm:$0xf] %v300_v9  ;;  %v302_v10 = vld [vmem:[%s5066_s25 + $0x250] sm:$0xf]  ;;  %v304_v11 = vld [vmem:[%s5066_s25 + $0x258] sm:$0xf] }
  0x45   : > { %v306_v12 = vld [vmem:[%s5066_s25 + $0x260] sm:$0xf]  ;;  %303 = vst [vmem:[%s5070_s26 + $0x128] sm:$0xf] %v302_v10  ;;  %305 = vst [vmem:[%s5070_s26 + $0x12c] sm:$0xf] %v304_v11 }
  0x46   : > { %307 = vst [vmem:[%s5070_s26 + $0x130] sm:$0xf] %v306_v12  ;;  %v308_v13 = vld [vmem:[%s5066_s25 + $0x268] sm:$0xf]  ;;  %v310_v14 = vld [vmem:[%s5066_s25 + $0x270] sm:$0xf] }
  0x47   : > { %v312_v15 = vld [vmem:[%s5066_s25 + $0x278] sm:$0xf]  ;;  %309 = vst [vmem:[%s5070_s26 + $0x134] sm:$0xf] %v308_v13  ;;  %311 = vst [vmem:[%s5070_s26 + $0x138] sm:$0xf] %v310_v14 }
  0x48   : > { %313 = vst [vmem:[%s5070_s26 + $0x13c] sm:$0xf] %v312_v15  ;;  %v314_v16 = vld [vmem:[%s5066_s25 + $0x280] sm:$0xf]  ;;  %v316_v17 = vld [vmem:[%s5066_s25 + $0x288] sm:$0xf] }
  0x49   : > { %v318_v18 = vld [vmem:[%s5066_s25 + $0x290] sm:$0xf]  ;;  %315 = vst [vmem:[%s5070_s26 + $0x140] sm:$0xf] %v314_v16  ;;  %317 = vst [vmem:[%s5070_s26 + $0x144] sm:$0xf] %v316_v17 }
  0x4a   : > { %319 = vst [vmem:[%s5070_s26 + $0x148] sm:$0xf] %v318_v18  ;;  %v320_v19 = vld [vmem:[%s5066_s25 + $0x298] sm:$0xf]  ;;  %v322_v20 = vld [vmem:[%s5066_s25 + $0x2a0] sm:$0xf] }
  0x4b   : > { %v324_v21 = vld [vmem:[%s5066_s25 + $0x2a8] sm:$0xf]  ;;  %321 = vst [vmem:[%s5070_s26 + $0x14c] sm:$0xf] %v320_v19  ;;  %323 = vst [vmem:[%s5070_s26 + $0x150] sm:$0xf] %v322_v20 }
  0x4c   : > { %325 = vst [vmem:[%s5070_s26 + $0x154] sm:$0xf] %v324_v21  ;;  %v326_v22 = vld [vmem:[%s5066_s25 + $0x2b0] sm:$0xf]  ;;  %v328_v23 = vld [vmem:[%s5066_s25 + $0x2b8] sm:$0xf] }
  0x4d   : > { %v330_v24 = vld [vmem:[%s5066_s25 + $0x2c0] sm:$0xf]  ;;  %327 = vst [vmem:[%s5070_s26 + $0x158] sm:$0xf] %v326_v22  ;;  %329 = vst [vmem:[%s5070_s26 + $0x15c] sm:$0xf] %v328_v23 }
  0x4e   : > { %331 = vst [vmem:[%s5070_s26 + $0x160] sm:$0xf] %v330_v24  ;;  %v332_v25 = vld [vmem:[%s5066_s25 + $0x2c8] sm:$0xf]  ;;  %v334_v26 = vld [vmem:[%s5066_s25 + $0x2d0] sm:$0xf] }
  0x4f   : > { %v336_v27 = vld [vmem:[%s5066_s25 + $0x2d8] sm:$0xf]  ;;  %333 = vst [vmem:[%s5070_s26 + $0x164] sm:$0xf] %v332_v25  ;;  %335 = vst [vmem:[%s5070_s26 + $0x168] sm:$0xf] %v334_v26 }
  0x50   : > { %337 = vst [vmem:[%s5070_s26 + $0x16c] sm:$0xf] %v336_v27  ;;  %v338_v28 = vld [vmem:[%s5066_s25 + $0x2e0] sm:$0xf]  ;;  %v340_v29 = vld [vmem:[%s5066_s25 + $0x2e8] sm:$0xf] }
  0x51   : > { %v342_v30 = vld [vmem:[%s5066_s25 + $0x2f0] sm:$0xf]  ;;  %339 = vst [vmem:[%s5070_s26 + $0x170] sm:$0xf] %v338_v28  ;;  %341 = vst [vmem:[%s5070_s26 + $0x174] sm:$0xf] %v340_v29 }
  0x52   : > { %343 = vst [vmem:[%s5070_s26 + $0x178] sm:$0xf] %v342_v30  ;;  %v344_v31 = vld [vmem:[%s5066_s25 + $0x2f8] sm:$0xf]  ;;  %v346_v32 = vld [vmem:[%s5066_s25 + $0x300] sm:$0xf] }
  0x53   : > { %v348_v33 = vld [vmem:[%s5066_s25 + $0x308] sm:$0xf]  ;;  %345 = vst [vmem:[%s5070_s26 + $0x17c] sm:$0xf] %v344_v31  ;;  %347 = vst [vmem:[%s5070_s26 + $0x180] sm:$0xf] %v346_v32 }
  0x54   : > { %349 = vst [vmem:[%s5070_s26 + $0x184] sm:$0xf] %v348_v33  ;;  %v350_v34 = vld [vmem:[%s5066_s25 + $0x310] sm:$0xf]  ;;  %v352_v35 = vld [vmem:[%s5066_s25 + $0x318] sm:$0xf] }
  0x55   : > { %v354_v36 = vld [vmem:[%s5066_s25 + $0x320] sm:$0xf]  ;;  %351 = vst [vmem:[%s5070_s26 + $0x188] sm:$0xf] %v350_v34  ;;  %353 = vst [vmem:[%s5070_s26 + $0x18c] sm:$0xf] %v352_v35 }
  0x56   : > { %355 = vst [vmem:[%s5070_s26 + $0x190] sm:$0xf] %v354_v36  ;;  %v356_v37 = vld [vmem:[%s5066_s25 + $0x328] sm:$0xf]  ;;  %v358_v38 = vld [vmem:[%s5066_s25 + $0x330] sm:$0xf] }
  0x57   : > { %v360_v39 = vld [vmem:[%s5066_s25 + $0x338] sm:$0xf]  ;;  %357 = vst [vmem:[%s5070_s26 + $0x194] sm:$0xf] %v356_v37  ;;  %359 = vst [vmem:[%s5070_s26 + $0x198] sm:$0xf] %v358_v38 }
  0x58   : > { %361 = vst [vmem:[%s5070_s26 + $0x19c] sm:$0xf] %v360_v39  ;;  %v362_v40 = vld [vmem:[%s5066_s25 + $0x340] sm:$0xf]  ;;  %v364_v41 = vld [vmem:[%s5066_s25 + $0x348] sm:$0xf] }
  0x59   : > { %v366_v42 = vld [vmem:[%s5066_s25 + $0x350] sm:$0xf]  ;;  %363 = vst [vmem:[%s5070_s26 + $0x1a0] sm:$0xf] %v362_v40  ;;  %365 = vst [vmem:[%s5070_s26 + $0x1a4] sm:$0xf] %v364_v41 }
  0x5a   : > { %367 = vst [vmem:[%s5070_s26 + $0x1a8] sm:$0xf] %v366_v42  ;;  %v368_v43 = vld [vmem:[%s5066_s25 + $0x358] sm:$0xf]  ;;  %v370_v44 = vld [vmem:[%s5066_s25 + $0x360] sm:$0xf] }
  0x5b   : > { %v372_v45 = vld [vmem:[%s5066_s25 + $0x368] sm:$0xf]  ;;  %369 = vst [vmem:[%s5070_s26 + $0x1ac] sm:$0xf] %v368_v43  ;;  %371 = vst [vmem:[%s5070_s26 + $0x1b0] sm:$0xf] %v370_v44 }
  0x5c   : > { %373 = vst [vmem:[%s5070_s26 + $0x1b4] sm:$0xf] %v372_v45  ;;  %v374_v46 = vld [vmem:[%s5066_s25 + $0x370] sm:$0xf]  ;;  %v376_v47 = vld [vmem:[%s5066_s25 + $0x378] sm:$0xf] }
  0x5d   : > { %v378_v48 = vld [vmem:[%s5066_s25 + $0x380] sm:$0xf]  ;;  %375 = vst [vmem:[%s5070_s26 + $0x1b8] sm:$0xf] %v374_v46  ;;  %377 = vst [vmem:[%s5070_s26 + $0x1bc] sm:$0xf] %v376_v47 }
  0x5e   : > { %379 = vst [vmem:[%s5070_s26 + $0x1c0] sm:$0xf] %v378_v48  ;;  %v380_v49 = vld [vmem:[%s5066_s25 + $0x388] sm:$0xf]  ;;  %v382_v50 = vld [vmem:[%s5066_s25 + $0x390] sm:$0xf] }
  0x5f   : > { %v384_v51 = vld [vmem:[%s5066_s25 + $0x398] sm:$0xf]  ;;  %381 = vst [vmem:[%s5070_s26 + $0x1c4] sm:$0xf] %v380_v49  ;;  %383 = vst [vmem:[%s5070_s26 + $0x1c8] sm:$0xf] %v382_v50 }
  0x60   : > { %385 = vst [vmem:[%s5070_s26 + $0x1cc] sm:$0xf] %v384_v51  ;;  %v386_v52 = vld [vmem:[%s5066_s25 + $0x3a0] sm:$0xf]  ;;  %v388_v53 = vld [vmem:[%s5066_s25 + $0x3a8] sm:$0xf] }
  0x61   : > { %v390_v54 = vld [vmem:[%s5066_s25 + $0x3b0] sm:$0xf]  ;;  %387 = vst [vmem:[%s5070_s26 + $0x1d0] sm:$0xf] %v386_v52  ;;  %389 = vst [vmem:[%s5070_s26 + $0x1d4] sm:$0xf] %v388_v53 }
  0x62   : > { %391 = vst [vmem:[%s5070_s26 + $0x1d8] sm:$0xf] %v390_v54  ;;  %v392_v55 = vld [vmem:[%s5066_s25 + $0x3b8] sm:$0xf]  ;;  %v394_v56 = vld [vmem:[%s5066_s25 + $0x3c0] sm:$0xf] }
  0x63   : > { %v396_v57 = vld [vmem:[%s5066_s25 + $0x3c8] sm:$0xf]  ;;  %393 = vst [vmem:[%s5070_s26 + $0x1dc] sm:$0xf] %v392_v55  ;;  %395 = vst [vmem:[%s5070_s26 + $0x1e0] sm:$0xf] %v394_v56 }
  0x64   : > { %397 = vst [vmem:[%s5070_s26 + $0x1e4] sm:$0xf] %v396_v57  ;;  %v398_v58 = vld [vmem:[%s5066_s25 + $0x3d0] sm:$0xf]  ;;  %v400_v59 = vld [vmem:[%s5066_s25 + $0x3d8] sm:$0xf] }
  0x65   : > { %v402_v60 = vld [vmem:[%s5066_s25 + $0x3e0] sm:$0xf]  ;;  %399 = vst [vmem:[%s5070_s26 + $0x1e8] sm:$0xf] %v398_v58  ;;  %401 = vst [vmem:[%s5070_s26 + $0x1ec] sm:$0xf] %v400_v59 }
  0x66   : > { %403 = vst [vmem:[%s5070_s26 + $0x1f0] sm:$0xf] %v402_v60  ;;  %v404_v61 = vld [vmem:[%s5066_s25 + $0x3e8] sm:$0xf]  ;;  %v406_v62 = vld [vmem:[%s5066_s25 + $0x3f0] sm:$0xf] }
  0x67   : > { %v408_v63 = vld [vmem:[%s5066_s25 + $0x3f8] sm:$0xf]  ;;  %405 = vst [vmem:[%s5070_s26 + $0x1f4] sm:$0xf] %v404_v61  ;;  %407 = vst [vmem:[%s5070_s26 + $0x1f8] sm:$0xf] %v406_v62 }
  0x68   : > { %409 = vst [vmem:[%s5070_s26 + $0x1fc] sm:$0xf] %v408_v63  ;;  %v410_v0 = vld [vmem:[%s5066_s25 + $0x400] sm:$0xf]  ;;  %v412_v1 = vld [vmem:[%s5066_s25 + $0x408] sm:$0xf] }
  0x69   : > { %v414_v2 = vld [vmem:[%s5066_s25 + $0x410] sm:$0xf]  ;;  %411 = vst [vmem:[%s5070_s26 + $0x200] sm:$0xf] %v410_v0  ;;  %413 = vst [vmem:[%s5070_s26 + $0x204] sm:$0xf] %v412_v1 }
  0x6a   : > { %415 = vst [vmem:[%s5070_s26 + $0x208] sm:$0xf] %v414_v2  ;;  %v416_v3 = vld [vmem:[%s5066_s25 + $0x418] sm:$0xf]  ;;  %v418_v4 = vld [vmem:[%s5066_s25 + $0x420] sm:$0xf] }
  0x6b   : > { %v420_v5 = vld [vmem:[%s5066_s25 + $0x428] sm:$0xf]  ;;  %417 = vst [vmem:[%s5070_s26 + $0x20c] sm:$0xf] %v416_v3  ;;  %419 = vst [vmem:[%s5070_s26 + $0x210] sm:$0xf] %v418_v4 }
  0x6c   : > { %421 = vst [vmem:[%s5070_s26 + $0x214] sm:$0xf] %v420_v5  ;;  %v422_v6 = vld [vmem:[%s5066_s25 + $0x430] sm:$0xf]  ;;  %v424_v7 = vld [vmem:[%s5066_s25 + $0x438] sm:$0xf] }
  0x6d   : > { %v426_v8 = vld [vmem:[%s5066_s25 + $0x440] sm:$0xf]  ;;  %423 = vst [vmem:[%s5070_s26 + $0x218] sm:$0xf] %v422_v6  ;;  %425 = vst [vmem:[%s5070_s26 + $0x21c] sm:$0xf] %v424_v7 }
  0x6e   : > { %427 = vst [vmem:[%s5070_s26 + $0x220] sm:$0xf] %v426_v8  ;;  %v428_v9 = vld [vmem:[%s5066_s25 + $0x448] sm:$0xf]  ;;  %v430_v10 = vld [vmem:[%s5066_s25 + $0x450] sm:$0xf] }
  0x6f   : > { %v432_v11 = vld [vmem:[%s5066_s25 + $0x458] sm:$0xf]  ;;  %429 = vst [vmem:[%s5070_s26 + $0x224] sm:$0xf] %v428_v9  ;;  %431 = vst [vmem:[%s5070_s26 + $0x228] sm:$0xf] %v430_v10 }
  0x70   : > { %433 = vst [vmem:[%s5070_s26 + $0x22c] sm:$0xf] %v432_v11  ;;  %v434_v12 = vld [vmem:[%s5066_s25 + $0x460] sm:$0xf]  ;;  %v436_v13 = vld [vmem:[%s5066_s25 + $0x468] sm:$0xf] }
  0x71   : > { %v438_v14 = vld [vmem:[%s5066_s25 + $0x470] sm:$0xf]  ;;  %435 = vst [vmem:[%s5070_s26 + $0x230] sm:$0xf] %v434_v12  ;;  %437 = vst [vmem:[%s5070_s26 + $0x234] sm:$0xf] %v436_v13 }
  0x72   : > { %439 = vst [vmem:[%s5070_s26 + $0x238] sm:$0xf] %v438_v14  ;;  %v440_v15 = vld [vmem:[%s5066_s25 + $0x478] sm:$0xf]  ;;  %v442_v16 = vld [vmem:[%s5066_s25 + $0x480] sm:$0xf] }
  0x73   : > { %v444_v17 = vld [vmem:[%s5066_s25 + $0x488] sm:$0xf]  ;;  %441 = vst [vmem:[%s5070_s26 + $0x23c] sm:$0xf] %v440_v15  ;;  %443 = vst [vmem:[%s5070_s26 + $0x240] sm:$0xf] %v442_v16 }
  0x74   : > { %445 = vst [vmem:[%s5070_s26 + $0x244] sm:$0xf] %v444_v17  ;;  %v446_v18 = vld [vmem:[%s5066_s25 + $0x490] sm:$0xf]  ;;  %v448_v19 = vld [vmem:[%s5066_s25 + $0x498] sm:$0xf] }
  0x75   : > { %v450_v20 = vld [vmem:[%s5066_s25 + $0x4a0] sm:$0xf]  ;;  %447 = vst [vmem:[%s5070_s26 + $0x248] sm:$0xf] %v446_v18  ;;  %449 = vst [vmem:[%s5070_s26 + $0x24c] sm:$0xf] %v448_v19 }
  0x76   : > { %451 = vst [vmem:[%s5070_s26 + $0x250] sm:$0xf] %v450_v20  ;;  %v452_v21 = vld [vmem:[%s5066_s25 + $0x4a8] sm:$0xf]  ;;  %v454_v22 = vld [vmem:[%s5066_s25 + $0x4b0] sm:$0xf] }
  0x77   : > { %v456_v23 = vld [vmem:[%s5066_s25 + $0x4b8] sm:$0xf]  ;;  %453 = vst [vmem:[%s5070_s26 + $0x254] sm:$0xf] %v452_v21  ;;  %455 = vst [vmem:[%s5070_s26 + $0x258] sm:$0xf] %v454_v22 }
  0x78   : > { %457 = vst [vmem:[%s5070_s26 + $0x25c] sm:$0xf] %v456_v23  ;;  %v458_v24 = vld [vmem:[%s5066_s25 + $0x4c0] sm:$0xf]  ;;  %v460_v25 = vld [vmem:[%s5066_s25 + $0x4c8] sm:$0xf] }
  0x79   : > { %v462_v26 = vld [vmem:[%s5066_s25 + $0x4d0] sm:$0xf]  ;;  %459 = vst [vmem:[%s5070_s26 + $0x260] sm:$0xf] %v458_v24  ;;  %461 = vst [vmem:[%s5070_s26 + $0x264] sm:$0xf] %v460_v25 }
  0x7a   : > { %463 = vst [vmem:[%s5070_s26 + $0x268] sm:$0xf] %v462_v26  ;;  %v464_v27 = vld [vmem:[%s5066_s25 + $0x4d8] sm:$0xf]  ;;  %v466_v28 = vld [vmem:[%s5066_s25 + $0x4e0] sm:$0xf] }
  0x7b   : > { %v468_v29 = vld [vmem:[%s5066_s25 + $0x4e8] sm:$0xf]  ;;  %465 = vst [vmem:[%s5070_s26 + $0x26c] sm:$0xf] %v464_v27  ;;  %467 = vst [vmem:[%s5070_s26 + $0x270] sm:$0xf] %v466_v28 }
  0x7c   : > { %469 = vst [vmem:[%s5070_s26 + $0x274] sm:$0xf] %v468_v29  ;;  %v470_v30 = vld [vmem:[%s5066_s25 + $0x4f0] sm:$0xf]  ;;  %v472_v31 = vld [vmem:[%s5066_s25 + $0x4f8] sm:$0xf] }
  0x7d   : > { %v474_v32 = vld [vmem:[%s5066_s25 + $0x500] sm:$0xf]  ;;  %471 = vst [vmem:[%s5070_s26 + $0x278] sm:$0xf] %v470_v30  ;;  %473 = vst [vmem:[%s5070_s26 + $0x27c] sm:$0xf] %v472_v31 }
  0x7e   : > { %475 = vst [vmem:[%s5070_s26 + $0x280] sm:$0xf] %v474_v32  ;;  %v476_v33 = vld [vmem:[%s5066_s25 + $0x508] sm:$0xf]  ;;  %v478_v34 = vld [vmem:[%s5066_s25 + $0x510] sm:$0xf] }
  0x7f   : > { %v480_v35 = vld [vmem:[%s5066_s25 + $0x518] sm:$0xf]  ;;  %477 = vst [vmem:[%s5070_s26 + $0x284] sm:$0xf] %v476_v33  ;;  %479 = vst [vmem:[%s5070_s26 + $0x288] sm:$0xf] %v478_v34 }
  0x80   : > { %481 = vst [vmem:[%s5070_s26 + $0x28c] sm:$0xf] %v480_v35  ;;  %v482_v36 = vld [vmem:[%s5066_s25 + $0x520] sm:$0xf]  ;;  %v484_v37 = vld [vmem:[%s5066_s25 + $0x528] sm:$0xf] }
  0x81   : > { %v486_v38 = vld [vmem:[%s5066_s25 + $0x530] sm:$0xf]  ;;  %483 = vst [vmem:[%s5070_s26 + $0x290] sm:$0xf] %v482_v36  ;;  %485 = vst [vmem:[%s5070_s26 + $0x294] sm:$0xf] %v484_v37 }
  0x82   : > { %487 = vst [vmem:[%s5070_s26 + $0x298] sm:$0xf] %v486_v38  ;;  %v488_v39 = vld [vmem:[%s5066_s25 + $0x538] sm:$0xf]  ;;  %v490_v40 = vld [vmem:[%s5066_s25 + $0x540] sm:$0xf] }
  0x83   : > { %v492_v41 = vld [vmem:[%s5066_s25 + $0x548] sm:$0xf]  ;;  %489 = vst [vmem:[%s5070_s26 + $0x29c] sm:$0xf] %v488_v39  ;;  %491 = vst [vmem:[%s5070_s26 + $0x2a0] sm:$0xf] %v490_v40 }
  0x84   : > { %493 = vst [vmem:[%s5070_s26 + $0x2a4] sm:$0xf] %v492_v41  ;;  %v494_v42 = vld [vmem:[%s5066_s25 + $0x550] sm:$0xf]  ;;  %v496_v43 = vld [vmem:[%s5066_s25 + $0x558] sm:$0xf] }
  0x85   : > { %v498_v44 = vld [vmem:[%s5066_s25 + $0x560] sm:$0xf]  ;;  %495 = vst [vmem:[%s5070_s26 + $0x2a8] sm:$0xf] %v494_v42  ;;  %497 = vst [vmem:[%s5070_s26 + $0x2ac] sm:$0xf] %v496_v43 }
  0x86   : > { %499 = vst [vmem:[%s5070_s26 + $0x2b0] sm:$0xf] %v498_v44  ;;  %v500_v45 = vld [vmem:[%s5066_s25 + $0x568] sm:$0xf]  ;;  %v502_v46 = vld [vmem:[%s5066_s25 + $0x570] sm:$0xf] }
  0x87   : > { %v504_v47 = vld [vmem:[%s5066_s25 + $0x578] sm:$0xf]  ;;  %501 = vst [vmem:[%s5070_s26 + $0x2b4] sm:$0xf] %v500_v45  ;;  %503 = vst [vmem:[%s5070_s26 + $0x2b8] sm:$0xf] %v502_v46 }
  0x88   : > { %505 = vst [vmem:[%s5070_s26 + $0x2bc] sm:$0xf] %v504_v47  ;;  %v506_v48 = vld [vmem:[%s5066_s25 + $0x580] sm:$0xf]  ;;  %v508_v49 = vld [vmem:[%s5066_s25 + $0x588] sm:$0xf] }
  0x89   : > { %v510_v50 = vld [vmem:[%s5066_s25 + $0x590] sm:$0xf]  ;;  %507 = vst [vmem:[%s5070_s26 + $0x2c0] sm:$0xf] %v506_v48  ;;  %509 = vst [vmem:[%s5070_s26 + $0x2c4] sm:$0xf] %v508_v49 }
  0x8a   : > { %511 = vst [vmem:[%s5070_s26 + $0x2c8] sm:$0xf] %v510_v50  ;;  %v512_v51 = vld [vmem:[%s5066_s25 + $0x598] sm:$0xf]  ;;  %v514_v52 = vld [vmem:[%s5066_s25 + $0x5a0] sm:$0xf] }
  0x8b   : > { %v516_v53 = vld [vmem:[%s5066_s25 + $0x5a8] sm:$0xf]  ;;  %513 = vst [vmem:[%s5070_s26 + $0x2cc] sm:$0xf] %v512_v51  ;;  %515 = vst [vmem:[%s5070_s26 + $0x2d0] sm:$0xf] %v514_v52 }
  0x8c   : > { %517 = vst [vmem:[%s5070_s26 + $0x2d4] sm:$0xf] %v516_v53  ;;  %v518_v54 = vld [vmem:[%s5066_s25 + $0x5b0] sm:$0xf]  ;;  %v520_v55 = vld [vmem:[%s5066_s25 + $0x5b8] sm:$0xf] }
  0x8d   : > { %v522_v56 = vld [vmem:[%s5066_s25 + $0x5c0] sm:$0xf]  ;;  %519 = vst [vmem:[%s5070_s26 + $0x2d8] sm:$0xf] %v518_v54  ;;  %521 = vst [vmem:[%s5070_s26 + $0x2dc] sm:$0xf] %v520_v55 }
  0x8e   : > { %523 = vst [vmem:[%s5070_s26 + $0x2e0] sm:$0xf] %v522_v56  ;;  %v524_v57 = vld [vmem:[%s5066_s25 + $0x5c8] sm:$0xf]  ;;  %v526_v58 = vld [vmem:[%s5066_s25 + $0x5d0] sm:$0xf] }
  0x8f   : > { %v528_v59 = vld [vmem:[%s5066_s25 + $0x5d8] sm:$0xf]  ;;  %525 = vst [vmem:[%s5070_s26 + $0x2e4] sm:$0xf] %v524_v57  ;;  %527 = vst [vmem:[%s5070_s26 + $0x2e8] sm:$0xf] %v526_v58 }
  0x90   : > { %529 = vst [vmem:[%s5070_s26 + $0x2ec] sm:$0xf] %v528_v59  ;;  %v530_v60 = vld [vmem:[%s5066_s25 + $0x5e0] sm:$0xf]  ;;  %v532_v61 = vld [vmem:[%s5066_s25 + $0x5e8] sm:$0xf] }
  0x91   : > { %v534_v62 = vld [vmem:[%s5066_s25 + $0x5f0] sm:$0xf]  ;;  %531 = vst [vmem:[%s5070_s26 + $0x2f0] sm:$0xf] %v530_v60  ;;  %533 = vst [vmem:[%s5070_s26 + $0x2f4] sm:$0xf] %v532_v61 }
  0x92   : > { %535 = vst [vmem:[%s5070_s26 + $0x2f8] sm:$0xf] %v534_v62  ;;  %v536_v63 = vld [vmem:[%s5066_s25 + $0x5f8] sm:$0xf]  ;;  %v538_v0 = vld [vmem:[%s5066_s25 + $0x600] sm:$0xf] }
  0x93   : > { %v540_v1 = vld [vmem:[%s5066_s25 + $0x608] sm:$0xf]  ;;  %537 = vst [vmem:[%s5070_s26 + $0x2fc] sm:$0xf] %v536_v63  ;;  %539 = vst [vmem:[%s5070_s26 + $0x300] sm:$0xf] %v538_v0 }
  0x94   : > { %541 = vst [vmem:[%s5070_s26 + $0x304] sm:$0xf] %v540_v1  ;;  %v542_v2 = vld [vmem:[%s5066_s25 + $0x610] sm:$0xf]  ;;  %v544_v3 = vld [vmem:[%s5066_s25 + $0x618] sm:$0xf] }
  0x95   : > { %v546_v4 = vld [vmem:[%s5066_s25 + $0x620] sm:$0xf]  ;;  %543 = vst [vmem:[%s5070_s26 + $0x308] sm:$0xf] %v542_v2  ;;  %545 = vst [vmem:[%s5070_s26 + $0x30c] sm:$0xf] %v544_v3 }
  0x96   : > { %547 = vst [vmem:[%s5070_s26 + $0x310] sm:$0xf] %v546_v4  ;;  %v548_v5 = vld [vmem:[%s5066_s25 + $0x628] sm:$0xf]  ;;  %v550_v6 = vld [vmem:[%s5066_s25 + $0x630] sm:$0xf] }
  0x97   : > { %v552_v7 = vld [vmem:[%s5066_s25 + $0x638] sm:$0xf]  ;;  %549 = vst [vmem:[%s5070_s26 + $0x314] sm:$0xf] %v548_v5  ;;  %551 = vst [vmem:[%s5070_s26 + $0x318] sm:$0xf] %v550_v6 }
  0x98   : > { %553 = vst [vmem:[%s5070_s26 + $0x31c] sm:$0xf] %v552_v7  ;;  %v554_v8 = vld [vmem:[%s5066_s25 + $0x640] sm:$0xf]  ;;  %v556_v9 = vld [vmem:[%s5066_s25 + $0x648] sm:$0xf] }
  0x99   : > { %v558_v10 = vld [vmem:[%s5066_s25 + $0x650] sm:$0xf]  ;;  %555 = vst [vmem:[%s5070_s26 + $0x320] sm:$0xf] %v554_v8  ;;  %557 = vst [vmem:[%s5070_s26 + $0x324] sm:$0xf] %v556_v9 }
  0x9a   : > { %559 = vst [vmem:[%s5070_s26 + $0x328] sm:$0xf] %v558_v10  ;;  %v560_v11 = vld [vmem:[%s5066_s25 + $0x658] sm:$0xf]  ;;  %v562_v12 = vld [vmem:[%s5066_s25 + $0x660] sm:$0xf] }
  0x9b   : > { %v564_v13 = vld [vmem:[%s5066_s25 + $0x668] sm:$0xf]  ;;  %561 = vst [vmem:[%s5070_s26 + $0x32c] sm:$0xf] %v560_v11  ;;  %563 = vst [vmem:[%s5070_s26 + $0x330] sm:$0xf] %v562_v12 }
  0x9c   : > { %565 = vst [vmem:[%s5070_s26 + $0x334] sm:$0xf] %v564_v13  ;;  %v566_v14 = vld [vmem:[%s5066_s25 + $0x670] sm:$0xf]  ;;  %v568_v15 = vld [vmem:[%s5066_s25 + $0x678] sm:$0xf] }
  0x9d   : > { %v570_v16 = vld [vmem:[%s5066_s25 + $0x680] sm:$0xf]  ;;  %567 = vst [vmem:[%s5070_s26 + $0x338] sm:$0xf] %v566_v14  ;;  %569 = vst [vmem:[%s5070_s26 + $0x33c] sm:$0xf] %v568_v15 }
  0x9e   : > { %571 = vst [vmem:[%s5070_s26 + $0x340] sm:$0xf] %v570_v16  ;;  %v572_v17 = vld [vmem:[%s5066_s25 + $0x688] sm:$0xf]  ;;  %v574_v18 = vld [vmem:[%s5066_s25 + $0x690] sm:$0xf] }
  0x9f   : > { %v576_v19 = vld [vmem:[%s5066_s25 + $0x698] sm:$0xf]  ;;  %573 = vst [vmem:[%s5070_s26 + $0x344] sm:$0xf] %v572_v17  ;;  %575 = vst [vmem:[%s5070_s26 + $0x348] sm:$0xf] %v574_v18 }
  0xa0   : > { %577 = vst [vmem:[%s5070_s26 + $0x34c] sm:$0xf] %v576_v19  ;;  %v578_v20 = vld [vmem:[%s5066_s25 + $0x6a0] sm:$0xf]  ;;  %v580_v21 = vld [vmem:[%s5066_s25 + $0x6a8] sm:$0xf] }
  0xa1   : > { %v582_v22 = vld [vmem:[%s5066_s25 + $0x6b0] sm:$0xf]  ;;  %579 = vst [vmem:[%s5070_s26 + $0x350] sm:$0xf] %v578_v20  ;;  %581 = vst [vmem:[%s5070_s26 + $0x354] sm:$0xf] %v580_v21 }
  0xa2   : > { %583 = vst [vmem:[%s5070_s26 + $0x358] sm:$0xf] %v582_v22  ;;  %v584_v23 = vld [vmem:[%s5066_s25 + $0x6b8] sm:$0xf]  ;;  %v586_v24 = vld [vmem:[%s5066_s25 + $0x6c0] sm:$0xf] }
  0xa3   : > { %v588_v25 = vld [vmem:[%s5066_s25 + $0x6c8] sm:$0xf]  ;;  %585 = vst [vmem:[%s5070_s26 + $0x35c] sm:$0xf] %v584_v23  ;;  %587 = vst [vmem:[%s5070_s26 + $0x360] sm:$0xf] %v586_v24 }
  0xa4   : > { %589 = vst [vmem:[%s5070_s26 + $0x364] sm:$0xf] %v588_v25  ;;  %v590_v26 = vld [vmem:[%s5066_s25 + $0x6d0] sm:$0xf]  ;;  %v592_v27 = vld [vmem:[%s5066_s25 + $0x6d8] sm:$0xf] }
  0xa5   : > { %v594_v28 = vld [vmem:[%s5066_s25 + $0x6e0] sm:$0xf]  ;;  %591 = vst [vmem:[%s5070_s26 + $0x368] sm:$0xf] %v590_v26  ;;  %593 = vst [vmem:[%s5070_s26 + $0x36c] sm:$0xf] %v592_v27 }
  0xa6   : > { %595 = vst [vmem:[%s5070_s26 + $0x370] sm:$0xf] %v594_v28  ;;  %v596_v29 = vld [vmem:[%s5066_s25 + $0x6e8] sm:$0xf]  ;;  %v598_v30 = vld [vmem:[%s5066_s25 + $0x6f0] sm:$0xf] }
  0xa7   : > { %v600_v31 = vld [vmem:[%s5066_s25 + $0x6f8] sm:$0xf]  ;;  %597 = vst [vmem:[%s5070_s26 + $0x374] sm:$0xf] %v596_v29  ;;  %599 = vst [vmem:[%s5070_s26 + $0x378] sm:$0xf] %v598_v30 }
  0xa8   : > { %601 = vst [vmem:[%s5070_s26 + $0x37c] sm:$0xf] %v600_v31  ;;  %v602_v32 = vld [vmem:[%s5066_s25 + $0x700] sm:$0xf]  ;;  %v604_v33 = vld [vmem:[%s5066_s25 + $0x708] sm:$0xf] }
  0xa9   : > { %v606_v34 = vld [vmem:[%s5066_s25 + $0x710] sm:$0xf]  ;;  %603 = vst [vmem:[%s5070_s26 + $0x380] sm:$0xf] %v602_v32  ;;  %605 = vst [vmem:[%s5070_s26 + $0x384] sm:$0xf] %v604_v33 }
  0xaa   : > { %607 = vst [vmem:[%s5070_s26 + $0x388] sm:$0xf] %v606_v34  ;;  %v608_v35 = vld [vmem:[%s5066_s25 + $0x718] sm:$0xf]  ;;  %v610_v36 = vld [vmem:[%s5066_s25 + $0x720] sm:$0xf] }
  0xab   : > { %v612_v37 = vld [vmem:[%s5066_s25 + $0x728] sm:$0xf]  ;;  %609 = vst [vmem:[%s5070_s26 + $0x38c] sm:$0xf] %v608_v35  ;;  %611 = vst [vmem:[%s5070_s26 + $0x390] sm:$0xf] %v610_v36 }
  0xac   : > { %613 = vst [vmem:[%s5070_s26 + $0x394] sm:$0xf] %v612_v37  ;;  %v614_v38 = vld [vmem:[%s5066_s25 + $0x730] sm:$0xf]  ;;  %v616_v39 = vld [vmem:[%s5066_s25 + $0x738] sm:$0xf] }
  0xad   : > { %v618_v40 = vld [vmem:[%s5066_s25 + $0x740] sm:$0xf]  ;;  %615 = vst [vmem:[%s5070_s26 + $0x398] sm:$0xf] %v614_v38  ;;  %617 = vst [vmem:[%s5070_s26 + $0x39c] sm:$0xf] %v616_v39 }
  0xae   : > { %619 = vst [vmem:[%s5070_s26 + $0x3a0] sm:$0xf] %v618_v40  ;;  %v620_v41 = vld [vmem:[%s5066_s25 + $0x748] sm:$0xf]  ;;  %v622_v42 = vld [vmem:[%s5066_s25 + $0x750] sm:$0xf] }
  0xaf   : > { %v624_v43 = vld [vmem:[%s5066_s25 + $0x758] sm:$0xf]  ;;  %621 = vst [vmem:[%s5070_s26 + $0x3a4] sm:$0xf] %v620_v41  ;;  %623 = vst [vmem:[%s5070_s26 + $0x3a8] sm:$0xf] %v622_v42 }
  0xb0   : > { %625 = vst [vmem:[%s5070_s26 + $0x3ac] sm:$0xf] %v624_v43  ;;  %v626_v44 = vld [vmem:[%s5066_s25 + $0x760] sm:$0xf]  ;;  %v628_v45 = vld [vmem:[%s5066_s25 + $0x768] sm:$0xf] }
  0xb1   : > { %v630_v46 = vld [vmem:[%s5066_s25 + $0x770] sm:$0xf]  ;;  %627 = vst [vmem:[%s5070_s26 + $0x3b0] sm:$0xf] %v626_v44  ;;  %629 = vst [vmem:[%s5070_s26 + $0x3b4] sm:$0xf] %v628_v45 }
  0xb2   : > { %631 = vst [vmem:[%s5070_s26 + $0x3b8] sm:$0xf] %v630_v46  ;;  %v632_v47 = vld [vmem:[%s5066_s25 + $0x778] sm:$0xf]  ;;  %v634_v48 = vld [vmem:[%s5066_s25 + $0x780] sm:$0xf] }
  0xb3   : > { %v636_v49 = vld [vmem:[%s5066_s25 + $0x788] sm:$0xf]  ;;  %633 = vst [vmem:[%s5070_s26 + $0x3bc] sm:$0xf] %v632_v47  ;;  %635 = vst [vmem:[%s5070_s26 + $0x3c0] sm:$0xf] %v634_v48 }
  0xb4   : > { %637 = vst [vmem:[%s5070_s26 + $0x3c4] sm:$0xf] %v636_v49  ;;  %v638_v50 = vld [vmem:[%s5066_s25 + $0x790] sm:$0xf]  ;;  %v640_v51 = vld [vmem:[%s5066_s25 + $0x798] sm:$0xf] }
  0xb5   : > { %v642_v52 = vld [vmem:[%s5066_s25 + $0x7a0] sm:$0xf]  ;;  %639 = vst [vmem:[%s5070_s26 + $0x3c8] sm:$0xf] %v638_v50  ;;  %641 = vst [vmem:[%s5070_s26 + $0x3cc] sm:$0xf] %v640_v51 }
  0xb6   : > { %643 = vst [vmem:[%s5070_s26 + $0x3d0] sm:$0xf] %v642_v52  ;;  %v644_v53 = vld [vmem:[%s5066_s25 + $0x7a8] sm:$0xf]  ;;  %v646_v54 = vld [vmem:[%s5066_s25 + $0x7b0] sm:$0xf] }
  0xb7   : > { %v648_v55 = vld [vmem:[%s5066_s25 + $0x7b8] sm:$0xf]  ;;  %645 = vst [vmem:[%s5070_s26 + $0x3d4] sm:$0xf] %v644_v53  ;;  %647 = vst [vmem:[%s5070_s26 + $0x3d8] sm:$0xf] %v646_v54 }
  0xb8   : > { %649 = vst [vmem:[%s5070_s26 + $0x3dc] sm:$0xf] %v648_v55  ;;  %v650_v56 = vld [vmem:[%s5066_s25 + $0x7c0] sm:$0xf]  ;;  %v652_v57 = vld [vmem:[%s5066_s25 + $0x7c8] sm:$0xf] }
  0xb9   : > { %v654_v58 = vld [vmem:[%s5066_s25 + $0x7d0] sm:$0xf]  ;;  %651 = vst [vmem:[%s5070_s26 + $0x3e0] sm:$0xf] %v650_v56  ;;  %653 = vst [vmem:[%s5070_s26 + $0x3e4] sm:$0xf] %v652_v57 }
  0xba   : > { %655 = vst [vmem:[%s5070_s26 + $0x3e8] sm:$0xf] %v654_v58  ;;  %v656_v59 = vld [vmem:[%s5066_s25 + $0x7d8] sm:$0xf]  ;;  %v658_v60 = vld [vmem:[%s5066_s25 + $0x7e0] sm:$0xf] }
  0xbb   : > { %v660_v61 = vld [vmem:[%s5066_s25 + $0x7e8] sm:$0xf]  ;;  %657 = vst [vmem:[%s5070_s26 + $0x3ec] sm:$0xf] %v656_v59  ;;  %659 = vst [vmem:[%s5070_s26 + $0x3f0] sm:$0xf] %v658_v60 }
  0xbc   : > { %661 = vst [vmem:[%s5070_s26 + $0x3f4] sm:$0xf] %v660_v61  ;;  %v662_v62 = vld [vmem:[%s5066_s25 + $0x7f0] sm:$0xf]  ;;  %v664_v63 = vld [vmem:[%s5066_s25 + $0x7f8] sm:$0xf] }
  0xbd   : > { %663 = vst [vmem:[%s5070_s26 + $0x3f8] sm:$0xf] %v662_v62  ;;  %665 = vst [vmem:[%s5070_s26 + $0x3fc] sm:$0xf] %v664_v63 }
  0xbe PF: > { %p4020_p8 = scmp.ge.s32.totalorder %s5001_s13, 1  ;;  %p1200_p9 = scmp.lt.s32.totalorder %s5001_s13, 3 }
  0xc0   : > { %p1201_p10 = pnand %p4020_p8, %p1200_p9 }
  0xc2   : > { %1204 = sbr.rel (%p1201_p10) target bundleno = 698 (0x2ba), region = 65 }
  0xc7   : > { %s1207_s27 = sand.u32 1, %s4985_s9   ;;  %v5588_v0 = vld [vmem:[%s6450_s0] sm:$0xff]  ;;  %v5598_v2 = vld [vmem:[%s6450_s0 + $0x8] sm:$0xff] }
  0xc8   : > { %v5593_v1 = vld [vmem:[%s6450_s0 + $0x40] sm:$0xff]  ;;  %s4021_s6 = sshll.u32 %s1207_s27, 10  ;;  %v5607_v4 = vld [vmem:[%s6450_s0 + $0x48] sm:$0xff] }
  0xc9   : > { %v4024_v3 = vcombine.high %v5588_v0, %v5593_v1  ;;  %v4026_v5 = vcombine.high %v5598_v2, %v5607_v4  ;;  %s5611_s15 = scalar_lea.vmem [#allocation2], %s4021_s6  ;;  %v1258_v35 = vld [vmem:[%s6450_s0 + $0x80] sm:$0xff]  ;;  %v1259_v38 = vld [vmem:[%s6450_s0 + $0x88] sm:$0xff]  ;;  %v4023_v42 = vcombine.low %v5588_v0, %v5593_v1  ;;  %v4025_v43 = vcombine.low %v5598_v2, %v5607_v4 }
  0xca   : > { %v4835_v6 = vld [vmem:[%s5611_s15 + $0x78] sm:$0xff]   ;;  %v4839_v10 = vld [vmem:[%s5611_s15 + $0x70] sm:$0xff]   ;;  %v4843_v14 = vld [vmem:[%s5611_s15 + $0x68] sm:$0xff]  }
  0xcb   : > { %3066 = vmatprep.mubr.bf16.mxu0 %v4024_v3  ;;  %v4836_v7 = vld [vmem:[%s5611_s15 + $0xf8] sm:$0xff]   ;;  %3163 = vmatprep.mubr.bf16.mxu1 %v4026_v5  ;;  %v4840_v11 = vld [vmem:[%s5611_s15 + $0xf0] sm:$0xff]   ;;  %v4844_v15 = vld [vmem:[%s5611_s15 + $0xe8] sm:$0xff]  }
  0xcc   : > { %4283 = vmatprep.subr.bf16.mxu0 %v4835_v6  ;;  %v4837_v8 = vld [vmem:[%s5611_s15 + $0x38] sm:$0xff]   ;;  %4347 = vmatprep.subr.bf16.mxu1 %v4836_v7  ;;  %v4841_v12 = vld [vmem:[%s5611_s15 + $0x30] sm:$0xff]   ;;  %v4845_v16 = vld [vmem:[%s5611_s15 + $0x28] sm:$0xff]  }
  0xcd   : > { %v4838_v9 = vld [vmem:[%s5611_s15 + $0xb8] sm:$0xff]   ;;  %4284 = vmatpush3.bf16.msra.mxu0 %v4837_v8  ;;  %v4842_v13 = vld [vmem:[%s5611_s15 + $0xb0] sm:$0xff]   ;;  %v4846_v17 = vld [vmem:[%s5611_s15 + $0xa8] sm:$0xff]  }
  0xce   : > { %4348 = vmatpush3.bf16.msra.mxu1 %v4838_v9  ;;  %4285 = vmatprep.subr.bf16.mxu0 %v4839_v10  ;;  %v4847_v18 = vld [vmem:[%s5611_s15 + $0x60] sm:$0xff]   ;;  %v4851_v22 = vld [vmem:[%s5611_s15 + $0x58] sm:$0xff]   ;;  %v4855_v26 = vld [vmem:[%s5611_s15 + $0x50] sm:$0xff]  }
  0xcf   : > { %4349 = vmatprep.subr.bf16.mxu1 %v4840_v11  ;;  %v4848_v19 = vld [vmem:[%s5611_s15 + $0xe0] sm:$0xff]   ;;  %v4852_v23 = vld [vmem:[%s5611_s15 + $0xd8] sm:$0xff]   ;;  %v4856_v27 = vld [vmem:[%s5611_s15 + $0xd0] sm:$0xff]  }
  0xd0   : > { %v4849_v20 = vld [vmem:[%s5611_s15 + $0x20] sm:$0xff]   ;;  %v4853_v24 = vld [vmem:[%s5611_s15 + $0x18] sm:$0xff]   ;;  %v4857_v28 = vld [vmem:[%s5611_s15 + $0x10] sm:$0xff]  }
  0xd1   : > { %4286 = vmatpush3.bf16.msra.mxu0 %v4841_v12  ;;  %v4850_v21 = vld [vmem:[%s5611_s15 + $0xa0] sm:$0xff]   ;;  %v4854_v25 = vld [vmem:[%s5611_s15 + $0x98] sm:$0xff]   ;;  %v4858_v29 = vld [vmem:[%s5611_s15 + $0x90] sm:$0xff]  }
  0xd2   : > { %4350 = vmatpush3.bf16.msra.mxu1 %v4842_v13  ;;  %4287 = vmatprep.subr.bf16.mxu0 %v4843_v14  ;;  %v4859_v30 = vld [vmem:[%s5611_s15 + $0x48] sm:$0xff]   ;;  %v4863_v34 = vld [vmem:[%s5611_s15 + $0x40] sm:$0xff]   ;;  %v4867_v44 = vld [vmem:[%s5611_s15 + $0x178] sm:$0xff]  }
  0xd3   : > { %4351 = vmatprep.subr.bf16.mxu1 %v4844_v15  ;;  %v4860_v31 = vld [vmem:[%s5611_s15 + $0xc8] sm:$0xff]   ;;  %v1266_v36 = vld [vmem:[%s6450_s0 + $0xc0] sm:$0xff]  ;;  %v4868_v45 = vld [vmem:[%s5611_s15 + $0x138] sm:$0xff]  }
  0xd4   : > { %v4861_v32 = vld [vmem:[%s5611_s15 + $0x8] sm:$0xff]   ;;  %v4864_v37 = vld [vmem:[%s5611_s15 + $0xc0] sm:$0xff]   ;;  %v4040_v46 = vcombine.high %v1258_v35, %v1266_v36  ;;  %v4869_v47 = vld [vmem:[%s5611_s15 + $0x1f8] sm:$0xff]   ;;  %v4039_v54 = vcombine.low %v1258_v35, %v1266_v36 }
  0xd5   : > { %4288 = vmatpush3.bf16.msra.mxu0 %v4845_v16  ;;  %v4862_v33 = vld [vmem:[%s5611_s15 + $0x88] sm:$0xff]   ;;  %v4865_v40 = vld [vmem:[%s5611_s15] sm:$0xff]   ;;  %v4870_v49 = vld [vmem:[%s5611_s15 + $0x1b8] sm:$0xff]  }
  0xd6   : > { %4352 = vmatpush3.bf16.msra.mxu1 %v4846_v17  ;;  %4289 = vmatprep.subr.bf16.mxu0 %v4847_v18  ;;  %v1267_v39 = vld [vmem:[%s6450_s0 + $0xc8] sm:$0xff]  ;;  %v4866_v41 = vld [vmem:[%s5611_s15 + $0x80] sm:$0xff]   ;;  %v4871_v50 = vld [vmem:[%s5611_s15 + $0x170] sm:$0xff]  }
  0xd7   : > { %4353 = vmatprep.subr.bf16.mxu1 %v4848_v19  ;;  %v4042_v48 = vcombine.high %v1259_v38, %v1267_v39  ;;  %v1274_v51 = vld [vmem:[%s6450_s0 + $0x100] sm:$0xff]  ;;  %v4872_v52 = vld [vmem:[%s5611_s15 + $0x130] sm:$0xff]   ;;  %v4041_v56 = vcombine.low %v1259_v38, %v1267_v39  ;;  %v1275_v58 = vld [vmem:[%s6450_s0 + $0x108] sm:$0xff] }
  0xd8   : > { %v4873_v53 = vld [vmem:[%s5611_s15 + $0x1f0] sm:$0xff]   ;;  %v1282_v57 = vld [vmem:[%s6450_s0 + $0x140] sm:$0xff]  ;;  %v1283_v59 = vld [vmem:[%s6450_s0 + $0x148] sm:$0xff] }
  0xd9   : > { %4290 = vmatpush3.bf16.msra.mxu0 %v4849_v20  ;;  %v4874_v55 = vld [vmem:[%s5611_s15 + $0x1b0] sm:$0xff]   ;;  %v4056_v60 = vcombine.high %v1274_v51, %v1282_v57  ;;  %v4058_v61 = vcombine.high %v1275_v58, %v1283_v59  ;;  %v4875_v62 = vld [vmem:[%s5611_s15 + $0x168] sm:$0xff]   ;;  %v1290_v2 = vld [vmem:[%s6450_s0 + $0x180] sm:$0xff]  ;;  %v4055_v6 = vcombine.low %v1274_v51, %v1282_v57  ;;  %v4057_v8 = vcombine.low %v1275_v58, %v1283_v59 }
  0xda   : > { %4354 = vmatpush3.bf16.msra.mxu1 %v4850_v21  ;;  %4291 = vmatprep.subr.bf16.mxu0 %v4851_v22  ;;  %v4876_v63 = vld [vmem:[%s5611_s15 + $0x128] sm:$0xff]   ;;  %v1298_v3 = vld [vmem:[%s6450_s0 + $0x1c0] sm:$0xff]  ;;  %v4883_v18 = vld [vmem:[%s5611_s15 + $0x158] sm:$0xff]  }
  0xdb   : > { %4355 = vmatprep.subr.bf16.mxu1 %v4852_v23  ;;  %v4877_v0 = vld [vmem:[%s5611_s15 + $0x1e8] sm:$0xff]   ;;  %v4879_v7 = vld [vmem:[%s5611_s15 + $0x160] sm:$0xff]   ;;  %v4072_v9 = vcombine.high %v1290_v2, %v1298_v3  ;;  %v4884_v19 = vld [vmem:[%s5611_s15 + $0x118] sm:$0xff]   ;;  %v4071_v21 = vcombine.low %v1290_v2, %v1298_v3 }
  0xdc   : > { %v4878_v1 = vld [vmem:[%s5611_s15 + $0x1a8] sm:$0xff]   ;;  %v4880_v10 = vld [vmem:[%s5611_s15 + $0x120] sm:$0xff]   ;;  %v4885_v20 = vld [vmem:[%s5611_s15 + $0x1d8] sm:$0xff]  }
  0xdd   : > { %4292 = vmatpush3.bf16.msra.mxu0 %v4853_v24  ;;  %v1291_v4 = vld [vmem:[%s6450_s0 + $0x188] sm:$0xff]  ;;  %v4881_v12 = vld [vmem:[%s5611_s15 + $0x1e0] sm:$0xff]   ;;  %v4886_v22 = vld [vmem:[%s5611_s15 + $0x198] sm:$0xff]  }
  0xde   : > { %4356 = vmatpush3.bf16.msra.mxu1 %v4854_v25  ;;  %4293 = vmatprep.subr.bf16.mxu0 %v4855_v26  ;;  %v1299_v5 = vld [vmem:[%s6450_s0 + $0x1c8] sm:$0xff]  ;;  %v4882_v13 = vld [vmem:[%s5611_s15 + $0x1a0] sm:$0xff]   ;;  %v4887_v26 = vld [vmem:[%s5611_s15 + $0x150] sm:$0xff]  }
  0xdf   : > { %4357 = vmatprep.subr.bf16.mxu1 %v4856_v27  ;;  %v4074_v11 = vcombine.high %v1291_v4, %v1299_v5  ;;  %v1306_v14 = vld [vmem:[%s6450_s0 + $0x200] sm:$0xff]  ;;  %v1307_v16 = vld [vmem:[%s6450_s0 + $0x208] sm:$0xff]  ;;  %v4073_v23 = vcombine.low %v1291_v4, %v1299_v5  ;;  %v4888_v27 = vld [vmem:[%s5611_s15 + $0x110] sm:$0xff]  }
  0xe0   : > { %v1314_v15 = vld [vmem:[%s6450_s0 + $0x240] sm:$0xff]  ;;  %v1315_v17 = vld [vmem:[%s6450_s0 + $0x248] sm:$0xff]  ;;  %v1245_v2 = vld [vmem:[%s6450_s0 + $0x18] sm:$0xff] }
  0xe1   : > { %4294 = vmatpush3.bf16.msra.mxu0 %v4857_v28  ;;  %v4088_v24 = vcombine.high %v1306_v14, %v1314_v15  ;;  %v4090_v25 = vcombine.high %v1307_v16, %v1315_v17  ;;  %v4889_v28 = vld [vmem:[%s5611_s15 + $0x1d0] sm:$0xff]   ;;  %v4891_v35 = vld [vmem:[%s5611_s15 + $0x148] sm:$0xff]   ;;  %v4089_v36 = vcombine.low %v1307_v16, %v1315_v17  ;;  %v1362_v57 = vld [vmem:[%s6450_s0 + $0x3c0] sm:$0xff] }
  0xe2   : > { %4358 = vmatpush3.bf16.msra.mxu1 %v4858_v29  ;;  %4295 = vmatprep.subr.bf16.mxu0 %v4859_v30  ;;  %v4890_v29 = vld [vmem:[%s5611_s15 + $0x190] sm:$0xff]   ;;  %v1322_v30 = vld [vmem:[%s6450_s0 + $0x280] sm:$0xff]  ;;  %v4892_v38 = vld [vmem:[%s5611_s15 + $0x108] sm:$0xff]  }
  0xe3   : > { %4359 = vmatprep.subr.bf16.mxu1 %v4860_v31  ;;  %v1330_v31 = vld [vmem:[%s6450_s0 + $0x2c0] sm:$0xff]  ;;  %v1355_v58 = vld [vmem:[%s6450_s0 + $0x388] sm:$0xff]  ;;  %v1253_v3 = vld [vmem:[%s6450_s0 + $0x58] sm:$0xff] }
  0xe4   : > { %v1363_v59 = vld [vmem:[%s6450_s0 + $0x3c8] sm:$0xff] }
  0xe5   : > { %4296 = vmatpush3.bf16.msra.mxu0 %v4861_v32  ;;  %v1323_v32 = vld [vmem:[%s6450_s0 + $0x288] sm:$0xff]  ;;  %v4137_v5 = vcombine.low %v1355_v58, %v1363_v59 }
  0xe6   : > { %4360 = vmatpush3.bf16.msra.mxu1 %v4862_v33  ;;  %4297 = vmatprep.subr.bf16.mxu0 %v4863_v34  ;;  %v1331_v33 = vld [vmem:[%s6450_s0 + $0x2c8] sm:$0xff]  ;;  %v4087_v34 = vcombine.low %v1306_v14, %v1314_v15  ;;  %v4900_v14 = vld [vmem:[%s5611_s15 + $0x238] sm:$0xff]  }
  0xe7   : > { %4361 = vmatprep.subr.bf16.mxu1 %v4864_v37  ;;  %v4104_v37 = vcombine.high %v1322_v30, %v1330_v31  ;;  %v4106_v39 = vcombine.high %v1323_v32, %v1331_v33  ;;  %v4105_v51 = vcombine.low %v1323_v32, %v1331_v33  ;;  %v4902_v15 = vld [vmem:[%s5611_s15 + $0x2b8] sm:$0xff]   ;;  %v4910_v33 = vld [vmem:[%s5611_s15 + $0x2a8] sm:$0xff]  }
  0xe9   : > { %4298 = vmatpush3.bf16.msra.mxu0 %v4865_v40  ;;  %v4893_v40 = vld [vmem:[%s5611_s15 + $0x1c8] sm:$0xff]  }
  0xea   : > { %4362 = vmatpush3.bf16.msra.mxu1 %v4866_v41  ;;  %4411 = vmatprep.subr.bf16.mxu0 %v4867_v44  ;;  %v4894_v41 = vld [vmem:[%s5611_s15 + $0x188] sm:$0xff]  }
  0xeb   : > { %4475 = vmatprep.subr.bf16.mxu1 %v4869_v47  ;;  %v1339_v44 = vld [vmem:[%s6450_s0 + $0x308] sm:$0xff]  ;;  %v4896_v47 = vld [vmem:[%s5611_s15 + $0x100] sm:$0xff]  }
  0xec   : > { %3067 = vmatmul.mubr.bf16.vlgmr.msra.gmra.mxu0 %v4023_v42  ;;  %v1338_v42 = vld [vmem:[%s6450_s0 + $0x300] sm:$0xff] }
  0xed   : > { %3164 = vmatmul.mubr.bf16.vlgmr.msra.gmra.mxu1 %v4025_v43  ;;  %4412 = vmatpush3.bf16.msra.mxu0 %v4868_v45  ;;  %v1346_v43 = vld [vmem:[%s6450_s0 + $0x340] sm:$0xff]  ;;  %v1347_v45 = vld [vmem:[%s6450_s0 + $0x348] sm:$0xff] }
  0xee   : > { %3074 = vmatprep.mubr.bf16.mxu0 %v4040_v46  ;;  %4476 = vmatpush3.bf16.msra.mxu1 %v4870_v49  ;;  %v4895_v46 = vld [vmem:[%s5611_s15 + $0x140] sm:$0xff]   ;;  %v4103_v49 = vcombine.low %v1322_v30, %v1330_v31  ;;  %v4908_v31 = vld [vmem:[%s5611_s15 + $0x228] sm:$0xff]  }
  0xef   : > { %3171 = vmatprep.mubr.bf16.mxu1 %v4042_v48  ;;  %4413 = vmatprep.subr.bf16.mxu0 %v4871_v50  ;;  %v4897_v48 = vld [vmem:[%s5611_s15 + $0x1c0] sm:$0xff]  }
  0xf0   : > { %4477 = vmatprep.subr.bf16.mxu1 %v4873_v53  ;;  %v4898_v50 = vld [vmem:[%s5611_s15 + $0x180] sm:$0xff]   ;;  %v4122_v53 = vcombine.high %v1339_v44, %v1347_v45 }
  0xf1   : > { %4414 = vmatpush3.bf16.msra.mxu0 %v4872_v52  ;;  %v4120_v52 = vcombine.high %v1338_v42, %v1346_v43 }
  0xf2   : > { %4478 = vmatpush3.bf16.msra.mxu1 %v4874_v55  ;;  %4415 = vmatprep.subr.bf16.mxu0 %v4875_v62  ;;  %v4901_v55 = vld [vmem:[%s5611_s15 + $0x2f8] sm:$0xff]  }
  0xf3   : > { %4479 = vmatprep.subr.bf16.mxu1 %v4877_v0  ;;  %v1244_v0 = vld [vmem:[%s6450_s0 + $0x10] sm:$0xff] }
  0xf4   : > { %3075 = vmatmul.mubr.bf16.gmra.mxu0 %v4039_v54  ;;  %v4899_v54 = vld [vmem:[%s5611_s15 + $0x278] sm:$0xff]  }
  0xf5   : > { %3172 = vmatmul.mubr.bf16.gmra.mxu1 %v4041_v56  ;;  %3082 = vmatprep.mubr.bf16.mxu0 %v4056_v60  ;;  %v1354_v56 = vld [vmem:[%s6450_s0 + $0x380] sm:$0xff]  ;;  %v4119_v60 = vcombine.low %v1338_v42, %v1346_v43  ;;  %v4915_v42 = vld [vmem:[%s5611_s15 + $0x258] sm:$0xff]  }
  0xf6   : > { %3179 = vmatprep.mubr.bf16.mxu1 %v4058_v61  ;;  %4416 = vmatpush3.bf16.msra.mxu0 %v4876_v63  ;;  %v4121_v61 = vcombine.low %v1339_v44, %v1347_v45  ;;  %v4136_v62 = vcombine.high %v1354_v56, %v1362_v57  ;;  %v4138_v63 = vcombine.high %v1355_v58, %v1363_v59  ;;  %v4917_v44 = vld [vmem:[%s5611_s15 + $0x2d8] sm:$0xff]   ;;  %v4923_v58 = vld [vmem:[%s5611_s15 + $0x248] sm:$0xff]  }
  0xf7   : > { %4480 = vmatpush3.bf16.msra.mxu1 %v4878_v1  ;;  %4417 = vmatprep.subr.bf16.mxu0 %v4879_v7  ;;  %v1252_v1 = vld [vmem:[%s6450_s0 + $0x50] sm:$0xff]  ;;  %v4135_v4 = vcombine.low %v1354_v56, %v1362_v57  ;;  %v4030_v7 = vcombine.high %v1245_v2, %v1253_v3 }
  0xf8   : > { %4481 = vmatprep.subr.bf16.mxu1 %v4881_v12  ;;  %v1269_v12 = vld [vmem:[%s6450_s0 + $0xd8] sm:$0xff]  ;;  %v4920_v56 = vld [vmem:[%s5611_s15 + $0x210] sm:$0xff]  }
  0xf9   : > { %v4922_v57 = vld [vmem:[%s5611_s15 + $0x290] sm:$0xff]  }
  0xfa   : > { %4418 = vmatpush3.bf16.msra.mxu0 %v4880_v10  ;;  %v1261_v10 = vld [vmem:[%s6450_s0 + $0x98] sm:$0xff] }
  0xfb   : > { %4482 = vmatpush3.bf16.msra.mxu1 %v4882_v13  ;;  %4419 = vmatprep.subr.bf16.mxu0 %v4883_v18  ;;  %v4029_v13 = vcombine.low %v1245_v2, %v1253_v3  ;;  %v4046_v17 = vcombine.high %v1261_v10, %v1269_v12  ;;  %v4903_v18 = vld [vmem:[%s5611_s15 + $0x270] sm:$0xff]   ;;  %v4927_v2 = vld [vmem:[%s5611_s15 + $0x240] sm:$0xff]  }
  0xfc   : > { %3083 = vmatmul.mubr.bf16.gmra.mxu0 %v4055_v6  ;;  %4483 = vmatprep.subr.bf16.mxu1 %v4885_v20  ;;  %v4028_v6 = vcombine.high %v1244_v0, %v1252_v1  ;;  %v4905_v20 = vld [vmem:[%s5611_s15 + $0x2f0] sm:$0xff]  }
  0xfd   : > { %3180 = vmatmul.mubr.bf16.gmra.mxu1 %v4057_v8  ;;  %3090 = vmatprep.mubr.bf16.mxu0 %v4072_v9  ;;  %v1260_v8 = vld [vmem:[%s6450_s0 + $0x90] sm:$0xff] }
  0xfe   : > { %3187 = vmatprep.mubr.bf16.mxu1 %v4074_v11  ;;  %4420 = vmatpush3.bf16.msra.mxu0 %v4884_v19  ;;  %v1268_v9 = vld [vmem:[%s6450_s0 + $0xd0] sm:$0xff]  ;;  %v4027_v11 = vcombine.low %v1244_v0, %v1252_v1  ;;  %v4926_v1 = vld [vmem:[%s5611_s15 + $0x288] sm:$0xff]  }
  0xff   : > { %4484 = vmatpush3.bf16.msra.mxu1 %v4886_v22  ;;  %4421 = vmatprep.subr.bf16.mxu0 %v4887_v26  ;;  %v4044_v16 = vcombine.high %v1260_v8, %v1268_v9  ;;  %v4904_v19 = vld [vmem:[%s5611_s15 + $0x230] sm:$0xff]   ;;  %v4907_v26 = vld [vmem:[%s5611_s15 + $0x268] sm:$0xff]  }
 0x100   : > { %4485 = vmatprep.subr.bf16.mxu1 %v4889_v28  ;;  %v1276_v22 = vld [vmem:[%s6450_s0 + $0x110] sm:$0xff]  ;;  %v4043_v28 = vcombine.low %v1260_v8, %v1268_v9  ;;  %v4928_v8 = vld [vmem:[%s5611_s15 + $0x200] sm:$0xff]  }
 0x101   : > { %v1324_v3 = vld [vmem:[%s6450_s0 + $0x290] sm:$0xff]  ;;  %v4930_v9 = vld [vmem:[%s5611_s15 + $0x280] sm:$0xff]  }
 0x102   : > { %4422 = vmatpush3.bf16.msra.mxu0 %v4888_v27  ;;  %v4909_v27 = vld [vmem:[%s5611_s15 + $0x2e8] sm:$0xff]  }
 0x103   : > { %4486 = vmatpush3.bf16.msra.mxu1 %v4890_v29  ;;  %4423 = vmatprep.subr.bf16.mxu0 %v4891_v35  ;;  %v4045_v29 = vcombine.low %v1261_v10, %v1269_v12  ;;  %v1292_v35 = vld [vmem:[%s6450_s0 + $0x190] sm:$0xff]  ;;  %v4931_v10 = vld [vmem:[%s5611_s15 + $0x378] sm:$0xff]  }
 0x104   : > { %3091 = vmatmul.mubr.bf16.gmra.mxu0 %v4071_v21  ;;  %4487 = vmatprep.subr.bf16.mxu1 %v4893_v40  ;;  %v4906_v21 = vld [vmem:[%s5611_s15 + $0x2b0] sm:$0xff]   ;;  %v4912_v40 = vld [vmem:[%s5611_s15 + $0x220] sm:$0xff]   ;;  %v4933_v12 = vld [vmem:[%s5611_s15 + $0x3f8] sm:$0xff]  }
 0x105   : > { %3188 = vmatmul.mubr.bf16.gmra.mxu1 %v4073_v23  ;;  %3098 = vmatprep.mubr.bf16.mxu0 %v4088_v24  ;;  %v1284_v23 = vld [vmem:[%s6450_s0 + $0x150] sm:$0xff]  ;;  %v1277_v24 = vld [vmem:[%s6450_s0 + $0x118] sm:$0xff] }
 0x106   : > { %3195 = vmatprep.mubr.bf16.mxu1 %v4090_v25  ;;  %4424 = vmatpush3.bf16.msra.mxu0 %v4892_v38  ;;  %v1285_v25 = vld [vmem:[%s6450_s0 + $0x158] sm:$0xff]  ;;  %v4060_v30 = vcombine.high %v1276_v22, %v1284_v23  ;;  %v4059_v43 = vcombine.low %v1276_v22, %v1284_v23 }
 0x107   : > { %4488 = vmatpush3.bf16.msra.mxu1 %v4894_v41  ;;  %4425 = vmatprep.subr.bf16.mxu0 %v4895_v46  ;;  %v4062_v32 = vcombine.high %v1277_v24, %v1285_v25  ;;  %v1293_v38 = vld [vmem:[%s6450_s0 + $0x198] sm:$0xff]  ;;  %v4914_v41 = vld [vmem:[%s5611_s15 + $0x2a0] sm:$0xff]   ;;  %v4061_v45 = vcombine.low %v1277_v24, %v1285_v25  ;;  %v1356_v24 = vld [vmem:[%s6450_s0 + $0x390] sm:$0xff] }
 0x108   : > { %4489 = vmatprep.subr.bf16.mxu1 %v4897_v48  ;;  %v4916_v48 = vld [vmem:[%s5611_s15 + $0x218] sm:$0xff]   ;;  %v1364_v25 = vld [vmem:[%s6450_s0 + $0x3d0] sm:$0xff] }
 0x10a   : > { %4426 = vmatpush3.bf16.msra.mxu0 %v4896_v47 }
 0x10b   : > { %4490 = vmatpush3.bf16.msra.mxu1 %v4898_v50  ;;  %4539 = vmatprep.subr.bf16.mxu0 %v4899_v54  ;;  %v4919_v50 = vld [vmem:[%s5611_s15 + $0x250] sm:$0xff]   ;;  %v1309_v54 = vld [vmem:[%s6450_s0 + $0x218] sm:$0xff] }
 0x10c   : > { %3099 = vmatmul.mubr.bf16.gmra.mxu0 %v4087_v34  ;;  %4603 = vmatprep.subr.bf16.mxu1 %v4901_v55  ;;  %v4911_v34 = vld [vmem:[%s5611_s15 + $0x260] sm:$0xff]   ;;  %v1317_v55 = vld [vmem:[%s6450_s0 + $0x258] sm:$0xff] }
 0x10d   : > { %3196 = vmatmul.mubr.bf16.gmra.mxu1 %v4089_v36  ;;  %3106 = vmatprep.mubr.bf16.mxu0 %v4104_v37  ;;  %v1300_v36 = vld [vmem:[%s6450_s0 + $0x1d0] sm:$0xff]  ;;  %v4913_v37 = vld [vmem:[%s5611_s15 + $0x2e0] sm:$0xff]   ;;  %v4094_v0 = vcombine.high %v1309_v54, %v1317_v55 }
 0x10e   : > { %3203 = vmatprep.mubr.bf16.mxu1 %v4106_v39  ;;  %v1301_v39 = vld [vmem:[%s6450_s0 + $0x1d8] sm:$0xff]  ;;  %v4076_v46 = vcombine.high %v1292_v35, %v1300_v36  ;;  %v4075_v59 = vcombine.low %v1292_v35, %v1300_v36  ;;  %v1255_v35 = vld [vmem:[%s6450_s0 + $0x68] sm:$0xff]  ;;  %v4139_v36 = vcombine.low %v1356_v24, %v1364_v25 }
 0x10f   : > { %v4078_v47 = vcombine.high %v1293_v38, %v1301_v39 }
 0x114   : > { %3107 = vmatmul.mubr.bf16.gmra.mxu0 %v4103_v49  ;;  %v4918_v49 = vld [vmem:[%s5611_s15 + $0x298] sm:$0xff]  }
 0x115   : > { %3204 = vmatmul.mubr.bf16.gmra.mxu1 %v4105_v51  ;;  %3114 = vmatprep.mubr.bf16.mxu0 %v4120_v52  ;;  %v1308_v51 = vld [vmem:[%s6450_s0 + $0x210] sm:$0xff] }
 0x116   : > { %3211 = vmatprep.mubr.bf16.mxu1 %v4122_v53  ;;  %v1316_v52 = vld [vmem:[%s6450_s0 + $0x250] sm:$0xff] }
 0x117   : > { %v4921_v53 = vld [vmem:[%s5611_s15 + $0x2d0] sm:$0xff]  }
 0x11c   : > { %3115 = vmatmul.mubr.bf16.gmra.mxu0 %v4119_v60  ;;  %v4925_v60 = vld [vmem:[%s5611_s15 + $0x2c8] sm:$0xff]  }
 0x11d   : > { %3212 = vmatmul.mubr.bf16.gmra.mxu1 %v4121_v61  ;;  %3122 = vmatprep.mubr.bf16.mxu0 %v4136_v62  ;;  %v4077_v61 = vcombine.low %v1293_v38, %v1301_v39  ;;  %v4092_v62 = vcombine.high %v1308_v51, %v1316_v52 }
 0x11e   : > { %3219 = vmatprep.mubr.bf16.mxu1 %v4138_v63  ;;  %v4924_v63 = vld [vmem:[%s5611_s15 + $0x208] sm:$0xff]  }
 0x124   : > { %3123 = vmatmul.mubr.bf16.gmra.mxu0 %v4135_v4  ;;  %v1332_v4 = vld [vmem:[%s6450_s0 + $0x2d0] sm:$0xff] }
 0x125   : > { %3220 = vmatmul.mubr.bf16.gmra.mxu1 %v4137_v5  ;;  %3260 = vmatprep.mubr.bf16.mxu0 %v4028_v6  ;;  %v4929_v5 = vld [vmem:[%s5611_s15 + $0x2c0] sm:$0xff]   ;;  %v1325_v6 = vld [vmem:[%s6450_s0 + $0x298] sm:$0xff] }
 0x126   : > { %3357 = vmatprep.mubr.bf16.mxu1 %v4030_v7  ;;  %v1333_v7 = vld [vmem:[%s6450_s0 + $0x2d8] sm:$0xff] }
 0x12c   : > { %3261 = vmatmul.mubr.bf16.vlgmr.msra.gmra.mxu0 %v4027_v11  ;;  %v4091_v11 = vcombine.low %v1308_v51, %v1316_v52  ;;  %v4937_v51 = vld [vmem:[%s5611_s15 + $0x3f0] sm:$0xff]  }
 0x12d   : > { %3358 = vmatmul.mubr.bf16.vlgmr.msra.gmra.mxu1 %v4029_v13  ;;  %4540 = vmatpush3.bf16.msra.mxu0 %v4900_v14  ;;  %v4093_v13 = vcombine.low %v1309_v54, %v1317_v55  ;;  %v4108_v14 = vcombine.high %v1324_v3, %v1332_v4  ;;  %v4936_v52 = vld [vmem:[%s5611_s15 + $0x330] sm:$0xff]   ;;  %v1278_v54 = vld [vmem:[%s6450_s0 + $0x120] sm:$0xff] }
 0x12e   : > { %4604 = vmatpush3.bf16.msra.mxu1 %v4902_v15  ;;  %3268 = vmatprep.mubr.bf16.mxu0 %v4044_v16  ;;  %v4110_v15 = vcombine.high %v1325_v6, %v1333_v7  ;;  %v1340_v16 = vld [vmem:[%s6450_s0 + $0x310] sm:$0xff]  ;;  %v1286_v55 = vld [vmem:[%s6450_s0 + $0x160] sm:$0xff] }
 0x12f   : > { %3365 = vmatprep.mubr.bf16.mxu1 %v4046_v17  ;;  %4541 = vmatprep.subr.bf16.mxu0 %v4903_v18  ;;  %v1348_v17 = vld [vmem:[%s6450_s0 + $0x350] sm:$0xff]  ;;  %v1341_v18 = vld [vmem:[%s6450_s0 + $0x318] sm:$0xff] }
 0x130   : > { %4605 = vmatprep.subr.bf16.mxu1 %v4905_v20  ;;  %v4107_v20 = vcombine.low %v1324_v3, %v1332_v4  ;;  %v4124_v22 = vcombine.high %v1340_v16, %v1348_v17  ;;  %v4945_v3 = vld [vmem:[%s5611_s15 + $0x3e0] sm:$0xff]  }
 0x131   : > { %4542 = vmatpush3.bf16.msra.mxu0 %v4904_v19  ;;  %v1349_v19 = vld [vmem:[%s6450_s0 + $0x358] sm:$0xff]  ;;  %v1294_v4 = vld [vmem:[%s6450_s0 + $0x1a0] sm:$0xff] }
 0x132   : > { %4606 = vmatpush3.bf16.msra.mxu1 %v4906_v21  ;;  %4543 = vmatprep.subr.bf16.mxu0 %v4907_v26  ;;  %v4109_v21 = vcombine.low %v1325_v6, %v1333_v7  ;;  %v4126_v23 = vcombine.high %v1341_v18, %v1349_v19  ;;  %v1357_v26 = vld [vmem:[%s6450_s0 + $0x398] sm:$0xff]  ;;  %v1295_v6 = vld [vmem:[%s6450_s0 + $0x1a8] sm:$0xff]  ;;  %v4944_v7 = vld [vmem:[%s5611_s15 + $0x320] sm:$0xff]  }
 0x133   : > { %4607 = vmatprep.subr.bf16.mxu1 %v4909_v27  ;;  %v1365_v27 = vld [vmem:[%s6450_s0 + $0x3d8] sm:$0xff] }
 0x134   : > { %3269 = vmatmul.mubr.bf16.gmra.mxu0 %v4043_v28  ;;  %v4123_v28 = vcombine.low %v1340_v16, %v1348_v17  ;;  %v4948_v16 = vld [vmem:[%s5611_s15 + $0x318] sm:$0xff]  }
 0x135   : > { %3366 = vmatmul.mubr.bf16.gmra.mxu1 %v4045_v29  ;;  %3276 = vmatprep.mubr.bf16.mxu0 %v4060_v30  ;;  %v4125_v29 = vcombine.low %v1341_v18, %v1349_v19  ;;  %v4140_v30 = vcombine.high %v1356_v24, %v1364_v25  ;;  %v4950_v17 = vld [vmem:[%s5611_s15 + $0x398] sm:$0xff]   ;;  %v4951_v18 = vld [vmem:[%s5611_s15 + $0x350] sm:$0xff]   ;;  %v1319_v24 = vld [vmem:[%s6450_s0 + $0x268] sm:$0xff] }
 0x136   : > { %3373 = vmatprep.mubr.bf16.mxu1 %v4062_v32  ;;  %4544 = vmatpush3.bf16.msra.mxu0 %v4908_v31  ;;  %v4142_v31 = vcombine.high %v1357_v26, %v1365_v27  ;;  %v1246_v32 = vld [vmem:[%s6450_s0 + $0x20] sm:$0xff]  ;;  %v4953_v19 = vld [vmem:[%s5611_s15 + $0x3d0] sm:$0xff]  }
 0x137   : > { %4608 = vmatpush3.bf16.msra.mxu1 %v4910_v33  ;;  %4545 = vmatprep.subr.bf16.mxu0 %v4911_v34  ;;  %v1254_v33 = vld [vmem:[%s6450_s0 + $0x60] sm:$0xff]  ;;  %v1247_v34 = vld [vmem:[%s6450_s0 + $0x28] sm:$0xff]  ;;  %v4954_v25 = vld [vmem:[%s5611_s15 + $0x390] sm:$0xff]  }
 0x138   : > { %4609 = vmatprep.subr.bf16.mxu1 %v4913_v37  ;;  %v4141_v37 = vcombine.low %v1357_v26, %v1365_v27  ;;  %v4032_v38 = vcombine.high %v1246_v32, %v1254_v33  ;;  %v4034_v39 = vcombine.high %v1247_v34, %v1255_v35  ;;  %v4955_v26 = vld [vmem:[%s5611_s15 + $0x348] sm:$0xff]  }
 0x13a   : > { %4546 = vmatpush3.bf16.msra.mxu0 %v4912_v40  ;;  %v1262_v40 = vld [vmem:[%s6450_s0 + $0xa0] sm:$0xff] }
 0x13b   : > { %4610 = vmatpush3.bf16.msra.mxu1 %v4914_v41  ;;  %4547 = vmatprep.subr.bf16.mxu0 %v4915_v42  ;;  %v1270_v41 = vld [vmem:[%s6450_s0 + $0xe0] sm:$0xff]  ;;  %v4031_v42 = vcombine.low %v1246_v32, %v1254_v33  ;;  %v4956_v32 = vld [vmem:[%s5611_s15 + $0x308] sm:$0xff]  }
 0x13c   : > { %3277 = vmatmul.mubr.bf16.gmra.mxu0 %v4059_v43  ;;  %4611 = vmatprep.subr.bf16.mxu1 %v4917_v44  ;;  %v1263_v43 = vld [vmem:[%s6450_s0 + $0xa8] sm:$0xff] }
 0x13d   : > { %3374 = vmatmul.mubr.bf16.gmra.mxu1 %v4061_v45  ;;  %3284 = vmatprep.mubr.bf16.mxu0 %v4076_v46  ;;  %v1271_v44 = vld [vmem:[%s6450_s0 + $0xe8] sm:$0xff]  ;;  %v4033_v45 = vcombine.low %v1247_v34, %v1255_v35  ;;  %v4932_v46 = vld [vmem:[%s5611_s15 + $0x338] sm:$0xff]   ;;  %v4959_v34 = vld [vmem:[%s5611_s15 + $0x340] sm:$0xff]  }
 0x13e   : > { %3381 = vmatprep.mubr.bf16.mxu1 %v4078_v47  ;;  %4548 = vmatpush3.bf16.msra.mxu0 %v4916_v48  ;;  %v4934_v47 = vld [vmem:[%s5611_s15 + $0x3b8] sm:$0xff]   ;;  %v4048_v48 = vcombine.high %v1262_v40, %v1270_v41  ;;  %v4958_v33 = vld [vmem:[%s5611_s15 + $0x388] sm:$0xff]   ;;  %v4961_v35 = vld [vmem:[%s5611_s15 + $0x3c0] sm:$0xff]  }
 0x13f   : > { %4612 = vmatpush3.bf16.msra.mxu1 %v4918_v49  ;;  %4549 = vmatprep.subr.bf16.mxu0 %v4919_v50  ;;  %v4050_v49 = vcombine.high %v1263_v43, %v1271_v44  ;;  %v4935_v50 = vld [vmem:[%s5611_s15 + $0x370] sm:$0xff]  }
 0x140   : > { %4613 = vmatprep.subr.bf16.mxu1 %v4921_v53  ;;  %v4938_v53 = vld [vmem:[%s5611_s15 + $0x3b0] sm:$0xff]  }
 0x142   : > { %4550 = vmatpush3.bf16.msra.mxu0 %v4920_v56  ;;  %v4939_v56 = vld [vmem:[%s5611_s15 + $0x368] sm:$0xff]  }
 0x143   : > { %4614 = vmatpush3.bf16.msra.mxu1 %v4922_v57  ;;  %4551 = vmatprep.subr.bf16.mxu0 %v4923_v58  ;;  %v1279_v57 = vld [vmem:[%s6450_s0 + $0x128] sm:$0xff] }
 0x144   : > { %3285 = vmatmul.mubr.bf16.gmra.mxu0 %v4075_v59  ;;  %4615 = vmatprep.subr.bf16.mxu1 %v4925_v60  ;;  %v1287_v58 = vld [vmem:[%s6450_s0 + $0x168] sm:$0xff]  ;;  %v4047_v60 = vcombine.low %v1262_v40, %v1270_v41  ;;  %v4962_v41 = vld [vmem:[%s5611_s15 + $0x380] sm:$0xff]  }
 0x145   : > { %3382 = vmatmul.mubr.bf16.gmra.mxu1 %v4077_v61  ;;  %3292 = vmatprep.mubr.bf16.mxu0 %v4092_v62  ;;  %v4941_v59 = vld [vmem:[%s5611_s15 + $0x3e8] sm:$0xff]   ;;  %v4049_v61 = vcombine.low %v1263_v43, %v1271_v44  ;;  %v4064_v62 = vcombine.high %v1278_v54, %v1286_v55 }
 0x146   : > { %3389 = vmatprep.mubr.bf16.mxu1 %v4094_v0  ;;  %4552 = vmatpush3.bf16.msra.mxu0 %v4924_v63  ;;  %v4066_v63 = vcombine.high %v1279_v57, %v1287_v58  ;;  %v4940_v0 = vld [vmem:[%s5611_s15 + $0x328] sm:$0xff]  }
 0x147   : > { %4616 = vmatpush3.bf16.msra.mxu1 %v4926_v1  ;;  %4553 = vmatprep.subr.bf16.mxu0 %v4927_v2  ;;  %v4942_v1 = vld [vmem:[%s5611_s15 + $0x3a8] sm:$0xff]   ;;  %v4943_v2 = vld [vmem:[%s5611_s15 + $0x360] sm:$0xff]  }
 0x148   : > { %4617 = vmatprep.subr.bf16.mxu1 %v4929_v5  ;;  %v1302_v5 = vld [vmem:[%s6450_s0 + $0x1e0] sm:$0xff]  ;;  %v1335_v40 = vld [vmem:[%s6450_s0 + $0x2e8] sm:$0xff] }
 0x149   : > { %v4079_v27 = vcombine.low %v1294_v4, %v1302_v5 }
 0x14a   : > { %4554 = vmatpush3.bf16.msra.mxu0 %v4928_v8  ;;  %v1303_v8 = vld [vmem:[%s6450_s0 + $0x1e8] sm:$0xff] }
 0x14b   : > { %4618 = vmatpush3.bf16.msra.mxu1 %v4930_v9  ;;  %4667 = vmatprep.subr.bf16.mxu0 %v4931_v10  ;;  %v4946_v9 = vld [vmem:[%s5611_s15 + $0x3a0] sm:$0xff]   ;;  %v4947_v10 = vld [vmem:[%s5611_s15 + $0x358] sm:$0xff]  }
 0x14c   : > { %3293 = vmatmul.mubr.bf16.gmra.mxu0 %v4091_v11  ;;  %4731 = vmatprep.subr.bf16.mxu1 %v4933_v12  ;;  %v4063_v11 = vcombine.low %v1278_v54, %v1286_v55  ;;  %v4949_v12 = vld [vmem:[%s5611_s15 + $0x3d8] sm:$0xff]   ;;  %v1358_v54 = vld [vmem:[%s6450_s0 + $0x3a0] sm:$0xff] }
 0x14d   : > { %3390 = vmatmul.mubr.bf16.gmra.mxu1 %v4093_v13  ;;  %3300 = vmatprep.mubr.bf16.mxu0 %v4108_v14  ;;  %v4065_v13 = vcombine.low %v1279_v57, %v1287_v58  ;;  %v4080_v14 = vcombine.high %v1294_v4, %v1302_v5  ;;  %v1366_v55 = vld [vmem:[%s6450_s0 + $0x3e0] sm:$0xff]  ;;  %v1367_v57 = vld [vmem:[%s6450_s0 + $0x3e8] sm:$0xff] }
 0x14e   : > { %3397 = vmatprep.mubr.bf16.mxu1 %v4110_v15  ;;  %v4082_v15 = vcombine.high %v1295_v6, %v1303_v8 }
 0x154   : > { %3301 = vmatmul.mubr.bf16.gmra.mxu0 %v4107_v20  ;;  %v1310_v20 = vld [vmem:[%s6450_s0 + $0x220] sm:$0xff] }
 0x155   : > { %3398 = vmatmul.mubr.bf16.gmra.mxu1 %v4109_v21  ;;  %3308 = vmatprep.mubr.bf16.mxu0 %v4124_v22  ;;  %v1318_v21 = vld [vmem:[%s6450_s0 + $0x260] sm:$0xff]  ;;  %v1311_v22 = vld [vmem:[%s6450_s0 + $0x228] sm:$0xff] }
 0x156   : > { %3405 = vmatprep.mubr.bf16.mxu1 %v4126_v23  ;;  %v4952_v23 = vld [vmem:[%s5611_s15 + $0x310] sm:$0xff]   ;;  %v4097_v43 = vcombine.low %v1311_v22, %v1319_v24 }
 0x15c   : > { %3309 = vmatmul.mubr.bf16.gmra.mxu0 %v4123_v28  ;;  %v4957_v28 = vld [vmem:[%s5611_s15 + $0x3c8] sm:$0xff]  }
 0x15d   : > { %3406 = vmatmul.mubr.bf16.gmra.mxu1 %v4125_v29  ;;  %3316 = vmatprep.mubr.bf16.mxu0 %v4140_v30  ;;  %v4081_v29 = vcombine.low %v1295_v6, %v1303_v8  ;;  %v4096_v30 = vcombine.high %v1310_v20, %v1318_v21  ;;  %v1264_v6 = vld [vmem:[%s6450_s0 + $0xb0] sm:$0xff]  ;;  %v1265_v8 = vld [vmem:[%s6450_s0 + $0xb8] sm:$0xff] }
 0x15e   : > { %3413 = vmatprep.mubr.bf16.mxu1 %v4142_v31  ;;  %v4098_v31 = vcombine.high %v1311_v22, %v1319_v24  ;;  %v1289_v22 = vld [vmem:[%s6450_s0 + $0x178] sm:$0xff] }
 0x164   : > { %3317 = vmatmul.mubr.bf16.gmra.mxu0 %v4139_v36  ;;  %v1326_v36 = vld [vmem:[%s6450_s0 + $0x2a0] sm:$0xff] }
 0x165   : > { %3414 = vmatmul.mubr.bf16.gmra.mxu1 %v4141_v37  ;;  %3454 = vmatprep.mubr.bf16.mxu0 %v4032_v38  ;;  %v1334_v37 = vld [vmem:[%s6450_s0 + $0x2e0] sm:$0xff] }
 0x166   : > { %3551 = vmatprep.mubr.bf16.mxu1 %v4034_v39  ;;  %v4960_v38 = vld [vmem:[%s5611_s15 + $0x300] sm:$0xff]   ;;  %v1327_v39 = vld [vmem:[%s6450_s0 + $0x2a8] sm:$0xff]  ;;  %v4112_v44 = vcombine.high %v1326_v36, %v1334_v37  ;;  %s4022_s15 = sshll.u32 %s1207_s27, 7  ;;  %s4280_s27 = sshll.u32 (%p5053_p6), %s4993_s11, 3 }
 0x167   : > { %s6332_s9 = scalar_lea.vmem [#allocation3], %s4022_s15  ;;  %s3837_s3 = scalar_lea.vmem (%p5053_p6), %s6452_s2, %s4280_s27 }
 0x16c   : > { %3455 = vmatmul.mubr.bf16.vlgmr.msra.gmra.mxu0 %v4031_v42  ;;  %v4095_v42 = vcombine.low %v1310_v20, %v1318_v21  ;;  %v1281_v21 = vld [vmem:[%s6450_s0 + $0x138] sm:$0xff] }
 0x16d   : > { %3552 = vmatmul.mubr.bf16.vlgmr.msra.gmra.mxu1 %v4033_v45  ;;  %4668 = vmatpush3.bf16.msra.mxu0 %v4932_v46  ;;  %v4114_v45 = vcombine.high %v1327_v39, %v1335_v40  ;;  %v1342_v46 = vld [vmem:[%s6450_s0 + $0x320] sm:$0xff] }
 0x16e   : > { %4732 = vmatpush3.bf16.msra.mxu1 %v4934_v47  ;;  %3462 = vmatprep.mubr.bf16.mxu0 %v4048_v48  ;;  %v1350_v47 = vld [vmem:[%s6450_s0 + $0x360] sm:$0xff]  ;;  %v1343_v48 = vld [vmem:[%s6450_s0 + $0x328] sm:$0xff] }
 0x16f   : > { %3559 = vmatprep.mubr.bf16.mxu1 %v4050_v49  ;;  %4669 = vmatprep.subr.bf16.mxu0 %v4935_v50  ;;  %v1351_v49 = vld [vmem:[%s6450_s0 + $0x368] sm:$0xff]  ;;  %v4111_v50 = vcombine.low %v1326_v36, %v1334_v37  ;;  %v4127_v58 = vcombine.low %v1342_v46, %v1350_v47 }
 0x170   : > { %4733 = vmatprep.subr.bf16.mxu1 %v4937_v51  ;;  %v4113_v51 = vcombine.low %v1327_v39, %v1335_v40  ;;  %v1296_v39 = vld [vmem:[%s6450_s0 + $0x1b0] sm:$0xff] }
 0x171   : > { %4670 = vmatpush3.bf16.msra.mxu0 %v4936_v52  ;;  %v4128_v52 = vcombine.high %v1342_v46, %v1350_v47  ;;  %v1304_v40 = vld [vmem:[%s6450_s0 + $0x1f0] sm:$0xff] }
 0x172   : > { %4734 = vmatpush3.bf16.msra.mxu1 %v4938_v53  ;;  %4671 = vmatprep.subr.bf16.mxu0 %v4939_v56  ;;  %v4130_v53 = vcombine.high %v1343_v48, %v1351_v49  ;;  %v1359_v56 = vld [vmem:[%s6450_s0 + $0x3a8] sm:$0xff] }
 0x173   : > { %4735 = vmatprep.subr.bf16.mxu1 %v4941_v59  ;;  %v4129_v59 = vcombine.low %v1343_v48, %v1351_v49  ;;  %v4069_v49 = vcombine.low %v1281_v21, %v1289_v22 }
 0x174   : > { %3463 = vmatmul.mubr.bf16.gmra.mxu0 %v4047_v60  ;;  %v4144_v60 = vcombine.high %v1358_v54, %v1366_v55 }
 0x175   : > { %3560 = vmatmul.mubr.bf16.gmra.mxu1 %v4049_v61  ;;  %3470 = vmatprep.mubr.bf16.mxu0 %v4064_v62  ;;  %v4146_v61 = vcombine.high %v1359_v56, %v1367_v57  ;;  %v1248_v62 = vld [vmem:[%s6450_s0 + $0x30] sm:$0xff] }
 0x176   : > { %3567 = vmatprep.mubr.bf16.mxu1 %v4066_v63  ;;  %4672 = vmatpush3.bf16.msra.mxu0 %v4940_v0  ;;  %v1256_v63 = vld [vmem:[%s6450_s0 + $0x70] sm:$0xff]  ;;  %v1249_v0 = vld [vmem:[%s6450_s0 + $0x38] sm:$0xff] }
 0x177   : > { %4736 = vmatpush3.bf16.msra.mxu1 %v4942_v1  ;;  %4673 = vmatprep.subr.bf16.mxu0 %v4943_v2  ;;  %v1257_v1 = vld [vmem:[%s6450_s0 + $0x78] sm:$0xff]  ;;  %v4143_v2 = vcombine.low %v1358_v54, %v1366_v55  ;;  %v4036_v4 = vcombine.high %v1248_v62, %v1256_v63 }
 0x178   : > { %4737 = vmatprep.subr.bf16.mxu1 %v4945_v3  ;;  %v4145_v3 = vcombine.low %v1359_v56, %v1367_v57  ;;  %v4038_v5 = vcombine.high %v1249_v0, %v1257_v1 }
 0x17a   : > { %4674 = vmatpush3.bf16.msra.mxu0 %v4944_v7  ;;  %v1272_v7 = vld [vmem:[%s6450_s0 + $0xf0] sm:$0xff] }
 0x17b   : > { %4738 = vmatpush3.bf16.msra.mxu1 %v4946_v9  ;;  %4675 = vmatprep.subr.bf16.mxu0 %v4947_v10  ;;  %v1273_v9 = vld [vmem:[%s6450_s0 + $0xf8] sm:$0xff]  ;;  %v4035_v10 = vcombine.low %v1248_v62, %v1256_v63  ;;  %v1320_v62 = vld [vmem:[%s6450_s0 + $0x270] sm:$0xff] }
 0x17c   : > { %3471 = vmatmul.mubr.bf16.gmra.mxu0 %v4063_v11  ;;  %4739 = vmatprep.subr.bf16.mxu1 %v4949_v12  ;;  %v4037_v11 = vcombine.low %v1249_v0, %v1257_v1  ;;  %v4052_v12 = vcombine.high %v1264_v6, %v1272_v7  ;;  %v1313_v1 = vld [vmem:[%s6450_s0 + $0x238] sm:$0xff] }
 0x17d   : > { %3568 = vmatmul.mubr.bf16.gmra.mxu1 %v4065_v13  ;;  %3478 = vmatprep.mubr.bf16.mxu0 %v4080_v14  ;;  %v4054_v13 = vcombine.high %v1265_v8, %v1273_v9 }
 0x17e   : > { %3575 = vmatprep.mubr.bf16.mxu1 %v4082_v15  ;;  %4676 = vmatpush3.bf16.msra.mxu0 %v4948_v16 }
 0x17f   : > { %4740 = vmatpush3.bf16.msra.mxu1 %v4950_v17  ;;  %4677 = vmatprep.subr.bf16.mxu0 %v4951_v18  ;;  %v1280_v17 = vld [vmem:[%s6450_s0 + $0x130] sm:$0xff] }
 0x180   : > { %4741 = vmatprep.subr.bf16.mxu1 %v4953_v19  ;;  %v1288_v18 = vld [vmem:[%s6450_s0 + $0x170] sm:$0xff] }
 0x181   : > { %v4067_v47 = vcombine.low %v1280_v17, %v1288_v18 }
 0x182   : > { %4678 = vmatpush3.bf16.msra.mxu0 %v4952_v23 }
 0x183   : > { %4742 = vmatpush3.bf16.msra.mxu1 %v4954_v25  ;;  %4679 = vmatprep.subr.bf16.mxu0 %v4955_v26  ;;  %v4051_v25 = vcombine.low %v1264_v6, %v1272_v7 }
 0x184   : > { %3479 = vmatmul.mubr.bf16.gmra.mxu0 %v4079_v27  ;;  %4743 = vmatprep.subr.bf16.mxu1 %v4957_v28  ;;  %v4053_v27 = vcombine.low %v1265_v8, %v1273_v9  ;;  %v4068_v28 = vcombine.high %v1280_v17, %v1288_v18 }
 0x185   : > { %3576 = vmatmul.mubr.bf16.gmra.mxu1 %v4081_v29  ;;  %3486 = vmatprep.mubr.bf16.mxu0 %v4096_v30 }
 0x186   : > { %3583 = vmatprep.mubr.bf16.mxu1 %v4098_v31  ;;  %4680 = vmatpush3.bf16.msra.mxu0 %v4956_v32  ;;  %v4070_v31 = vcombine.high %v1281_v21, %v1289_v22 }
 0x187   : > { %4744 = vmatpush3.bf16.msra.mxu1 %v4958_v33  ;;  %4681 = vmatprep.subr.bf16.mxu0 %v4959_v34 }
 0x188   : > { %4745 = vmatprep.subr.bf16.mxu1 %v4961_v35 }
 0x18a   : > { %4682 = vmatpush3.bf16.msra.mxu0 %v4960_v38 }
 0x18b   : > { %4746 = vmatpush3.bf16.msra.mxu1 %v4962_v41 }
 0x18c   : > { %3487 = vmatmul.mubr.bf16.gmra.mxu0 %v4095_v42 }
 0x18d   : > { %3584 = vmatmul.mubr.bf16.gmra.mxu1 %v4097_v43  ;;  %3494 = vmatprep.mubr.bf16.mxu0 %v4112_v44  ;;  %v1297_v43 = vld [vmem:[%s6450_s0 + $0x1b8] sm:$0xff] }
 0x18e   : > { %3591 = vmatprep.mubr.bf16.mxu1 %v4114_v45  ;;  %v1305_v44 = vld [vmem:[%s6450_s0 + $0x1f8] sm:$0xff] }
 0x18f   : > { %v4085_v7 = vcombine.low %v1297_v43, %v1305_v44 }
 0x194   : > { %3495 = vmatmul.mubr.bf16.gmra.mxu0 %v4111_v50  ;;  %v4084_v50 = vcombine.high %v1296_v39, %v1304_v40 }
 0x195   : > { %3592 = vmatmul.mubr.bf16.gmra.mxu1 %v4113_v51  ;;  %3502 = vmatprep.mubr.bf16.mxu0 %v4128_v52 }
 0x196   : > { %3599 = vmatprep.mubr.bf16.mxu1 %v4130_v53  ;;  %v4086_v53 = vcombine.high %v1297_v43, %v1305_v44  ;;  %v1344_v43 = vld [vmem:[%s6450_s0 + $0x330] sm:$0xff] }
 0x197   : > { %v1352_v44 = vld [vmem:[%s6450_s0 + $0x370] sm:$0xff] }
 0x19c   : > { %3503 = vmatmul.mubr.bf16.gmra.mxu0 %v4127_v58 }
 0x19d   : > { %3600 = vmatmul.mubr.bf16.gmra.mxu1 %v4129_v59  ;;  %3510 = vmatprep.mubr.bf16.mxu0 %v4144_v60 }
 0x19e   : > { %3607 = vmatprep.mubr.bf16.mxu1 %v4146_v61  ;;  %v1312_v61 = vld [vmem:[%s6450_s0 + $0x230] sm:$0xff] }
 0x19f   : > { %v4100_v8 = vcombine.high %v1312_v61, %v1320_v62 }
 0x1a4   : > { %3511 = vmatmul.mubr.bf16.gmra.mxu0 %v4143_v2  ;;  %v1321_v2 = vld [vmem:[%s6450_s0 + $0x278] sm:$0xff] }
 0x1a5   : > { %3608 = vmatmul.mubr.bf16.gmra.mxu1 %v4145_v3  ;;  %3648 = vmatprep.mubr.bf16.mxu0 %v4036_v4 }
 0x1a6   : > { %3745 = vmatprep.mubr.bf16.mxu1 %v4038_v5  ;;  %v4083_v5 = vcombine.low %v1296_v39, %v1304_v40 }
 0x1ac   : > { %v4299_v14 = vpop.f32.mrf.mxu0  ;;  %3649 = vmatmul.mubr.bf16.vlgmr.msra.gmra.mxu0 %v4035_v10 }
 0x1ad   : > { %v4363_v15 = vpop.f32.mrf.mxu1  ;;  %3746 = vmatmul.mubr.bf16.vlgmr.msra.gmra.mxu1 %v4037_v11  ;;  %3656 = vmatprep.mubr.bf16.mxu0 %v4052_v12  ;;  %v4102_v11 = vcombine.high %v1313_v1, %v1321_v2 }
 0x1ae   : > { %v4300_v16 = vpop.f32.mrf.mxu0  ;;  %3753 = vmatprep.mubr.bf16.mxu1 %v4054_v13 }
 0x1af   : > { %v4301_v19 = vadd.f32 %v4300_v16, %v4299_v14  ;;  %v4364_v20 = vpop.f32.mrf.mxu1 }
 0x1b0   : > { %v4365_v23 = vadd.f32 %v4364_v20, %v4363_v15  ;;  %v4302_v24 = vpop.f32.mrf.mxu0  ;;  %v1336_v20 = vld [vmem:[%s6450_s0 + $0x2f0] sm:$0xff] }
 0x1b1   : > { %v4366_v26 = vpop.f32.mrf.mxu1 }
 0x1b2   : > { %v6057_v29 = vadd.f32 %v4365_v23, %v4301_v19  ;;  %v4303_v30 = vpop.f32.mrf.mxu0  ;;  %v1328_v19 = vld [vmem:[%s6450_s0 + $0x2b0] sm:$0xff]  ;;  %v1329_v23 = vld [vmem:[%s6450_s0 + $0x2b8] sm:$0xff] }
 0x1b3   : > { %v4304_v32 = vadd.f32 %v4303_v30, %v4302_v24  ;;  %v4367_v33 = vpop.f32.mrf.mxu1  ;;  %v1337_v24 = vld [vmem:[%s6450_s0 + $0x2f8] sm:$0xff]  ;;  %v4101_v30 = vcombine.low %v1313_v1, %v1321_v2 }
 0x1b4   : > { %v4368_v34 = vadd.f32 %v4367_v33, %v4366_v26  ;;  %v4305_v35 = vpop.f32.mrf.mxu0  ;;  %3657 = vmatmul.mubr.bf16.gmra.mxu0 %v4051_v25 }
 0x1b5   : > { %v4369_v36 = vpop.f32.mrf.mxu1  ;;  %3754 = vmatmul.mubr.bf16.gmra.mxu1 %v4053_v27  ;;  %3664 = vmatprep.mubr.bf16.mxu0 %v4068_v28  ;;  %v4099_v27 = vcombine.low %v1312_v61, %v1320_v62 }
 0x1b6   : > { %v6059_v37 = vadd.f32 %v4368_v34, %v4304_v32  ;;  %v4306_v38 = vpop.f32.mrf.mxu0  ;;  %3761 = vmatprep.mubr.bf16.mxu1 %v4070_v31  ;;  %v4116_v31 = vcombine.high %v1328_v19, %v1336_v20  ;;  %v4118_v34 = vcombine.high %v1329_v23, %v1337_v24 }
 0x1b7   : > { %v4307_v41 = vadd.f32 %v4306_v38, %v4305_v35  ;;  %v4370_v42 = vpop.f32.mrf.mxu1 }
 0x1b8   : > { %v4371_v45 = vadd.f32 %v4370_v42, %v4369_v36  ;;  %v4308_v46 = vpop.f32.mrf.mxu0 }
 0x1b9   : > { %v4372_v48 = vpop.f32.mrf.mxu1 }
 0x1ba   : > { %v6073_v51 = vadd.f32 %v4371_v45, %v4307_v41  ;;  %v4309_v52 = vpop.f32.mrf.mxu0 }
 0x1bb   : > { %v4310_v54 = vadd.f32 %v4309_v52, %v4308_v46  ;;  %v4373_v55 = vpop.f32.mrf.mxu1  ;;  %v4115_v52 = vcombine.low %v1328_v19, %v1336_v20 }
 0x1bc   : > { %v4374_v56 = vadd.f32 %v4373_v55, %v4372_v48  ;;  %v4311_v57 = vpop.f32.mrf.mxu0  ;;  %3665 = vmatmul.mubr.bf16.gmra.mxu0 %v4067_v47  ;;  %v1345_v47 = vld [vmem:[%s6450_s0 + $0x338] sm:$0xff]  ;;  %v4132_v55 = vcombine.high %v1344_v43, %v1352_v44 }
 0x1bd   : > { %v4375_v58 = vpop.f32.mrf.mxu1  ;;  %3762 = vmatmul.mubr.bf16.gmra.mxu1 %v4069_v49  ;;  %3672 = vmatprep.mubr.bf16.mxu0 %v4084_v50  ;;  %v1353_v48 = vld [vmem:[%s6450_s0 + $0x378] sm:$0xff] }
 0x1be   : > { %v6075_v59 = vadd.f32 %v4374_v56, %v4310_v54  ;;  %v4312_v60 = vpop.f32.mrf.mxu0  ;;  %3769 = vmatprep.mubr.bf16.mxu1 %v4086_v53  ;;  %v4117_v54 = vcombine.low %v1329_v23, %v1337_v24 }
 0x1bf   : > { %v4313_v63 = vadd.f32 %v4312_v60, %v4311_v57  ;;  %v4376_v0 = vpop.f32.mrf.mxu1 }
 0x1c0   : > { %v4377_v3 = vadd.f32 %v4376_v0, %v4375_v58  ;;  %v4314_v4 = vpop.f32.mrf.mxu0  ;;  %v4134_v58 = vcombine.high %v1345_v47, %v1353_v48 }
 0x1c1   : > { %v4378_v6 = vpop.f32.mrf.mxu1 }
 0x1c2   : > { %v6089_v9 = vadd.f32 %v4377_v3, %v4313_v63  ;;  %v4315_v10 = vpop.f32.mrf.mxu0  ;;  %v1360_v3 = vld [vmem:[%s6450_s0 + $0x3b0] sm:$0xff] }
 0x1c3   : > { %v4316_v12 = vadd.f32 %v4315_v10, %v4314_v4  ;;  %v4379_v13 = vpop.f32.mrf.mxu1  ;;  %v1368_v4 = vld [vmem:[%s6450_s0 + $0x3f0] sm:$0xff] }
 0x1c4   : > { %v4380_v14 = vadd.f32 %v4379_v13, %v4378_v6  ;;  %v4317_v15 = vpop.f32.mrf.mxu0  ;;  %3673 = vmatmul.mubr.bf16.gmra.mxu0 %v4083_v5 }
 0x1c5   : > { %v4381_v16 = vpop.f32.mrf.mxu1  ;;  %3770 = vmatmul.mubr.bf16.gmra.mxu1 %v4085_v7  ;;  %3680 = vmatprep.mubr.bf16.mxu0 %v4100_v8  ;;  %v1361_v7 = vld [vmem:[%s6450_s0 + $0x3b8] sm:$0xff] }
 0x1c6   : > { %v6091_v17 = vadd.f32 %v4380_v14, %v4316_v12  ;;  %v4318_v18 = vpop.f32.mrf.mxu0  ;;  %3777 = vmatprep.mubr.bf16.mxu1 %v4102_v11  ;;  %v1369_v8 = vld [vmem:[%s6450_s0 + $0x3f8] sm:$0xff]  ;;  %v4131_v12 = vcombine.low %v1344_v43, %v1352_v44  ;;  %v4133_v14 = vcombine.low %v1345_v47, %v1353_v48 }
 0x1c7   : > { %v4319_v21 = vadd.f32 %v4318_v18, %v4317_v15  ;;  %v4382_v22 = vpop.f32.mrf.mxu1  ;;  %v4148_v15 = vcombine.high %v1360_v3, %v1368_v4  ;;  %v4150_v19 = vcombine.high %v1361_v7, %v1369_v8 }
 0x1c8   : > { %v4383_v25 = vadd.f32 %v4382_v22, %v4381_v16  ;;  %v4320_v26 = vpop.f32.mrf.mxu0 }
 0x1c9   : > { %v4384_v28 = vpop.f32.mrf.mxu1 }
 0x1ca   : > { %v6105_v32 = vadd.f32 %v4383_v25, %v4319_v21  ;;  %v4321_v33 = vpop.f32.mrf.mxu0 }
 0x1cb   : > { %v4322_v35 = vadd.f32 %v4321_v33, %v4320_v26  ;;  %v4385_v36 = vpop.f32.mrf.mxu1  ;;  %v4147_v33 = vcombine.low %v1360_v3, %v1368_v4 }
 0x1cc   : > { %v4386_v38 = vadd.f32 %v4385_v36, %v4384_v28  ;;  %v4323_v39 = vpop.f32.mrf.mxu0  ;;  %3681 = vmatmul.mubr.bf16.gmra.mxu0 %v4099_v27 }
 0x1cd   : > { %v4387_v40 = vpop.f32.mrf.mxu1  ;;  %3778 = vmatmul.mubr.bf16.gmra.mxu1 %v4101_v30  ;;  %3688 = vmatprep.mubr.bf16.mxu0 %v4116_v31 }
 0x1ce   : > { %v6107_v41 = vadd.f32 %v4386_v38, %v4322_v35  ;;  %v4324_v42 = vpop.f32.mrf.mxu0  ;;  %3785 = vmatprep.mubr.bf16.mxu1 %v4118_v34  ;;  %v4149_v35 = vcombine.low %v1361_v7, %v1369_v8 }
 0x1cf   : > { %v4325_v45 = vadd.f32 %v4324_v42, %v4323_v39  ;;  %v4388_v46 = vpop.f32.mrf.mxu1 }
 0x1d0   : > { %v4389_v49 = vadd.f32 %v4388_v46, %v4387_v40  ;;  %v4326_v50 = vpop.f32.mrf.mxu0 }
 0x1d1   : > { %v4390_v53 = vpop.f32.mrf.mxu1 }
 0x1d2   : > { %v6121_v56 = vadd.f32 %v4389_v49, %v4325_v45  ;;  %v4327_v57 = vpop.f32.mrf.mxu0 }
 0x1d3   : > { %v4328_v60 = vadd.f32 %v4327_v57, %v4326_v50  ;;  %v4391_v61 = vpop.f32.mrf.mxu1 }
 0x1d4   : > { %v4392_v62 = vadd.f32 %v4391_v61, %v4390_v53  ;;  %v4329_v63 = vpop.f32.mrf.mxu0  ;;  %3689 = vmatmul.mubr.bf16.gmra.mxu0 %v4115_v52 }
 0x1d5   : > { %v4393_v0 = vpop.f32.mrf.mxu1  ;;  %3786 = vmatmul.mubr.bf16.gmra.mxu1 %v4117_v54  ;;  %3696 = vmatprep.mubr.bf16.mxu0 %v4132_v55 }
 0x1d6   : > { %v6123_v1 = vadd.f32 %v4392_v62, %v4328_v60  ;;  %v4330_v2 = vpop.f32.mrf.mxu0  ;;  %3793 = vmatprep.mubr.bf16.mxu1 %v4134_v58 }
 0x1d7   : > { %v4331_v5 = vadd.f32 %v4330_v2, %v4329_v63  ;;  %v4394_v6 = vpop.f32.mrf.mxu1 }
 0x1d8   : > { %v4395_v10 = vadd.f32 %v4394_v6, %v4393_v0  ;;  %v4332_v11 = vpop.f32.mrf.mxu0 }
 0x1d9   : > { %v4396_v13 = vpop.f32.mrf.mxu1 }
 0x1da   : > { %v6137_v16 = vadd.f32 %v4395_v10, %v4331_v5  ;;  %v4333_v18 = vpop.f32.mrf.mxu0 }
 0x1db   : > { %v4334_v20 = vadd.f32 %v4333_v18, %v4332_v11  ;;  %v4397_v21 = vpop.f32.mrf.mxu1 }
 0x1dc   : > { %v4398_v22 = vadd.f32 %v4397_v21, %v4396_v13  ;;  %v4335_v23 = vpop.f32.mrf.mxu0  ;;  %3697 = vmatmul.mubr.bf16.gmra.mxu0 %v4131_v12 }
 0x1dd   : > { %v4399_v24 = vpop.f32.mrf.mxu1  ;;  %3794 = vmatmul.mubr.bf16.gmra.mxu1 %v4133_v14  ;;  %3704 = vmatprep.mubr.bf16.mxu0 %v4148_v15 }
 0x1de   : > { %v6139_v25 = vadd.f32 %v4398_v22, %v4334_v20  ;;  %v4336_v26 = vpop.f32.mrf.mxu0  ;;  %3801 = vmatprep.mubr.bf16.mxu1 %v4150_v19 }
 0x1df   : > { %v4337_v27 = vadd.f32 %v4336_v26, %v4335_v23  ;;  %v4400_v28 = vpop.f32.mrf.mxu1 }
 0x1e0   : > { %v4401_v30 = vadd.f32 %v4400_v28, %v4399_v24  ;;  %v4338_v31 = vpop.f32.mrf.mxu0 }
 0x1e1   : > { %v4402_v34 = vpop.f32.mrf.mxu1 }
 0x1e2   : > { %v6141_v36 = vadd.f32 %v4401_v30, %v4337_v27  ;;  %v4339_v38 = vpop.f32.mrf.mxu0 }
 0x1e3   : > { %v4340_v39 = vadd.f32 %v4339_v38, %v4338_v31  ;;  %v4403_v40 = vpop.f32.mrf.mxu1 }
 0x1e4   : > { %v4404_v42 = vadd.f32 %v4403_v40, %v4402_v34  ;;  %v4341_v43 = vpop.f32.mrf.mxu0  ;;  %3705 = vmatmul.mubr.bf16.gmra.mxu0 %v4147_v33 }
 0x1e5   : > { %v4405_v44 = vpop.f32.mrf.mxu1  ;;  %3802 = vmatmul.mubr.bf16.gmra.mxu1 %v4149_v35 }
 0x1e6   : > { %v6143_v45 = vadd.f32 %v4404_v42, %v4340_v39  ;;  %v4342_v46 = vpop.f32.mrf.mxu0 }
 0x1e7   : > { %v4343_v47 = vadd.f32 %v4342_v46, %v4341_v43  ;;  %v4406_v48 = vpop.f32.mrf.mxu1 }
 0x1e8   : > { %v4407_v49 = vadd.f32 %v4406_v48, %v4405_v44  ;;  %v4344_v50 = vpop.f32.mrf.mxu0 }
 0x1e9   : > { %v4408_v52 = vpop.f32.mrf.mxu1 }
 0x1ea   : > { %v6145_v53 = vadd.f32 %v4407_v49, %v4343_v47  ;;  %v4345_v54 = vpop.f32.mrf.mxu0 }
 0x1eb   : > { %v4346_v55 = vadd.f32 %v4345_v54, %v4344_v50  ;;  %v4409_v57 = vpop.f32.mrf.mxu1 }
 0x1ec   : > { %v4410_v58 = vadd.f32 %v4409_v57, %v4408_v52  ;;  %v4427_v60 = vpop.f32.mrf.mxu0 }
 0x1ed   : > { %v4491_v61 = vpop.f32.mrf.mxu1 }
 0x1ee   : > { %v6147_v62 = vadd.f32 %v4410_v58, %v4346_v55  ;;  %v4428_v63 = vpop.f32.mrf.mxu0 }
 0x1ef   : > { %v4429_v0 = vadd.f32 %v4428_v63, %v4427_v60  ;;  %v4492_v2 = vpop.f32.mrf.mxu1 }
 0x1f0   : > { %v4493_v3 = vadd.f32 %v4492_v2, %v4491_v61  ;;  %v4430_v4 = vpop.f32.mrf.mxu0 }
 0x1f1   : > { %v3263_v5 = vadd.f32 %v4429_v0, %v6057_v29  ;;  %v4494_v6 = vpop.f32.mrf.mxu1 }
 0x1f2   : > { %v4431_v7 = vpop.f32.mrf.mxu0 }
 0x1f3   : > { %v6150_v8 = vadd.f32 %v4493_v3, %v3263_v5  ;;  %v4432_v10 = vadd.f32 %v4431_v7, %v4430_v4  ;;  %v4495_v11 = vpop.f32.mrf.mxu1 }
 0x1f4   : > { %v4496_v12 = vadd.f32 %v4495_v11, %v4494_v6  ;;  %v4433_v13 = vpop.f32.mrf.mxu0 }
 0x1f5   : > { %v3266_v14 = vadd.f32 %v4432_v10, %v6059_v37  ;;  %v4497_v15 = vpop.f32.mrf.mxu1 }
 0x1f6   : > { %v4434_v18 = vpop.f32.mrf.mxu0 }
 0x1f7   : > { %v6153_v19 = vadd.f32 %v4496_v12, %v3266_v14  ;;  %v4435_v20 = vadd.f32 %v4434_v18, %v4433_v13  ;;  %v4498_v21 = vpop.f32.mrf.mxu1 }
 0x1f8   : > { %v4499_v22 = vadd.f32 %v4498_v21, %v4497_v15  ;;  %v4436_v23 = vpop.f32.mrf.mxu0 }
 0x1f9   : > { %v3271_v29 = vadd.f32 %v4435_v20, %v6073_v51  ;;  %v4500_v24 = vpop.f32.mrf.mxu1 }
 0x1fa   : > { %v4437_v26 = vpop.f32.mrf.mxu0 }
 0x1fb   : > { %v6156_v27 = vadd.f32 %v4499_v22, %v3271_v29  ;;  %v4438_v28 = vadd.f32 %v4437_v26, %v4436_v23  ;;  %v4501_v30 = vpop.f32.mrf.mxu1 }
 0x1fc   : > { %v4502_v31 = vadd.f32 %v4501_v30, %v4500_v24  ;;  %v4439_v33 = vpop.f32.mrf.mxu0 }
 0x1fd   : > { %v3274_v37 = vadd.f32 %v4438_v28, %v6075_v59  ;;  %v4503_v34 = vpop.f32.mrf.mxu1 }
 0x1fe   : > { %v4440_v35 = vpop.f32.mrf.mxu0 }
 0x1ff   : > { %v6159_v38 = vadd.f32 %v4502_v31, %v3274_v37  ;;  %v4441_v39 = vadd.f32 %v4440_v35, %v4439_v33  ;;  %v4504_v40 = vpop.f32.mrf.mxu1 }
 0x200   : > { %v4505_v42 = vadd.f32 %v4504_v40, %v4503_v34  ;;  %v4442_v43 = vpop.f32.mrf.mxu0 }
 0x201   : > { %v3279_v51 = vadd.f32 %v4441_v39, %v6089_v9  ;;  %v4506_v44 = vpop.f32.mrf.mxu1 }
 0x202   : > { %v4443_v46 = vpop.f32.mrf.mxu0 }
 0x203   : > { %v6162_v47 = vadd.f32 %v4505_v42, %v3279_v51  ;;  %v4444_v48 = vadd.f32 %v4443_v46, %v4442_v43  ;;  %v4507_v49 = vpop.f32.mrf.mxu1 }
 0x204   : > { %v4508_v50 = vadd.f32 %v4507_v49, %v4506_v44  ;;  %v4445_v52 = vpop.f32.mrf.mxu0 }
 0x205   : > { %v3282_v59 = vadd.f32 %v4444_v48, %v6091_v17  ;;  %v4509_v54 = vpop.f32.mrf.mxu1 }
 0x206   : > { %v4446_v55 = vpop.f32.mrf.mxu0 }
 0x207   : > { %v6165_v57 = vadd.f32 %v4508_v50, %v3282_v59  ;;  %v4447_v58 = vadd.f32 %v4446_v55, %v4445_v52  ;;  %v4510_v60 = vpop.f32.mrf.mxu1 }
 0x208   : > { %v4511_v61 = vadd.f32 %v4510_v60, %v4509_v54  ;;  %v4448_v63 = vpop.f32.mrf.mxu0 }
 0x209   : > { %v3287_v9 = vadd.f32 %v4447_v58, %v6105_v32  ;;  %v4512_v0 = vpop.f32.mrf.mxu1 }
 0x20a   : > { %v4449_v2 = vpop.f32.mrf.mxu0 }
 0x20b   : > { %v6168_v3 = vadd.f32 %v4511_v61, %v3287_v9  ;;  %v4450_v4 = vadd.f32 %v4449_v2, %v4448_v63  ;;  %v4513_v5 = vpop.f32.mrf.mxu1 }
 0x20c   : > { %v4514_v6 = vadd.f32 %v4513_v5, %v4512_v0  ;;  %v4451_v7 = vpop.f32.mrf.mxu0 }
 0x20d   : > { %v3290_v17 = vadd.f32 %v4450_v4, %v6107_v41  ;;  %v4515_v10 = vpop.f32.mrf.mxu1 }
 0x20e   : > { %v4452_v11 = vpop.f32.mrf.mxu0 }
 0x20f   : > { %v6171_v12 = vadd.f32 %v4514_v6, %v3290_v17  ;;  %v4453_v13 = vadd.f32 %v4452_v11, %v4451_v7  ;;  %v4516_v14 = vpop.f32.mrf.mxu1 }
 0x210   : > { %v4517_v15 = vadd.f32 %v4516_v14, %v4515_v10  ;;  %v4454_v18 = vpop.f32.mrf.mxu0 }
 0x211   : > { %v3295_v32 = vadd.f32 %v4453_v13, %v6121_v56  ;;  %v4518_v20 = vpop.f32.mrf.mxu1 }
 0x212   : > { %v4455_v21 = vpop.f32.mrf.mxu0 }
 0x213   : > { %v6174_v22 = vadd.f32 %v4517_v15, %v3295_v32  ;;  %v4456_v23 = vadd.f32 %v4455_v21, %v4454_v18  ;;  %v4519_v29 = vpop.f32.mrf.mxu1 }
 0x214   : > { %v4520_v24 = vadd.f32 %v4519_v29, %v4518_v20  ;;  %v4457_v26 = vpop.f32.mrf.mxu0 }
 0x215   : > { %v3298_v41 = vadd.f32 %v4456_v23, %v6123_v1  ;;  %v4521_v28 = vpop.f32.mrf.mxu1 }
 0x216   : > { %v4458_v30 = vpop.f32.mrf.mxu0 }
 0x217   : > { %v6177_v31 = vadd.f32 %v4520_v24, %v3298_v41  ;;  %v4459_v33 = vadd.f32 %v4458_v30, %v4457_v26  ;;  %v4522_v37 = vpop.f32.mrf.mxu1 }
 0x218   : > { %v4523_v34 = vadd.f32 %v4522_v37, %v4521_v28  ;;  %v4460_v35 = vpop.f32.mrf.mxu0 }
 0x219   : > { %v3303_v56 = vadd.f32 %v4459_v33, %v6137_v16  ;;  %v4524_v39 = vpop.f32.mrf.mxu1 }
 0x21a   : > { %v4461_v40 = vpop.f32.mrf.mxu0 }
 0x21b   : > { %v6180_v42 = vadd.f32 %v4523_v34, %v3303_v56  ;;  %v4462_v43 = vadd.f32 %v4461_v40, %v4460_v35  ;;  %v4525_v51 = vpop.f32.mrf.mxu1 }
 0x21c   : > { %v4526_v44 = vadd.f32 %v4525_v51, %v4524_v39  ;;  %v4463_v46 = vpop.f32.mrf.mxu0 }
 0x21d   : > { %v3306_v1 = vadd.f32 %v4462_v43, %v6139_v25  ;;  %v4527_v48 = vpop.f32.mrf.mxu1 }
 0x21e   : > { %v4464_v49 = vpop.f32.mrf.mxu0 }
 0x21f   : > { %v6183_v50 = vadd.f32 %v4526_v44, %v3306_v1  ;;  %v4465_v52 = vadd.f32 %v4464_v49, %v4463_v46  ;;  %v4528_v59 = vpop.f32.mrf.mxu1 }
 0x220   : > { %v4529_v54 = vadd.f32 %v4528_v59, %v4527_v48  ;;  %v4466_v55 = vpop.f32.mrf.mxu0 }
 0x221   : > { %6454 = vst [vmem:[#allocation4_spill] sm:$0xff] %v6183_v50  ;;  %v3311_v16 = vadd.f32 %v4465_v52, %v6141_v36  ;;  %v4530_v58 = vpop.f32.mrf.mxu1 }
 0x222   : > { %v4467_v60 = vpop.f32.mrf.mxu0 }
 0x223   : > { %v6186_v61 = vadd.f32 %v4529_v54, %v3311_v16  ;;  %v4468_v63 = vadd.f32 %v4467_v60, %v4466_v55  ;;  %v4531_v9 = vpop.f32.mrf.mxu1 }
 0x224   : > { %v4532_v0 = vadd.f32 %v4531_v9, %v4530_v58  ;;  %v4469_v2 = vpop.f32.mrf.mxu0 }
 0x225   : > { %6455 = vst [vmem:[#allocation5_spill] sm:$0xff] %v6186_v61  ;;  %v3314_v25 = vadd.f32 %v4468_v63, %v6143_v45  ;;  %v4533_v4 = vpop.f32.mrf.mxu1 }
 0x226   : > { %v4470_v5 = vpop.f32.mrf.mxu0 }
 0x227   : > { %v6189_v6 = vadd.f32 %v4532_v0, %v3314_v25  ;;  %v4471_v7 = vadd.f32 %v4470_v5, %v4469_v2  ;;  %v4534_v17 = vpop.f32.mrf.mxu1 }
 0x228   : > { %v4535_v10 = vadd.f32 %v4534_v17, %v4533_v4  ;;  %v4472_v11 = vpop.f32.mrf.mxu0 }
 0x229   : > { %6456 = vst [vmem:[#allocation6_spill] sm:$0xff] %v6189_v6  ;;  %v3319_v36 = vadd.f32 %v4471_v7, %v6145_v53  ;;  %v4536_v13 = vpop.f32.mrf.mxu1 }
 0x22a   : > { %v4473_v14 = vpop.f32.mrf.mxu0 }
 0x22b   : > { %v6192_v15 = vadd.f32 %v4535_v10, %v3319_v36  ;;  %v4474_v18 = vadd.f32 %v4473_v14, %v4472_v11  ;;  %v4537_v32 = vpop.f32.mrf.mxu1 }
 0x22c   : > { %v4538_v20 = vadd.f32 %v4537_v32, %v4536_v13  ;;  %v4555_v21 = vpop.f32.mrf.mxu0 }
 0x22d   : > { %6457 = vst [vmem:[#allocation7_spill] sm:$0xff] %v6192_v15  ;;  %v3322_v45 = vadd.f32 %v4474_v18, %v6147_v62  ;;  %v6195_v23 = vpop.f32.mrf.mxu1 }
 0x22e   : > { %v4556_v29 = vpop.f32.mrf.mxu0 }
 0x22f   : > { %v6197_v24 = vadd.f32 %v4538_v20, %v3322_v45  ;;  %v6199_v26 = vpop.f32.mrf.mxu1 }
 0x230   : > { %v4558_v41 = vpop.f32.mrf.mxu0 }
 0x231   : > { %6458 = vst [vmem:[#allocation8_spill] sm:$0xff] %v6197_v24  ;;  %v6201_v28 = vpop.f32.mrf.mxu1 }
 0x232   : > { %v4559_v53 = vpop.f32.mrf.mxu0 }
 0x233   : > { %v6203_v30 = vpop.f32.mrf.mxu1 }
 0x234   : > { %v6205_v33 = vpop.f32.mrf.mxu0 }
 0x235   : > { %v6207_v37 = vpop.f32.mrf.mxu1 }
 0x236   : > { %v6209_v34 = vpop.f32.mrf.mxu0 }
 0x237   : > { %v6211_v62 = vpop.f32.mrf.mxu1 }
 0x238   : > { %v6213_v35 = vpop.f32.mrf.mxu0 }
 0x239   : > { %v6215_v56 = vpop.f32.mrf.mxu1 }
 0x23a   : > { %v6217_v39 = vpop.f32.mrf.mxu0 }
 0x23b   : > { %v6219_v40 = vpop.f32.mrf.mxu1 }
 0x23c   : > { %v6221_v43 = vpop.f32.mrf.mxu0 }
 0x23d   : > { %v6223_v51 = vpop.f32.mrf.mxu1 }
 0x23e   : > { %v6225_v44 = vpop.f32.mrf.mxu0 }
 0x23f   : > { %v6227_v46 = vpop.f32.mrf.mxu1 }
 0x240   : > { %v6229_v1 = vpop.f32.mrf.mxu0 }
 0x241   : > { %v6231_v48 = vpop.f32.mrf.mxu1 }
 0x242   : > { %v6233_v49 = vpop.f32.mrf.mxu0 }
 0x243   : > { %v6235_v52 = vpop.f32.mrf.mxu1 }
 0x244   : > { %v6237_v59 = vpop.f32.mrf.mxu0 }
 0x245   : > { %v6239_v54 = vpop.f32.mrf.mxu1 }
 0x246   : > { %v6241_v55 = vpop.f32.mrf.mxu0 }
 0x247   : > { %v6243_v16 = vpop.f32.mrf.mxu1 }
 0x248   : > { %v6245_v58 = vpop.f32.mrf.mxu0 }
 0x249   : > { %v6247_v60 = vpop.f32.mrf.mxu1 }
 0x24a   : > { %v6249_v63 = vpop.f32.mrf.mxu0 }
 0x24b   : > { %v6251_v9 = vpop.f32.mrf.mxu1 }
 0x24c   : > { %v6253_v0 = vpop.f32.mrf.mxu0 }
 0x24d   : > { %v6255_v2 = vpop.f32.mrf.mxu1 }
 0x24e   : > { %v6257_v25 = vpop.f32.mrf.mxu0 }
 0x24f   : > { %v6259_v4 = vpop.f32.mrf.mxu1 }
 0x250   : > { %v6261_v5 = vpop.f32.mrf.mxu0 }
 0x251   : > { %v6263_v7 = vpop.f32.mrf.mxu1 }
 0x252   : > { %v6265_v17 = vpop.f32.mrf.mxu0 }
 0x253   : > { %v6267_v10 = vpop.f32.mrf.mxu1 }
 0x254   : > { %v6269_v11 = vpop.f32.mrf.mxu0 }
 0x255   : > { %v6271_v36 = vpop.f32.mrf.mxu1 }
 0x256   : > { %6459 = vst [vmem:[#allocation9_spill] sm:$0xff] %v6271_v36  ;;  %v6273_v13 = vpop.f32.mrf.mxu0 }
 0x257   : > { %v6275_v14 = vpop.f32.mrf.mxu1 }
 0x258   : > { %6460 = vst [vmem:[#allocation10_spill] sm:$0xff] %v6275_v14  ;;  %v6277_v18 = vpop.f32.mrf.mxu0 }
 0x259   : > { %6461 = vst [vmem:[#allocation11_spill] sm:$0xff] %v6277_v18  ;;  %v6279_v32 = vpop.f32.mrf.mxu1 }
 0x25a   : > { %6462 = vst [vmem:[#allocation12_spill] sm:$0xff] %v6279_v32  ;;  %v6281_v20 = vpop.f32.mrf.mxu0 }
 0x25b   : > { %6463 = vst [vmem:[#allocation13_spill] sm:$0xff] %v6281_v20  ;;  %v6283_v45 = vpop.f32.mrf.mxu1 }
 0x25c   : > { %6464 = vst [vmem:[#allocation14_spill] sm:$0xff] %v6283_v45  ;;  %v6285_v24 = vpop.f32.mrf.mxu0 }
 0x25d   : > { %6465 = vst [vmem:[#allocation15_spill] sm:$0xff] %v6285_v24  ;;  %v6287_v15 = vpop.f32.mrf.mxu1  ;;  %v4557_v24 = vadd.f32 %v4556_v29, %v4555_v21 }
 0x25e   : > { %6466 = vst [vmem:[#allocation16_spill] sm:$0xff] %v6287_v15  ;;  %v6289_v6 = vpop.f32.mrf.mxu0 }
 0x25f   : > { %6467 = vst [vmem:[#allocation17_spill] sm:$0xff] %v6289_v6  ;;  %v6291_v61 = vpop.f32.mrf.mxu1 }
 0x260   : > { %6468 = vst [vmem:[#allocation18_spill] sm:$0xff] %v6291_v61  ;;  %v6293_v50 = vpop.f32.mrf.mxu0 }
 0x261   : > { %6469 = vst [vmem:[#allocation19_spill] sm:$0xff] %v6293_v50  ;;  %v6295_v36 = vpop.f32.mrf.mxu1  ;;  %v4560_v50 = vadd.f32 %v4559_v53, %v4558_v41 }
 0x262   : > { %6470 = vst [vmem:[#allocation20_spill] sm:$0xff] %v6295_v36  ;;  %v6297_v14 = vpop.f32.mrf.mxu0 }
 0x263   : > { %6471 = vst [vmem:[#allocation21_spill] sm:$0xff] %v6297_v14  ;;  %v6299_v18 = vpop.f32.mrf.mxu1  ;;  %v3457_v14 = vadd.f32 %v4557_v24, %v6150_v8  ;;  %v3460_v21 = vadd.f32 %v4560_v50, %v6153_v19  ;;  %v4624_v8 = vadd.f32 %v6203_v30, %v6201_v28  ;;  %v4566_v50 = vadd.f32 %v6217_v39, %v6213_v35 }
 0x264   : > { %6472 = vst [vmem:[#allocation22_spill] sm:$0xff] %v6299_v18  ;;  %v6301_v32 = vpop.f32.mrf.mxu0 }
 0x265   : > { %6473 = vst [vmem:[#allocation23_spill] sm:$0xff] %v6301_v32  ;;  %v6303_v20 = vpop.f32.mrf.mxu1  ;;  %v3468_v35 = vadd.f32 %v4566_v50, %v6159_v38 }
 0x266   : > { %6474 = vst [vmem:[#allocation24_spill] sm:$0xff] %v6303_v20  ;;  %v6305_v45 = vpop.f32.mrf.mxu0  ;;  %v4621_v20 = vadd.f32 %v6199_v26, %v6195_v23  ;;  %v3557_v23 = vadd.f32 %v4624_v8, %v3460_v21 }
 0x267   : > { %6475 = vst [vmem:[#allocation25_spill] sm:$0xff] %v6305_v45  ;;  %v6307_v15 = vpop.f32.mrf.mxu1 }
 0x268   : > { %6476 = vst [vmem:[#allocation26_spill] sm:$0xff] %v6307_v15  ;;  %v6309_v6 = vpop.f32.mrf.mxu0  ;;  %v3554_v15 = vadd.f32 %v4621_v20, %v3457_v14  ;;  %v4627_v20 = vadd.f32 %v6211_v62, %v6207_v37  ;;  %v4630_v62 = vadd.f32 %v6219_v40, %v6215_v56 }
 0x269   : > { %6477 = vst [vmem:[#allocation27_spill] sm:$0xff] %v6309_v6  ;;  %v6311_v61 = vpop.f32.mrf.mxu1  ;;  %v4563_v6 = vadd.f32 %v6209_v34, %v6205_v33 }
 0x26a   : > { %6478 = vst [vmem:[#allocation28_spill] sm:$0xff] %v6311_v61  ;;  %v6313_v36 = vpop.f32.mrf.mxu0 }
 0x26b   : > { %6479 = vst [vmem:[#allocation29_spill] sm:$0xff] %v6313_v36  ;;  %v6316_v18 = vpop.f32.mrf.mxu1  ;;  %v3465_v19 = vadd.f32 %v4563_v6, %v6156_v27  ;;  %v4569_v27 = vadd.f32 %v6225_v44, %v6221_v43  ;;  %v3565_v43 = vadd.f32 %v4630_v62, %v3468_v35  ;;  %v4572_v44 = vadd.f32 %v6233_v49, %v6229_v1 }
 0x26c   : > { %6480 = vst [vmem:[#allocation30_spill] sm:$0xff] %v6316_v18  ;;  %v4683_v32 = vpop.f32.mrf.mxu0  ;;  %v4639_v35 = vadd.f32 %v6243_v16, %v6239_v54 }
 0x26d   : > { %v4747_v45 = vpop.f32.mrf.mxu1  ;;  %v3562_v30 = vadd.f32 %v4627_v20, %v3465_v19 }
 0x26e   : > { %v4684_v29 = vpop.f32.mrf.mxu0 }
 0x26f   : > { %v4685_v61 = vadd.f32 %v4684_v29, %v4683_v32  ;;  %v4748_v41 = vpop.f32.mrf.mxu1 }
 0x270   : > { %v4686_v24 = vpop.f32.mrf.mxu0  ;;  %v4749_v18 = vadd.f32 %v4748_v41, %v4747_v45  ;;  %v3473_v41 = vadd.f32 %v4569_v27, %v6162_v47  ;;  %v3476_v47 = vadd.f32 %v4572_v44, %v6165_v57 }
 0x271   : > { %v3651_v53 = vadd.f32 %v4685_v61, %v3554_v15  ;;  %v4750_v36 = vpop.f32.mrf.mxu1 }
 0x272   : > { %v4687_v26 = vpop.f32.mrf.mxu0 }
 0x273   : > { %v3748_v14 = vadd.f32 %v4749_v18, %v3651_v53  ;;  %v4688_v33 = vadd.f32 %v4687_v26, %v4686_v24  ;;  %v4751_v34 = vpop.f32.mrf.mxu1 }
 0x274   : > { %v4689_v32 = vpop.f32.mrf.mxu0  ;;  %v4752_v15 = vadd.f32 %v4751_v34, %v4750_v36 }
 0x275   : > { %3810 = vst [vmem:[%s6332_s9] sm:$0xff] %v3748_v14  ;;  %v3654_v61 = vadd.f32 %v4688_v33, %v3557_v23  ;;  %v4753_v28 = vpop.f32.mrf.mxu1  ;;  %v4633_v23 = vadd.f32 %v6227_v46, %v6223_v51  ;;  %v4575_v33 = vadd.f32 %v6241_v55, %v6237_v59  ;;  %v4636_v51 = vadd.f32 %v6235_v52, %v6231_v48 }
 0x276   : > { %v4690_v6 = vpop.f32.mrf.mxu0 }
 0x277   : > { %v3751_v39 = vadd.f32 %v4752_v15, %v3654_v61  ;;  %v4691_v18 = vadd.f32 %v4690_v6, %v4689_v32  ;;  %v4754_v45 = vpop.f32.mrf.mxu1  ;;  %v3570_v50 = vadd.f32 %v4633_v23, %v3473_v41  ;;  %v4578_v15 = vadd.f32 %v6249_v63, %v6245_v58 }
 0x278   : > { %v4692_v37 = vpop.f32.mrf.mxu0  ;;  %v4755_v29 = vadd.f32 %v4754_v45, %v4753_v28  ;;  %v3573_v57 = vadd.f32 %v4636_v51, %v3476_v47  ;;  %v3481_v27 = vadd.f32 %v4575_v33, %v6168_v3  ;;  %v4581_v63 = vadd.f32 %v6257_v25, %v6253_v0  ;;  %v6483_v51 = vld [vmem:[#allocation9_spill] sm:$0xff] }
 0x279   : > { %3811 = vst [vmem:[%s6332_s9 + $0x8] sm:$0xff] %v3751_v39  ;;  %v3659_v21 = vadd.f32 %v4691_v18, %v3562_v30  ;;  %v4756_v36 = vpop.f32.mrf.mxu1  ;;  %v3484_v18 = vadd.f32 %v4578_v15, %v6171_v12  ;;  %v4587_v23 = vadd.f32 %v6273_v13, %v6269_v11  ;;  %v6481_v13 = vld [vmem:[#allocation11_spill] sm:$0xff] }
 0x27a   : > { %v4693_v8 = vpop.f32.mrf.mxu0  ;;  %v3578_v58 = vadd.f32 %v4639_v35, %v3481_v27  ;;  %v3489_v12 = vadd.f32 %v4581_v63, %v6174_v22 }
 0x27b   : > { %v3756_v38 = vadd.f32 %v4755_v29, %v3659_v21  ;;  %v4694_v24 = vadd.f32 %v4693_v8, %v4692_v37  ;;  %v4757_v53 = vpop.f32.mrf.mxu1  ;;  %v4642_v21 = vadd.f32 %v6251_v9, %v6247_v60  ;;  %v4645_v60 = vadd.f32 %v6259_v4, %v6255_v2 }
 0x27c   : > { %v4695_v26 = vpop.f32.mrf.mxu0  ;;  %v4758_v40 = vadd.f32 %v4757_v53, %v4756_v36  ;;  %v3497_v47 = vadd.f32 %v4587_v23, %v6180_v42  ;;  %v6485_v42 = vld [vmem:[#allocation4_spill] sm:$0xff] }
 0x27d   : > { %3812 = vst [vmem:[%s6332_s9 + $0x10] sm:$0xff] %v3756_v38  ;;  %v3662_v56 = vadd.f32 %v4694_v24, %v3565_v43  ;;  %v4759_v19 = vpop.f32.mrf.mxu1  ;;  %v3581_v41 = vadd.f32 %v4642_v21, %v3484_v18  ;;  %v4584_v43 = vadd.f32 %v6265_v17, %v6261_v5  ;;  %v3586_v22 = vadd.f32 %v4645_v60, %v3489_v12  ;;  %v6489_v18 = vld [vmem:[#allocation14_spill] sm:$0xff] }
 0x27e   : > { %v4696_v14 = vpop.f32.mrf.mxu0 }
 0x27f   : > { %v3759_v1 = vadd.f32 %v4758_v40, %v3662_v56  ;;  %v4697_v49 = vadd.f32 %v4696_v14, %v4695_v26  ;;  %v4760_v34 = vpop.f32.mrf.mxu1  ;;  %v3492_v56 = vadd.f32 %v4584_v43, %v6177_v31 }
 0x280   : > { %v4698_v32 = vpop.f32.mrf.mxu0  ;;  %v4761_v20 = vadd.f32 %v4760_v34, %v4759_v19 }
 0x281   : > { %3813 = vst [vmem:[%s6332_s9 + $0x18] sm:$0xff] %v3759_v1  ;;  %v3667_v46 = vadd.f32 %v4697_v49, %v3570_v50  ;;  %v4762_v61 = vpop.f32.mrf.mxu1  ;;  %v4648_v50 = vadd.f32 %v6267_v10, %v6263_v7  ;;  %v6482_v1 = vld [vmem:[#allocation13_spill] sm:$0xff] }
 0x282   : > { %v4699_v28 = vpop.f32.mrf.mxu0  ;;  %v4590_v49 = vadd.f32 %v6482_v1, %v6481_v13 }
 0x283   : > { %v3764_v59 = vadd.f32 %v4761_v20, %v3667_v46  ;;  %v4700_v55 = vadd.f32 %v4699_v28, %v4698_v32  ;;  %v4763_v6 = vpop.f32.mrf.mxu1  ;;  %v3589_v11 = vadd.f32 %v4648_v50, %v3492_v56  ;;  %v6484_v46 = vld [vmem:[#allocation10_spill] sm:$0xff]  ;;  %v6497_v56 = vld [vmem:[#allocation25_spill] sm:$0xff]  ;;  %v6498_v50 = vld [vmem:[#allocation20_spill] sm:$0xff] }
 0x284   : > { %v4701_v30 = vpop.f32.mrf.mxu0  ;;  %v4764_v52 = vadd.f32 %v4763_v6, %v4762_v61  ;;  %v4651_v20 = vadd.f32 %v6484_v46, %v6483_v51  ;;  %v3500_v27 = vadd.f32 %v4590_v49, %v6485_v42  ;;  %v6500_v49 = vld [vmem:[#allocation7_spill] sm:$0xff] }
 0x285   : > { %3814 = vst [vmem:[%s6332_s9 + $0x20] sm:$0xff] %v3764_v59  ;;  %v3670_v48 = vadd.f32 %v4700_v55, %v3573_v57  ;;  %v4765_v39 = vpop.f32.mrf.mxu1  ;;  %v6486_v59 = vld [vmem:[#allocation15_spill] sm:$0xff]  ;;  %v6487_v55 = vld [vmem:[#allocation17_spill] sm:$0xff] }
 0x286   : > { %v4702_v45 = vpop.f32.mrf.mxu0  ;;  %v3594_v28 = vadd.f32 %v4651_v20, %v3497_v47  ;;  %v4593_v6 = vadd.f32 %v6487_v55, %v6486_v59 }
 0x287   : > { %v3767_v3 = vadd.f32 %v4764_v52, %v3670_v48  ;;  %v4703_v37 = vadd.f32 %v4702_v45, %v4701_v30  ;;  %v4766_v62 = vpop.f32.mrf.mxu1 }
 0x288   : > { %v4704_v29 = vpop.f32.mrf.mxu0  ;;  %v4767_v16 = vadd.f32 %v4766_v62, %v4765_v39  ;;  %v6488_v39 = vld [vmem:[#allocation12_spill] sm:$0xff]  ;;  %v6491_v62 = vld [vmem:[#allocation21_spill] sm:$0xff] }
 0x289   : > { %3815 = vst [vmem:[%s6332_s9 + $0x28] sm:$0xff] %v3767_v3  ;;  %v3675_v54 = vadd.f32 %v4703_v37, %v3578_v58  ;;  %v4768_v36 = vpop.f32.mrf.mxu1  ;;  %v4654_v45 = vadd.f32 %v6489_v18, %v6488_v39  ;;  %v6490_v37 = vld [vmem:[#allocation19_spill] sm:$0xff]  ;;  %v6506_v18 = vld [vmem:[#allocation28_spill] sm:$0xff] }
 0x28a   : > { %v4705_v8 = vpop.f32.mrf.mxu0  ;;  %v4596_v21 = vadd.f32 %v6491_v62, %v6490_v37 }
 0x28b   : > { %v3772_v0 = vadd.f32 %v4767_v16, %v3675_v54  ;;  %v4706_v25 = vadd.f32 %v4705_v8, %v4704_v29  ;;  %v4769_v44 = vpop.f32.mrf.mxu1  ;;  %v3597_v54 = vadd.f32 %v4654_v45, %v3500_v27  ;;  %v6492_v16 = vld [vmem:[#allocation5_spill] sm:$0xff]  ;;  %v6507_v45 = vld [vmem:[#allocation30_spill] sm:$0xff] }
 0x28c   : > { %v4707_v38 = vpop.f32.mrf.mxu0  ;;  %v4770_v24 = vadd.f32 %v4769_v44, %v4768_v36  ;;  %v3505_v36 = vadd.f32 %v4593_v6, %v6492_v16  ;;  %v6505_v6 = vld [vmem:[#allocation8_spill] sm:$0xff] }
 0x28d   : > { %3816 = vst [vmem:[%s6332_s9 + $0x30] sm:$0xff] %v3772_v0  ;;  %v3678_v9 = vadd.f32 %v4706_v25, %v3581_v41  ;;  %v4771_v53 = vpop.f32.mrf.mxu1  ;;  %v6493_v0 = vld [vmem:[#allocation16_spill] sm:$0xff]  ;;  %v6494_v25 = vld [vmem:[#allocation18_spill] sm:$0xff] }
 0x28e   : > { %v4708_v26 = vpop.f32.mrf.mxu0  ;;  %v4657_v44 = vadd.f32 %v6494_v25, %v6493_v0  ;;  %v3900_v0 = vld [vmem:[%s6332_s9 + $0x10] sm:$0xff] (%p5053_p6)  ;;  %v3902_v25 = vld [vmem:[%s6332_s9 + $0x18] sm:$0xff] (%p5053_p6) }
 0x28f   : > { %v3775_v5 = vadd.f32 %v4770_v24, %v3678_v9  ;;  %v4709_v17 = vadd.f32 %v4708_v26, %v4707_v38  ;;  %v4772_v40 = vpop.f32.mrf.mxu1  ;;  %v6495_v24 = vld [vmem:[#allocation6_spill] sm:$0xff]  ;;  %3901 = vst [vmem:[%s3837_s3 + $0x20] sm:$0xff] (%p5053_p6), %v3900_v0  ;;  %3903 = vst [vmem:[%s3837_s3 + $0x30] sm:$0xff] (%p5053_p6), %v3902_v25 }
 0x290   : > { %v4710_v19 = vpop.f32.mrf.mxu0  ;;  %v4773_v4 = vadd.f32 %v4772_v40, %v4771_v53  ;;  %v3508_v53 = vadd.f32 %v4596_v21, %v6495_v24  ;;  %v3602_v26 = vadd.f32 %v4657_v44, %v3505_v36  ;;  %v3904_v44 = vld [vmem:[%s6332_s9 + $0x20] sm:$0xff] (%p5053_p6) }
 0x291   : > { %3817 = vst [vmem:[%s6332_s9 + $0x38] sm:$0xff] %v3775_v5  ;;  %v3683_v2 = vadd.f32 %v4709_v17, %v3586_v22  ;;  %v4774_v14 = vpop.f32.mrf.mxu1  ;;  %v6496_v22 = vld [vmem:[#allocation23_spill] sm:$0xff]  ;;  %3905 = vst [vmem:[%s3837_s3 + $0x40] sm:$0xff] (%p5053_p6), %v3904_v44 }
 0x292   : > { %v4711_v33 = vpop.f32.mrf.mxu0  ;;  %v4599_v5 = vadd.f32 %v6497_v56, %v6496_v22 }
 0x293   : > { %v3780_v31 = vadd.f32 %v4773_v4, %v3683_v2  ;;  %v4712_v34 = vadd.f32 %v4711_v33, %v4710_v19  ;;  %v4775_v32 = vpop.f32.mrf.mxu1  ;;  %v6499_v2 = vld [vmem:[#allocation22_spill] sm:$0xff] }
 0x294   : > { %v4713_v61 = vpop.f32.mrf.mxu0  ;;  %v4776_v10 = vadd.f32 %v4775_v32, %v4774_v14  ;;  %v4660_v4 = vadd.f32 %v6499_v2, %v6498_v50  ;;  %v6502_v32 = vld [vmem:[#allocation29_spill] sm:$0xff] }
 0x295   : > { %3818 = vst [vmem:[%s6332_s9 + $0x40] sm:$0xff] %v3780_v31  ;;  %v3686_v7 = vadd.f32 %v4712_v34, %v3589_v11  ;;  %v4777_v15 = vpop.f32.mrf.mxu1  ;;  %v3513_v31 = vadd.f32 %v4599_v5, %v6500_v49  ;;  %v6501_v34 = vld [vmem:[#allocation27_spill] sm:$0xff] }
 0x296   : > { %v4714_v57 = vpop.f32.mrf.mxu0  ;;  %v3605_v13 = vadd.f32 %v4660_v4, %v3508_v53  ;;  %v4602_v51 = vadd.f32 %v6502_v32, %v6501_v34 }
 0x297   : > { %v3783_v30 = vadd.f32 %v4776_v10, %v3686_v7  ;;  %v4715_v35 = vadd.f32 %v4714_v57, %v4713_v61  ;;  %v4778_v48 = vpop.f32.mrf.mxu1  ;;  %v6503_v10 = vld [vmem:[#allocation24_spill] sm:$0xff] }
 0x298   : > { %v4716_v52 = vpop.f32.mrf.mxu0  ;;  %v4779_v63 = vadd.f32 %v4778_v48, %v4777_v15  ;;  %v6504_v15 = vld [vmem:[#allocation26_spill] sm:$0xff] }
 0x299   : > { %3819 = vst [vmem:[%s6332_s9 + $0x48] sm:$0xff] %v3783_v30  ;;  %v3691_v58 = vadd.f32 %v4715_v35, %v3594_v28  ;;  %v4780_v3 = vpop.f32.mrf.mxu1  ;;  %v4663_v28 = vadd.f32 %v6504_v15, %v6503_v10  ;;  %v3516_v30 = vadd.f32 %v4602_v51, %v6505_v6 }
 0x29a   : > { %v4717_v29 = vpop.f32.mrf.mxu0 }
 0x29b   : > { %v3788_v41 = vadd.f32 %v4779_v63, %v3691_v58  ;;  %v4718_v8 = vadd.f32 %v4717_v29, %v4716_v52  ;;  %v4781_v12 = vpop.f32.mrf.mxu1  ;;  %v3610_v55 = vadd.f32 %v4663_v28, %v3513_v31  ;;  %v4666_v58 = vadd.f32 %v6507_v45, %v6506_v18 }
 0x29c   : > { %v4719_v43 = vpop.f32.mrf.mxu0  ;;  %v4782_v60 = vadd.f32 %v4781_v12, %v4780_v3  ;;  %v3896_v12 = vld [vmem:[%s6332_s9] sm:$0xff] (%p5053_p6) }
 0x29d   : > { %3820 = vst [vmem:[%s6332_s9 + $0x50] sm:$0xff] %v3788_v41  ;;  %v3694_v38 = vadd.f32 %v4718_v8, %v3597_v54  ;;  %v4783_v9 = vpop.f32.mrf.mxu1  ;;  %v3613_v21 = vadd.f32 %v4666_v58, %v3516_v30  ;;  %3897 = vst [vmem:[%s3837_s3] sm:$0xff] (%p5053_p6), %v3896_v12  ;;  %v3912_v24 = vld [vmem:[%s6332_s9 + $0x40] sm:$0xff] (%p5053_p6) }
 0x29e   : > { %v4720_v23 = vpop.f32.mrf.mxu0  ;;  %3913 = vst [vmem:[%s3837_s3 + $0x80] sm:$0xff] (%p5053_p6), %v3912_v24 }
 0x29f   : > { %v3791_v17 = vadd.f32 %v4782_v60, %v3694_v38  ;;  %v4721_v40 = vadd.f32 %v4720_v23, %v4719_v43  ;;  %v4784_v19 = vpop.f32.mrf.mxu1  ;;  %v3898_v43 = vld [vmem:[%s6332_s9 + $0x8] sm:$0xff] (%p5053_p6)  ;;  %v3908_v60 = vld [vmem:[%s6332_s9 + $0x30] sm:$0xff] (%p5053_p6) }
 0x2a0   : > { %v4722_v14 = vpop.f32.mrf.mxu0  ;;  %v4785_v33 = vadd.f32 %v4784_v19, %v4783_v9  ;;  %v3906_v38 = vld [vmem:[%s6332_s9 + $0x28] sm:$0xff] (%p5053_p6)  ;;  %3899 = vst [vmem:[%s3837_s3 + $0x10] sm:$0xff] (%p5053_p6), %v3898_v43  ;;  %v3910_v9 = vld [vmem:[%s6332_s9 + $0x38] sm:$0xff] (%p5053_p6)  ;;  %3909 = vst [vmem:[%s3837_s3 + $0x60] sm:$0xff] (%p5053_p6), %v3908_v60 }
 0x2a1   : > { %3821 = vst [vmem:[%s6332_s9 + $0x58] sm:$0xff] %v3791_v17  ;;  %v3699_v47 = vadd.f32 %v4721_v40, %v3602_v26  ;;  %v4786_v11 = vpop.f32.mrf.mxu1  ;;  %3907 = vst [vmem:[%s3837_s3 + $0x50] sm:$0xff] (%p5053_p6), %v3906_v38  ;;  %v3914_v53 = vld [vmem:[%s6332_s9 + $0x48] sm:$0xff] (%p5053_p6) }
 0x2a2   : > { %v4723_v1 = vpop.f32.mrf.mxu0  ;;  %3911 = vst [vmem:[%s3837_s3 + $0x70] sm:$0xff] (%p5053_p6), %v3910_v9  ;;  %3915 = vst [vmem:[%s3837_s3 + $0x90] sm:$0xff] (%p5053_p6), %v3914_v53 }
 0x2a3   : > { %v3796_v46 = vadd.f32 %v4785_v33, %v3699_v47  ;;  %v4724_v20 = vadd.f32 %v4723_v1, %v4722_v14  ;;  %v4787_v61 = vpop.f32.mrf.mxu1 }
 0x2a4   : > { %v4725_v7 = vpop.f32.mrf.mxu0  ;;  %v4788_v42 = vadd.f32 %v4787_v61, %v4786_v11  ;;  %v3916_v23 = vld [vmem:[%s6332_s9 + $0x50] sm:$0xff] (%p5053_p6) }
 0x2a5   : > { %3822 = vst [vmem:[%s6332_s9 + $0x60] sm:$0xff] %v3796_v46  ;;  %v3702_v57 = vadd.f32 %v4724_v20, %v3605_v13  ;;  %v4789_v27 = vpop.f32.mrf.mxu1  ;;  %3917 = vst [vmem:[%s3837_s3 + $0xa0] sm:$0xff] (%p5053_p6), %v3916_v23 }
 0x2a6   : > { %v4726_v59 = vpop.f32.mrf.mxu0 }
 0x2a7   : > { %v3799_v35 = vadd.f32 %v4788_v42, %v3702_v57  ;;  %v4727_v48 = vadd.f32 %v4726_v59, %v4725_v7  ;;  %v4790_v52 = vpop.f32.mrf.mxu1 }
 0x2a8   : > { %v4728_v39 = vpop.f32.mrf.mxu0  ;;  %v4791_v3 = vadd.f32 %v4790_v52, %v4789_v27  ;;  %v3918_v26 = vld [vmem:[%s6332_s9 + $0x58] sm:$0xff] (%p5053_p6) }
 0x2a9   : > { %3823 = vst [vmem:[%s6332_s9 + $0x68] sm:$0xff] %v3799_v35  ;;  %v3707_v63 = vadd.f32 %v4727_v48, %v3610_v55  ;;  %v4792_v37 = vpop.f32.mrf.mxu1  ;;  %3919 = vst [vmem:[%s3837_s3 + $0xb0] sm:$0xff] (%p5053_p6), %v3918_v26 }
 0x2aa   : > { %v4729_v62 = vpop.f32.mrf.mxu0 }
 0x2ab   : > { %v3804_v29 = vadd.f32 %v4791_v3, %v3707_v63  ;;  %v4730_v54 = vadd.f32 %v4729_v62, %v4728_v39  ;;  %v4793_v16 = vpop.f32.mrf.mxu1 }
 0x2ac   : > { %v4794_v41 = vadd.f32 %v4793_v16, %v4792_v37  ;;  %v3920_v22 = vld [vmem:[%s6332_s9 + $0x60] sm:$0xff] (%p5053_p6) }
 0x2ad   : > { %3824 = vst [vmem:[%s6332_s9 + $0x70] sm:$0xff] %v3804_v29  ;;  %v3710_v36 = vadd.f32 %v4730_v54, %v3613_v21  ;;  %3832 = sbr.rel (!%p5053_p6) target bundleno = 698 (0x2ba), region = 73  ;;  %3921 = vst [vmem:[%s3837_s3 + $0xc0] sm:$0xff] (%p5053_p6), %v3920_v22 }
 0x2af   : > { %v3807_v8 = vadd.f32 %v4794_v41, %v3710_v36 }
 0x2b0   : > { %v3922_v56 = vld [vmem:[%s6332_s9 + $0x68] sm:$0xff] (%p5053_p6) }
 0x2b1   : > { %3825 = vst [vmem:[%s6332_s9 + $0x78] sm:$0xff] %v3807_v8  ;;  %3923 = vst [vmem:[%s3837_s3 + $0xd0] sm:$0xff] (%p5053_p6), %v3922_v56 }
 0x2b4   : > { %v3924_v5 = vld [vmem:[%s6332_s9 + $0x70] sm:$0xff] }
 0x2b5   : > { %3925 = vst [vmem:[%s3837_s3 + $0xe0] sm:$0xff] %v3924_v5 }
 0x2b8   : > { %v3926_v17 = vld [vmem:[%s6332_s9 + $0x78] sm:$0xff] }
 0x2b9   : > { %3927 = vst [vmem:[%s3837_s3 + $0xf0] sm:$0xff] %v3926_v17 }
 0x2ba PF: > { %s12_s13 = sadd.s32 1, %s5001_s13   ;;  %s6508_s9 = smov %s4989_s10 }
 0x2bb   : > { %p9_p11 = scmp.ge.s32.totalorder %s12_s13, 4   ;;  %s6509_s10 = smov %s5058_s19 }
 0x2bc   : > { %s6510_s11 = smov %s4997_s12  ;;  %s6511_s12 = smov %s6513_s14 }
 0x2bd   :  { %11 = sbr.rel (!%p9_p11) target bundleno = 3 (0x3), region = 145 }

// kernel: discriminator_forward.12
= control target key start
LH: loop header
LB: loop body
LE: loop exit
PB: predicated region body
PF: predicated region fallthrough
CT: control target
= control target key end

     0   :  { %v48_v0 = vlaneseq  ;;  %s621_s1 = inlined_call_operand.vmem [shape: f32[1,256], index: 1, kind: input, shape index: {}]   ;;  %s622_s2 = inlined_call_operand.vmem [shape: f32[1,256], index: 2, kind: input, shape index: {}]   ;;  %s623_s0 = inlined_call_operand.vmem [shape: f32[128,256], index: 0, kind: input, shape index: {}]   ;;  %s624_s3 = inlined_call_operand.vmem [shape: bf16[128,256], index: 3, kind: output, shape index: {}]  }
   0x1   :  { %v46_v2 = vld [vmem:[%s621_s1] sm:$0x3]  ;;  %v15_v5 = vld [vmem:[%s623_s0 + $0x8] sm:$0xff]  ;;  %v16_v8 = vld [vmem:[%s623_s0 + $0x10] sm:$0xff] }
   0x2   :  { %v49_v1 = vshrl.u32 %v48_v0, 7  ;;  %v90_v3 = vld [vmem:[%s622_s2] sm:$0x3]  ;;  %v17_v9 = vld [vmem:[%s623_s0 + $0x18] sm:$0xff]  ;;  %v19_v15 = vld [vmem:[%s623_s0 + $0x28] sm:$0xff] }
   0x3   :  { %v14_v4 = vld [vmem:[%s623_s0] sm:$0xff]  ;;  %v20_v16 = vld [vmem:[%s623_s0 + $0x30] sm:$0xff]  ;;  %v21_v17 = vld [vmem:[%s623_s0 + $0x38] sm:$0xff] }
   0x4   :  { %v50_v6 = vsub.s32 0, %v49_v1  ;;  %v54_v7 = vsub.s32 1, %v49_v1  ;;  %v18_v10 = vld [vmem:[%s623_s0 + $0x20] sm:$0xff]  ;;  %v23_v45 = vld [vmem:[%s623_s0 + $0x48] sm:$0xff]  ;;  %v24_v46 = vld [vmem:[%s623_s0 + $0x50] sm:$0xff] }
   0x5   :  { %v22_v40 = vld [vmem:[%s623_s0 + $0x40] sm:$0xff]  ;;  %v25_v47 = vld [vmem:[%s623_s0 + $0x58] sm:$0xff]  ;;  %v27_v59 = vld [vmem:[%s623_s0 + $0x68] sm:$0xff] }
   0x6   :  { %v419_v11 = vrot.slane %v46_v2, %v50_v6  ;;  %v421_v12 = vrot.slane %v46_v2, %v54_v7  ;;  %v423_v13 = vrot.slane %v90_v3, %v50_v6  ;;  %v425_v14 = vrot.slane %v90_v3, %v54_v7  ;;  %v26_v58 = vld [vmem:[%s623_s0 + $0x60] sm:$0xff]  ;;  %v28_v7 = vld [vmem:[%s623_s0 + $0x70] sm:$0xff] }
   0x8   :  { %v58_v18 = vsub.f32 %v14_v4, %v419_v11  ;;  %v59_v19 = vsub.f32 %v15_v5, %v421_v12  ;;  %v60_v20 = vsub.f32 %v16_v8, %v419_v11  ;;  %v61_v21 = vsub.f32 %v17_v9, %v421_v12  ;;  %v29_v8 = vld [vmem:[%s623_s0 + $0x78] sm:$0xff] }
   0x9   :  { %v62_v22 = vsub.f32 %v18_v10, %v419_v11  ;;  %v63_v23 = vsub.f32 %v19_v15, %v421_v12  ;;  %v64_v24 = vsub.f32 %v20_v16, %v419_v11  ;;  %v65_v25 = vsub.f32 %v21_v17, %v421_v12 }
   0xa   :  { %v102_v26 = vmul.f32 %v423_v13, %v58_v18  ;;  %v103_v27 = vmul.f32 %v425_v14, %v59_v19  ;;  %v104_v28 = vmul.f32 %v423_v13, %v60_v20  ;;  %v105_v29 = vmul.f32 %v425_v14, %v61_v21 }
   0xb   :  { %v106_v30 = vmul.f32 %v423_v13, %v62_v22  ;;  %v107_v31 = vmul.f32 %v425_v14, %v63_v23  ;;  %v108_v32 = vmul.f32 %v423_v13, %v64_v24  ;;  %v109_v33 = vmul.f32 %v425_v14, %v65_v25  ;;  %v30_v22 = vld [vmem:[%s623_s0 + $0x80] sm:$0xff]  ;;  %v31_v23 = vld [vmem:[%s623_s0 + $0x88] sm:$0xff] }
   0xc   :  { %vm134_vm0 = vcmp.gt.f32.partialorder %v102_v26, 0.0  ;;  %vm135_vm1 = vcmp.gt.f32.partialorder %v103_v27, 0.0  ;;  %v166_v34 = vmul.f32 0.2, %v102_v26  ;;  %v167_v35 = vmul.f32 0.2, %v103_v27 }
   0xd   :  { %vm136_vm2 = vcmp.gt.f32.partialorder %v104_v28, 0.0  ;;  %vm137_vm3 = vcmp.gt.f32.partialorder %v105_v29, 0.0  ;;  %v168_v36 = vmul.f32 0.2, %v104_v28  ;;  %v169_v37 = vmul.f32 0.2, %v105_v29 }
   0xe   :  { %v198_v38 = vsel %vm134_vm0, %v102_v26, %v166_v34  ;;  %v199_v39 = vsel %vm135_vm1, %v103_v27, %v167_v35  ;;  %vm138_vm4 = vcmp.gt.f32.partialorder %v106_v30, 0.0  ;;  %vm139_vm5 = vcmp.gt.f32.partialorder %v107_v31, 0.0  ;;  %v32_v27 = vld [vmem:[%s623_s0 + $0x90] sm:$0xff] }
   0xf   :  { %v362_v41 = vpack.c.bf16 %v199_v39, %v198_v38  ;;  %v200_v42 = vsel %vm136_vm2, %v104_v28, %v168_v36  ;;  %v201_v43 = vsel %vm137_vm3, %v105_v29, %v169_v37  ;;  %v170_v44 = vmul.f32 0.2, %v106_v30  ;;  %v33_v28 = vld [vmem:[%s623_s0 + $0x98] sm:$0xff] }
  0x10   :  { %v363_v48 = vpack.c.bf16 %v201_v43, %v200_v42  ;;  %v171_v49 = vmul.f32 0.2, %v107_v31  ;;  %vm140_vm6 = vcmp.gt.f32.partialorder %v108_v32, 0.0  ;;  %vm141_vm7 = vcmp.gt.f32.partialorder %v109_v33, 0.0 }
  0x11   :  { %326 = vst [vmem:[%s624_s3] sm:$0xff] %v362_v41  ;;  %v202_v50 = vsel %vm138_vm4, %v106_v30, %v170_v44  ;;  %v172_v51 = vmul.f32 0.2, %v108_v32  ;;  %v173_v52 = vmul.f32 0.2, %v109_v33  ;;  %v66_v53 = vsub.f32 %v22_v40, %v419_v11  ;;  %v34_v40 = vld [vmem:[%s623_s0 + $0xa0] sm:$0xff]  ;;  %v35_v41 = vld [vmem:[%s623_s0 + $0xa8] sm:$0xff] }
  0x12   :  { %327 = vst [vmem:[%s624_s3 + $0x8] sm:$0xff] %v363_v48  ;;  %v203_v54 = vsel %vm139_vm5, %v107_v31, %v171_v49  ;;  %v67_v55 = vsub.f32 %v23_v45, %v421_v12  ;;  %v68_v56 = vsub.f32 %v24_v46, %v419_v11  ;;  %v69_v57 = vsub.f32 %v25_v47, %v421_v12 }
  0x13   :  { %v364_v60 = vpack.c.bf16 %v203_v54, %v202_v50  ;;  %v204_v61 = vsel %vm140_vm6, %v108_v32, %v172_v51  ;;  %v205_v62 = vsel %vm141_vm7, %v109_v33, %v173_v52  ;;  %v110_v63 = vmul.f32 %v423_v13, %v66_v53  ;;  %v36_v54 = vld [vmem:[%s623_s0 + $0xb0] sm:$0xff] }
  0x14   :  { %v365_v0 = vpack.c.bf16 %v205_v62, %v204_v61  ;;  %v111_v1 = vmul.f32 %v425_v14, %v67_v55  ;;  %v112_v2 = vmul.f32 %v423_v13, %v68_v56  ;;  %v113_v3 = vmul.f32 %v425_v14, %v69_v57  ;;  %v37_v55 = vld [vmem:[%s623_s0 + $0xb8] sm:$0xff] }
  0x15   :  { %328 = vst [vmem:[%s624_s3 + $0x10] sm:$0xff] %v364_v60  ;;  %vm142_vm8 = vcmp.gt.f32.partialorder %v110_v63, 0.0  ;;  %v174_v4 = vmul.f32 0.2, %v110_v63  ;;  %v70_v5 = vsub.f32 %v26_v58, %v419_v11  ;;  %v71_v6 = vsub.f32 %v27_v59, %v421_v12 }
  0x16   :  { %329 = vst [vmem:[%s624_s3 + $0x18] sm:$0xff] %v365_v0  ;;  %vm143_vm9 = vcmp.gt.f32.partialorder %v111_v1, 0.0  ;;  %v175_v9 = vmul.f32 0.2, %v111_v1  ;;  %vm144_vm10 = vcmp.gt.f32.partialorder %v112_v2, 0.0  ;;  %vm145_vm11 = vcmp.gt.f32.partialorder %v113_v3, 0.0 }
  0x17   :  { %v206_v10 = vsel %vm142_vm8, %v110_v63, %v174_v4  ;;  %v176_v15 = vmul.f32 0.2, %v112_v2  ;;  %v177_v16 = vmul.f32 0.2, %v113_v3  ;;  %v114_v17 = vmul.f32 %v423_v13, %v70_v5 }
  0x18   :  { %v207_v18 = vsel %vm143_vm9, %v111_v1, %v175_v9  ;;  %v115_v19 = vmul.f32 %v425_v14, %v71_v6  ;;  %v72_v20 = vsub.f32 %v28_v7, %v419_v11  ;;  %v73_v21 = vsub.f32 %v29_v8, %v421_v12  ;;  %v40_v7 = vld [vmem:[%s623_s0 + $0xd0] sm:$0xff]  ;;  %v41_v8 = vld [vmem:[%s623_s0 + $0xd8] sm:$0xff] }
  0x19   :  { %v366_v24 = vpack.c.bf16 %v207_v18, %v206_v10  ;;  %v208_v25 = vsel %vm144_vm10, %v112_v2, %v176_v15  ;;  %v209_v26 = vsel %vm145_vm11, %v113_v3, %v177_v16  ;;  %vm146_vm12 = vcmp.gt.f32.partialorder %v114_v17, 0.0  ;;  %v38_v2 = vld [vmem:[%s623_s0 + $0xc0] sm:$0xff]  ;;  %v39_v3 = vld [vmem:[%s623_s0 + $0xc8] sm:$0xff] }
  0x1a   :  { %v367_v29 = vpack.c.bf16 %v209_v26, %v208_v25  ;;  %vm147_vm13 = vcmp.gt.f32.partialorder %v115_v19, 0.0  ;;  %v178_v30 = vmul.f32 0.2, %v114_v17  ;;  %v179_v31 = vmul.f32 0.2, %v115_v19  ;;  %v43_v25 = vld [vmem:[%s623_s0 + $0xe8] sm:$0xff] }
  0x1b   :  { %330 = vst [vmem:[%s624_s3 + $0x20] sm:$0xff] %v366_v24  ;;  %v116_v32 = vmul.f32 %v423_v13, %v72_v20  ;;  %v117_v33 = vmul.f32 %v425_v14, %v73_v21  ;;  %v74_v34 = vsub.f32 %v30_v22, %v419_v11  ;;  %v75_v35 = vsub.f32 %v31_v23, %v421_v12  ;;  %v42_v24 = vld [vmem:[%s623_s0 + $0xe0] sm:$0xff] }
  0x1c   :  { %331 = vst [vmem:[%s624_s3 + $0x28] sm:$0xff] %v367_v29  ;;  %v210_v36 = vsel %vm146_vm12, %v114_v17, %v178_v30  ;;  %v211_v37 = vsel %vm147_vm13, %v115_v19, %v179_v31  ;;  %v76_v38 = vsub.f32 %v32_v27, %v419_v11  ;;  %v77_v39 = vsub.f32 %v33_v28, %v421_v12 }
  0x1d   :  { %v368_v42 = vpack.c.bf16 %v211_v37, %v210_v36  ;;  %vm148_vm14 = vcmp.gt.f32.partialorder %v116_v32, 0.0  ;;  %vm149_vm15 = vcmp.gt.f32.partialorder %v117_v33, 0.0  ;;  %v180_v43 = vmul.f32 0.2, %v116_v32 }
  0x1e   :  { %v181_v44 = vmul.f32 0.2, %v117_v33  ;;  %v118_v45 = vmul.f32 %v423_v13, %v74_v34  ;;  %v119_v46 = vmul.f32 %v425_v14, %v75_v35  ;;  %v120_v47 = vmul.f32 %v423_v13, %v76_v38  ;;  %v44_v38 = vld [vmem:[%s623_s0 + $0xf0] sm:$0xff] }
  0x1f   :  { %332 = vst [vmem:[%s624_s3 + $0x30] sm:$0xff] %v368_v42  ;;  %v212_v48 = vsel %vm148_vm14, %v116_v32, %v180_v43  ;;  %v121_v49 = vmul.f32 %v425_v14, %v77_v39  ;;  %v78_v50 = vsub.f32 %v34_v40, %v419_v11  ;;  %v79_v51 = vsub.f32 %v35_v41, %v421_v12  ;;  %v45_v39 = vld [vmem:[%s623_s0 + $0xf8] sm:$0xff] }
  0x20   :  { %v213_v52 = vsel %vm149_vm15, %v117_v33, %v181_v44  ;;  %vm150_vm0 = vcmp.gt.f32.partialorder %v118_v45, 0.0  ;;  %vm151_vm1 = vcmp.gt.f32.partialorder %v119_v46, 0.0  ;;  %v182_v53 = vmul.f32 0.2, %v118_v45 }
  0x21   :  { %v369_v56 = vpack.c.bf16 %v213_v52, %v212_v48  ;;  %v183_v57 = vmul.f32 0.2, %v119_v46  ;;  %vm152_vm2 = vcmp.gt.f32.partialorder %v120_v47, 0.0  ;;  %vm153_vm3 = vcmp.gt.f32.partialorder %v121_v49, 0.0 }
  0x22   :  { %v214_v58 = vsel %vm150_vm0, %v118_v45, %v182_v53  ;;  %v184_v59 = vmul.f32 0.2, %v120_v47  ;;  %v185_v60 = vmul.f32 0.2, %v121_v49  ;;  %v122_v61 = vmul.f32 %v423_v13, %v78_v50 }
  0x23   :  { %333 = vst [vmem:[%s624_s3 + $0x38] sm:$0xff] %v369_v56  ;;  %v215_v62 = vsel %vm151_vm1, %v119_v46, %v183_v57  ;;  %v123_v63 = vmul.f32 %v425_v14, %v79_v51  ;;  %v80_v0 = vsub.f32 %v36_v54, %v419_v11  ;;  %v81_v1 = vsub.f32 %v37_v55, %v421_v12 }
  0x24   :  { %v370_v4 = vpack.c.bf16 %v215_v62, %v214_v58  ;;  %v216_v5 = vsel %vm152_vm2, %v120_v47, %v184_v59  ;;  %v217_v6 = vsel %vm153_vm3, %v121_v49, %v185_v60  ;;  %vm154_vm4 = vcmp.gt.f32.partialorder %v122_v61, 0.0 }
  0x25   :  { %v371_v9 = vpack.c.bf16 %v217_v6, %v216_v5  ;;  %vm155_vm5 = vcmp.gt.f32.partialorder %v123_v63, 0.0  ;;  %v186_v10 = vmul.f32 0.2, %v122_v61  ;;  %v187_v15 = vmul.f32 0.2, %v123_v63 }
  0x26   :  { %334 = vst [vmem:[%s624_s3 + $0x40] sm:$0xff] %v370_v4  ;;  %v124_v16 = vmul.f32 %v423_v13, %v80_v0  ;;  %v125_v17 = vmul.f32 %v425_v14, %v81_v1  ;;  %v82_v18 = vsub.f32 %v38_v2, %v419_v11  ;;  %v83_v19 = vsub.f32 %v39_v3, %v421_v12 }
  0x27   :  { %335 = vst [vmem:[%s624_s3 + $0x48] sm:$0xff] %v371_v9  ;;  %v218_v20 = vsel %vm154_vm4, %v122_v61, %v186_v10  ;;  %v219_v21 = vsel %vm155_vm5, %v123_v63, %v187_v15  ;;  %v84_v22 = vsub.f32 %v40_v7, %v419_v11  ;;  %v85_v23 = vsub.f32 %v41_v8, %v421_v12 }
  0x28   :  { %v372_v26 = vpack.c.bf16 %v219_v21, %v218_v20  ;;  %vm156_vm6 = vcmp.gt.f32.partialorder %v124_v16, 0.0  ;;  %vm157_vm7 = vcmp.gt.f32.partialorder %v125_v17, 0.0  ;;  %v188_v27 = vmul.f32 0.2, %v124_v16 }
  0x29   :  { %v189_v28 = vmul.f32 0.2, %v125_v17  ;;  %v126_v29 = vmul.f32 %v423_v13, %v82_v18  ;;  %v127_v30 = vmul.f32 %v425_v14, %v83_v19  ;;  %v128_v31 = vmul.f32 %v423_v13, %v84_v22 }
  0x2a   :  { %336 = vst [vmem:[%s624_s3 + $0x50] sm:$0xff] %v372_v26  ;;  %v220_v32 = vsel %vm156_vm6, %v124_v16, %v188_v27  ;;  %v129_v33 = vmul.f32 %v425_v14, %v85_v23  ;;  %v86_v34 = vsub.f32 %v42_v24, %v419_v11  ;;  %v87_v35 = vsub.f32 %v43_v25, %v421_v12 }
  0x2b   :  { %v221_v36 = vsel %vm157_vm7, %v125_v17, %v189_v28  ;;  %vm158_vm8 = vcmp.gt.f32.partialorder %v126_v29, 0.0  ;;  %vm159_vm9 = vcmp.gt.f32.partialorder %v127_v30, 0.0  ;;  %v190_v37 = vmul.f32 0.2, %v126_v29 }
  0x2c   :  { %v373_v40 = vpack.c.bf16 %v221_v36, %v220_v32  ;;  %v191_v41 = vmul.f32 0.2, %v127_v30  ;;  %vm160_vm10 = vcmp.gt.f32.partialorder %v128_v31, 0.0  ;;  %vm161_vm11 = vcmp.gt.f32.partialorder %v129_v33, 0.0 }
  0x2d   :  { %v222_v42 = vsel %vm158_vm8, %v126_v29, %v190_v37  ;;  %v192_v43 = vmul.f32 0.2, %v128_v31  ;;  %v193_v44 = vmul.f32 0.2, %v129_v33  ;;  %v130_v45 = vmul.f32 %v423_v13, %v86_v34 }
  0x2e   :  { %337 = vst [vmem:[%s624_s3 + $0x58] sm:$0xff] %v373_v40  ;;  %v223_v46 = vsel %vm159_vm9, %v127_v30, %v191_v41  ;;  %v131_v47 = vmul.f32 %v425_v14, %v87_v35  ;;  %v88_v48 = vsub.f32 %v44_v38, %v419_v11  ;;  %v89_v49 = vsub.f32 %v45_v39, %v421_v12 }
  0x2f   :  { %v374_v50 = vpack.c.bf16 %v223_v46, %v222_v42  ;;  %v224_v51 = vsel %vm160_vm10, %v128_v31, %v192_v43  ;;  %v225_v52 = vsel %vm161_vm11, %v129_v33, %v193_v44  ;;  %vm162_vm12 = vcmp.gt.f32.partialorder %v130_v45, 0.0 }
  0x30   :  { %v375_v53 = vpack.c.bf16 %v225_v52, %v224_v51  ;;  %vm163_vm13 = vcmp.gt.f32.partialorder %v131_v47, 0.0  ;;  %v194_v54 = vmul.f32 0.2, %v130_v45  ;;  %v195_v55 = vmul.f32 0.2, %v131_v47 }
  0x31   :  { %338 = vst [vmem:[%s624_s3 + $0x60] sm:$0xff] %v374_v50  ;;  %v132_v56 = vmul.f32 %v423_v13, %v88_v48  ;;  %v133_v57 = vmul.f32 %v425_v14, %v89_v49 }
  0x32   :  { %339 = vst [vmem:[%s624_s3 + $0x68] sm:$0xff] %v375_v53  ;;  %v226_v11 = vsel %vm162_vm12, %v130_v45, %v194_v54  ;;  %v227_v12 = vsel %vm163_vm13, %v131_v47, %v195_v55 }
  0x33   :  { %v376_v58 = vpack.c.bf16 %v227_v12, %v226_v11  ;;  %vm164_vm14 = vcmp.gt.f32.partialorder %v132_v56, 0.0  ;;  %vm165_vm15 = vcmp.gt.f32.partialorder %v133_v57, 0.0  ;;  %v196_v59 = vmul.f32 0.2, %v132_v56 }
  0x34   :  { %v197_v60 = vmul.f32 0.2, %v133_v57 }
  0x35   :  { %340 = vst [vmem:[%s624_s3 + $0x70] sm:$0xff] %v376_v58  ;;  %v228_v61 = vsel %vm164_vm14, %v132_v56, %v196_v59 }
  0x36   :  { %v229_v62 = vsel %vm165_vm15, %v133_v57, %v197_v60 }
  0x37   :  { %v377_v13 = vpack.c.bf16 %v229_v62, %v228_v61 }
  0x39   :  { %341 = vst [vmem:[%s624_s3 + $0x78] sm:$0xff] %v377_v13 }

// kernel: discriminator_forward.14
= control target key start
LH: loop header
LB: loop body
LE: loop exit
PB: predicated region body
PF: predicated region fallthrough
CT: control target
= control target key end

     0   :  { %v32_v0 = vlaneseq  ;;  %s377_s1 = inlined_call_operand.vmem [shape: f32[1,512], index: 1, kind: input, shape index: {}]   ;;  %s378_s2 = inlined_call_operand.vmem [shape: f32[1,512], index: 2, kind: input, shape index: {}]   ;;  %s379_s0 = inlined_call_operand.vmem [shape: f32[32,512], index: 0, kind: input, shape index: {}]   ;;  %s380_s3 = inlined_call_operand.vmem [shape: bf16[32,512], index: 3, kind: output, shape index: {}]  }
   0x1   :  { %v30_v2 = vld [vmem:[%s377_s1] sm:$0xf]  ;;  %v15_v5 = vld [vmem:[%s379_s0 + $0x8] sm:$0xff]  ;;  %v16_v10 = vld [vmem:[%s379_s0 + $0x10] sm:$0xff] }
   0x2   :  { %v33_v1 = vshrl.u32 %v32_v0, 7  ;;  %v68_v3 = vld [vmem:[%s378_s2] sm:$0xf]  ;;  %v19_v12 = vld [vmem:[%s379_s0 + $0x28] sm:$0xff]  ;;  %v17_v17 = vld [vmem:[%s379_s0 + $0x18] sm:$0xff] }
   0x3   :  { %v14_v4 = vld [vmem:[%s379_s0] sm:$0xff]  ;;  %v20_v18 = vld [vmem:[%s379_s0 + $0x30] sm:$0xff]  ;;  %v21_v19 = vld [vmem:[%s379_s0 + $0x38] sm:$0xff] }
   0x4   :  { %v34_v6 = vsub.s32 0, %v33_v1  ;;  %v38_v7 = vsub.s32 1, %v33_v1  ;;  %v42_v8 = vsub.s32 2, %v33_v1  ;;  %v46_v9 = vsub.s32 3, %v33_v1  ;;  %v18_v11 = vld [vmem:[%s379_s0 + $0x20] sm:$0xff]  ;;  %v23_v51 = vld [vmem:[%s379_s0 + $0x48] sm:$0xff] }
   0x5   :  { %v22_v46 = vld [vmem:[%s379_s0 + $0x40] sm:$0xff]  ;;  %v24_v52 = vld [vmem:[%s379_s0 + $0x50] sm:$0xff]  ;;  %v25_v53 = vld [vmem:[%s379_s0 + $0x58] sm:$0xff] }
   0x6   :  { %v271_v13 = vrot.slane %v30_v2, %v34_v6  ;;  %v273_v14 = vrot.slane %v30_v2, %v38_v7  ;;  %v275_v15 = vrot.slane %v68_v3, %v34_v6  ;;  %v277_v16 = vrot.slane %v68_v3, %v38_v7  ;;  %v26_v0 = vld [vmem:[%s379_s0 + $0x60] sm:$0xff]  ;;  %v27_v1 = vld [vmem:[%s379_s0 + $0x68] sm:$0xff] }
   0x7   :  { %v288_v20 = vrot.slane %v30_v2, %v42_v8  ;;  %v290_v21 = vrot.slane %v30_v2, %v46_v9  ;;  %v292_v22 = vrot.slane %v68_v3, %v42_v8  ;;  %v294_v23 = vrot.slane %v68_v3, %v46_v9 }
   0x8   :  { %v52_v24 = vsub.f32 %v14_v4, %v271_v13  ;;  %v53_v25 = vsub.f32 %v15_v5, %v273_v14  ;;  %v56_v26 = vsub.f32 %v18_v11, %v271_v13  ;;  %v57_v27 = vsub.f32 %v19_v12, %v273_v14 }
   0x9   :  { %v54_v28 = vsub.f32 %v16_v10, %v288_v20  ;;  %v55_v29 = vsub.f32 %v17_v17, %v290_v21  ;;  %v58_v30 = vsub.f32 %v20_v18, %v288_v20  ;;  %v59_v31 = vsub.f32 %v21_v19, %v290_v21  ;;  %v28_v17 = vld [vmem:[%s379_s0 + $0x70] sm:$0xff]  ;;  %v29_v18 = vld [vmem:[%s379_s0 + $0x78] sm:$0xff] }
   0xa   :  { %v90_v32 = vmul.f32 %v275_v15, %v52_v24  ;;  %v91_v33 = vmul.f32 %v277_v16, %v53_v25  ;;  %v94_v34 = vmul.f32 %v275_v15, %v56_v26  ;;  %v95_v35 = vmul.f32 %v277_v16, %v57_v27 }
   0xb   :  { %v92_v36 = vmul.f32 %v292_v22, %v54_v28  ;;  %v93_v37 = vmul.f32 %v294_v23, %v55_v29  ;;  %v96_v38 = vmul.f32 %v292_v22, %v58_v30  ;;  %v97_v39 = vmul.f32 %v294_v23, %v59_v31 }
   0xc   :  { %vm106_vm0 = vcmp.gt.f32.partialorder %v90_v32, 0.0  ;;  %vm107_vm1 = vcmp.gt.f32.partialorder %v91_v33, 0.0  ;;  %v122_v40 = vmul.f32 0.2, %v90_v32  ;;  %v123_v41 = vmul.f32 0.2, %v91_v33 }
   0xd   :  { %vm108_vm2 = vcmp.gt.f32.partialorder %v92_v36, 0.0  ;;  %vm109_vm3 = vcmp.gt.f32.partialorder %v93_v37, 0.0  ;;  %v124_v42 = vmul.f32 0.2, %v92_v36  ;;  %v125_v43 = vmul.f32 0.2, %v93_v37 }
   0xe   :  { %v138_v44 = vsel %vm106_vm0, %v90_v32, %v122_v40  ;;  %v139_v45 = vsel %vm107_vm1, %v91_v33, %v123_v41  ;;  %vm110_vm4 = vcmp.gt.f32.partialorder %v94_v34, 0.0  ;;  %vm111_vm5 = vcmp.gt.f32.partialorder %v95_v35, 0.0 }
   0xf   :  { %v222_v47 = vpack.c.bf16 %v139_v45, %v138_v44  ;;  %v140_v48 = vsel %vm108_vm2, %v92_v36, %v124_v42  ;;  %v141_v49 = vsel %vm109_vm3, %v93_v37, %v125_v43  ;;  %v126_v50 = vmul.f32 0.2, %v94_v34 }
  0x10   :  { %v223_v54 = vpack.c.bf16 %v141_v49, %v140_v48  ;;  %v127_v55 = vmul.f32 0.2, %v95_v35  ;;  %vm112_vm6 = vcmp.gt.f32.partialorder %v96_v38, 0.0  ;;  %vm113_vm7 = vcmp.gt.f32.partialorder %v97_v39, 0.0 }
  0x11   :  { %202 = vst [vmem:[%s380_s3] sm:$0xff] %v222_v47  ;;  %v142_v56 = vsel %vm110_vm4, %v94_v34, %v126_v50  ;;  %v128_v57 = vmul.f32 0.2, %v96_v38  ;;  %v129_v58 = vmul.f32 0.2, %v97_v39  ;;  %v60_v59 = vsub.f32 %v22_v46, %v271_v13 }
  0x12   :  { %203 = vst [vmem:[%s380_s3 + $0x8] sm:$0xff] %v223_v54  ;;  %v143_v60 = vsel %vm111_vm5, %v95_v35, %v127_v55  ;;  %v61_v61 = vsub.f32 %v23_v51, %v273_v14  ;;  %v62_v62 = vsub.f32 %v24_v52, %v288_v20  ;;  %v63_v63 = vsub.f32 %v25_v53, %v290_v21 }
  0x13   :  { %v224_v2 = vpack.c.bf16 %v143_v60, %v142_v56  ;;  %v144_v3 = vsel %vm112_vm6, %v96_v38, %v128_v57  ;;  %v145_v4 = vsel %vm113_vm7, %v97_v39, %v129_v58  ;;  %v98_v5 = vmul.f32 %v275_v15, %v60_v59 }
  0x14   :  { %v225_v6 = vpack.c.bf16 %v145_v4, %v144_v3  ;;  %v99_v7 = vmul.f32 %v277_v16, %v61_v61  ;;  %v100_v8 = vmul.f32 %v292_v22, %v62_v62  ;;  %v101_v9 = vmul.f32 %v294_v23, %v63_v63 }
  0x15   :  { %204 = vst [vmem:[%s380_s3 + $0x10] sm:$0xff] %v224_v2  ;;  %vm114_vm8 = vcmp.gt.f32.partialorder %v98_v5, 0.0  ;;  %v130_v10 = vmul.f32 0.2, %v98_v5  ;;  %v64_v11 = vsub.f32 %v26_v0, %v271_v13  ;;  %v65_v12 = vsub.f32 %v27_v1, %v273_v14 }
  0x16   :  { %205 = vst [vmem:[%s380_s3 + $0x18] sm:$0xff] %v225_v6  ;;  %vm115_vm9 = vcmp.gt.f32.partialorder %v99_v7, 0.0  ;;  %v131_v19 = vmul.f32 0.2, %v99_v7  ;;  %vm116_vm10 = vcmp.gt.f32.partialorder %v100_v8, 0.0  ;;  %vm117_vm11 = vcmp.gt.f32.partialorder %v101_v9, 0.0 }
  0x17   :  { %v146_v24 = vsel %vm114_vm8, %v98_v5, %v130_v10  ;;  %v132_v13 = vmul.f32 0.2, %v100_v8  ;;  %v133_v25 = vmul.f32 0.2, %v101_v9  ;;  %v102_v14 = vmul.f32 %v275_v15, %v64_v11 }
  0x18   :  { %v147_v26 = vsel %vm115_vm9, %v99_v7, %v131_v19  ;;  %v103_v27 = vmul.f32 %v277_v16, %v65_v12  ;;  %v66_v28 = vsub.f32 %v28_v17, %v288_v20  ;;  %v67_v29 = vsub.f32 %v29_v18, %v290_v21 }
  0x19   :  { %v226_v30 = vpack.c.bf16 %v147_v26, %v146_v24  ;;  %v148_v31 = vsel %vm116_vm10, %v100_v8, %v132_v13  ;;  %v149_v32 = vsel %vm117_vm11, %v101_v9, %v133_v25  ;;  %vm118_vm12 = vcmp.gt.f32.partialorder %v102_v14, 0.0 }
  0x1a   :  { %v227_v33 = vpack.c.bf16 %v149_v32, %v148_v31  ;;  %vm119_vm13 = vcmp.gt.f32.partialorder %v103_v27, 0.0  ;;  %v134_v34 = vmul.f32 0.2, %v102_v14  ;;  %v135_v35 = vmul.f32 0.2, %v103_v27 }
  0x1b   :  { %206 = vst [vmem:[%s380_s3 + $0x20] sm:$0xff] %v226_v30  ;;  %v104_v15 = vmul.f32 %v292_v22, %v66_v28  ;;  %v105_v16 = vmul.f32 %v294_v23, %v67_v29 }
  0x1c   :  { %207 = vst [vmem:[%s380_s3 + $0x28] sm:$0xff] %v227_v33  ;;  %v150_v20 = vsel %vm118_vm12, %v102_v14, %v134_v34  ;;  %v151_v21 = vsel %vm119_vm13, %v103_v27, %v135_v35 }
  0x1d   :  { %v228_v36 = vpack.c.bf16 %v151_v21, %v150_v20  ;;  %vm120_vm14 = vcmp.gt.f32.partialorder %v104_v15, 0.0  ;;  %vm121_vm15 = vcmp.gt.f32.partialorder %v105_v16, 0.0  ;;  %v136_v37 = vmul.f32 0.2, %v104_v15 }
  0x1e   :  { %v137_v38 = vmul.f32 0.2, %v105_v16 }
  0x1f   :  { %208 = vst [vmem:[%s380_s3 + $0x30] sm:$0xff] %v228_v36  ;;  %v152_v39 = vsel %vm120_vm14, %v104_v15, %v136_v37 }
  0x20   :  { %v153_v40 = vsel %vm121_vm15, %v105_v16, %v137_v38 }
  0x21   :  { %v229_v22 = vpack.c.bf16 %v153_v40, %v152_v39 }
  0x23   :  { %209 = vst [vmem:[%s380_s3 + $0x38] sm:$0xff] %v229_v22 }

// kernel: discriminator_forward.13
= control target key start
LH: loop header
LB: loop body
LE: loop exit
PB: predicated region body
PF: predicated region fallthrough
CT: control target
= control target key end

     0   :  { %s8844_s9 = smov 0   ;;  %s8846_s10 = smov 0   ;;  %s10628_s0 = inlined_call_operand.vmem [shape: bf16[32,4096], index: 0, kind: input, shape index: {}]   ;;  %s10629_s1 = inlined_call_operand.vmem [shape: bf16[4096,512], index: 1, kind: input, shape index: {}]   ;;  %s10630_s2 = inlined_call_operand.vmem [shape: f32[32,512], index: 2, kind: output, shape index: {}]  }
   0x1   :  { %s8848_s11 = smov 0   ;;  %s8850_s12 = smov 0  }
   0x2   :  { %s8852_s13 = smov 0  }
   0x3 LB: > { %s21_s14 = sadd.s32 1, %s8823_s12  ;;  %s7711_s15 = sadd.s32 4294967295, %s8827_s13   ;;  %s8827_s13 = sphi %s8852_s13, %s12_s13   ;;  %s8823_s12 = sphi %s8850_s12, %s10667_s12   ;;  %s8819_s11 = sphi %s8848_s11, %s10666_s11   ;;  %s8815_s10 = sphi %s8846_s10, %s10665_s10   ;;  %s8811_s9 = sphi %s8844_s9, %s10664_s9  }
   0x4   : > { %p22_p0 = scmp.ge.s32.totalorder %s21_s14, 4  ;;  %p64_p1 = scmp.ne.s32.totalorder %s8815_s10, %s8811_s9 }
   0x5   : > { %p65_p2 = scmp.eq.s32.totalorder %s8827_s13, 0  ;;  %p96_p4 = scmp.eq.s32.totalorder %s7711_s15, 3 }
   0x6   : > { %s10669_s14 = smov (%p22_p0, %s21_s14), 0  ;;  %s57_s17 = sadd.s32 1, %s8815_s10 }
   0x7   : > { %p66_p3 = por %p65_p2, %p64_p1  ;;  %s54_s16 = ssub.s32 %s8823_s12, %s10669_s14 }
   0x8   : > { %p55_p5 = scmp.eq.s32.totalorder %s54_s16, 0  ;;  %p8879_p6 = por %p96_p4, %p64_p1 }
   0x9   : > { %p7715_p7 = scmp.ge.s32.totalorder %s8827_s13, 4 }
   0xa   : > { %s8884_s19 = scalar_select %p55_p5, %s8815_s10, %s57_s17  }
   0xb   : > { %128 = sbr.rel (%p7715_p7) target bundleno = 361 (0x169), region = 20 }
  0x10   : > { %131 = sbr.rel (!%p66_p3) target bundleno = 361 (0x169), region = 24  ;;  %s133_s20 = sand.u32 (%p66_p3), 1, %s8815_s10  }
  0x11   : > { %s7717_s21 = sshll.u32 (%p66_p3), %s8823_s12, 2  ;;  %s7716_s22 = sshll.u32 (%p66_p3), %s133_s20, 11 }
  0x12   : > { %s8892_s25 = scalar_lea.vmem (%p66_p3), %s10629_s1, %s7717_s21  ;;  %s8896_s26 = scalar_lea.vmem (%p66_p3), [#allocation2], %s7716_s22 }
  0x13   : > { %v154_v0 = vld [vmem:[%s8892_s25] sm:$0xf] (%p66_p3)  ;;  %v156_v1 = vld [vmem:[%s8892_s25 + $0x10] sm:$0xf] (%p66_p3) }
  0x14   : > { %155 = vst [vmem:[%s8896_s26] sm:$0xf] (%p66_p3), %v154_v0  ;;  %157 = vst [vmem:[%s8896_s26 + $0x4] sm:$0xf] (%p66_p3), %v156_v1  ;;  %v158_v2 = vld [vmem:[%s8892_s25 + $0x20] sm:$0xf] (%p66_p3) }
  0x15   : > { %v160_v3 = vld [vmem:[%s8892_s25 + $0x30] sm:$0xf]  ;;  %v162_v4 = vld [vmem:[%s8892_s25 + $0x40] sm:$0xf]  ;;  %159 = vst [vmem:[%s8896_s26 + $0x8] sm:$0xf] %v158_v2 }
  0x16   : > { %161 = vst [vmem:[%s8896_s26 + $0xc] sm:$0xf] %v160_v3  ;;  %163 = vst [vmem:[%s8896_s26 + $0x10] sm:$0xf] %v162_v4  ;;  %v164_v5 = vld [vmem:[%s8892_s25 + $0x50] sm:$0xf] }
  0x17   : > { %v166_v6 = vld [vmem:[%s8892_s25 + $0x60] sm:$0xf]  ;;  %v168_v7 = vld [vmem:[%s8892_s25 + $0x70] sm:$0xf]  ;;  %165 = vst [vmem:[%s8896_s26 + $0x14] sm:$0xf] %v164_v5 }
  0x18   : > { %167 = vst [vmem:[%s8896_s26 + $0x18] sm:$0xf] %v166_v6  ;;  %169 = vst [vmem:[%s8896_s26 + $0x1c] sm:$0xf] %v168_v7  ;;  %v170_v8 = vld [vmem:[%s8892_s25 + $0x80] sm:$0xf] }
  0x19   : > { %v172_v9 = vld [vmem:[%s8892_s25 + $0x90] sm:$0xf]  ;;  %v174_v10 = vld [vmem:[%s8892_s25 + $0xa0] sm:$0xf]  ;;  %171 = vst [vmem:[%s8896_s26 + $0x20] sm:$0xf] %v170_v8 }
  0x1a   : > { %173 = vst [vmem:[%s8896_s26 + $0x24] sm:$0xf] %v172_v9  ;;  %175 = vst [vmem:[%s8896_s26 + $0x28] sm:$0xf] %v174_v10  ;;  %v176_v11 = vld [vmem:[%s8892_s25 + $0xb0] sm:$0xf] }
  0x1b   : > { %v178_v12 = vld [vmem:[%s8892_s25 + $0xc0] sm:$0xf]  ;;  %v180_v13 = vld [vmem:[%s8892_s25 + $0xd0] sm:$0xf]  ;;  %177 = vst [vmem:[%s8896_s26 + $0x2c] sm:$0xf] %v176_v11 }
  0x1c   : > { %179 = vst [vmem:[%s8896_s26 + $0x30] sm:$0xf] %v178_v12  ;;  %181 = vst [vmem:[%s8896_s26 + $0x34] sm:$0xf] %v180_v13  ;;  %v182_v14 = vld [vmem:[%s8892_s25 + $0xe0] sm:$0xf] }
  0x1d   : > { %v184_v15 = vld [vmem:[%s8892_s25 + $0xf0] sm:$0xf]  ;;  %v186_v16 = vld [vmem:[%s8892_s25 + $0x100] sm:$0xf]  ;;  %183 = vst [vmem:[%s8896_s26 + $0x38] sm:$0xf] %v182_v14 }
  0x1e   : > { %185 = vst [vmem:[%s8896_s26 + $0x3c] sm:$0xf] %v184_v15  ;;  %187 = vst [vmem:[%s8896_s26 + $0x40] sm:$0xf] %v186_v16  ;;  %v188_v17 = vld [vmem:[%s8892_s25 + $0x110] sm:$0xf] }
  0x1f   : > { %v190_v18 = vld [vmem:[%s8892_s25 + $0x120] sm:$0xf]  ;;  %v192_v19 = vld [vmem:[%s8892_s25 + $0x130] sm:$0xf]  ;;  %189 = vst [vmem:[%s8896_s26 + $0x44] sm:$0xf] %v188_v17 }
  0x20   : > { %191 = vst [vmem:[%s8896_s26 + $0x48] sm:$0xf] %v190_v18  ;;  %193 = vst [vmem:[%s8896_s26 + $0x4c] sm:$0xf] %v192_v19  ;;  %v194_v20 = vld [vmem:[%s8892_s25 + $0x140] sm:$0xf] }
  0x21   : > { %v196_v21 = vld [vmem:[%s8892_s25 + $0x150] sm:$0xf]  ;;  %v198_v22 = vld [vmem:[%s8892_s25 + $0x160] sm:$0xf]  ;;  %195 = vst [vmem:[%s8896_s26 + $0x50] sm:$0xf] %v194_v20 }
  0x22   : > { %197 = vst [vmem:[%s8896_s26 + $0x54] sm:$0xf] %v196_v21  ;;  %199 = vst [vmem:[%s8896_s26 + $0x58] sm:$0xf] %v198_v22  ;;  %v200_v23 = vld [vmem:[%s8892_s25 + $0x170] sm:$0xf] }
  0x23   : > { %v202_v24 = vld [vmem:[%s8892_s25 + $0x180] sm:$0xf]  ;;  %v204_v25 = vld [vmem:[%s8892_s25 + $0x190] sm:$0xf]  ;;  %201 = vst [vmem:[%s8896_s26 + $0x5c] sm:$0xf] %v200_v23 }
  0x24   : > { %203 = vst [vmem:[%s8896_s26 + $0x60] sm:$0xf] %v202_v24  ;;  %205 = vst [vmem:[%s8896_s26 + $0x64] sm:$0xf] %v204_v25  ;;  %v206_v26 = vld [vmem:[%s8892_s25 + $0x1a0] sm:$0xf] }
  0x25   : > { %v208_v27 = vld [vmem:[%s8892_s25 + $0x1b0] sm:$0xf]  ;;  %v210_v28 = vld [vmem:[%s8892_s25 + $0x1c0] sm:$0xf]  ;;  %207 = vst [vmem:[%s8896_s26 + $0x68] sm:$0xf] %v206_v26 }
  0x26   : > { %209 = vst [vmem:[%s8896_s26 + $0x6c] sm:$0xf] %v208_v27  ;;  %211 = vst [vmem:[%s8896_s26 + $0x70] sm:$0xf] %v210_v28  ;;  %v212_v29 = vld [vmem:[%s8892_s25 + $0x1d0] sm:$0xf] }
  0x27   : > { %v214_v30 = vld [vmem:[%s8892_s25 + $0x1e0] sm:$0xf]  ;;  %v216_v31 = vld [vmem:[%s8892_s25 + $0x1f0] sm:$0xf]  ;;  %213 = vst [vmem:[%s8896_s26 + $0x74] sm:$0xf] %v212_v29 }
  0x28   : > { %215 = vst [vmem:[%s8896_s26 + $0x78] sm:$0xf] %v214_v30  ;;  %217 = vst [vmem:[%s8896_s26 + $0x7c] sm:$0xf] %v216_v31  ;;  %v218_v32 = vld [vmem:[%s8892_s25 + $0x200] sm:$0xf] }
  0x29   : > { %v220_v33 = vld [vmem:[%s8892_s25 + $0x210] sm:$0xf]  ;;  %v222_v34 = vld [vmem:[%s8892_s25 + $0x220] sm:$0xf]  ;;  %219 = vst [vmem:[%s8896_s26 + $0x80] sm:$0xf] %v218_v32 }
  0x2a   : > { %221 = vst [vmem:[%s8896_s26 + $0x84] sm:$0xf] %v220_v33  ;;  %223 = vst [vmem:[%s8896_s26 + $0x88] sm:$0xf] %v222_v34  ;;  %v224_v35 = vld [vmem:[%s8892_s25 + $0x230] sm:$0xf] }
  0x2b   : > { %v226_v36 = vld [vmem:[%s8892_s25 + $0x240] sm:$0xf]  ;;  %v228_v37 = vld [vmem:[%s8892_s25 + $0x250] sm:$0xf]  ;;  %225 = vst [vmem:[%s8896_s26 + $0x8c] sm:$0xf] %v224_v35 }
  0x2c   : > { %227 = vst [vmem:[%s8896_s26 + $0x90] sm:$0xf] %v226_v36  ;;  %229 = vst [vmem:[%s8896_s26 + $0x94] sm:$0xf] %v228_v37  ;;  %v230_v38 = vld [vmem:[%s8892_s25 + $0x260] sm:$0xf] }
  0x2d   : > { %v232_v39 = vld [vmem:[%s8892_s25 + $0x270] sm:$0xf]  ;;  %v234_v40 = vld [vmem:[%s8892_s25 + $0x280] sm:$0xf]  ;;  %231 = vst [vmem:[%s8896_s26 + $0x98] sm:$0xf] %v230_v38 }
  0x2e   : > { %233 = vst [vmem:[%s8896_s26 + $0x9c] sm:$0xf] %v232_v39  ;;  %235 = vst [vmem:[%s8896_s26 + $0xa0] sm:$0xf] %v234_v40  ;;  %v236_v41 = vld [vmem:[%s8892_s25 + $0x290] sm:$0xf] }
  0x2f   : > { %v238_v42 = vld [vmem:[%s8892_s25 + $0x2a0] sm:$0xf]  ;;  %v240_v43 = vld [vmem:[%s8892_s25 + $0x2b0] sm:$0xf]  ;;  %237 = vst [vmem:[%s8896_s26 + $0xa4] sm:$0xf] %v236_v41 }
  0x30   : > { %239 = vst [vmem:[%s8896_s26 + $0xa8] sm:$0xf] %v238_v42  ;;  %241 = vst [vmem:[%s8896_s26 + $0xac] sm:$0xf] %v240_v43  ;;  %v242_v44 = vld [vmem:[%s8892_s25 + $0x2c0] sm:$0xf] }
  0x31   : > { %v244_v45 = vld [vmem:[%s8892_s25 + $0x2d0] sm:$0xf]  ;;  %v246_v46 = vld [vmem:[%s8892_s25 + $0x2e0] sm:$0xf]  ;;  %243 = vst [vmem:[%s8896_s26 + $0xb0] sm:$0xf] %v242_v44 }
  0x32   : > { %245 = vst [vmem:[%s8896_s26 + $0xb4] sm:$0xf] %v244_v45  ;;  %247 = vst [vmem:[%s8896_s26 + $0xb8] sm:$0xf] %v246_v46  ;;  %v248_v47 = vld [vmem:[%s8892_s25 + $0x2f0] sm:$0xf] }
  0x33   : > { %v250_v48 = vld [vmem:[%s8892_s25 + $0x300] sm:$0xf]  ;;  %v252_v49 = vld [vmem:[%s8892_s25 + $0x310] sm:$0xf]  ;;  %249 = vst [vmem:[%s8896_s26 + $0xbc] sm:$0xf] %v248_v47 }
  0x34   : > { %251 = vst [vmem:[%s8896_s26 + $0xc0] sm:$0xf] %v250_v48  ;;  %253 = vst [vmem:[%s8896_s26 + $0xc4] sm:$0xf] %v252_v49  ;;  %v254_v50 = vld [vmem:[%s8892_s25 + $0x320] sm:$0xf] }
  0x35   : > { %v256_v51 = vld [vmem:[%s8892_s25 + $0x330] sm:$0xf]  ;;  %v258_v52 = vld [vmem:[%s8892_s25 + $0x340] sm:$0xf]  ;;  %255 = vst [vmem:[%s8896_s26 + $0xc8] sm:$0xf] %v254_v50 }
  0x36   : > { %257 = vst [vmem:[%s8896_s26 + $0xcc] sm:$0xf] %v256_v51  ;;  %259 = vst [vmem:[%s8896_s26 + $0xd0] sm:$0xf] %v258_v52  ;;  %v260_v53 = vld [vmem:[%s8892_s25 + $0x350] sm:$0xf] }
  0x37   : > { %v262_v54 = vld [vmem:[%s8892_s25 + $0x360] sm:$0xf]  ;;  %v264_v55 = vld [vmem:[%s8892_s25 + $0x370] sm:$0xf]  ;;  %261 = vst [vmem:[%s8896_s26 + $0xd4] sm:$0xf] %v260_v53 }
  0x38   : > { %263 = vst [vmem:[%s8896_s26 + $0xd8] sm:$0xf] %v262_v54  ;;  %265 = vst [vmem:[%s8896_s26 + $0xdc] sm:$0xf] %v264_v55  ;;  %v266_v56 = vld [vmem:[%s8892_s25 + $0x380] sm:$0xf] }
  0x39   : > { %v268_v57 = vld [vmem:[%s8892_s25 + $0x390] sm:$0xf]  ;;  %v270_v58 = vld [vmem:[%s8892_s25 + $0x3a0] sm:$0xf]  ;;  %267 = vst [vmem:[%s8896_s26 + $0xe0] sm:$0xf] %v266_v56 }
  0x3a   : > { %269 = vst [vmem:[%s8896_s26 + $0xe4] sm:$0xf] %v268_v57  ;;  %271 = vst [vmem:[%s8896_s26 + $0xe8] sm:$0xf] %v270_v58  ;;  %v272_v59 = vld [vmem:[%s8892_s25 + $0x3b0] sm:$0xf] }
  0x3b   : > { %v274_v60 = vld [vmem:[%s8892_s25 + $0x3c0] sm:$0xf]  ;;  %v276_v61 = vld [vmem:[%s8892_s25 + $0x3d0] sm:$0xf]  ;;  %273 = vst [vmem:[%s8896_s26 + $0xec] sm:$0xf] %v272_v59 }
  0x3c   : > { %275 = vst [vmem:[%s8896_s26 + $0xf0] sm:$0xf] %v274_v60  ;;  %277 = vst [vmem:[%s8896_s26 + $0xf4] sm:$0xf] %v276_v61  ;;  %v278_v62 = vld [vmem:[%s8892_s25 + $0x3e0] sm:$0xf] }
  0x3d   : > { %v280_v63 = vld [vmem:[%s8892_s25 + $0x3f0] sm:$0xf]  ;;  %v282_v0 = vld [vmem:[%s8892_s25 + $0x400] sm:$0xf]  ;;  %279 = vst [vmem:[%s8896_s26 + $0xf8] sm:$0xf] %v278_v62 }
  0x3e   : > { %281 = vst [vmem:[%s8896_s26 + $0xfc] sm:$0xf] %v280_v63  ;;  %283 = vst [vmem:[%s8896_s26 + $0x100] sm:$0xf] %v282_v0  ;;  %v284_v1 = vld [vmem:[%s8892_s25 + $0x410] sm:$0xf] }
  0x3f   : > { %v286_v2 = vld [vmem:[%s8892_s25 + $0x420] sm:$0xf]  ;;  %v288_v3 = vld [vmem:[%s8892_s25 + $0x430] sm:$0xf]  ;;  %285 = vst [vmem:[%s8896_s26 + $0x104] sm:$0xf] %v284_v1 }
  0x40   : > { %287 = vst [vmem:[%s8896_s26 + $0x108] sm:$0xf] %v286_v2  ;;  %289 = vst [vmem:[%s8896_s26 + $0x10c] sm:$0xf] %v288_v3  ;;  %v290_v4 = vld [vmem:[%s8892_s25 + $0x440] sm:$0xf] }
  0x41   : > { %v292_v5 = vld [vmem:[%s8892_s25 + $0x450] sm:$0xf]  ;;  %v294_v6 = vld [vmem:[%s8892_s25 + $0x460] sm:$0xf]  ;;  %291 = vst [vmem:[%s8896_s26 + $0x110] sm:$0xf] %v290_v4 }
  0x42   : > { %293 = vst [vmem:[%s8896_s26 + $0x114] sm:$0xf] %v292_v5  ;;  %295 = vst [vmem:[%s8896_s26 + $0x118] sm:$0xf] %v294_v6  ;;  %v296_v7 = vld [vmem:[%s8892_s25 + $0x470] sm:$0xf] }
  0x43   : > { %v298_v8 = vld [vmem:[%s8892_s25 + $0x480] sm:$0xf]  ;;  %v300_v9 = vld [vmem:[%s8892_s25 + $0x490] sm:$0xf]  ;;  %297 = vst [vmem:[%s8896_s26 + $0x11c] sm:$0xf] %v296_v7 }
  0x44   : > { %299 = vst [vmem:[%s8896_s26 + $0x120] sm:$0xf] %v298_v8  ;;  %301 = vst [vmem:[%s8896_s26 + $0x124] sm:$0xf] %v300_v9  ;;  %v302_v10 = vld [vmem:[%s8892_s25 + $0x4a0] sm:$0xf] }
  0x45   : > { %v304_v11 = vld [vmem:[%s8892_s25 + $0x4b0] sm:$0xf]  ;;  %v306_v12 = vld [vmem:[%s8892_s25 + $0x4c0] sm:$0xf]  ;;  %303 = vst [vmem:[%s8896_s26 + $0x128] sm:$0xf] %v302_v10 }
  0x46   : > { %305 = vst [vmem:[%s8896_s26 + $0x12c] sm:$0xf] %v304_v11  ;;  %307 = vst [vmem:[%s8896_s26 + $0x130] sm:$0xf] %v306_v12  ;;  %v308_v13 = vld [vmem:[%s8892_s25 + $0x4d0] sm:$0xf] }
  0x47   : > { %v310_v14 = vld [vmem:[%s8892_s25 + $0x4e0] sm:$0xf]  ;;  %v312_v15 = vld [vmem:[%s8892_s25 + $0x4f0] sm:$0xf]  ;;  %309 = vst [vmem:[%s8896_s26 + $0x134] sm:$0xf] %v308_v13 }
  0x48   : > { %311 = vst [vmem:[%s8896_s26 + $0x138] sm:$0xf] %v310_v14  ;;  %313 = vst [vmem:[%s8896_s26 + $0x13c] sm:$0xf] %v312_v15  ;;  %v314_v16 = vld [vmem:[%s8892_s25 + $0x500] sm:$0xf] }
  0x49   : > { %v316_v17 = vld [vmem:[%s8892_s25 + $0x510] sm:$0xf]  ;;  %v318_v18 = vld [vmem:[%s8892_s25 + $0x520] sm:$0xf]  ;;  %315 = vst [vmem:[%s8896_s26 + $0x140] sm:$0xf] %v314_v16 }
  0x4a   : > { %317 = vst [vmem:[%s8896_s26 + $0x144] sm:$0xf] %v316_v17  ;;  %319 = vst [vmem:[%s8896_s26 + $0x148] sm:$0xf] %v318_v18  ;;  %v320_v19 = vld [vmem:[%s8892_s25 + $0x530] sm:$0xf] }
  0x4b   : > { %v322_v20 = vld [vmem:[%s8892_s25 + $0x540] sm:$0xf]  ;;  %v324_v21 = vld [vmem:[%s8892_s25 + $0x550] sm:$0xf]  ;;  %321 = vst [vmem:[%s8896_s26 + $0x14c] sm:$0xf] %v320_v19 }
  0x4c   : > { %323 = vst [vmem:[%s8896_s26 + $0x150] sm:$0xf] %v322_v20  ;;  %325 = vst [vmem:[%s8896_s26 + $0x154] sm:$0xf] %v324_v21  ;;  %v326_v22 = vld [vmem:[%s8892_s25 + $0x560] sm:$0xf] }
  0x4d   : > { %v328_v23 = vld [vmem:[%s8892_s25 + $0x570] sm:$0xf]  ;;  %v330_v24 = vld [vmem:[%s8892_s25 + $0x580] sm:$0xf]  ;;  %327 = vst [vmem:[%s8896_s26 + $0x158] sm:$0xf] %v326_v22 }
  0x4e   : > { %329 = vst [vmem:[%s8896_s26 + $0x15c] sm:$0xf] %v328_v23  ;;  %331 = vst [vmem:[%s8896_s26 + $0x160] sm:$0xf] %v330_v24  ;;  %v332_v25 = vld [vmem:[%s8892_s25 + $0x590] sm:$0xf] }
  0x4f   : > { %v334_v26 = vld [vmem:[%s8892_s25 + $0x5a0] sm:$0xf]  ;;  %v336_v27 = vld [vmem:[%s8892_s25 + $0x5b0] sm:$0xf]  ;;  %333 = vst [vmem:[%s8896_s26 + $0x164] sm:$0xf] %v332_v25 }
  0x50   : > { %335 = vst [vmem:[%s8896_s26 + $0x168] sm:$0xf] %v334_v26  ;;  %337 = vst [vmem:[%s8896_s26 + $0x16c] sm:$0xf] %v336_v27  ;;  %v338_v28 = vld [vmem:[%s8892_s25 + $0x5c0] sm:$0xf] }
  0x51   : > { %v340_v29 = vld [vmem:[%s8892_s25 + $0x5d0] sm:$0xf]  ;;  %v342_v30 = vld [vmem:[%s8892_s25 + $0x5e0] sm:$0xf]  ;;  %339 = vst [vmem:[%s8896_s26 + $0x170] sm:$0xf] %v338_v28 }
  0x52   : > { %341 = vst [vmem:[%s8896_s26 + $0x174] sm:$0xf] %v340_v29  ;;  %343 = vst [vmem:[%s8896_s26 + $0x178] sm:$0xf] %v342_v30  ;;  %v344_v31 = vld [vmem:[%s8892_s25 + $0x5f0] sm:$0xf] }
  0x53   : > { %v346_v32 = vld [vmem:[%s8892_s25 + $0x600] sm:$0xf]  ;;  %v348_v33 = vld [vmem:[%s8892_s25 + $0x610] sm:$0xf]  ;;  %345 = vst [vmem:[%s8896_s26 + $0x17c] sm:$0xf] %v344_v31 }
  0x54   : > { %347 = vst [vmem:[%s8896_s26 + $0x180] sm:$0xf] %v346_v32  ;;  %349 = vst [vmem:[%s8896_s26 + $0x184] sm:$0xf] %v348_v33  ;;  %v350_v34 = vld [vmem:[%s8892_s25 + $0x620] sm:$0xf] }
  0x55   : > { %v352_v35 = vld [vmem:[%s8892_s25 + $0x630] sm:$0xf]  ;;  %v354_v36 = vld [vmem:[%s8892_s25 + $0x640] sm:$0xf]  ;;  %351 = vst [vmem:[%s8896_s26 + $0x188] sm:$0xf] %v350_v34 }
  0x56   : > { %353 = vst [vmem:[%s8896_s26 + $0x18c] sm:$0xf] %v352_v35  ;;  %355 = vst [vmem:[%s8896_s26 + $0x190] sm:$0xf] %v354_v36  ;;  %v356_v37 = vld [vmem:[%s8892_s25 + $0x650] sm:$0xf] }
  0x57   : > { %v358_v38 = vld [vmem:[%s8892_s25 + $0x660] sm:$0xf]  ;;  %v360_v39 = vld [vmem:[%s8892_s25 + $0x670] sm:$0xf]  ;;  %357 = vst [vmem:[%s8896_s26 + $0x194] sm:$0xf] %v356_v37 }
  0x58   : > { %359 = vst [vmem:[%s8896_s26 + $0x198] sm:$0xf] %v358_v38  ;;  %361 = vst [vmem:[%s8896_s26 + $0x19c] sm:$0xf] %v360_v39  ;;  %v362_v40 = vld [vmem:[%s8892_s25 + $0x680] sm:$0xf] }
  0x59   : > { %v364_v41 = vld [vmem:[%s8892_s25 + $0x690] sm:$0xf]  ;;  %v366_v42 = vld [vmem:[%s8892_s25 + $0x6a0] sm:$0xf]  ;;  %363 = vst [vmem:[%s8896_s26 + $0x1a0] sm:$0xf] %v362_v40 }
  0x5a   : > { %365 = vst [vmem:[%s8896_s26 + $0x1a4] sm:$0xf] %v364_v41  ;;  %367 = vst [vmem:[%s8896_s26 + $0x1a8] sm:$0xf] %v366_v42  ;;  %v368_v43 = vld [vmem:[%s8892_s25 + $0x6b0] sm:$0xf] }
  0x5b   : > { %v370_v44 = vld [vmem:[%s8892_s25 + $0x6c0] sm:$0xf]  ;;  %v372_v45 = vld [vmem:[%s8892_s25 + $0x6d0] sm:$0xf]  ;;  %369 = vst [vmem:[%s8896_s26 + $0x1ac] sm:$0xf] %v368_v43 }
  0x5c   : > { %371 = vst [vmem:[%s8896_s26 + $0x1b0] sm:$0xf] %v370_v44  ;;  %373 = vst [vmem:[%s8896_s26 + $0x1b4] sm:$0xf] %v372_v45  ;;  %v374_v46 = vld [vmem:[%s8892_s25 + $0x6e0] sm:$0xf] }
  0x5d   : > { %v376_v47 = vld [vmem:[%s8892_s25 + $0x6f0] sm:$0xf]  ;;  %v378_v48 = vld [vmem:[%s8892_s25 + $0x700] sm:$0xf]  ;;  %375 = vst [vmem:[%s8896_s26 + $0x1b8] sm:$0xf] %v374_v46 }
  0x5e   : > { %377 = vst [vmem:[%s8896_s26 + $0x1bc] sm:$0xf] %v376_v47  ;;  %379 = vst [vmem:[%s8896_s26 + $0x1c0] sm:$0xf] %v378_v48  ;;  %v380_v49 = vld [vmem:[%s8892_s25 + $0x710] sm:$0xf] }
  0x5f   : > { %v382_v50 = vld [vmem:[%s8892_s25 + $0x720] sm:$0xf]  ;;  %v384_v51 = vld [vmem:[%s8892_s25 + $0x730] sm:$0xf]  ;;  %381 = vst [vmem:[%s8896_s26 + $0x1c4] sm:$0xf] %v380_v49 }
  0x60   : > { %383 = vst [vmem:[%s8896_s26 + $0x1c8] sm:$0xf] %v382_v50  ;;  %385 = vst [vmem:[%s8896_s26 + $0x1cc] sm:$0xf] %v384_v51  ;;  %v386_v52 = vld [vmem:[%s8892_s25 + $0x740] sm:$0xf] }
  0x61   : > { %v388_v53 = vld [vmem:[%s8892_s25 + $0x750] sm:$0xf]  ;;  %v390_v54 = vld [vmem:[%s8892_s25 + $0x760] sm:$0xf]  ;;  %387 = vst [vmem:[%s8896_s26 + $0x1d0] sm:$0xf] %v386_v52 }
  0x62   : > { %389 = vst [vmem:[%s8896_s26 + $0x1d4] sm:$0xf] %v388_v53  ;;  %391 = vst [vmem:[%s8896_s26 + $0x1d8] sm:$0xf] %v390_v54  ;;  %v392_v55 = vld [vmem:[%s8892_s25 + $0x770] sm:$0xf] }
  0x63   : > { %v394_v56 = vld [vmem:[%s8892_s25 + $0x780] sm:$0xf]  ;;  %v396_v57 = vld [vmem:[%s8892_s25 + $0x790] sm:$0xf]  ;;  %393 = vst [vmem:[%s8896_s26 + $0x1dc] sm:$0xf] %v392_v55 }
  0x64   : > { %395 = vst [vmem:[%s8896_s26 + $0x1e0] sm:$0xf] %v394_v56  ;;  %397 = vst [vmem:[%s8896_s26 + $0x1e4] sm:$0xf] %v396_v57  ;;  %v398_v58 = vld [vmem:[%s8892_s25 + $0x7a0] sm:$0xf] }
  0x65   : > { %v400_v59 = vld [vmem:[%s8892_s25 + $0x7b0] sm:$0xf]  ;;  %v402_v60 = vld [vmem:[%s8892_s25 + $0x7c0] sm:$0xf]  ;;  %399 = vst [vmem:[%s8896_s26 + $0x1e8] sm:$0xf] %v398_v58 }
  0x66   : > { %401 = vst [vmem:[%s8896_s26 + $0x1ec] sm:$0xf] %v400_v59  ;;  %403 = vst [vmem:[%s8896_s26 + $0x1f0] sm:$0xf] %v402_v60  ;;  %v404_v61 = vld [vmem:[%s8892_s25 + $0x7d0] sm:$0xf] }
  0x67   : > { %v406_v62 = vld [vmem:[%s8892_s25 + $0x7e0] sm:$0xf]  ;;  %v408_v63 = vld [vmem:[%s8892_s25 + $0x7f0] sm:$0xf]  ;;  %405 = vst [vmem:[%s8896_s26 + $0x1f4] sm:$0xf] %v404_v61 }
  0x68   : > { %407 = vst [vmem:[%s8896_s26 + $0x1f8] sm:$0xf] %v406_v62  ;;  %409 = vst [vmem:[%s8896_s26 + $0x1fc] sm:$0xf] %v408_v63  ;;  %v410_v0 = vld [vmem:[%s8892_s25 + $0x800] sm:$0xf] }
  0x69   : > { %v412_v1 = vld [vmem:[%s8892_s25 + $0x810] sm:$0xf]  ;;  %v414_v2 = vld [vmem:[%s8892_s25 + $0x820] sm:$0xf]  ;;  %411 = vst [vmem:[%s8896_s26 + $0x200] sm:$0xf] %v410_v0 }
  0x6a   : > { %413 = vst [vmem:[%s8896_s26 + $0x204] sm:$0xf] %v412_v1  ;;  %415 = vst [vmem:[%s8896_s26 + $0x208] sm:$0xf] %v414_v2  ;;  %v416_v3 = vld [vmem:[%s8892_s25 + $0x830] sm:$0xf] }
  0x6b   : > { %v418_v4 = vld [vmem:[%s8892_s25 + $0x840] sm:$0xf]  ;;  %v420_v5 = vld [vmem:[%s8892_s25 + $0x850] sm:$0xf]  ;;  %417 = vst [vmem:[%s8896_s26 + $0x20c] sm:$0xf] %v416_v3 }
  0x6c   : > { %419 = vst [vmem:[%s8896_s26 + $0x210] sm:$0xf] %v418_v4  ;;  %421 = vst [vmem:[%s8896_s26 + $0x214] sm:$0xf] %v420_v5  ;;  %v422_v6 = vld [vmem:[%s8892_s25 + $0x860] sm:$0xf] }
  0x6d   : > { %v424_v7 = vld [vmem:[%s8892_s25 + $0x870] sm:$0xf]  ;;  %v426_v8 = vld [vmem:[%s8892_s25 + $0x880] sm:$0xf]  ;;  %423 = vst [vmem:[%s8896_s26 + $0x218] sm:$0xf] %v422_v6 }
  0x6e   : > { %425 = vst [vmem:[%s8896_s26 + $0x21c] sm:$0xf] %v424_v7  ;;  %427 = vst [vmem:[%s8896_s26 + $0x220] sm:$0xf] %v426_v8  ;;  %v428_v9 = vld [vmem:[%s8892_s25 + $0x890] sm:$0xf] }
  0x6f   : > { %v430_v10 = vld [vmem:[%s8892_s25 + $0x8a0] sm:$0xf]  ;;  %v432_v11 = vld [vmem:[%s8892_s25 + $0x8b0] sm:$0xf]  ;;  %429 = vst [vmem:[%s8896_s26 + $0x224] sm:$0xf] %v428_v9 }
  0x70   : > { %431 = vst [vmem:[%s8896_s26 + $0x228] sm:$0xf] %v430_v10  ;;  %433 = vst [vmem:[%s8896_s26 + $0x22c] sm:$0xf] %v432_v11  ;;  %v434_v12 = vld [vmem:[%s8892_s25 + $0x8c0] sm:$0xf] }
  0x71   : > { %v436_v13 = vld [vmem:[%s8892_s25 + $0x8d0] sm:$0xf]  ;;  %v438_v14 = vld [vmem:[%s8892_s25 + $0x8e0] sm:$0xf]  ;;  %435 = vst [vmem:[%s8896_s26 + $0x230] sm:$0xf] %v434_v12 }
  0x72   : > { %437 = vst [vmem:[%s8896_s26 + $0x234] sm:$0xf] %v436_v13  ;;  %439 = vst [vmem:[%s8896_s26 + $0x238] sm:$0xf] %v438_v14  ;;  %v440_v15 = vld [vmem:[%s8892_s25 + $0x8f0] sm:$0xf] }
  0x73   : > { %v442_v16 = vld [vmem:[%s8892_s25 + $0x900] sm:$0xf]  ;;  %v444_v17 = vld [vmem:[%s8892_s25 + $0x910] sm:$0xf]  ;;  %441 = vst [vmem:[%s8896_s26 + $0x23c] sm:$0xf] %v440_v15 }
  0x74   : > { %443 = vst [vmem:[%s8896_s26 + $0x240] sm:$0xf] %v442_v16  ;;  %445 = vst [vmem:[%s8896_s26 + $0x244] sm:$0xf] %v444_v17  ;;  %v446_v18 = vld [vmem:[%s8892_s25 + $0x920] sm:$0xf] }
  0x75   : > { %v448_v19 = vld [vmem:[%s8892_s25 + $0x930] sm:$0xf]  ;;  %v450_v20 = vld [vmem:[%s8892_s25 + $0x940] sm:$0xf]  ;;  %447 = vst [vmem:[%s8896_s26 + $0x248] sm:$0xf] %v446_v18 }
  0x76   : > { %449 = vst [vmem:[%s8896_s26 + $0x24c] sm:$0xf] %v448_v19  ;;  %451 = vst [vmem:[%s8896_s26 + $0x250] sm:$0xf] %v450_v20  ;;  %v452_v21 = vld [vmem:[%s8892_s25 + $0x950] sm:$0xf] }
  0x77   : > { %v454_v22 = vld [vmem:[%s8892_s25 + $0x960] sm:$0xf]  ;;  %v456_v23 = vld [vmem:[%s8892_s25 + $0x970] sm:$0xf]  ;;  %453 = vst [vmem:[%s8896_s26 + $0x254] sm:$0xf] %v452_v21 }
  0x78   : > { %455 = vst [vmem:[%s8896_s26 + $0x258] sm:$0xf] %v454_v22  ;;  %457 = vst [vmem:[%s8896_s26 + $0x25c] sm:$0xf] %v456_v23  ;;  %v458_v24 = vld [vmem:[%s8892_s25 + $0x980] sm:$0xf] }
  0x79   : > { %v460_v25 = vld [vmem:[%s8892_s25 + $0x990] sm:$0xf]  ;;  %v462_v26 = vld [vmem:[%s8892_s25 + $0x9a0] sm:$0xf]  ;;  %459 = vst [vmem:[%s8896_s26 + $0x260] sm:$0xf] %v458_v24 }
  0x7a   : > { %461 = vst [vmem:[%s8896_s26 + $0x264] sm:$0xf] %v460_v25  ;;  %463 = vst [vmem:[%s8896_s26 + $0x268] sm:$0xf] %v462_v26  ;;  %v464_v27 = vld [vmem:[%s8892_s25 + $0x9b0] sm:$0xf] }
  0x7b   : > { %v466_v28 = vld [vmem:[%s8892_s25 + $0x9c0] sm:$0xf]  ;;  %v468_v29 = vld [vmem:[%s8892_s25 + $0x9d0] sm:$0xf]  ;;  %465 = vst [vmem:[%s8896_s26 + $0x26c] sm:$0xf] %v464_v27 }
  0x7c   : > { %467 = vst [vmem:[%s8896_s26 + $0x270] sm:$0xf] %v466_v28  ;;  %469 = vst [vmem:[%s8896_s26 + $0x274] sm:$0xf] %v468_v29  ;;  %v470_v30 = vld [vmem:[%s8892_s25 + $0x9e0] sm:$0xf] }
  0x7d   : > { %v472_v31 = vld [vmem:[%s8892_s25 + $0x9f0] sm:$0xf]  ;;  %v474_v32 = vld [vmem:[%s8892_s25 + $0xa00] sm:$0xf]  ;;  %471 = vst [vmem:[%s8896_s26 + $0x278] sm:$0xf] %v470_v30 }
  0x7e   : > { %473 = vst [vmem:[%s8896_s26 + $0x27c] sm:$0xf] %v472_v31  ;;  %475 = vst [vmem:[%s8896_s26 + $0x280] sm:$0xf] %v474_v32  ;;  %v476_v33 = vld [vmem:[%s8892_s25 + $0xa10] sm:$0xf] }
  0x7f   : > { %v478_v34 = vld [vmem:[%s8892_s25 + $0xa20] sm:$0xf]  ;;  %v480_v35 = vld [vmem:[%s8892_s25 + $0xa30] sm:$0xf]  ;;  %477 = vst [vmem:[%s8896_s26 + $0x284] sm:$0xf] %v476_v33 }
  0x80   : > { %479 = vst [vmem:[%s8896_s26 + $0x288] sm:$0xf] %v478_v34  ;;  %481 = vst [vmem:[%s8896_s26 + $0x28c] sm:$0xf] %v480_v35  ;;  %v482_v36 = vld [vmem:[%s8892_s25 + $0xa40] sm:$0xf] }
  0x81   : > { %v484_v37 = vld [vmem:[%s8892_s25 + $0xa50] sm:$0xf]  ;;  %v486_v38 = vld [vmem:[%s8892_s25 + $0xa60] sm:$0xf]  ;;  %483 = vst [vmem:[%s8896_s26 + $0x290] sm:$0xf] %v482_v36 }
  0x82   : > { %485 = vst [vmem:[%s8896_s26 + $0x294] sm:$0xf] %v484_v37  ;;  %487 = vst [vmem:[%s8896_s26 + $0x298] sm:$0xf] %v486_v38  ;;  %v488_v39 = vld [vmem:[%s8892_s25 + $0xa70] sm:$0xf] }
  0x83   : > { %v490_v40 = vld [vmem:[%s8892_s25 + $0xa80] sm:$0xf]  ;;  %v492_v41 = vld [vmem:[%s8892_s25 + $0xa90] sm:$0xf]  ;;  %489 = vst [vmem:[%s8896_s26 + $0x29c] sm:$0xf] %v488_v39 }
  0x84   : > { %491 = vst [vmem:[%s8896_s26 + $0x2a0] sm:$0xf] %v490_v40  ;;  %493 = vst [vmem:[%s8896_s26 + $0x2a4] sm:$0xf] %v492_v41  ;;  %v494_v42 = vld [vmem:[%s8892_s25 + $0xaa0] sm:$0xf] }
  0x85   : > { %v496_v43 = vld [vmem:[%s8892_s25 + $0xab0] sm:$0xf]  ;;  %v498_v44 = vld [vmem:[%s8892_s25 + $0xac0] sm:$0xf]  ;;  %495 = vst [vmem:[%s8896_s26 + $0x2a8] sm:$0xf] %v494_v42 }
  0x86   : > { %497 = vst [vmem:[%s8896_s26 + $0x2ac] sm:$0xf] %v496_v43  ;;  %499 = vst [vmem:[%s8896_s26 + $0x2b0] sm:$0xf] %v498_v44  ;;  %v500_v45 = vld [vmem:[%s8892_s25 + $0xad0] sm:$0xf] }
  0x87   : > { %v502_v46 = vld [vmem:[%s8892_s25 + $0xae0] sm:$0xf]  ;;  %v504_v47 = vld [vmem:[%s8892_s25 + $0xaf0] sm:$0xf]  ;;  %501 = vst [vmem:[%s8896_s26 + $0x2b4] sm:$0xf] %v500_v45 }
  0x88   : > { %503 = vst [vmem:[%s8896_s26 + $0x2b8] sm:$0xf] %v502_v46  ;;  %505 = vst [vmem:[%s8896_s26 + $0x2bc] sm:$0xf] %v504_v47  ;;  %v506_v48 = vld [vmem:[%s8892_s25 + $0xb00] sm:$0xf] }
  0x89   : > { %v508_v49 = vld [vmem:[%s8892_s25 + $0xb10] sm:$0xf]  ;;  %v510_v50 = vld [vmem:[%s8892_s25 + $0xb20] sm:$0xf]  ;;  %507 = vst [vmem:[%s8896_s26 + $0x2c0] sm:$0xf] %v506_v48 }
  0x8a   : > { %509 = vst [vmem:[%s8896_s26 + $0x2c4] sm:$0xf] %v508_v49  ;;  %511 = vst [vmem:[%s8896_s26 + $0x2c8] sm:$0xf] %v510_v50  ;;  %v512_v51 = vld [vmem:[%s8892_s25 + $0xb30] sm:$0xf] }
  0x8b   : > { %v514_v52 = vld [vmem:[%s8892_s25 + $0xb40] sm:$0xf]  ;;  %v516_v53 = vld [vmem:[%s8892_s25 + $0xb50] sm:$0xf]  ;;  %513 = vst [vmem:[%s8896_s26 + $0x2cc] sm:$0xf] %v512_v51 }
  0x8c   : > { %515 = vst [vmem:[%s8896_s26 + $0x2d0] sm:$0xf] %v514_v52  ;;  %517 = vst [vmem:[%s8896_s26 + $0x2d4] sm:$0xf] %v516_v53  ;;  %v518_v54 = vld [vmem:[%s8892_s25 + $0xb60] sm:$0xf] }
  0x8d   : > { %v520_v55 = vld [vmem:[%s8892_s25 + $0xb70] sm:$0xf]  ;;  %v522_v56 = vld [vmem:[%s8892_s25 + $0xb80] sm:$0xf]  ;;  %519 = vst [vmem:[%s8896_s26 + $0x2d8] sm:$0xf] %v518_v54 }
  0x8e   : > { %521 = vst [vmem:[%s8896_s26 + $0x2dc] sm:$0xf] %v520_v55  ;;  %523 = vst [vmem:[%s8896_s26 + $0x2e0] sm:$0xf] %v522_v56  ;;  %v524_v57 = vld [vmem:[%s8892_s25 + $0xb90] sm:$0xf] }
  0x8f   : > { %v526_v58 = vld [vmem:[%s8892_s25 + $0xba0] sm:$0xf]  ;;  %v528_v59 = vld [vmem:[%s8892_s25 + $0xbb0] sm:$0xf]  ;;  %525 = vst [vmem:[%s8896_s26 + $0x2e4] sm:$0xf] %v524_v57 }
  0x90   : > { %527 = vst [vmem:[%s8896_s26 + $0x2e8] sm:$0xf] %v526_v58  ;;  %529 = vst [vmem:[%s8896_s26 + $0x2ec] sm:$0xf] %v528_v59  ;;  %v530_v60 = vld [vmem:[%s8892_s25 + $0xbc0] sm:$0xf] }
  0x91   : > { %v532_v61 = vld [vmem:[%s8892_s25 + $0xbd0] sm:$0xf]  ;;  %v534_v62 = vld [vmem:[%s8892_s25 + $0xbe0] sm:$0xf]  ;;  %531 = vst [vmem:[%s8896_s26 + $0x2f0] sm:$0xf] %v530_v60 }
  0x92   : > { %533 = vst [vmem:[%s8896_s26 + $0x2f4] sm:$0xf] %v532_v61  ;;  %535 = vst [vmem:[%s8896_s26 + $0x2f8] sm:$0xf] %v534_v62  ;;  %v536_v63 = vld [vmem:[%s8892_s25 + $0xbf0] sm:$0xf] }
  0x93   : > { %v538_v0 = vld [vmem:[%s8892_s25 + $0xc00] sm:$0xf]  ;;  %v540_v1 = vld [vmem:[%s8892_s25 + $0xc10] sm:$0xf]  ;;  %537 = vst [vmem:[%s8896_s26 + $0x2fc] sm:$0xf] %v536_v63 }
  0x94   : > { %539 = vst [vmem:[%s8896_s26 + $0x300] sm:$0xf] %v538_v0  ;;  %541 = vst [vmem:[%s8896_s26 + $0x304] sm:$0xf] %v540_v1  ;;  %v542_v2 = vld [vmem:[%s8892_s25 + $0xc20] sm:$0xf] }
  0x95   : > { %v544_v3 = vld [vmem:[%s8892_s25 + $0xc30] sm:$0xf]  ;;  %v546_v4 = vld [vmem:[%s8892_s25 + $0xc40] sm:$0xf]  ;;  %543 = vst [vmem:[%s8896_s26 + $0x308] sm:$0xf] %v542_v2 }
  0x96   : > { %545 = vst [vmem:[%s8896_s26 + $0x30c] sm:$0xf] %v544_v3  ;;  %547 = vst [vmem:[%s8896_s26 + $0x310] sm:$0xf] %v546_v4  ;;  %v548_v5 = vld [vmem:[%s8892_s25 + $0xc50] sm:$0xf] }
  0x97   : > { %v550_v6 = vld [vmem:[%s8892_s25 + $0xc60] sm:$0xf]  ;;  %v552_v7 = vld [vmem:[%s8892_s25 + $0xc70] sm:$0xf]  ;;  %549 = vst [vmem:[%s8896_s26 + $0x314] sm:$0xf] %v548_v5 }
  0x98   : > { %551 = vst [vmem:[%s8896_s26 + $0x318] sm:$0xf] %v550_v6  ;;  %553 = vst [vmem:[%s8896_s26 + $0x31c] sm:$0xf] %v552_v7  ;;  %v554_v8 = vld [vmem:[%s8892_s25 + $0xc80] sm:$0xf] }
  0x99   : > { %v556_v9 = vld [vmem:[%s8892_s25 + $0xc90] sm:$0xf]  ;;  %v558_v10 = vld [vmem:[%s8892_s25 + $0xca0] sm:$0xf]  ;;  %555 = vst [vmem:[%s8896_s26 + $0x320] sm:$0xf] %v554_v8 }
  0x9a   : > { %557 = vst [vmem:[%s8896_s26 + $0x324] sm:$0xf] %v556_v9  ;;  %559 = vst [vmem:[%s8896_s26 + $0x328] sm:$0xf] %v558_v10  ;;  %v560_v11 = vld [vmem:[%s8892_s25 + $0xcb0] sm:$0xf] }
  0x9b   : > { %v562_v12 = vld [vmem:[%s8892_s25 + $0xcc0] sm:$0xf]  ;;  %v564_v13 = vld [vmem:[%s8892_s25 + $0xcd0] sm:$0xf]  ;;  %561 = vst [vmem:[%s8896_s26 + $0x32c] sm:$0xf] %v560_v11 }
  0x9c   : > { %563 = vst [vmem:[%s8896_s26 + $0x330] sm:$0xf] %v562_v12  ;;  %565 = vst [vmem:[%s8896_s26 + $0x334] sm:$0xf] %v564_v13  ;;  %v566_v14 = vld [vmem:[%s8892_s25 + $0xce0] sm:$0xf] }
  0x9d   : > { %v568_v15 = vld [vmem:[%s8892_s25 + $0xcf0] sm:$0xf]  ;;  %v570_v16 = vld [vmem:[%s8892_s25 + $0xd00] sm:$0xf]  ;;  %567 = vst [vmem:[%s8896_s26 + $0x338] sm:$0xf] %v566_v14 }
  0x9e   : > { %569 = vst [vmem:[%s8896_s26 + $0x33c] sm:$0xf] %v568_v15  ;;  %571 = vst [vmem:[%s8896_s26 + $0x340] sm:$0xf] %v570_v16  ;;  %v572_v17 = vld [vmem:[%s8892_s25 + $0xd10] sm:$0xf] }
  0x9f   : > { %v574_v18 = vld [vmem:[%s8892_s25 + $0xd20] sm:$0xf]  ;;  %v576_v19 = vld [vmem:[%s8892_s25 + $0xd30] sm:$0xf]  ;;  %573 = vst [vmem:[%s8896_s26 + $0x344] sm:$0xf] %v572_v17 }
  0xa0   : > { %575 = vst [vmem:[%s8896_s26 + $0x348] sm:$0xf] %v574_v18  ;;  %577 = vst [vmem:[%s8896_s26 + $0x34c] sm:$0xf] %v576_v19  ;;  %v578_v20 = vld [vmem:[%s8892_s25 + $0xd40] sm:$0xf] }
  0xa1   : > { %v580_v21 = vld [vmem:[%s8892_s25 + $0xd50] sm:$0xf]  ;;  %v582_v22 = vld [vmem:[%s8892_s25 + $0xd60] sm:$0xf]  ;;  %579 = vst [vmem:[%s8896_s26 + $0x350] sm:$0xf] %v578_v20 }
  0xa2   : > { %581 = vst [vmem:[%s8896_s26 + $0x354] sm:$0xf] %v580_v21  ;;  %583 = vst [vmem:[%s8896_s26 + $0x358] sm:$0xf] %v582_v22  ;;  %v584_v23 = vld [vmem:[%s8892_s25 + $0xd70] sm:$0xf] }
  0xa3   : > { %v586_v24 = vld [vmem:[%s8892_s25 + $0xd80] sm:$0xf]  ;;  %v588_v25 = vld [vmem:[%s8892_s25 + $0xd90] sm:$0xf]  ;;  %585 = vst [vmem:[%s8896_s26 + $0x35c] sm:$0xf] %v584_v23 }
  0xa4   : > { %587 = vst [vmem:[%s8896_s26 + $0x360] sm:$0xf] %v586_v24  ;;  %589 = vst [vmem:[%s8896_s26 + $0x364] sm:$0xf] %v588_v25  ;;  %v590_v26 = vld [vmem:[%s8892_s25 + $0xda0] sm:$0xf] }
  0xa5   : > { %v592_v27 = vld [vmem:[%s8892_s25 + $0xdb0] sm:$0xf]  ;;  %v594_v28 = vld [vmem:[%s8892_s25 + $0xdc0] sm:$0xf]  ;;  %591 = vst [vmem:[%s8896_s26 + $0x368] sm:$0xf] %v590_v26 }
  0xa6   : > { %593 = vst [vmem:[%s8896_s26 + $0x36c] sm:$0xf] %v592_v27  ;;  %595 = vst [vmem:[%s8896_s26 + $0x370] sm:$0xf] %v594_v28  ;;  %v596_v29 = vld [vmem:[%s8892_s25 + $0xdd0] sm:$0xf] }
  0xa7   : > { %v598_v30 = vld [vmem:[%s8892_s25 + $0xde0] sm:$0xf]  ;;  %v600_v31 = vld [vmem:[%s8892_s25 + $0xdf0] sm:$0xf]  ;;  %597 = vst [vmem:[%s8896_s26 + $0x374] sm:$0xf] %v596_v29 }
  0xa8   : > { %599 = vst [vmem:[%s8896_s26 + $0x378] sm:$0xf] %v598_v30  ;;  %601 = vst [vmem:[%s8896_s26 + $0x37c] sm:$0xf] %v600_v31  ;;  %v602_v32 = vld [vmem:[%s8892_s25 + $0xe00] sm:$0xf] }
  0xa9   : > { %v604_v33 = vld [vmem:[%s8892_s25 + $0xe10] sm:$0xf]  ;;  %v606_v34 = vld [vmem:[%s8892_s25 + $0xe20] sm:$0xf]  ;;  %603 = vst [vmem:[%s8896_s26 + $0x380] sm:$0xf] %v602_v32 }
  0xaa   : > { %605 = vst [vmem:[%s8896_s26 + $0x384] sm:$0xf] %v604_v33  ;;  %607 = vst [vmem:[%s8896_s26 + $0x388] sm:$0xf] %v606_v34  ;;  %v608_v35 = vld [vmem:[%s8892_s25 + $0xe30] sm:$0xf] }
  0xab   : > { %v610_v36 = vld [vmem:[%s8892_s25 + $0xe40] sm:$0xf]  ;;  %v612_v37 = vld [vmem:[%s8892_s25 + $0xe50] sm:$0xf]  ;;  %609 = vst [vmem:[%s8896_s26 + $0x38c] sm:$0xf] %v608_v35 }
  0xac   : > { %611 = vst [vmem:[%s8896_s26 + $0x390] sm:$0xf] %v610_v36  ;;  %613 = vst [vmem:[%s8896_s26 + $0x394] sm:$0xf] %v612_v37  ;;  %v614_v38 = vld [vmem:[%s8892_s25 + $0xe60] sm:$0xf] }
  0xad   : > { %v616_v39 = vld [vmem:[%s8892_s25 + $0xe70] sm:$0xf]  ;;  %v618_v40 = vld [vmem:[%s8892_s25 + $0xe80] sm:$0xf]  ;;  %615 = vst [vmem:[%s8896_s26 + $0x398] sm:$0xf] %v614_v38 }
  0xae   : > { %617 = vst [vmem:[%s8896_s26 + $0x39c] sm:$0xf] %v616_v39  ;;  %619 = vst [vmem:[%s8896_s26 + $0x3a0] sm:$0xf] %v618_v40  ;;  %v620_v41 = vld [vmem:[%s8892_s25 + $0xe90] sm:$0xf] }
  0xaf   : > { %v622_v42 = vld [vmem:[%s8892_s25 + $0xea0] sm:$0xf]  ;;  %v624_v43 = vld [vmem:[%s8892_s25 + $0xeb0] sm:$0xf]  ;;  %621 = vst [vmem:[%s8896_s26 + $0x3a4] sm:$0xf] %v620_v41 }
  0xb0   : > { %623 = vst [vmem:[%s8896_s26 + $0x3a8] sm:$0xf] %v622_v42  ;;  %625 = vst [vmem:[%s8896_s26 + $0x3ac] sm:$0xf] %v624_v43  ;;  %v626_v44 = vld [vmem:[%s8892_s25 + $0xec0] sm:$0xf] }
  0xb1   : > { %v628_v45 = vld [vmem:[%s8892_s25 + $0xed0] sm:$0xf]  ;;  %v630_v46 = vld [vmem:[%s8892_s25 + $0xee0] sm:$0xf]  ;;  %627 = vst [vmem:[%s8896_s26 + $0x3b0] sm:$0xf] %v626_v44 }
  0xb2   : > { %629 = vst [vmem:[%s8896_s26 + $0x3b4] sm:$0xf] %v628_v45  ;;  %631 = vst [vmem:[%s8896_s26 + $0x3b8] sm:$0xf] %v630_v46  ;;  %v632_v47 = vld [vmem:[%s8892_s25 + $0xef0] sm:$0xf] }
  0xb3   : > { %v634_v48 = vld [vmem:[%s8892_s25 + $0xf00] sm:$0xf]  ;;  %v636_v49 = vld [vmem:[%s8892_s25 + $0xf10] sm:$0xf]  ;;  %633 = vst [vmem:[%s8896_s26 + $0x3bc] sm:$0xf] %v632_v47 }
  0xb4   : > { %635 = vst [vmem:[%s8896_s26 + $0x3c0] sm:$0xf] %v634_v48  ;;  %637 = vst [vmem:[%s8896_s26 + $0x3c4] sm:$0xf] %v636_v49  ;;  %v638_v50 = vld [vmem:[%s8892_s25 + $0xf20] sm:$0xf] }
  0xb5   : > { %v640_v51 = vld [vmem:[%s8892_s25 + $0xf30] sm:$0xf]  ;;  %v642_v52 = vld [vmem:[%s8892_s25 + $0xf40] sm:$0xf]  ;;  %639 = vst [vmem:[%s8896_s26 + $0x3c8] sm:$0xf] %v638_v50 }
  0xb6   : > { %641 = vst [vmem:[%s8896_s26 + $0x3cc] sm:$0xf] %v640_v51  ;;  %643 = vst [vmem:[%s8896_s26 + $0x3d0] sm:$0xf] %v642_v52  ;;  %v644_v53 = vld [vmem:[%s8892_s25 + $0xf50] sm:$0xf] }
  0xb7   : > { %v646_v54 = vld [vmem:[%s8892_s25 + $0xf60] sm:$0xf]  ;;  %v648_v55 = vld [vmem:[%s8892_s25 + $0xf70] sm:$0xf]  ;;  %645 = vst [vmem:[%s8896_s26 + $0x3d4] sm:$0xf] %v644_v53 }
  0xb8   : > { %647 = vst [vmem:[%s8896_s26 + $0x3d8] sm:$0xf] %v646_v54  ;;  %649 = vst [vmem:[%s8896_s26 + $0x3dc] sm:$0xf] %v648_v55  ;;  %v650_v56 = vld [vmem:[%s8892_s25 + $0xf80] sm:$0xf] }
  0xb9   : > { %v652_v57 = vld [vmem:[%s8892_s25 + $0xf90] sm:$0xf]  ;;  %v654_v58 = vld [vmem:[%s8892_s25 + $0xfa0] sm:$0xf]  ;;  %651 = vst [vmem:[%s8896_s26 + $0x3e0] sm:$0xf] %v650_v56 }
  0xba   : > { %653 = vst [vmem:[%s8896_s26 + $0x3e4] sm:$0xf] %v652_v57  ;;  %655 = vst [vmem:[%s8896_s26 + $0x3e8] sm:$0xf] %v654_v58  ;;  %v656_v59 = vld [vmem:[%s8892_s25 + $0xfb0] sm:$0xf] }
  0xbb   : > { %v658_v60 = vld [vmem:[%s8892_s25 + $0xfc0] sm:$0xf]  ;;  %v660_v61 = vld [vmem:[%s8892_s25 + $0xfd0] sm:$0xf]  ;;  %657 = vst [vmem:[%s8896_s26 + $0x3ec] sm:$0xf] %v656_v59 }
  0xbc   : > { %659 = vst [vmem:[%s8896_s26 + $0x3f0] sm:$0xf] %v658_v60  ;;  %661 = vst [vmem:[%s8896_s26 + $0x3f4] sm:$0xf] %v660_v61  ;;  %v662_v62 = vld [vmem:[%s8892_s25 + $0xfe0] sm:$0xf] }
  0xbd   : > { %v664_v63 = vld [vmem:[%s8892_s25 + $0xff0] sm:$0xf]  ;;  %v666_v0 = vld [vmem:[%s8892_s25 + $0x1000] sm:$0xf]  ;;  %663 = vst [vmem:[%s8896_s26 + $0x3f8] sm:$0xf] %v662_v62 }
  0xbe   : > { %665 = vst [vmem:[%s8896_s26 + $0x3fc] sm:$0xf] %v664_v63  ;;  %667 = vst [vmem:[%s8896_s26 + $0x400] sm:$0xf] %v666_v0  ;;  %v668_v1 = vld [vmem:[%s8892_s25 + $0x1010] sm:$0xf] }
  0xbf   : > { %v670_v2 = vld [vmem:[%s8892_s25 + $0x1020] sm:$0xf]  ;;  %v672_v3 = vld [vmem:[%s8892_s25 + $0x1030] sm:$0xf]  ;;  %669 = vst [vmem:[%s8896_s26 + $0x404] sm:$0xf] %v668_v1 }
  0xc0   : > { %671 = vst [vmem:[%s8896_s26 + $0x408] sm:$0xf] %v670_v2  ;;  %673 = vst [vmem:[%s8896_s26 + $0x40c] sm:$0xf] %v672_v3  ;;  %v674_v4 = vld [vmem:[%s8892_s25 + $0x1040] sm:$0xf] }
  0xc1   : > { %v676_v5 = vld [vmem:[%s8892_s25 + $0x1050] sm:$0xf]  ;;  %v678_v6 = vld [vmem:[%s8892_s25 + $0x1060] sm:$0xf]  ;;  %675 = vst [vmem:[%s8896_s26 + $0x410] sm:$0xf] %v674_v4 }
  0xc2   : > { %677 = vst [vmem:[%s8896_s26 + $0x414] sm:$0xf] %v676_v5  ;;  %679 = vst [vmem:[%s8896_s26 + $0x418] sm:$0xf] %v678_v6  ;;  %v680_v7 = vld [vmem:[%s8892_s25 + $0x1070] sm:$0xf] }
  0xc3   : > { %v682_v8 = vld [vmem:[%s8892_s25 + $0x1080] sm:$0xf]  ;;  %v684_v9 = vld [vmem:[%s8892_s25 + $0x1090] sm:$0xf]  ;;  %681 = vst [vmem:[%s8896_s26 + $0x41c] sm:$0xf] %v680_v7 }
  0xc4   : > { %683 = vst [vmem:[%s8896_s26 + $0x420] sm:$0xf] %v682_v8  ;;  %685 = vst [vmem:[%s8896_s26 + $0x424] sm:$0xf] %v684_v9  ;;  %v686_v10 = vld [vmem:[%s8892_s25 + $0x10a0] sm:$0xf] }
  0xc5   : > { %v688_v11 = vld [vmem:[%s8892_s25 + $0x10b0] sm:$0xf]  ;;  %v690_v12 = vld [vmem:[%s8892_s25 + $0x10c0] sm:$0xf]  ;;  %687 = vst [vmem:[%s8896_s26 + $0x428] sm:$0xf] %v686_v10 }
  0xc6   : > { %689 = vst [vmem:[%s8896_s26 + $0x42c] sm:$0xf] %v688_v11  ;;  %691 = vst [vmem:[%s8896_s26 + $0x430] sm:$0xf] %v690_v12  ;;  %v692_v13 = vld [vmem:[%s8892_s25 + $0x10d0] sm:$0xf] }
  0xc7   : > { %v694_v14 = vld [vmem:[%s8892_s25 + $0x10e0] sm:$0xf]  ;;  %v696_v15 = vld [vmem:[%s8892_s25 + $0x10f0] sm:$0xf]  ;;  %693 = vst [vmem:[%s8896_s26 + $0x434] sm:$0xf] %v692_v13 }
  0xc8   : > { %695 = vst [vmem:[%s8896_s26 + $0x438] sm:$0xf] %v694_v14  ;;  %697 = vst [vmem:[%s8896_s26 + $0x43c] sm:$0xf] %v696_v15  ;;  %v698_v16 = vld [vmem:[%s8892_s25 + $0x1100] sm:$0xf] }
  0xc9   : > { %v700_v17 = vld [vmem:[%s8892_s25 + $0x1110] sm:$0xf]  ;;  %v702_v18 = vld [vmem:[%s8892_s25 + $0x1120] sm:$0xf]  ;;  %699 = vst [vmem:[%s8896_s26 + $0x440] sm:$0xf] %v698_v16 }
  0xca   : > { %701 = vst [vmem:[%s8896_s26 + $0x444] sm:$0xf] %v700_v17  ;;  %703 = vst [vmem:[%s8896_s26 + $0x448] sm:$0xf] %v702_v18  ;;  %v704_v19 = vld [vmem:[%s8892_s25 + $0x1130] sm:$0xf] }
  0xcb   : > { %v706_v20 = vld [vmem:[%s8892_s25 + $0x1140] sm:$0xf]  ;;  %v708_v21 = vld [vmem:[%s8892_s25 + $0x1150] sm:$0xf]  ;;  %705 = vst [vmem:[%s8896_s26 + $0x44c] sm:$0xf] %v704_v19 }
  0xcc   : > { %707 = vst [vmem:[%s8896_s26 + $0x450] sm:$0xf] %v706_v20  ;;  %709 = vst [vmem:[%s8896_s26 + $0x454] sm:$0xf] %v708_v21  ;;  %v710_v22 = vld [vmem:[%s8892_s25 + $0x1160] sm:$0xf] }
  0xcd   : > { %v712_v23 = vld [vmem:[%s8892_s25 + $0x1170] sm:$0xf]  ;;  %v714_v24 = vld [vmem:[%s8892_s25 + $0x1180] sm:$0xf]  ;;  %711 = vst [vmem:[%s8896_s26 + $0x458] sm:$0xf] %v710_v22 }
  0xce   : > { %713 = vst [vmem:[%s8896_s26 + $0x45c] sm:$0xf] %v712_v23  ;;  %715 = vst [vmem:[%s8896_s26 + $0x460] sm:$0xf] %v714_v24  ;;  %v716_v25 = vld [vmem:[%s8892_s25 + $0x1190] sm:$0xf] }
  0xcf   : > { %v718_v26 = vld [vmem:[%s8892_s25 + $0x11a0] sm:$0xf]  ;;  %v720_v27 = vld [vmem:[%s8892_s25 + $0x11b0] sm:$0xf]  ;;  %717 = vst [vmem:[%s8896_s26 + $0x464] sm:$0xf] %v716_v25 }
  0xd0   : > { %719 = vst [vmem:[%s8896_s26 + $0x468] sm:$0xf] %v718_v26  ;;  %721 = vst [vmem:[%s8896_s26 + $0x46c] sm:$0xf] %v720_v27  ;;  %v722_v28 = vld [vmem:[%s8892_s25 + $0x11c0] sm:$0xf] }
  0xd1   : > { %v724_v29 = vld [vmem:[%s8892_s25 + $0x11d0] sm:$0xf]  ;;  %v726_v30 = vld [vmem:[%s8892_s25 + $0x11e0] sm:$0xf]  ;;  %723 = vst [vmem:[%s8896_s26 + $0x470] sm:$0xf] %v722_v28 }
  0xd2   : > { %725 = vst [vmem:[%s8896_s26 + $0x474] sm:$0xf] %v724_v29  ;;  %727 = vst [vmem:[%s8896_s26 + $0x478] sm:$0xf] %v726_v30  ;;  %v728_v31 = vld [vmem:[%s8892_s25 + $0x11f0] sm:$0xf] }
  0xd3   : > { %v730_v32 = vld [vmem:[%s8892_s25 + $0x1200] sm:$0xf]  ;;  %v732_v33 = vld [vmem:[%s8892_s25 + $0x1210] sm:$0xf]  ;;  %729 = vst [vmem:[%s8896_s26 + $0x47c] sm:$0xf] %v728_v31 }
  0xd4   : > { %731 = vst [vmem:[%s8896_s26 + $0x480] sm:$0xf] %v730_v32  ;;  %733 = vst [vmem:[%s8896_s26 + $0x484] sm:$0xf] %v732_v33  ;;  %v734_v34 = vld [vmem:[%s8892_s25 + $0x1220] sm:$0xf] }
  0xd5   : > { %v736_v35 = vld [vmem:[%s8892_s25 + $0x1230] sm:$0xf]  ;;  %v738_v36 = vld [vmem:[%s8892_s25 + $0x1240] sm:$0xf]  ;;  %735 = vst [vmem:[%s8896_s26 + $0x488] sm:$0xf] %v734_v34 }
  0xd6   : > { %737 = vst [vmem:[%s8896_s26 + $0x48c] sm:$0xf] %v736_v35  ;;  %739 = vst [vmem:[%s8896_s26 + $0x490] sm:$0xf] %v738_v36  ;;  %v740_v37 = vld [vmem:[%s8892_s25 + $0x1250] sm:$0xf] }
  0xd7   : > { %v742_v38 = vld [vmem:[%s8892_s25 + $0x1260] sm:$0xf]  ;;  %v744_v39 = vld [vmem:[%s8892_s25 + $0x1270] sm:$0xf]  ;;  %741 = vst [vmem:[%s8896_s26 + $0x494] sm:$0xf] %v740_v37 }
  0xd8   : > { %743 = vst [vmem:[%s8896_s26 + $0x498] sm:$0xf] %v742_v38  ;;  %745 = vst [vmem:[%s8896_s26 + $0x49c] sm:$0xf] %v744_v39  ;;  %v746_v40 = vld [vmem:[%s8892_s25 + $0x1280] sm:$0xf] }
  0xd9   : > { %v748_v41 = vld [vmem:[%s8892_s25 + $0x1290] sm:$0xf]  ;;  %v750_v42 = vld [vmem:[%s8892_s25 + $0x12a0] sm:$0xf]  ;;  %747 = vst [vmem:[%s8896_s26 + $0x4a0] sm:$0xf] %v746_v40 }
  0xda   : > { %749 = vst [vmem:[%s8896_s26 + $0x4a4] sm:$0xf] %v748_v41  ;;  %751 = vst [vmem:[%s8896_s26 + $0x4a8] sm:$0xf] %v750_v42  ;;  %v752_v43 = vld [vmem:[%s8892_s25 + $0x12b0] sm:$0xf] }
  0xdb   : > { %v754_v44 = vld [vmem:[%s8892_s25 + $0x12c0] sm:$0xf]  ;;  %v756_v45 = vld [vmem:[%s8892_s25 + $0x12d0] sm:$0xf]  ;;  %753 = vst [vmem:[%s8896_s26 + $0x4ac] sm:$0xf] %v752_v43 }
  0xdc   : > { %755 = vst [vmem:[%s8896_s26 + $0x4b0] sm:$0xf] %v754_v44  ;;  %757 = vst [vmem:[%s8896_s26 + $0x4b4] sm:$0xf] %v756_v45  ;;  %v758_v46 = vld [vmem:[%s8892_s25 + $0x12e0] sm:$0xf] }
  0xdd   : > { %v760_v47 = vld [vmem:[%s8892_s25 + $0x12f0] sm:$0xf]  ;;  %v762_v48 = vld [vmem:[%s8892_s25 + $0x1300] sm:$0xf]  ;;  %759 = vst [vmem:[%s8896_s26 + $0x4b8] sm:$0xf] %v758_v46 }
  0xde   : > { %761 = vst [vmem:[%s8896_s26 + $0x4bc] sm:$0xf] %v760_v47  ;;  %763 = vst [vmem:[%s8896_s26 + $0x4c0] sm:$0xf] %v762_v48  ;;  %v764_v49 = vld [vmem:[%s8892_s25 + $0x1310] sm:$0xf] }
  0xdf   : > { %v766_v50 = vld [vmem:[%s8892_s25 + $0x1320] sm:$0xf]  ;;  %v768_v51 = vld [vmem:[%s8892_s25 + $0x1330] sm:$0xf]  ;;  %765 = vst [vmem:[%s8896_s26 + $0x4c4] sm:$0xf] %v764_v49 }
  0xe0   : > { %767 = vst [vmem:[%s8896_s26 + $0x4c8] sm:$0xf] %v766_v50  ;;  %769 = vst [vmem:[%s8896_s26 + $0x4cc] sm:$0xf] %v768_v51  ;;  %v770_v52 = vld [vmem:[%s8892_s25 + $0x1340] sm:$0xf] }
  0xe1   : > { %v772_v53 = vld [vmem:[%s8892_s25 + $0x1350] sm:$0xf]  ;;  %v774_v54 = vld [vmem:[%s8892_s25 + $0x1360] sm:$0xf]  ;;  %771 = vst [vmem:[%s8896_s26 + $0x4d0] sm:$0xf] %v770_v52 }
  0xe2   : > { %773 = vst [vmem:[%s8896_s26 + $0x4d4] sm:$0xf] %v772_v53  ;;  %775 = vst [vmem:[%s8896_s26 + $0x4d8] sm:$0xf] %v774_v54  ;;  %v776_v55 = vld [vmem:[%s8892_s25 + $0x1370] sm:$0xf] }
  0xe3   : > { %v778_v56 = vld [vmem:[%s8892_s25 + $0x1380] sm:$0xf]  ;;  %v780_v57 = vld [vmem:[%s8892_s25 + $0x1390] sm:$0xf]  ;;  %777 = vst [vmem:[%s8896_s26 + $0x4dc] sm:$0xf] %v776_v55 }
  0xe4   : > { %779 = vst [vmem:[%s8896_s26 + $0x4e0] sm:$0xf] %v778_v56  ;;  %781 = vst [vmem:[%s8896_s26 + $0x4e4] sm:$0xf] %v780_v57  ;;  %v782_v58 = vld [vmem:[%s8892_s25 + $0x13a0] sm:$0xf] }
  0xe5   : > { %v784_v59 = vld [vmem:[%s8892_s25 + $0x13b0] sm:$0xf]  ;;  %v786_v60 = vld [vmem:[%s8892_s25 + $0x13c0] sm:$0xf]  ;;  %783 = vst [vmem:[%s8896_s26 + $0x4e8] sm:$0xf] %v782_v58 }
  0xe6   : > { %785 = vst [vmem:[%s8896_s26 + $0x4ec] sm:$0xf] %v784_v59  ;;  %787 = vst [vmem:[%s8896_s26 + $0x4f0] sm:$0xf] %v786_v60  ;;  %v788_v61 = vld [vmem:[%s8892_s25 + $0x13d0] sm:$0xf] }
  0xe7   : > { %v790_v62 = vld [vmem:[%s8892_s25 + $0x13e0] sm:$0xf]  ;;  %v792_v63 = vld [vmem:[%s8892_s25 + $0x13f0] sm:$0xf]  ;;  %789 = vst [vmem:[%s8896_s26 + $0x4f4] sm:$0xf] %v788_v61 }
  0xe8   : > { %791 = vst [vmem:[%s8896_s26 + $0x4f8] sm:$0xf] %v790_v62  ;;  %793 = vst [vmem:[%s8896_s26 + $0x4fc] sm:$0xf] %v792_v63  ;;  %v794_v0 = vld [vmem:[%s8892_s25 + $0x1400] sm:$0xf] }
  0xe9   : > { %v796_v1 = vld [vmem:[%s8892_s25 + $0x1410] sm:$0xf]  ;;  %v798_v2 = vld [vmem:[%s8892_s25 + $0x1420] sm:$0xf]  ;;  %795 = vst [vmem:[%s8896_s26 + $0x500] sm:$0xf] %v794_v0 }
  0xea   : > { %797 = vst [vmem:[%s8896_s26 + $0x504] sm:$0xf] %v796_v1  ;;  %799 = vst [vmem:[%s8896_s26 + $0x508] sm:$0xf] %v798_v2  ;;  %v800_v3 = vld [vmem:[%s8892_s25 + $0x1430] sm:$0xf] }
  0xeb   : > { %v802_v4 = vld [vmem:[%s8892_s25 + $0x1440] sm:$0xf]  ;;  %v804_v5 = vld [vmem:[%s8892_s25 + $0x1450] sm:$0xf]  ;;  %801 = vst [vmem:[%s8896_s26 + $0x50c] sm:$0xf] %v800_v3 }
  0xec   : > { %803 = vst [vmem:[%s8896_s26 + $0x510] sm:$0xf] %v802_v4  ;;  %805 = vst [vmem:[%s8896_s26 + $0x514] sm:$0xf] %v804_v5  ;;  %v806_v6 = vld [vmem:[%s8892_s25 + $0x1460] sm:$0xf] }
  0xed   : > { %v808_v7 = vld [vmem:[%s8892_s25 + $0x1470] sm:$0xf]  ;;  %v810_v8 = vld [vmem:[%s8892_s25 + $0x1480] sm:$0xf]  ;;  %807 = vst [vmem:[%s8896_s26 + $0x518] sm:$0xf] %v806_v6 }
  0xee   : > { %809 = vst [vmem:[%s8896_s26 + $0x51c] sm:$0xf] %v808_v7  ;;  %811 = vst [vmem:[%s8896_s26 + $0x520] sm:$0xf] %v810_v8  ;;  %v812_v9 = vld [vmem:[%s8892_s25 + $0x1490] sm:$0xf] }
  0xef   : > { %v814_v10 = vld [vmem:[%s8892_s25 + $0x14a0] sm:$0xf]  ;;  %v816_v11 = vld [vmem:[%s8892_s25 + $0x14b0] sm:$0xf]  ;;  %813 = vst [vmem:[%s8896_s26 + $0x524] sm:$0xf] %v812_v9 }
  0xf0   : > { %815 = vst [vmem:[%s8896_s26 + $0x528] sm:$0xf] %v814_v10  ;;  %817 = vst [vmem:[%s8896_s26 + $0x52c] sm:$0xf] %v816_v11  ;;  %v818_v12 = vld [vmem:[%s8892_s25 + $0x14c0] sm:$0xf] }
  0xf1   : > { %v820_v13 = vld [vmem:[%s8892_s25 + $0x14d0] sm:$0xf]  ;;  %v822_v14 = vld [vmem:[%s8892_s25 + $0x14e0] sm:$0xf]  ;;  %819 = vst [vmem:[%s8896_s26 + $0x530] sm:$0xf] %v818_v12 }
  0xf2   : > { %821 = vst [vmem:[%s8896_s26 + $0x534] sm:$0xf] %v820_v13  ;;  %823 = vst [vmem:[%s8896_s26 + $0x538] sm:$0xf] %v822_v14  ;;  %v824_v15 = vld [vmem:[%s8892_s25 + $0x14f0] sm:$0xf] }
  0xf3   : > { %v826_v16 = vld [vmem:[%s8892_s25 + $0x1500] sm:$0xf]  ;;  %v828_v17 = vld [vmem:[%s8892_s25 + $0x1510] sm:$0xf]  ;;  %825 = vst [vmem:[%s8896_s26 + $0x53c] sm:$0xf] %v824_v15 }
  0xf4   : > { %827 = vst [vmem:[%s8896_s26 + $0x540] sm:$0xf] %v826_v16  ;;  %829 = vst [vmem:[%s8896_s26 + $0x544] sm:$0xf] %v828_v17  ;;  %v830_v18 = vld [vmem:[%s8892_s25 + $0x1520] sm:$0xf] }
  0xf5   : > { %v832_v19 = vld [vmem:[%s8892_s25 + $0x1530] sm:$0xf]  ;;  %v834_v20 = vld [vmem:[%s8892_s25 + $0x1540] sm:$0xf]  ;;  %831 = vst [vmem:[%s8896_s26 + $0x548] sm:$0xf] %v830_v18 }
  0xf6   : > { %833 = vst [vmem:[%s8896_s26 + $0x54c] sm:$0xf] %v832_v19  ;;  %835 = vst [vmem:[%s8896_s26 + $0x550] sm:$0xf] %v834_v20  ;;  %v836_v21 = vld [vmem:[%s8892_s25 + $0x1550] sm:$0xf] }
  0xf7   : > { %v838_v22 = vld [vmem:[%s8892_s25 + $0x1560] sm:$0xf]  ;;  %v840_v23 = vld [vmem:[%s8892_s25 + $0x1570] sm:$0xf]  ;;  %837 = vst [vmem:[%s8896_s26 + $0x554] sm:$0xf] %v836_v21 }
  0xf8   : > { %839 = vst [vmem:[%s8896_s26 + $0x558] sm:$0xf] %v838_v22  ;;  %841 = vst [vmem:[%s8896_s26 + $0x55c] sm:$0xf] %v840_v23  ;;  %v842_v24 = vld [vmem:[%s8892_s25 + $0x1580] sm:$0xf] }
  0xf9   : > { %v844_v25 = vld [vmem:[%s8892_s25 + $0x1590] sm:$0xf]  ;;  %v846_v26 = vld [vmem:[%s8892_s25 + $0x15a0] sm:$0xf]  ;;  %843 = vst [vmem:[%s8896_s26 + $0x560] sm:$0xf] %v842_v24 }
  0xfa   : > { %845 = vst [vmem:[%s8896_s26 + $0x564] sm:$0xf] %v844_v25  ;;  %847 = vst [vmem:[%s8896_s26 + $0x568] sm:$0xf] %v846_v26  ;;  %v848_v27 = vld [vmem:[%s8892_s25 + $0x15b0] sm:$0xf] }
  0xfb   : > { %v850_v28 = vld [vmem:[%s8892_s25 + $0x15c0] sm:$0xf]  ;;  %v852_v29 = vld [vmem:[%s8892_s25 + $0x15d0] sm:$0xf]  ;;  %849 = vst [vmem:[%s8896_s26 + $0x56c] sm:$0xf] %v848_v27 }
  0xfc   : > { %851 = vst [vmem:[%s8896_s26 + $0x570] sm:$0xf] %v850_v28  ;;  %853 = vst [vmem:[%s8896_s26 + $0x574] sm:$0xf] %v852_v29  ;;  %v854_v30 = vld [vmem:[%s8892_s25 + $0x15e0] sm:$0xf] }
  0xfd   : > { %v856_v31 = vld [vmem:[%s8892_s25 + $0x15f0] sm:$0xf]  ;;  %v858_v32 = vld [vmem:[%s8892_s25 + $0x1600] sm:$0xf]  ;;  %855 = vst [vmem:[%s8896_s26 + $0x578] sm:$0xf] %v854_v30 }
  0xfe   : > { %857 = vst [vmem:[%s8896_s26 + $0x57c] sm:$0xf] %v856_v31  ;;  %859 = vst [vmem:[%s8896_s26 + $0x580] sm:$0xf] %v858_v32  ;;  %v860_v33 = vld [vmem:[%s8892_s25 + $0x1610] sm:$0xf] }
  0xff   : > { %v862_v34 = vld [vmem:[%s8892_s25 + $0x1620] sm:$0xf]  ;;  %v864_v35 = vld [vmem:[%s8892_s25 + $0x1630] sm:$0xf]  ;;  %861 = vst [vmem:[%s8896_s26 + $0x584] sm:$0xf] %v860_v33 }
 0x100   : > { %863 = vst [vmem:[%s8896_s26 + $0x588] sm:$0xf] %v862_v34  ;;  %865 = vst [vmem:[%s8896_s26 + $0x58c] sm:$0xf] %v864_v35  ;;  %v866_v36 = vld [vmem:[%s8892_s25 + $0x1640] sm:$0xf] }
 0x101   : > { %v868_v37 = vld [vmem:[%s8892_s25 + $0x1650] sm:$0xf]  ;;  %v870_v38 = vld [vmem:[%s8892_s25 + $0x1660] sm:$0xf]  ;;  %867 = vst [vmem:[%s8896_s26 + $0x590] sm:$0xf] %v866_v36 }
 0x102   : > { %869 = vst [vmem:[%s8896_s26 + $0x594] sm:$0xf] %v868_v37  ;;  %871 = vst [vmem:[%s8896_s26 + $0x598] sm:$0xf] %v870_v38  ;;  %v872_v39 = vld [vmem:[%s8892_s25 + $0x1670] sm:$0xf] }
 0x103   : > { %v874_v40 = vld [vmem:[%s8892_s25 + $0x1680] sm:$0xf]  ;;  %v876_v41 = vld [vmem:[%s8892_s25 + $0x1690] sm:$0xf]  ;;  %873 = vst [vmem:[%s8896_s26 + $0x59c] sm:$0xf] %v872_v39 }
 0x104   : > { %875 = vst [vmem:[%s8896_s26 + $0x5a0] sm:$0xf] %v874_v40  ;;  %877 = vst [vmem:[%s8896_s26 + $0x5a4] sm:$0xf] %v876_v41  ;;  %v878_v42 = vld [vmem:[%s8892_s25 + $0x16a0] sm:$0xf] }
 0x105   : > { %v880_v43 = vld [vmem:[%s8892_s25 + $0x16b0] sm:$0xf]  ;;  %v882_v44 = vld [vmem:[%s8892_s25 + $0x16c0] sm:$0xf]  ;;  %879 = vst [vmem:[%s8896_s26 + $0x5a8] sm:$0xf] %v878_v42 }
 0x106   : > { %881 = vst [vmem:[%s8896_s26 + $0x5ac] sm:$0xf] %v880_v43  ;;  %883 = vst [vmem:[%s8896_s26 + $0x5b0] sm:$0xf] %v882_v44  ;;  %v884_v45 = vld [vmem:[%s8892_s25 + $0x16d0] sm:$0xf] }
 0x107   : > { %v886_v46 = vld [vmem:[%s8892_s25 + $0x16e0] sm:$0xf]  ;;  %v888_v47 = vld [vmem:[%s8892_s25 + $0x16f0] sm:$0xf]  ;;  %885 = vst [vmem:[%s8896_s26 + $0x5b4] sm:$0xf] %v884_v45 }
 0x108   : > { %887 = vst [vmem:[%s8896_s26 + $0x5b8] sm:$0xf] %v886_v46  ;;  %889 = vst [vmem:[%s8896_s26 + $0x5bc] sm:$0xf] %v888_v47  ;;  %v890_v48 = vld [vmem:[%s8892_s25 + $0x1700] sm:$0xf] }
 0x109   : > { %v892_v49 = vld [vmem:[%s8892_s25 + $0x1710] sm:$0xf]  ;;  %v894_v50 = vld [vmem:[%s8892_s25 + $0x1720] sm:$0xf]  ;;  %891 = vst [vmem:[%s8896_s26 + $0x5c0] sm:$0xf] %v890_v48 }
 0x10a   : > { %893 = vst [vmem:[%s8896_s26 + $0x5c4] sm:$0xf] %v892_v49  ;;  %895 = vst [vmem:[%s8896_s26 + $0x5c8] sm:$0xf] %v894_v50  ;;  %v896_v51 = vld [vmem:[%s8892_s25 + $0x1730] sm:$0xf] }
 0x10b   : > { %v898_v52 = vld [vmem:[%s8892_s25 + $0x1740] sm:$0xf]  ;;  %v900_v53 = vld [vmem:[%s8892_s25 + $0x1750] sm:$0xf]  ;;  %897 = vst [vmem:[%s8896_s26 + $0x5cc] sm:$0xf] %v896_v51 }
 0x10c   : > { %899 = vst [vmem:[%s8896_s26 + $0x5d0] sm:$0xf] %v898_v52  ;;  %901 = vst [vmem:[%s8896_s26 + $0x5d4] sm:$0xf] %v900_v53  ;;  %v902_v54 = vld [vmem:[%s8892_s25 + $0x1760] sm:$0xf] }
 0x10d   : > { %v904_v55 = vld [vmem:[%s8892_s25 + $0x1770] sm:$0xf]  ;;  %v906_v56 = vld [vmem:[%s8892_s25 + $0x1780] sm:$0xf]  ;;  %903 = vst [vmem:[%s8896_s26 + $0x5d8] sm:$0xf] %v902_v54 }
 0x10e   : > { %905 = vst [vmem:[%s8896_s26 + $0x5dc] sm:$0xf] %v904_v55  ;;  %907 = vst [vmem:[%s8896_s26 + $0x5e0] sm:$0xf] %v906_v56  ;;  %v908_v57 = vld [vmem:[%s8892_s25 + $0x1790] sm:$0xf] }
 0x10f   : > { %v910_v58 = vld [vmem:[%s8892_s25 + $0x17a0] sm:$0xf]  ;;  %v912_v59 = vld [vmem:[%s8892_s25 + $0x17b0] sm:$0xf]  ;;  %909 = vst [vmem:[%s8896_s26 + $0x5e4] sm:$0xf] %v908_v57 }
 0x110   : > { %911 = vst [vmem:[%s8896_s26 + $0x5e8] sm:$0xf] %v910_v58  ;;  %913 = vst [vmem:[%s8896_s26 + $0x5ec] sm:$0xf] %v912_v59  ;;  %v914_v60 = vld [vmem:[%s8892_s25 + $0x17c0] sm:$0xf] }
 0x111   : > { %v916_v61 = vld [vmem:[%s8892_s25 + $0x17d0] sm:$0xf]  ;;  %v918_v62 = vld [vmem:[%s8892_s25 + $0x17e0] sm:$0xf]  ;;  %915 = vst [vmem:[%s8896_s26 + $0x5f0] sm:$0xf] %v914_v60 }
 0x112   : > { %917 = vst [vmem:[%s8896_s26 + $0x5f4] sm:$0xf] %v916_v61  ;;  %919 = vst [vmem:[%s8896_s26 + $0x5f8] sm:$0xf] %v918_v62  ;;  %v920_v63 = vld [vmem:[%s8892_s25 + $0x17f0] sm:$0xf] }
 0x113   : > { %v922_v0 = vld [vmem:[%s8892_s25 + $0x1800] sm:$0xf]  ;;  %v924_v1 = vld [vmem:[%s8892_s25 + $0x1810] sm:$0xf]  ;;  %921 = vst [vmem:[%s8896_s26 + $0x5fc] sm:$0xf] %v920_v63 }
 0x114   : > { %923 = vst [vmem:[%s8896_s26 + $0x600] sm:$0xf] %v922_v0  ;;  %925 = vst [vmem:[%s8896_s26 + $0x604] sm:$0xf] %v924_v1  ;;  %v926_v2 = vld [vmem:[%s8892_s25 + $0x1820] sm:$0xf] }
 0x115   : > { %v928_v3 = vld [vmem:[%s8892_s25 + $0x1830] sm:$0xf]  ;;  %v930_v4 = vld [vmem:[%s8892_s25 + $0x1840] sm:$0xf]  ;;  %927 = vst [vmem:[%s8896_s26 + $0x608] sm:$0xf] %v926_v2 }
 0x116   : > { %929 = vst [vmem:[%s8896_s26 + $0x60c] sm:$0xf] %v928_v3  ;;  %931 = vst [vmem:[%s8896_s26 + $0x610] sm:$0xf] %v930_v4  ;;  %v932_v5 = vld [vmem:[%s8892_s25 + $0x1850] sm:$0xf] }
 0x117   : > { %v934_v6 = vld [vmem:[%s8892_s25 + $0x1860] sm:$0xf]  ;;  %v936_v7 = vld [vmem:[%s8892_s25 + $0x1870] sm:$0xf]  ;;  %933 = vst [vmem:[%s8896_s26 + $0x614] sm:$0xf] %v932_v5 }
 0x118   : > { %935 = vst [vmem:[%s8896_s26 + $0x618] sm:$0xf] %v934_v6  ;;  %937 = vst [vmem:[%s8896_s26 + $0x61c] sm:$0xf] %v936_v7  ;;  %v938_v8 = vld [vmem:[%s8892_s25 + $0x1880] sm:$0xf] }
 0x119   : > { %v940_v9 = vld [vmem:[%s8892_s25 + $0x1890] sm:$0xf]  ;;  %v942_v10 = vld [vmem:[%s8892_s25 + $0x18a0] sm:$0xf]  ;;  %939 = vst [vmem:[%s8896_s26 + $0x620] sm:$0xf] %v938_v8 }
 0x11a   : > { %941 = vst [vmem:[%s8896_s26 + $0x624] sm:$0xf] %v940_v9  ;;  %943 = vst [vmem:[%s8896_s26 + $0x628] sm:$0xf] %v942_v10  ;;  %v944_v11 = vld [vmem:[%s8892_s25 + $0x18b0] sm:$0xf] }
 0x11b   : > { %v946_v12 = vld [vmem:[%s8892_s25 + $0x18c0] sm:$0xf]  ;;  %v948_v13 = vld [vmem:[%s8892_s25 + $0x18d0] sm:$0xf]  ;;  %945 = vst [vmem:[%s8896_s26 + $0x62c] sm:$0xf] %v944_v11 }
 0x11c   : > { %947 = vst [vmem:[%s8896_s26 + $0x630] sm:$0xf] %v946_v12  ;;  %949 = vst [vmem:[%s8896_s26 + $0x634] sm:$0xf] %v948_v13  ;;  %v950_v14 = vld [vmem:[%s8892_s25 + $0x18e0] sm:$0xf] }
 0x11d   : > { %v952_v15 = vld [vmem:[%s8892_s25 + $0x18f0] sm:$0xf]  ;;  %v954_v16 = vld [vmem:[%s8892_s25 + $0x1900] sm:$0xf]  ;;  %951 = vst [vmem:[%s8896_s26 + $0x638] sm:$0xf] %v950_v14 }
 0x11e   : > { %953 = vst [vmem:[%s8896_s26 + $0x63c] sm:$0xf] %v952_v15  ;;  %955 = vst [vmem:[%s8896_s26 + $0x640] sm:$0xf] %v954_v16  ;;  %v956_v17 = vld [vmem:[%s8892_s25 + $0x1910] sm:$0xf] }
 0x11f   : > { %v958_v18 = vld [vmem:[%s8892_s25 + $0x1920] sm:$0xf]  ;;  %v960_v19 = vld [vmem:[%s8892_s25 + $0x1930] sm:$0xf]  ;;  %957 = vst [vmem:[%s8896_s26 + $0x644] sm:$0xf] %v956_v17 }
 0x120   : > { %959 = vst [vmem:[%s8896_s26 + $0x648] sm:$0xf] %v958_v18  ;;  %961 = vst [vmem:[%s8896_s26 + $0x64c] sm:$0xf] %v960_v19  ;;  %v962_v20 = vld [vmem:[%s8892_s25 + $0x1940] sm:$0xf] }
 0x121   : > { %v964_v21 = vld [vmem:[%s8892_s25 + $0x1950] sm:$0xf]  ;;  %v966_v22 = vld [vmem:[%s8892_s25 + $0x1960] sm:$0xf]  ;;  %963 = vst [vmem:[%s8896_s26 + $0x650] sm:$0xf] %v962_v20 }
 0x122   : > { %965 = vst [vmem:[%s8896_s26 + $0x654] sm:$0xf] %v964_v21  ;;  %967 = vst [vmem:[%s8896_s26 + $0x658] sm:$0xf] %v966_v22  ;;  %v968_v23 = vld [vmem:[%s8892_s25 + $0x1970] sm:$0xf] }
 0x123   : > { %v970_v24 = vld [vmem:[%s8892_s25 + $0x1980] sm:$0xf]  ;;  %v972_v25 = vld [vmem:[%s8892_s25 + $0x1990] sm:$0xf]  ;;  %969 = vst [vmem:[%s8896_s26 + $0x65c] sm:$0xf] %v968_v23 }
 0x124   : > { %971 = vst [vmem:[%s8896_s26 + $0x660] sm:$0xf] %v970_v24  ;;  %973 = vst [vmem:[%s8896_s26 + $0x664] sm:$0xf] %v972_v25  ;;  %v974_v26 = vld [vmem:[%s8892_s25 + $0x19a0] sm:$0xf] }
 0x125   : > { %v976_v27 = vld [vmem:[%s8892_s25 + $0x19b0] sm:$0xf]  ;;  %v978_v28 = vld [vmem:[%s8892_s25 + $0x19c0] sm:$0xf]  ;;  %975 = vst [vmem:[%s8896_s26 + $0x668] sm:$0xf] %v974_v26 }
 0x126   : > { %977 = vst [vmem:[%s8896_s26 + $0x66c] sm:$0xf] %v976_v27  ;;  %979 = vst [vmem:[%s8896_s26 + $0x670] sm:$0xf] %v978_v28  ;;  %v980_v29 = vld [vmem:[%s8892_s25 + $0x19d0] sm:$0xf] }
 0x127   : > { %v982_v30 = vld [vmem:[%s8892_s25 + $0x19e0] sm:$0xf]  ;;  %v984_v31 = vld [vmem:[%s8892_s25 + $0x19f0] sm:$0xf]  ;;  %981 = vst [vmem:[%s8896_s26 + $0x674] sm:$0xf] %v980_v29 }
 0x128   : > { %983 = vst [vmem:[%s8896_s26 + $0x678] sm:$0xf] %v982_v30  ;;  %985 = vst [vmem:[%s8896_s26 + $0x67c] sm:$0xf] %v984_v31  ;;  %v986_v32 = vld [vmem:[%s8892_s25 + $0x1a00] sm:$0xf] }
 0x129   : > { %v988_v33 = vld [vmem:[%s8892_s25 + $0x1a10] sm:$0xf]  ;;  %v990_v34 = vld [vmem:[%s8892_s25 + $0x1a20] sm:$0xf]  ;;  %987 = vst [vmem:[%s8896_s26 + $0x680] sm:$0xf] %v986_v32 }
 0x12a   : > { %989 = vst [vmem:[%s8896_s26 + $0x684] sm:$0xf] %v988_v33  ;;  %991 = vst [vmem:[%s8896_s26 + $0x688] sm:$0xf] %v990_v34  ;;  %v992_v35 = vld [vmem:[%s8892_s25 + $0x1a30] sm:$0xf] }
 0x12b   : > { %v994_v36 = vld [vmem:[%s8892_s25 + $0x1a40] sm:$0xf]  ;;  %v996_v37 = vld [vmem:[%s8892_s25 + $0x1a50] sm:$0xf]  ;;  %993 = vst [vmem:[%s8896_s26 + $0x68c] sm:$0xf] %v992_v35 }
 0x12c   : > { %995 = vst [vmem:[%s8896_s26 + $0x690] sm:$0xf] %v994_v36  ;;  %997 = vst [vmem:[%s8896_s26 + $0x694] sm:$0xf] %v996_v37  ;;  %v998_v38 = vld [vmem:[%s8892_s25 + $0x1a60] sm:$0xf] }
 0x12d   : > { %v1000_v39 = vld [vmem:[%s8892_s25 + $0x1a70] sm:$0xf]  ;;  %v1002_v40 = vld [vmem:[%s8892_s25 + $0x1a80] sm:$0xf]  ;;  %999 = vst [vmem:[%s8896_s26 + $0x698] sm:$0xf] %v998_v38 }
 0x12e   : > { %1001 = vst [vmem:[%s8896_s26 + $0x69c] sm:$0xf] %v1000_v39  ;;  %1003 = vst [vmem:[%s8896_s26 + $0x6a0] sm:$0xf] %v1002_v40  ;;  %v1004_v41 = vld [vmem:[%s8892_s25 + $0x1a90] sm:$0xf] }
 0x12f   : > { %v1006_v42 = vld [vmem:[%s8892_s25 + $0x1aa0] sm:$0xf]  ;;  %v1008_v43 = vld [vmem:[%s8892_s25 + $0x1ab0] sm:$0xf]  ;;  %1005 = vst [vmem:[%s8896_s26 + $0x6a4] sm:$0xf] %v1004_v41 }
 0x130   : > { %1007 = vst [vmem:[%s8896_s26 + $0x6a8] sm:$0xf] %v1006_v42  ;;  %1009 = vst [vmem:[%s8896_s26 + $0x6ac] sm:$0xf] %v1008_v43  ;;  %v1010_v44 = vld [vmem:[%s8892_s25 + $0x1ac0] sm:$0xf] }
 0x131   : > { %v1012_v45 = vld [vmem:[%s8892_s25 + $0x1ad0] sm:$0xf]  ;;  %v1014_v46 = vld [vmem:[%s8892_s25 + $0x1ae0] sm:$0xf]  ;;  %1011 = vst [vmem:[%s8896_s26 + $0x6b0] sm:$0xf] %v1010_v44 }
 0x132   : > { %1013 = vst [vmem:[%s8896_s26 + $0x6b4] sm:$0xf] %v1012_v45  ;;  %1015 = vst [vmem:[%s8896_s26 + $0x6b8] sm:$0xf] %v1014_v46  ;;  %v1016_v47 = vld [vmem:[%s8892_s25 + $0x1af0] sm:$0xf] }
 0x133   : > { %v1018_v48 = vld [vmem:[%s8892_s25 + $0x1b00] sm:$0xf]  ;;  %v1020_v49 = vld [vmem:[%s8892_s25 + $0x1b10] sm:$0xf]  ;;  %1017 = vst [vmem:[%s8896_s26 + $0x6bc] sm:$0xf] %v1016_v47 }
 0x134   : > { %1019 = vst [vmem:[%s8896_s26 + $0x6c0] sm:$0xf] %v1018_v48  ;;  %1021 = vst [vmem:[%s8896_s26 + $0x6c4] sm:$0xf] %v1020_v49  ;;  %v1022_v50 = vld [vmem:[%s8892_s25 + $0x1b20] sm:$0xf] }
 0x135   : > { %v1024_v51 = vld [vmem:[%s8892_s25 + $0x1b30] sm:$0xf]  ;;  %v1026_v52 = vld [vmem:[%s8892_s25 + $0x1b40] sm:$0xf]  ;;  %1023 = vst [vmem:[%s8896_s26 + $0x6c8] sm:$0xf] %v1022_v50 }
 0x136   : > { %1025 = vst [vmem:[%s8896_s26 + $0x6cc] sm:$0xf] %v1024_v51  ;;  %1027 = vst [vmem:[%s8896_s26 + $0x6d0] sm:$0xf] %v1026_v52  ;;  %v1028_v53 = vld [vmem:[%s8892_s25 + $0x1b50] sm:$0xf] }
 0x137   : > { %v1030_v54 = vld [vmem:[%s8892_s25 + $0x1b60] sm:$0xf]  ;;  %v1032_v55 = vld [vmem:[%s8892_s25 + $0x1b70] sm:$0xf]  ;;  %1029 = vst [vmem:[%s8896_s26 + $0x6d4] sm:$0xf] %v1028_v53 }
 0x138   : > { %1031 = vst [vmem:[%s8896_s26 + $0x6d8] sm:$0xf] %v1030_v54  ;;  %1033 = vst [vmem:[%s8896_s26 + $0x6dc] sm:$0xf] %v1032_v55  ;;  %v1034_v56 = vld [vmem:[%s8892_s25 + $0x1b80] sm:$0xf] }
 0x139   : > { %v1036_v57 = vld [vmem:[%s8892_s25 + $0x1b90] sm:$0xf]  ;;  %v1038_v58 = vld [vmem:[%s8892_s25 + $0x1ba0] sm:$0xf]  ;;  %1035 = vst [vmem:[%s8896_s26 + $0x6e0] sm:$0xf] %v1034_v56 }
 0x13a   : > { %1037 = vst [vmem:[%s8896_s26 + $0x6e4] sm:$0xf] %v1036_v57  ;;  %1039 = vst [vmem:[%s8896_s26 + $0x6e8] sm:$0xf] %v1038_v58  ;;  %v1040_v59 = vld [vmem:[%s8892_s25 + $0x1bb0] sm:$0xf] }
 0x13b   : > { %v1042_v60 = vld [vmem:[%s8892_s25 + $0x1bc0] sm:$0xf]  ;;  %v1044_v61 = vld [vmem:[%s8892_s25 + $0x1bd0] sm:$0xf]  ;;  %1041 = vst [vmem:[%s8896_s26 + $0x6ec] sm:$0xf] %v1040_v59 }
 0x13c   : > { %1043 = vst [vmem:[%s8896_s26 + $0x6f0] sm:$0xf] %v1042_v60  ;;  %1045 = vst [vmem:[%s8896_s26 + $0x6f4] sm:$0xf] %v1044_v61  ;;  %v1046_v62 = vld [vmem:[%s8892_s25 + $0x1be0] sm:$0xf] }
 0x13d   : > { %v1048_v63 = vld [vmem:[%s8892_s25 + $0x1bf0] sm:$0xf]  ;;  %v1050_v0 = vld [vmem:[%s8892_s25 + $0x1c00] sm:$0xf]  ;;  %1047 = vst [vmem:[%s8896_s26 + $0x6f8] sm:$0xf] %v1046_v62 }
 0x13e   : > { %1049 = vst [vmem:[%s8896_s26 + $0x6fc] sm:$0xf] %v1048_v63  ;;  %1051 = vst [vmem:[%s8896_s26 + $0x700] sm:$0xf] %v1050_v0  ;;  %v1052_v1 = vld [vmem:[%s8892_s25 + $0x1c10] sm:$0xf] }
 0x13f   : > { %v1054_v2 = vld [vmem:[%s8892_s25 + $0x1c20] sm:$0xf]  ;;  %v1056_v3 = vld [vmem:[%s8892_s25 + $0x1c30] sm:$0xf]  ;;  %1053 = vst [vmem:[%s8896_s26 + $0x704] sm:$0xf] %v1052_v1 }
 0x140   : > { %1055 = vst [vmem:[%s8896_s26 + $0x708] sm:$0xf] %v1054_v2  ;;  %1057 = vst [vmem:[%s8896_s26 + $0x70c] sm:$0xf] %v1056_v3  ;;  %v1058_v4 = vld [vmem:[%s8892_s25 + $0x1c40] sm:$0xf] }
 0x141   : > { %v1060_v5 = vld [vmem:[%s8892_s25 + $0x1c50] sm:$0xf]  ;;  %v1062_v6 = vld [vmem:[%s8892_s25 + $0x1c60] sm:$0xf]  ;;  %1059 = vst [vmem:[%s8896_s26 + $0x710] sm:$0xf] %v1058_v4 }
 0x142   : > { %1061 = vst [vmem:[%s8896_s26 + $0x714] sm:$0xf] %v1060_v5  ;;  %1063 = vst [vmem:[%s8896_s26 + $0x718] sm:$0xf] %v1062_v6  ;;  %v1064_v7 = vld [vmem:[%s8892_s25 + $0x1c70] sm:$0xf] }
 0x143   : > { %v1066_v8 = vld [vmem:[%s8892_s25 + $0x1c80] sm:$0xf]  ;;  %v1068_v9 = vld [vmem:[%s8892_s25 + $0x1c90] sm:$0xf]  ;;  %1065 = vst [vmem:[%s8896_s26 + $0x71c] sm:$0xf] %v1064_v7 }
 0x144   : > { %1067 = vst [vmem:[%s8896_s26 + $0x720] sm:$0xf] %v1066_v8  ;;  %1069 = vst [vmem:[%s8896_s26 + $0x724] sm:$0xf] %v1068_v9  ;;  %v1070_v10 = vld [vmem:[%s8892_s25 + $0x1ca0] sm:$0xf] }
 0x145   : > { %v1072_v11 = vld [vmem:[%s8892_s25 + $0x1cb0] sm:$0xf]  ;;  %v1074_v12 = vld [vmem:[%s8892_s25 + $0x1cc0] sm:$0xf]  ;;  %1071 = vst [vmem:[%s8896_s26 + $0x728] sm:$0xf] %v1070_v10 }
 0x146   : > { %1073 = vst [vmem:[%s8896_s26 + $0x72c] sm:$0xf] %v1072_v11  ;;  %1075 = vst [vmem:[%s8896_s26 + $0x730] sm:$0xf] %v1074_v12  ;;  %v1076_v13 = vld [vmem:[%s8892_s25 + $0x1cd0] sm:$0xf] }
 0x147   : > { %v1078_v14 = vld [vmem:[%s8892_s25 + $0x1ce0] sm:$0xf]  ;;  %v1080_v15 = vld [vmem:[%s8892_s25 + $0x1cf0] sm:$0xf]  ;;  %1077 = vst [vmem:[%s8896_s26 + $0x734] sm:$0xf] %v1076_v13 }
 0x148   : > { %1079 = vst [vmem:[%s8896_s26 + $0x738] sm:$0xf] %v1078_v14  ;;  %1081 = vst [vmem:[%s8896_s26 + $0x73c] sm:$0xf] %v1080_v15  ;;  %v1082_v16 = vld [vmem:[%s8892_s25 + $0x1d00] sm:$0xf] }
 0x149   : > { %v1084_v17 = vld [vmem:[%s8892_s25 + $0x1d10] sm:$0xf]  ;;  %v1086_v18 = vld [vmem:[%s8892_s25 + $0x1d20] sm:$0xf]  ;;  %1083 = vst [vmem:[%s8896_s26 + $0x740] sm:$0xf] %v1082_v16 }
 0x14a   : > { %1085 = vst [vmem:[%s8896_s26 + $0x744] sm:$0xf] %v1084_v17  ;;  %1087 = vst [vmem:[%s8896_s26 + $0x748] sm:$0xf] %v1086_v18  ;;  %v1088_v19 = vld [vmem:[%s8892_s25 + $0x1d30] sm:$0xf] }
 0x14b   : > { %v1090_v20 = vld [vmem:[%s8892_s25 + $0x1d40] sm:$0xf]  ;;  %v1092_v21 = vld [vmem:[%s8892_s25 + $0x1d50] sm:$0xf]  ;;  %1089 = vst [vmem:[%s8896_s26 + $0x74c] sm:$0xf] %v1088_v19 }
 0x14c   : > { %1091 = vst [vmem:[%s8896_s26 + $0x750] sm:$0xf] %v1090_v20  ;;  %1093 = vst [vmem:[%s8896_s26 + $0x754] sm:$0xf] %v1092_v21  ;;  %v1094_v22 = vld [vmem:[%s8892_s25 + $0x1d60] sm:$0xf] }
 0x14d   : > { %v1096_v23 = vld [vmem:[%s8892_s25 + $0x1d70] sm:$0xf]  ;;  %v1098_v24 = vld [vmem:[%s8892_s25 + $0x1d80] sm:$0xf]  ;;  %1095 = vst [vmem:[%s8896_s26 + $0x758] sm:$0xf] %v1094_v22 }
 0x14e   : > { %1097 = vst [vmem:[%s8896_s26 + $0x75c] sm:$0xf] %v1096_v23  ;;  %1099 = vst [vmem:[%s8896_s26 + $0x760] sm:$0xf] %v1098_v24  ;;  %v1100_v25 = vld [vmem:[%s8892_s25 + $0x1d90] sm:$0xf] }
 0x14f   : > { %v1102_v26 = vld [vmem:[%s8892_s25 + $0x1da0] sm:$0xf]  ;;  %v1104_v27 = vld [vmem:[%s8892_s25 + $0x1db0] sm:$0xf]  ;;  %1101 = vst [vmem:[%s8896_s26 + $0x764] sm:$0xf] %v1100_v25 }
 0x150   : > { %1103 = vst [vmem:[%s8896_s26 + $0x768] sm:$0xf] %v1102_v26  ;;  %1105 = vst [vmem:[%s8896_s26 + $0x76c] sm:$0xf] %v1104_v27  ;;  %v1106_v28 = vld [vmem:[%s8892_s25 + $0x1dc0] sm:$0xf] }
 0x151   : > { %v1108_v29 = vld [vmem:[%s8892_s25 + $0x1dd0] sm:$0xf]  ;;  %v1110_v30 = vld [vmem:[%s8892_s25 + $0x1de0] sm:$0xf]  ;;  %1107 = vst [vmem:[%s8896_s26 + $0x770] sm:$0xf] %v1106_v28 }
 0x152   : > { %1109 = vst [vmem:[%s8896_s26 + $0x774] sm:$0xf] %v1108_v29  ;;  %1111 = vst [vmem:[%s8896_s26 + $0x778] sm:$0xf] %v1110_v30  ;;  %v1112_v31 = vld [vmem:[%s8892_s25 + $0x1df0] sm:$0xf] }
 0x153   : > { %v1114_v32 = vld [vmem:[%s8892_s25 + $0x1e00] sm:$0xf]  ;;  %v1116_v33 = vld [vmem:[%s8892_s25 + $0x1e10] sm:$0xf]  ;;  %1113 = vst [vmem:[%s8896_s26 + $0x77c] sm:$0xf] %v1112_v31 }
 0x154   : > { %1115 = vst [vmem:[%s8896_s26 + $0x780] sm:$0xf] %v1114_v32  ;;  %1117 = vst [vmem:[%s8896_s26 + $0x784] sm:$0xf] %v1116_v33  ;;  %v1118_v34 = vld [vmem:[%s8892_s25 + $0x1e20] sm:$0xf] }
 0x155   : > { %v1120_v35 = vld [vmem:[%s8892_s25 + $0x1e30] sm:$0xf]  ;;  %v1122_v36 = vld [vmem:[%s8892_s25 + $0x1e40] sm:$0xf]  ;;  %1119 = vst [vmem:[%s8896_s26 + $0x788] sm:$0xf] %v1118_v34 }
 0x156   : > { %1121 = vst [vmem:[%s8896_s26 + $0x78c] sm:$0xf] %v1120_v35  ;;  %1123 = vst [vmem:[%s8896_s26 + $0x790] sm:$0xf] %v1122_v36  ;;  %v1124_v37 = vld [vmem:[%s8892_s25 + $0x1e50] sm:$0xf] }
 0x157   : > { %v1126_v38 = vld [vmem:[%s8892_s25 + $0x1e60] sm:$0xf]  ;;  %v1128_v39 = vld [vmem:[%s8892_s25 + $0x1e70] sm:$0xf]  ;;  %1125 = vst [vmem:[%s8896_s26 + $0x794] sm:$0xf] %v1124_v37 }
 0x158   : > { %1127 = vst [vmem:[%s8896_s26 + $0x798] sm:$0xf] %v1126_v38  ;;  %1129 = vst [vmem:[%s8896_s26 + $0x79c] sm:$0xf] %v1128_v39  ;;  %v1130_v40 = vld [vmem:[%s8892_s25 + $0x1e80] sm:$0xf] }
 0x159   : > { %v1132_v41 = vld [vmem:[%s8892_s25 + $0x1e90] sm:$0xf]  ;;  %v1134_v42 = vld [vmem:[%s8892_s25 + $0x1ea0] sm:$0xf]  ;;  %1131 = vst [vmem:[%s8896_s26 + $0x7a0] sm:$0xf] %v1130_v40 }
 0x15a   : > { %1133 = vst [vmem:[%s8896_s26 + $0x7a4] sm:$0xf] %v1132_v41  ;;  %1135 = vst [vmem:[%s8896_s26 + $0x7a8] sm:$0xf] %v1134_v42  ;;  %v1136_v43 = vld [vmem:[%s8892_s25 + $0x1eb0] sm:$0xf] }
 0x15b   : > { %v1138_v44 = vld [vmem:[%s8892_s25 + $0x1ec0] sm:$0xf]  ;;  %v1140_v45 = vld [vmem:[%s8892_s25 + $0x1ed0] sm:$0xf]  ;;  %1137 = vst [vmem:[%s8896_s26 + $0x7ac] sm:$0xf] %v1136_v43 }
 0x15c   : > { %1139 = vst [vmem:[%s8896_s26 + $0x7b0] sm:$0xf] %v1138_v44  ;;  %1141 = vst [vmem:[%s8896_s26 + $0x7b4] sm:$0xf] %v1140_v45  ;;  %v1142_v46 = vld [vmem:[%s8892_s25 + $0x1ee0] sm:$0xf] }
 0x15d   : > { %v1144_v47 = vld [vmem:[%s8892_s25 + $0x1ef0] sm:$0xf]  ;;  %v1146_v48 = vld [vmem:[%s8892_s25 + $0x1f00] sm:$0xf]  ;;  %1143 = vst [vmem:[%s8896_s26 + $0x7b8] sm:$0xf] %v1142_v46 }
 0x15e   : > { %1145 = vst [vmem:[%s8896_s26 + $0x7bc] sm:$0xf] %v1144_v47  ;;  %1147 = vst [vmem:[%s8896_s26 + $0x7c0] sm:$0xf] %v1146_v48  ;;  %v1148_v49 = vld [vmem:[%s8892_s25 + $0x1f10] sm:$0xf] }
 0x15f   : > { %v1150_v50 = vld [vmem:[%s8892_s25 + $0x1f20] sm:$0xf]  ;;  %v1152_v51 = vld [vmem:[%s8892_s25 + $0x1f30] sm:$0xf]  ;;  %1149 = vst [vmem:[%s8896_s26 + $0x7c4] sm:$0xf] %v1148_v49 }
 0x160   : > { %1151 = vst [vmem:[%s8896_s26 + $0x7c8] sm:$0xf] %v1150_v50  ;;  %1153 = vst [vmem:[%s8896_s26 + $0x7cc] sm:$0xf] %v1152_v51  ;;  %v1154_v52 = vld [vmem:[%s8892_s25 + $0x1f40] sm:$0xf] }
 0x161   : > { %v1156_v53 = vld [vmem:[%s8892_s25 + $0x1f50] sm:$0xf]  ;;  %v1158_v54 = vld [vmem:[%s8892_s25 + $0x1f60] sm:$0xf]  ;;  %1155 = vst [vmem:[%s8896_s26 + $0x7d0] sm:$0xf] %v1154_v52 }
 0x162   : > { %1157 = vst [vmem:[%s8896_s26 + $0x7d4] sm:$0xf] %v1156_v53  ;;  %1159 = vst [vmem:[%s8896_s26 + $0x7d8] sm:$0xf] %v1158_v54  ;;  %v1160_v55 = vld [vmem:[%s8892_s25 + $0x1f70] sm:$0xf] }
 0x163   : > { %v1162_v56 = vld [vmem:[%s8892_s25 + $0x1f80] sm:$0xf]  ;;  %v1164_v57 = vld [vmem:[%s8892_s25 + $0x1f90] sm:$0xf]  ;;  %1161 = vst [vmem:[%s8896_s26 + $0x7dc] sm:$0xf] %v1160_v55 }
 0x164   : > { %1163 = vst [vmem:[%s8896_s26 + $0x7e0] sm:$0xf] %v1162_v56  ;;  %1165 = vst [vmem:[%s8896_s26 + $0x7e4] sm:$0xf] %v1164_v57  ;;  %v1166_v58 = vld [vmem:[%s8892_s25 + $0x1fa0] sm:$0xf] }
 0x165   : > { %v1168_v59 = vld [vmem:[%s8892_s25 + $0x1fb0] sm:$0xf]  ;;  %v1170_v60 = vld [vmem:[%s8892_s25 + $0x1fc0] sm:$0xf]  ;;  %1167 = vst [vmem:[%s8896_s26 + $0x7e8] sm:$0xf] %v1166_v58 }
 0x166   : > { %1169 = vst [vmem:[%s8896_s26 + $0x7ec] sm:$0xf] %v1168_v59  ;;  %1171 = vst [vmem:[%s8896_s26 + $0x7f0] sm:$0xf] %v1170_v60  ;;  %v1172_v61 = vld [vmem:[%s8892_s25 + $0x1fd0] sm:$0xf] }
 0x167   : > { %v1174_v62 = vld [vmem:[%s8892_s25 + $0x1fe0] sm:$0xf]  ;;  %v1176_v63 = vld [vmem:[%s8892_s25 + $0x1ff0] sm:$0xf]  ;;  %1173 = vst [vmem:[%s8896_s26 + $0x7f4] sm:$0xf] %v1172_v61 }
 0x168   : > { %1175 = vst [vmem:[%s8896_s26 + $0x7f8] sm:$0xf] %v1174_v62  ;;  %1177 = vst [vmem:[%s8896_s26 + $0x7fc] sm:$0xf] %v1176_v63 }
 0x169 PF: > { %p7718_p8 = scmp.ge.s32.totalorder %s8827_s13, 1  ;;  %p4302_p9 = scmp.lt.s32.totalorder %s8827_s13, 5 }
 0x16b   : > { %p4303_p10 = pnand %p7718_p8, %p4302_p9 }
 0x16d   : > { %4306 = sbr.rel (%p4303_p10) target bundleno = 864 (0x360), region = 76 }
 0x172   : > { %s4309_s27 = sand.u32 1, %s8811_s9   ;;  %v9926_v0 = vld [vmem:[%s10628_s0] sm:$0xff]  ;;  %v9936_v2 = vld [vmem:[%s10628_s0 + $0x8] sm:$0xff] }
 0x173   : > { %v9931_v1 = vld [vmem:[%s10628_s0 + $0x80] sm:$0xff]  ;;  %s7719_s6 = sshll.u32 %s4309_s27, 11  ;;  %v9945_v4 = vld [vmem:[%s10628_s0 + $0x88] sm:$0xff]  ;;  %s7720_s30 = sshll.u32 %s4309_s27, 5 }
 0x174   : > { %v7722_v3 = vcombine.high %v9926_v0, %v9931_v1  ;;  %v7724_v5 = vcombine.high %v9936_v2, %v9945_v4  ;;  %s9949_s15 = scalar_lea.vmem [#allocation2], %s7719_s6  ;;  %v4376_v35 = vld [vmem:[%s10628_s0 + $0x100] sm:$0xff]  ;;  %v4377_v38 = vld [vmem:[%s10628_s0 + $0x108] sm:$0xff]  ;;  %v7721_v42 = vcombine.low %v9926_v0, %v9931_v1  ;;  %v7723_v43 = vcombine.low %v9936_v2, %v9945_v4  ;;  %s10597_s9 = scalar_lea.vmem [#allocation3], %s7720_s30 }
 0x175   : > { %v8533_v6 = vld [vmem:[%s9949_s15 + $0x78] sm:$0xff]   ;;  %v8537_v10 = vld [vmem:[%s9949_s15 + $0x70] sm:$0xff]   ;;  %v8541_v14 = vld [vmem:[%s9949_s15 + $0x68] sm:$0xff]   ;;  %s8042_s27 = sshll.u32 (%p8879_p6), %s8819_s11, 3 }
 0x176   : > { %6808 = vmatprep.mubr.bf16.mxu0 %v7722_v3  ;;  %v8534_v7 = vld [vmem:[%s9949_s15 + $0xf8] sm:$0xff]   ;;  %6857 = vmatprep.mubr.bf16.mxu1 %v7724_v5  ;;  %v8538_v11 = vld [vmem:[%s9949_s15 + $0xf0] sm:$0xff]   ;;  %v8542_v15 = vld [vmem:[%s9949_s15 + $0xe8] sm:$0xff]   ;;  %s7575_s5 = scalar_lea.vmem (%p8879_p6), %s10630_s2, %s8042_s27 }
 0x177   : > { %8045 = vmatprep.subr.bf16.mxu0 %v8533_v6  ;;  %v8535_v8 = vld [vmem:[%s9949_s15 + $0x38] sm:$0xff]   ;;  %8073 = vmatprep.subr.bf16.mxu1 %v8534_v7  ;;  %v8539_v12 = vld [vmem:[%s9949_s15 + $0x30] sm:$0xff]   ;;  %v8543_v16 = vld [vmem:[%s9949_s15 + $0x28] sm:$0xff]  }
 0x178   : > { %v8536_v9 = vld [vmem:[%s9949_s15 + $0xb8] sm:$0xff]   ;;  %8046 = vmatpush3.bf16.msra.mxu0 %v8535_v8  ;;  %v8540_v13 = vld [vmem:[%s9949_s15 + $0xb0] sm:$0xff]   ;;  %v8544_v17 = vld [vmem:[%s9949_s15 + $0xa8] sm:$0xff]  }
 0x179   : > { %8074 = vmatpush3.bf16.msra.mxu1 %v8536_v9  ;;  %8047 = vmatprep.subr.bf16.mxu0 %v8537_v10  ;;  %v8545_v18 = vld [vmem:[%s9949_s15 + $0x60] sm:$0xff]   ;;  %v8549_v22 = vld [vmem:[%s9949_s15 + $0x58] sm:$0xff]   ;;  %v8553_v26 = vld [vmem:[%s9949_s15 + $0x50] sm:$0xff]  }
 0x17a   : > { %8075 = vmatprep.subr.bf16.mxu1 %v8538_v11  ;;  %v8546_v19 = vld [vmem:[%s9949_s15 + $0xe0] sm:$0xff]   ;;  %v8550_v23 = vld [vmem:[%s9949_s15 + $0xd8] sm:$0xff]   ;;  %v8554_v27 = vld [vmem:[%s9949_s15 + $0xd0] sm:$0xff]  }
 0x17b   : > { %v8547_v20 = vld [vmem:[%s9949_s15 + $0x20] sm:$0xff]   ;;  %v8551_v24 = vld [vmem:[%s9949_s15 + $0x18] sm:$0xff]   ;;  %v8555_v28 = vld [vmem:[%s9949_s15 + $0x10] sm:$0xff]  }
 0x17c   : > { %8048 = vmatpush3.bf16.msra.mxu0 %v8539_v12  ;;  %v8548_v21 = vld [vmem:[%s9949_s15 + $0xa0] sm:$0xff]   ;;  %v8552_v25 = vld [vmem:[%s9949_s15 + $0x98] sm:$0xff]   ;;  %v8556_v29 = vld [vmem:[%s9949_s15 + $0x90] sm:$0xff]  }
 0x17d   : > { %8076 = vmatpush3.bf16.msra.mxu1 %v8540_v13  ;;  %8049 = vmatprep.subr.bf16.mxu0 %v8541_v14  ;;  %v8557_v30 = vld [vmem:[%s9949_s15 + $0x48] sm:$0xff]   ;;  %v8561_v34 = vld [vmem:[%s9949_s15 + $0x40] sm:$0xff]   ;;  %v8565_v44 = vld [vmem:[%s9949_s15 + $0x178] sm:$0xff]  }
 0x17e   : > { %8077 = vmatprep.subr.bf16.mxu1 %v8542_v15  ;;  %v8558_v31 = vld [vmem:[%s9949_s15 + $0xc8] sm:$0xff]   ;;  %v4392_v36 = vld [vmem:[%s10628_s0 + $0x180] sm:$0xff]  ;;  %v8566_v45 = vld [vmem:[%s9949_s15 + $0x1f8] sm:$0xff]  }
 0x17f   : > { %v8559_v32 = vld [vmem:[%s9949_s15 + $0x8] sm:$0xff]   ;;  %v8562_v37 = vld [vmem:[%s9949_s15 + $0xc0] sm:$0xff]   ;;  %v7754_v46 = vcombine.high %v4376_v35, %v4392_v36  ;;  %v8567_v47 = vld [vmem:[%s9949_s15 + $0x138] sm:$0xff]   ;;  %v7753_v54 = vcombine.low %v4376_v35, %v4392_v36 }
 0x180   : > { %8050 = vmatpush3.bf16.msra.mxu0 %v8543_v16  ;;  %v8560_v33 = vld [vmem:[%s9949_s15 + $0x88] sm:$0xff]   ;;  %v8563_v40 = vld [vmem:[%s9949_s15] sm:$0xff]   ;;  %v8568_v49 = vld [vmem:[%s9949_s15 + $0x1b8] sm:$0xff]  }
 0x181   : > { %8078 = vmatpush3.bf16.msra.mxu1 %v8544_v17  ;;  %8051 = vmatprep.subr.bf16.mxu0 %v8545_v18  ;;  %v4393_v39 = vld [vmem:[%s10628_s0 + $0x188] sm:$0xff]  ;;  %v8564_v41 = vld [vmem:[%s9949_s15 + $0x80] sm:$0xff]   ;;  %v8569_v50 = vld [vmem:[%s9949_s15 + $0x170] sm:$0xff]  }
 0x182   : > { %8079 = vmatprep.subr.bf16.mxu1 %v8546_v19  ;;  %v7756_v48 = vcombine.high %v4377_v38, %v4393_v39  ;;  %v8570_v51 = vld [vmem:[%s9949_s15 + $0x1f0] sm:$0xff]   ;;  %v8573_v55 = vld [vmem:[%s9949_s15 + $0x168] sm:$0xff]   ;;  %v7755_v56 = vcombine.low %v4377_v38, %v4393_v39  ;;  %v8577_v60 = vld [vmem:[%s9949_s15 + $0x160] sm:$0xff]  }
 0x183   : > { %v8571_v52 = vld [vmem:[%s9949_s15 + $0x130] sm:$0xff]   ;;  %v8574_v57 = vld [vmem:[%s9949_s15 + $0x1e8] sm:$0xff]   ;;  %v8578_v61 = vld [vmem:[%s9949_s15 + $0x1e0] sm:$0xff]  }
 0x184   : > { %8052 = vmatpush3.bf16.msra.mxu0 %v8547_v20  ;;  %v8572_v53 = vld [vmem:[%s9949_s15 + $0x1b0] sm:$0xff]   ;;  %v8575_v58 = vld [vmem:[%s9949_s15 + $0x128] sm:$0xff]   ;;  %v8579_v62 = vld [vmem:[%s9949_s15 + $0x120] sm:$0xff]  }
 0x185   : > { %8080 = vmatpush3.bf16.msra.mxu1 %v8548_v21  ;;  %8053 = vmatprep.subr.bf16.mxu0 %v8549_v22  ;;  %v8576_v59 = vld [vmem:[%s9949_s15 + $0x1a8] sm:$0xff]   ;;  %v8580_v63 = vld [vmem:[%s9949_s15 + $0x1a0] sm:$0xff]   ;;  %v8581_v0 = vld [vmem:[%s9949_s15 + $0x158] sm:$0xff]  }
 0x186   : > { %8081 = vmatprep.subr.bf16.mxu1 %v8550_v23  ;;  %v8582_v1 = vld [vmem:[%s9949_s15 + $0x1d8] sm:$0xff]   ;;  %v8585_v4 = vld [vmem:[%s9949_s15 + $0x150] sm:$0xff]   ;;  %v8589_v8 = vld [vmem:[%s9949_s15 + $0x148] sm:$0xff]  }
 0x187   : > { %v8583_v2 = vld [vmem:[%s9949_s15 + $0x118] sm:$0xff]   ;;  %v8586_v5 = vld [vmem:[%s9949_s15 + $0x1d0] sm:$0xff]   ;;  %v8590_v9 = vld [vmem:[%s9949_s15 + $0x1c8] sm:$0xff]  }
 0x188   : > { %8054 = vmatpush3.bf16.msra.mxu0 %v8551_v24  ;;  %v8584_v3 = vld [vmem:[%s9949_s15 + $0x198] sm:$0xff]   ;;  %v8587_v6 = vld [vmem:[%s9949_s15 + $0x110] sm:$0xff]   ;;  %v8591_v10 = vld [vmem:[%s9949_s15 + $0x108] sm:$0xff]  }
 0x189   : > { %8082 = vmatpush3.bf16.msra.mxu1 %v8552_v25  ;;  %8055 = vmatprep.subr.bf16.mxu0 %v8553_v26  ;;  %v8588_v7 = vld [vmem:[%s9949_s15 + $0x190] sm:$0xff]   ;;  %v8592_v11 = vld [vmem:[%s9949_s15 + $0x188] sm:$0xff]   ;;  %v8593_v12 = vld [vmem:[%s9949_s15 + $0x140] sm:$0xff]  }
 0x18a   : > { %8083 = vmatprep.subr.bf16.mxu1 %v8554_v27  ;;  %v4346_v13 = vld [vmem:[%s10628_s0 + $0x10] sm:$0xff]  ;;  %v8594_v14 = vld [vmem:[%s9949_s15 + $0x1c0] sm:$0xff]   ;;  %v4347_v18 = vld [vmem:[%s10628_s0 + $0x18] sm:$0xff] }
 0x18b   : > { %v8595_v15 = vld [vmem:[%s9949_s15 + $0x100] sm:$0xff]   ;;  %v4362_v17 = vld [vmem:[%s10628_s0 + $0x90] sm:$0xff]  ;;  %v4363_v19 = vld [vmem:[%s10628_s0 + $0x98] sm:$0xff] }
 0x18c   : > { %8056 = vmatpush3.bf16.msra.mxu0 %v8555_v28  ;;  %v8596_v16 = vld [vmem:[%s9949_s15 + $0x180] sm:$0xff]   ;;  %v7725_v20 = vcombine.low %v4346_v13, %v4362_v17  ;;  %v7726_v21 = vcombine.high %v4346_v13, %v4362_v17  ;;  %v7727_v22 = vcombine.low %v4347_v18, %v4363_v19  ;;  %v7728_v23 = vcombine.high %v4347_v18, %v4363_v19  ;;  %v8597_v24 = vld [vmem:[%s9949_s15 + $0x278] sm:$0xff]   ;;  %v8601_v28 = vld [vmem:[%s9949_s15 + $0x270] sm:$0xff]  }
 0x18d   : > { %8084 = vmatpush3.bf16.msra.mxu1 %v8556_v29  ;;  %8057 = vmatprep.subr.bf16.mxu0 %v8557_v30  ;;  %v8598_v25 = vld [vmem:[%s9949_s15 + $0x2f8] sm:$0xff]   ;;  %v8602_v29 = vld [vmem:[%s9949_s15 + $0x2f0] sm:$0xff]   ;;  %v8605_v36 = vld [vmem:[%s9949_s15 + $0x268] sm:$0xff]  }
 0x18e   : > { %8085 = vmatprep.subr.bf16.mxu1 %v8558_v31  ;;  %v8599_v26 = vld [vmem:[%s9949_s15 + $0x238] sm:$0xff]   ;;  %v8603_v30 = vld [vmem:[%s9949_s15 + $0x230] sm:$0xff]   ;;  %v4396_v17 = vld [vmem:[%s10628_s0 + $0x1a0] sm:$0xff] }
 0x18f   : > { %v8600_v27 = vld [vmem:[%s9949_s15 + $0x2b8] sm:$0xff]   ;;  %v8604_v31 = vld [vmem:[%s9949_s15 + $0x2b0] sm:$0xff]  }
 0x190   : > { %8058 = vmatpush3.bf16.msra.mxu0 %v8559_v32  ;;  %v4378_v32 = vld [vmem:[%s10628_s0 + $0x110] sm:$0xff]  ;;  %v4379_v38 = vld [vmem:[%s10628_s0 + $0x118] sm:$0xff] }
 0x191   : > { %8086 = vmatpush3.bf16.msra.mxu1 %v8560_v33  ;;  %8059 = vmatprep.subr.bf16.mxu0 %v8561_v34  ;;  %v4394_v33 = vld [vmem:[%s10628_s0 + $0x190] sm:$0xff]  ;;  %v4395_v39 = vld [vmem:[%s10628_s0 + $0x198] sm:$0xff] }
 0x192   : > { %8087 = vmatprep.subr.bf16.mxu1 %v8562_v37  ;;  %v7758_v34 = vcombine.high %v4378_v32, %v4394_v33  ;;  %v7757_v35 = vcombine.low %v4378_v32, %v4394_v33  ;;  %v8606_v37 = vld [vmem:[%s9949_s15 + $0x2e8] sm:$0xff]   ;;  %v8634_v13 = vld [vmem:[%s9949_s15 + $0x3f0] sm:$0xff]   ;;  %v8645_v32 = vld [vmem:[%s9949_s15 + $0x358] sm:$0xff]  }
 0x193   : > { %v8646_v33 = vld [vmem:[%s9949_s15 + $0x3d8] sm:$0xff]  }
 0x194   : > { %8060 = vmatpush3.bf16.msra.mxu0 %v8563_v40  ;;  %v7760_v40 = vcombine.high %v4379_v38, %v4395_v39 }
 0x195   : > { %8088 = vmatpush3.bf16.msra.mxu1 %v8564_v41  ;;  %8101 = vmatprep.subr.bf16.mxu0 %v8565_v44  ;;  %v8607_v41 = vld [vmem:[%s9949_s15 + $0x228] sm:$0xff]   ;;  %v8609_v44 = vld [vmem:[%s9949_s15 + $0x260] sm:$0xff]  }
 0x196   : > { %8129 = vmatprep.subr.bf16.mxu1 %v8566_v45  ;;  %v8610_v45 = vld [vmem:[%s9949_s15 + $0x2e0] sm:$0xff]  }
 0x197   : > { %6809 = vmatmul.mubr.bf16.vlgmr.msra.gmra.mxu0 %v7721_v42  ;;  %v7759_v42 = vcombine.low %v4379_v38, %v4395_v39  ;;  %v8651_v38 = vld [vmem:[%s9949_s15 + $0x310] sm:$0xff]  }
 0x198   : > { %6858 = vmatmul.mubr.bf16.vlgmr.msra.gmra.mxu1 %v7723_v43  ;;  %8102 = vmatpush3.bf16.msra.mxu0 %v8567_v47  ;;  %v8608_v43 = vld [vmem:[%s9949_s15 + $0x2a8] sm:$0xff]   ;;  %v8612_v47 = vld [vmem:[%s9949_s15 + $0x2a0] sm:$0xff]   ;;  %v8652_v39 = vld [vmem:[%s9949_s15 + $0x390] sm:$0xff]  }
 0x199   : > { %8130 = vmatpush3.bf16.msra.mxu1 %v8568_v49  ;;  %6816 = vmatprep.mubr.bf16.mxu0 %v7754_v46  ;;  %v8611_v46 = vld [vmem:[%s9949_s15 + $0x220] sm:$0xff]   ;;  %v8614_v49 = vld [vmem:[%s9949_s15 + $0x2d8] sm:$0xff]  }
 0x19a   : > { %8103 = vmatprep.subr.bf16.mxu0 %v8569_v50  ;;  %6865 = vmatprep.mubr.bf16.mxu1 %v7756_v48  ;;  %v8613_v48 = vld [vmem:[%s9949_s15 + $0x258] sm:$0xff]  }
 0x19b   : > { %8131 = vmatprep.subr.bf16.mxu1 %v8570_v51  ;;  %v8615_v50 = vld [vmem:[%s9949_s15 + $0x218] sm:$0xff]  }
 0x19c   : > { %8104 = vmatpush3.bf16.msra.mxu0 %v8571_v52  ;;  %v8616_v51 = vld [vmem:[%s9949_s15 + $0x298] sm:$0xff]   ;;  %v8617_v52 = vld [vmem:[%s9949_s15 + $0x250] sm:$0xff]  }
 0x19d   : > { %8132 = vmatpush3.bf16.msra.mxu1 %v8572_v53  ;;  %8105 = vmatprep.subr.bf16.mxu0 %v8573_v55  ;;  %v8618_v53 = vld [vmem:[%s9949_s15 + $0x2d0] sm:$0xff]  }
 0x19e   : > { %8133 = vmatprep.subr.bf16.mxu1 %v8574_v57  ;;  %v8620_v55 = vld [vmem:[%s9949_s15 + $0x290] sm:$0xff]   ;;  %v8622_v57 = vld [vmem:[%s9949_s15 + $0x2c8] sm:$0xff]  }
 0x19f   : > { %6817 = vmatmul.mubr.bf16.gmra.mxu0 %v7753_v54  ;;  %v8619_v54 = vld [vmem:[%s9949_s15 + $0x210] sm:$0xff]  }
 0x1a0   : > { %8106 = vmatpush3.bf16.msra.mxu0 %v8575_v58  ;;  %6866 = vmatmul.mubr.bf16.gmra.mxu1 %v7755_v56  ;;  %v8621_v56 = vld [vmem:[%s9949_s15 + $0x248] sm:$0xff]  }
 0x1a1   : > { %8134 = vmatpush3.bf16.msra.mxu1 %v8576_v59  ;;  %8107 = vmatprep.subr.bf16.mxu0 %v8577_v60  ;;  %v8623_v58 = vld [vmem:[%s9949_s15 + $0x208] sm:$0xff]   ;;  %v8625_v60 = vld [vmem:[%s9949_s15 + $0x240] sm:$0xff]  }
 0x1a2   : > { %8135 = vmatprep.subr.bf16.mxu1 %v8578_v61  ;;  %6906 = vmatprep.mubr.bf16.mxu0 %v7726_v21  ;;  %v8624_v59 = vld [vmem:[%s9949_s15 + $0x288] sm:$0xff]   ;;  %v8626_v61 = vld [vmem:[%s9949_s15 + $0x2c0] sm:$0xff]  }
 0x1a3   : > { %6955 = vmatprep.mubr.bf16.mxu1 %v7728_v23  ;;  %v8638_v21 = vld [vmem:[%s9949_s15 + $0x3e8] sm:$0xff]  }
 0x1a4   : > { %8108 = vmatpush3.bf16.msra.mxu0 %v8579_v62  ;;  %v8627_v62 = vld [vmem:[%s9949_s15 + $0x200] sm:$0xff]   ;;  %v4397_v23 = vld [vmem:[%s10628_s0 + $0x1a8] sm:$0xff] }
 0x1a5   : > { %8136 = vmatpush3.bf16.msra.mxu1 %v8580_v63  ;;  %8109 = vmatprep.subr.bf16.mxu0 %v8581_v0  ;;  %v8628_v63 = vld [vmem:[%s9949_s15 + $0x280] sm:$0xff]  }
 0x1a6   : > { %8137 = vmatprep.subr.bf16.mxu1 %v8582_v1  ;;  %v4348_v0 = vld [vmem:[%s10628_s0 + $0x20] sm:$0xff] }
 0x1a7   : > { %v4364_v1 = vld [vmem:[%s10628_s0 + $0xa0] sm:$0xff] }
 0x1a8   : > { %8110 = vmatpush3.bf16.msra.mxu0 %v8583_v2  ;;  %v7729_v2 = vcombine.low %v4348_v0, %v4364_v1 }
 0x1a9   : > { %8138 = vmatpush3.bf16.msra.mxu1 %v8584_v3  ;;  %8111 = vmatprep.subr.bf16.mxu0 %v8585_v4  ;;  %v7730_v3 = vcombine.high %v4348_v0, %v4364_v1  ;;  %v4349_v4 = vld [vmem:[%s10628_s0 + $0x28] sm:$0xff]  ;;  %v4382_v0 = vld [vmem:[%s10628_s0 + $0x130] sm:$0xff] }
 0x1aa   : > { %8139 = vmatprep.subr.bf16.mxu1 %v8586_v5  ;;  %v4365_v5 = vld [vmem:[%s10628_s0 + $0xa8] sm:$0xff]  ;;  %v4398_v1 = vld [vmem:[%s10628_s0 + $0x1b0] sm:$0xff] }
 0x1ac   : > { %8112 = vmatpush3.bf16.msra.mxu0 %v8587_v6  ;;  %v7731_v6 = vcombine.low %v4349_v4, %v4365_v5 }
 0x1ad   : > { %8140 = vmatpush3.bf16.msra.mxu1 %v8588_v7  ;;  %8113 = vmatprep.subr.bf16.mxu0 %v8589_v8  ;;  %v7732_v7 = vcombine.high %v4349_v4, %v4365_v5  ;;  %v8629_v8 = vld [vmem:[%s9949_s15 + $0x378] sm:$0xff]   ;;  %v8669_v4 = vld [vmem:[%s9949_s15 + $0x468] sm:$0xff]  }
 0x1ae   : > { %8141 = vmatprep.subr.bf16.mxu1 %v8590_v9  ;;  %v8630_v9 = vld [vmem:[%s9949_s15 + $0x3f8] sm:$0xff]   ;;  %v8670_v5 = vld [vmem:[%s9949_s15 + $0x4e8] sm:$0xff]  }
 0x1b0   : > { %8114 = vmatpush3.bf16.msra.mxu0 %v8591_v10  ;;  %v8631_v10 = vld [vmem:[%s9949_s15 + $0x338] sm:$0xff]  }
 0x1b1   : > { %8142 = vmatpush3.bf16.msra.mxu1 %v8592_v11  ;;  %8115 = vmatprep.subr.bf16.mxu0 %v8593_v12  ;;  %v8632_v11 = vld [vmem:[%s9949_s15 + $0x3b8] sm:$0xff]   ;;  %v8633_v12 = vld [vmem:[%s9949_s15 + $0x370] sm:$0xff]  }
 0x1b2   : > { %8143 = vmatprep.subr.bf16.mxu1 %v8594_v14  ;;  %v8635_v14 = vld [vmem:[%s9949_s15 + $0x330] sm:$0xff]  }
 0x1b4   : > { %8116 = vmatpush3.bf16.msra.mxu0 %v8595_v15  ;;  %v8636_v15 = vld [vmem:[%s9949_s15 + $0x3b0] sm:$0xff]  }
 0x1b5   : > { %8144 = vmatpush3.bf16.msra.mxu1 %v8596_v16  ;;  %8157 = vmatprep.subr.bf16.mxu0 %v8597_v24  ;;  %v4380_v16 = vld [vmem:[%s10628_s0 + $0x120] sm:$0xff] }
 0x1b6   : > { %8185 = vmatprep.subr.bf16.mxu1 %v8598_v25  ;;  %v7762_v18 = vcombine.high %v4380_v16, %v4396_v17  ;;  %v7761_v19 = vcombine.low %v4380_v16, %v4396_v17  ;;  %v8639_v25 = vld [vmem:[%s9949_s15 + $0x328] sm:$0xff]   ;;  %v8677_v16 = vld [vmem:[%s9949_s15 + $0x458] sm:$0xff]  }
 0x1b7   : > { %6907 = vmatmul.mubr.bf16.vlgmr.msra.gmra.mxu0 %v7725_v20  ;;  %v8637_v20 = vld [vmem:[%s9949_s15 + $0x368] sm:$0xff]   ;;  %v8678_v17 = vld [vmem:[%s9949_s15 + $0x4d8] sm:$0xff]  }
 0x1b8   : > { %6956 = vmatmul.mubr.bf16.vlgmr.msra.gmra.mxu1 %v7727_v22  ;;  %8158 = vmatpush3.bf16.msra.mxu0 %v8599_v26  ;;  %v4381_v22 = vld [vmem:[%s10628_s0 + $0x128] sm:$0xff] }
 0x1b9   : > { %8186 = vmatpush3.bf16.msra.mxu1 %v8600_v27  ;;  %8159 = vmatprep.subr.bf16.mxu0 %v8601_v28  ;;  %v7764_v24 = vcombine.high %v4381_v22, %v4397_v23  ;;  %v7763_v26 = vcombine.low %v4381_v22, %v4397_v23  ;;  %v8640_v27 = vld [vmem:[%s9949_s15 + $0x3a8] sm:$0xff]   ;;  %v8641_v28 = vld [vmem:[%s9949_s15 + $0x360] sm:$0xff]   ;;  %v8683_v22 = vld [vmem:[%s9949_s15 + $0x410] sm:$0xff]  }
 0x1ba   : > { %8187 = vmatprep.subr.bf16.mxu1 %v8602_v29  ;;  %6914 = vmatprep.mubr.bf16.mxu0 %v7758_v34  ;;  %v8642_v29 = vld [vmem:[%s9949_s15 + $0x3e0] sm:$0xff]   ;;  %v8647_v34 = vld [vmem:[%s9949_s15 + $0x318] sm:$0xff]   ;;  %v8684_v23 = vld [vmem:[%s9949_s15 + $0x490] sm:$0xff]  }
 0x1bb   : > { %6963 = vmatprep.mubr.bf16.mxu1 %v7760_v40  ;;  %v8653_v40 = vld [vmem:[%s9949_s15 + $0x348] sm:$0xff]  }
 0x1bc   : > { %8160 = vmatpush3.bf16.msra.mxu0 %v8603_v30  ;;  %v8643_v30 = vld [vmem:[%s9949_s15 + $0x320] sm:$0xff]  }
 0x1bd   : > { %8188 = vmatpush3.bf16.msra.mxu1 %v8604_v31  ;;  %8161 = vmatprep.subr.bf16.mxu0 %v8605_v36  ;;  %v8644_v31 = vld [vmem:[%s9949_s15 + $0x3a0] sm:$0xff]   ;;  %v8649_v36 = vld [vmem:[%s9949_s15 + $0x350] sm:$0xff]  }
 0x1be   : > { %8189 = vmatprep.subr.bf16.mxu1 %v8606_v37  ;;  %v8650_v37 = vld [vmem:[%s9949_s15 + $0x3d0] sm:$0xff]  }
 0x1bf   : > { %6915 = vmatmul.mubr.bf16.gmra.mxu0 %v7757_v35  ;;  %v8648_v35 = vld [vmem:[%s9949_s15 + $0x398] sm:$0xff]  }
 0x1c0   : > { %8162 = vmatpush3.bf16.msra.mxu0 %v8607_v41  ;;  %6964 = vmatmul.mubr.bf16.gmra.mxu1 %v7759_v42  ;;  %v8654_v41 = vld [vmem:[%s9949_s15 + $0x3c8] sm:$0xff]  }
 0x1c1   : > { %8190 = vmatpush3.bf16.msra.mxu1 %v8608_v43  ;;  %8163 = vmatprep.subr.bf16.mxu0 %v8609_v44  ;;  %v8655_v42 = vld [vmem:[%s9949_s15 + $0x308] sm:$0xff]   ;;  %v8657_v44 = vld [vmem:[%s9949_s15 + $0x340] sm:$0xff]  }
 0x1c2   : > { %8191 = vmatprep.subr.bf16.mxu1 %v8610_v45  ;;  %7004 = vmatprep.mubr.bf16.mxu0 %v7730_v3  ;;  %v8656_v43 = vld [vmem:[%s9949_s15 + $0x388] sm:$0xff]   ;;  %v8658_v45 = vld [vmem:[%s9949_s15 + $0x3c0] sm:$0xff]   ;;  %v7765_v3 = vcombine.low %v4382_v0, %v4398_v1 }
 0x1c3   : > { %7053 = vmatprep.mubr.bf16.mxu1 %v7732_v7  ;;  %v4399_v7 = vld [vmem:[%s10628_s0 + $0x1b8] sm:$0xff] }
 0x1c4   : > { %8164 = vmatpush3.bf16.msra.mxu0 %v8611_v46  ;;  %v8659_v46 = vld [vmem:[%s9949_s15 + $0x300] sm:$0xff]  }
 0x1c5   : > { %8192 = vmatpush3.bf16.msra.mxu1 %v8612_v47  ;;  %8165 = vmatprep.subr.bf16.mxu0 %v8613_v48  ;;  %v8660_v47 = vld [vmem:[%s9949_s15 + $0x380] sm:$0xff]   ;;  %v4350_v48 = vld [vmem:[%s10628_s0 + $0x30] sm:$0xff] }
 0x1c6   : > { %8193 = vmatprep.subr.bf16.mxu1 %v8614_v49  ;;  %v4366_v49 = vld [vmem:[%s10628_s0 + $0xb0] sm:$0xff] }
 0x1c8   : > { %8166 = vmatpush3.bf16.msra.mxu0 %v8615_v50  ;;  %v4351_v50 = vld [vmem:[%s10628_s0 + $0x38] sm:$0xff] }
 0x1c9   : > { %8194 = vmatpush3.bf16.msra.mxu1 %v8616_v51  ;;  %8167 = vmatprep.subr.bf16.mxu0 %v8617_v52  ;;  %v7733_v51 = vcombine.low %v4350_v48, %v4366_v49  ;;  %v7734_v52 = vcombine.high %v4350_v48, %v4366_v49  ;;  %v4384_v48 = vld [vmem:[%s10628_s0 + $0x140] sm:$0xff] }
 0x1ca   : > { %8195 = vmatprep.subr.bf16.mxu1 %v8618_v53  ;;  %v4367_v53 = vld [vmem:[%s10628_s0 + $0xb8] sm:$0xff]  ;;  %v4400_v49 = vld [vmem:[%s10628_s0 + $0x1c0] sm:$0xff] }
 0x1cc   : > { %8168 = vmatpush3.bf16.msra.mxu0 %v8619_v54  ;;  %v7735_v54 = vcombine.low %v4351_v50, %v4367_v53 }
 0x1cd   : > { %8196 = vmatpush3.bf16.msra.mxu1 %v8620_v55  ;;  %8169 = vmatprep.subr.bf16.mxu0 %v8621_v56  ;;  %v7736_v55 = vcombine.high %v4351_v50, %v4367_v53  ;;  %v8661_v56 = vld [vmem:[%s9949_s15 + $0x478] sm:$0xff]   ;;  %v7770_v50 = vcombine.high %v4384_v48, %v4400_v49  ;;  %v8702_v53 = vld [vmem:[%s9949_s15 + $0x5e8] sm:$0xff]  }
 0x1ce   : > { %8197 = vmatprep.subr.bf16.mxu1 %v8622_v57  ;;  %v8662_v57 = vld [vmem:[%s9949_s15 + $0x4f8] sm:$0xff]  }
 0x1d0   : > { %8170 = vmatpush3.bf16.msra.mxu0 %v8623_v58  ;;  %v8663_v58 = vld [vmem:[%s9949_s15 + $0x438] sm:$0xff]  }
 0x1d1   : > { %8198 = vmatpush3.bf16.msra.mxu1 %v8624_v59  ;;  %8171 = vmatprep.subr.bf16.mxu0 %v8625_v60  ;;  %v8664_v59 = vld [vmem:[%s9949_s15 + $0x4b8] sm:$0xff]   ;;  %v8665_v60 = vld [vmem:[%s9949_s15 + $0x470] sm:$0xff]  }
 0x1d2   : > { %8199 = vmatprep.subr.bf16.mxu1 %v8626_v61  ;;  %v8666_v61 = vld [vmem:[%s9949_s15 + $0x4f0] sm:$0xff]  }
 0x1d4   : > { %8172 = vmatpush3.bf16.msra.mxu0 %v8627_v62  ;;  %v8667_v62 = vld [vmem:[%s9949_s15 + $0x430] sm:$0xff]  }
 0x1d5   : > { %8200 = vmatpush3.bf16.msra.mxu1 %v8628_v63  ;;  %8213 = vmatprep.subr.bf16.mxu0 %v8629_v8  ;;  %v8668_v63 = vld [vmem:[%s9949_s15 + $0x4b0] sm:$0xff]  }
 0x1d6   : > { %8241 = vmatprep.subr.bf16.mxu1 %v8630_v9  ;;  %v8671_v9 = vld [vmem:[%s9949_s15 + $0x428] sm:$0xff]  }
 0x1d7   : > { %7005 = vmatmul.mubr.bf16.vlgmr.msra.gmra.mxu0 %v7729_v2  ;;  %v7766_v2 = vcombine.high %v4382_v0, %v4398_v1  ;;  %v8709_v0 = vld [vmem:[%s9949_s15 + $0x558] sm:$0xff]  }
 0x1d8   : > { %7054 = vmatmul.mubr.bf16.vlgmr.msra.gmra.mxu1 %v7731_v6  ;;  %8214 = vmatpush3.bf16.msra.mxu0 %v8631_v10  ;;  %v4383_v6 = vld [vmem:[%s10628_s0 + $0x138] sm:$0xff] }
 0x1d9   : > { %8242 = vmatpush3.bf16.msra.mxu1 %v8632_v11  ;;  %8215 = vmatprep.subr.bf16.mxu0 %v8633_v12  ;;  %v7768_v8 = vcombine.high %v4383_v6, %v4399_v7  ;;  %v7767_v10 = vcombine.low %v4383_v6, %v4399_v7  ;;  %v8672_v11 = vld [vmem:[%s9949_s15 + $0x4a8] sm:$0xff]   ;;  %v8673_v12 = vld [vmem:[%s9949_s15 + $0x460] sm:$0xff]   ;;  %v8710_v1 = vld [vmem:[%s9949_s15 + $0x5d8] sm:$0xff]  }
 0x1da   : > { %8243 = vmatprep.subr.bf16.mxu1 %v8634_v13  ;;  %7012 = vmatprep.mubr.bf16.mxu0 %v7762_v18  ;;  %v8674_v13 = vld [vmem:[%s9949_s15 + $0x4e0] sm:$0xff]   ;;  %v8679_v18 = vld [vmem:[%s9949_s15 + $0x418] sm:$0xff]   ;;  %v8715_v6 = vld [vmem:[%s9949_s15 + $0x510] sm:$0xff]  }
 0x1db   : > { %7061 = vmatprep.mubr.bf16.mxu1 %v7764_v24  ;;  %v8685_v24 = vld [vmem:[%s9949_s15 + $0x448] sm:$0xff]   ;;  %v8716_v7 = vld [vmem:[%s9949_s15 + $0x590] sm:$0xff]  }
 0x1dc   : > { %8216 = vmatpush3.bf16.msra.mxu0 %v8635_v14  ;;  %v8675_v14 = vld [vmem:[%s9949_s15 + $0x420] sm:$0xff]  }
 0x1dd   : > { %8244 = vmatpush3.bf16.msra.mxu1 %v8636_v15  ;;  %8217 = vmatprep.subr.bf16.mxu0 %v8637_v20  ;;  %v8676_v15 = vld [vmem:[%s9949_s15 + $0x4a0] sm:$0xff]   ;;  %v8681_v20 = vld [vmem:[%s9949_s15 + $0x450] sm:$0xff]  }
 0x1de   : > { %8245 = vmatprep.subr.bf16.mxu1 %v8638_v21  ;;  %v8682_v21 = vld [vmem:[%s9949_s15 + $0x4d0] sm:$0xff]  }
 0x1df   : > { %7013 = vmatmul.mubr.bf16.gmra.mxu0 %v7761_v19  ;;  %v8680_v19 = vld [vmem:[%s9949_s15 + $0x498] sm:$0xff]  }
 0x1e0   : > { %8218 = vmatpush3.bf16.msra.mxu0 %v8639_v25  ;;  %7062 = vmatmul.mubr.bf16.gmra.mxu1 %v7763_v26  ;;  %v8686_v25 = vld [vmem:[%s9949_s15 + $0x4c8] sm:$0xff]  }
 0x1e1   : > { %8246 = vmatpush3.bf16.msra.mxu1 %v8640_v27  ;;  %8219 = vmatprep.subr.bf16.mxu0 %v8641_v28  ;;  %v8687_v26 = vld [vmem:[%s9949_s15 + $0x408] sm:$0xff]   ;;  %v8689_v28 = vld [vmem:[%s9949_s15 + $0x440] sm:$0xff]  }
 0x1e2   : > { %8247 = vmatprep.subr.bf16.mxu1 %v8642_v29  ;;  %7102 = vmatprep.mubr.bf16.mxu0 %v7734_v52  ;;  %v8688_v27 = vld [vmem:[%s9949_s15 + $0x488] sm:$0xff]   ;;  %v8690_v29 = vld [vmem:[%s9949_s15 + $0x4c0] sm:$0xff]  }
 0x1e3   : > { %7151 = vmatprep.mubr.bf16.mxu1 %v7736_v55  ;;  %v8701_v52 = vld [vmem:[%s9949_s15 + $0x568] sm:$0xff]  }
 0x1e4   : > { %8220 = vmatpush3.bf16.msra.mxu0 %v8643_v30  ;;  %v8691_v30 = vld [vmem:[%s9949_s15 + $0x400] sm:$0xff]   ;;  %v4401_v55 = vld [vmem:[%s10628_s0 + $0x1c8] sm:$0xff] }
 0x1e5   : > { %8248 = vmatpush3.bf16.msra.mxu1 %v8644_v31  ;;  %8221 = vmatprep.subr.bf16.mxu0 %v8645_v32  ;;  %v8692_v31 = vld [vmem:[%s9949_s15 + $0x480] sm:$0xff]  }
 0x1e6   : > { %8249 = vmatprep.subr.bf16.mxu1 %v8646_v33  ;;  %v4352_v32 = vld [vmem:[%s10628_s0 + $0x40] sm:$0xff] }
 0x1e7   : > { %v4368_v33 = vld [vmem:[%s10628_s0 + $0xc0] sm:$0xff] }
 0x1e8   : > { %8222 = vmatpush3.bf16.msra.mxu0 %v8647_v34  ;;  %v4353_v34 = vld [vmem:[%s10628_s0 + $0x48] sm:$0xff] }
 0x1e9   : > { %8250 = vmatpush3.bf16.msra.mxu1 %v8648_v35  ;;  %8223 = vmatprep.subr.bf16.mxu0 %v8649_v36  ;;  %v4369_v35 = vld [vmem:[%s10628_s0 + $0xc8] sm:$0xff]  ;;  %v7737_v36 = vcombine.low %v4352_v32, %v4368_v33 }
 0x1ea   : > { %8251 = vmatprep.subr.bf16.mxu1 %v8650_v37  ;;  %v7738_v37 = vcombine.high %v4352_v32, %v4368_v33  ;;  %v4386_v32 = vld [vmem:[%s10628_s0 + $0x150] sm:$0xff] }
 0x1eb   : > { %v4402_v33 = vld [vmem:[%s10628_s0 + $0x1d0] sm:$0xff] }
 0x1ec   : > { %8224 = vmatpush3.bf16.msra.mxu0 %v8651_v38  ;;  %v7739_v38 = vcombine.low %v4353_v34, %v4369_v35 }
 0x1ed   : > { %8252 = vmatpush3.bf16.msra.mxu1 %v8652_v39  ;;  %8225 = vmatprep.subr.bf16.mxu0 %v8653_v40  ;;  %v7740_v39 = vcombine.high %v4353_v34, %v4369_v35  ;;  %v8693_v40 = vld [vmem:[%s9949_s15 + $0x578] sm:$0xff]   ;;  %v7774_v34 = vcombine.high %v4386_v32, %v4402_v33  ;;  %v7773_v35 = vcombine.low %v4386_v32, %v4402_v33 }
 0x1ee   : > { %8253 = vmatprep.subr.bf16.mxu1 %v8654_v41  ;;  %v8694_v41 = vld [vmem:[%s9949_s15 + $0x5f8] sm:$0xff]  }
 0x1ef   : > { %v8759_v32 = vld [vmem:[%s9949_s15 + $0x738] sm:$0xff]  }
 0x1f0   : > { %8226 = vmatpush3.bf16.msra.mxu0 %v8655_v42  ;;  %v8695_v42 = vld [vmem:[%s9949_s15 + $0x538] sm:$0xff]  }
 0x1f1   : > { %8254 = vmatpush3.bf16.msra.mxu1 %v8656_v43  ;;  %8227 = vmatprep.subr.bf16.mxu0 %v8657_v44  ;;  %v8696_v43 = vld [vmem:[%s9949_s15 + $0x5b8] sm:$0xff]   ;;  %v8697_v44 = vld [vmem:[%s9949_s15 + $0x570] sm:$0xff]  }
 0x1f2   : > { %8255 = vmatprep.subr.bf16.mxu1 %v8658_v45  ;;  %v8698_v45 = vld [vmem:[%s9949_s15 + $0x5f0] sm:$0xff]  }
 0x1f4   : > { %8228 = vmatpush3.bf16.msra.mxu0 %v8659_v46  ;;  %v8699_v46 = vld [vmem:[%s9949_s15 + $0x530] sm:$0xff]  }
 0x1f5   : > { %8256 = vmatpush3.bf16.msra.mxu1 %v8660_v47  ;;  %8269 = vmatprep.subr.bf16.mxu0 %v8661_v56  ;;  %v8700_v47 = vld [vmem:[%s9949_s15 + $0x5b0] sm:$0xff]  }
 0x1f6   : > { %8297 = vmatprep.subr.bf16.mxu1 %v8662_v57  ;;  %v8703_v57 = vld [vmem:[%s9949_s15 + $0x528] sm:$0xff]  }
 0x1f7   : > { %7103 = vmatmul.mubr.bf16.vlgmr.msra.gmra.mxu0 %v7733_v51  ;;  %v7769_v51 = vcombine.low %v4384_v48, %v4400_v49  ;;  %v8741_v48 = vld [vmem:[%s9949_s15 + $0x658] sm:$0xff]  }
 0x1f8   : > { %7152 = vmatmul.mubr.bf16.vlgmr.msra.gmra.mxu1 %v7735_v54  ;;  %8270 = vmatpush3.bf16.msra.mxu0 %v8663_v58  ;;  %v4385_v54 = vld [vmem:[%s10628_s0 + $0x148] sm:$0xff]  ;;  %v8742_v49 = vld [vmem:[%s9949_s15 + $0x6d8] sm:$0xff]  }
 0x1f9   : > { %8298 = vmatpush3.bf16.msra.mxu1 %v8664_v59  ;;  %8271 = vmatprep.subr.bf16.mxu0 %v8665_v60  ;;  %v7772_v56 = vcombine.high %v4385_v54, %v4401_v55  ;;  %v7771_v58 = vcombine.low %v4385_v54, %v4401_v55  ;;  %v8704_v59 = vld [vmem:[%s9949_s15 + $0x5a8] sm:$0xff]   ;;  %v8705_v60 = vld [vmem:[%s9949_s15 + $0x560] sm:$0xff]   ;;  %v8747_v54 = vld [vmem:[%s9949_s15 + $0x610] sm:$0xff]  }
 0x1fa   : > { %8299 = vmatprep.subr.bf16.mxu1 %v8666_v61  ;;  %7110 = vmatprep.mubr.bf16.mxu0 %v7766_v2  ;;  %v8706_v61 = vld [vmem:[%s9949_s15 + $0x5e0] sm:$0xff]   ;;  %v8711_v2 = vld [vmem:[%s9949_s15 + $0x518] sm:$0xff]  }
 0x1fb   : > { %7159 = vmatprep.mubr.bf16.mxu1 %v7768_v8  ;;  %v8717_v8 = vld [vmem:[%s9949_s15 + $0x548] sm:$0xff]  }
 0x1fc   : > { %8272 = vmatpush3.bf16.msra.mxu0 %v8667_v62  ;;  %v8707_v62 = vld [vmem:[%s9949_s15 + $0x520] sm:$0xff]  }
 0x1fd   : > { %8300 = vmatpush3.bf16.msra.mxu1 %v8668_v63  ;;  %8273 = vmatprep.subr.bf16.mxu0 %v8669_v4  ;;  %v8708_v63 = vld [vmem:[%s9949_s15 + $0x5a0] sm:$0xff]   ;;  %v8713_v4 = vld [vmem:[%s9949_s15 + $0x550] sm:$0xff]  }
 0x1fe   : > { %8301 = vmatprep.subr.bf16.mxu1 %v8670_v5  ;;  %v8714_v5 = vld [vmem:[%s9949_s15 + $0x5d0] sm:$0xff]  }
 0x1ff   : > { %7111 = vmatmul.mubr.bf16.gmra.mxu0 %v7765_v3  ;;  %v8712_v3 = vld [vmem:[%s9949_s15 + $0x598] sm:$0xff]  }
 0x200   : > { %8274 = vmatpush3.bf16.msra.mxu0 %v8671_v9  ;;  %7160 = vmatmul.mubr.bf16.gmra.mxu1 %v7767_v10  ;;  %v8718_v9 = vld [vmem:[%s9949_s15 + $0x5c8] sm:$0xff]  }
 0x201   : > { %8302 = vmatpush3.bf16.msra.mxu1 %v8672_v11  ;;  %8275 = vmatprep.subr.bf16.mxu0 %v8673_v12  ;;  %v8719_v10 = vld [vmem:[%s9949_s15 + $0x508] sm:$0xff]   ;;  %v8721_v12 = vld [vmem:[%s9949_s15 + $0x540] sm:$0xff]  }
 0x202   : > { %8303 = vmatprep.subr.bf16.mxu1 %v8674_v13  ;;  %7200 = vmatprep.mubr.bf16.mxu0 %v7738_v37  ;;  %v8720_v11 = vld [vmem:[%s9949_s15 + $0x588] sm:$0xff]   ;;  %v8722_v13 = vld [vmem:[%s9949_s15 + $0x5c0] sm:$0xff]  }
 0x203   : > { %7249 = vmatprep.mubr.bf16.mxu1 %v7740_v39  ;;  %v8734_v37 = vld [vmem:[%s9949_s15 + $0x6e8] sm:$0xff]   ;;  %v4403_v39 = vld [vmem:[%s10628_s0 + $0x1d8] sm:$0xff] }
 0x204   : > { %8276 = vmatpush3.bf16.msra.mxu0 %v8675_v14  ;;  %v8723_v14 = vld [vmem:[%s9949_s15 + $0x500] sm:$0xff]  }
 0x205   : > { %8304 = vmatpush3.bf16.msra.mxu1 %v8676_v15  ;;  %8277 = vmatprep.subr.bf16.mxu0 %v8677_v16  ;;  %v8724_v15 = vld [vmem:[%s9949_s15 + $0x580] sm:$0xff]   ;;  %v4354_v16 = vld [vmem:[%s10628_s0 + $0x50] sm:$0xff] }
 0x206   : > { %8305 = vmatprep.subr.bf16.mxu1 %v8678_v17  ;;  %v4370_v17 = vld [vmem:[%s10628_s0 + $0xd0] sm:$0xff] }
 0x208   : > { %8278 = vmatpush3.bf16.msra.mxu0 %v8679_v18  ;;  %v7741_v18 = vcombine.low %v4354_v16, %v4370_v17 }
 0x209   : > { %8306 = vmatpush3.bf16.msra.mxu1 %v8680_v19  ;;  %8279 = vmatprep.subr.bf16.mxu0 %v8681_v20  ;;  %v7742_v19 = vcombine.high %v4354_v16, %v4370_v17  ;;  %v4355_v20 = vld [vmem:[%s10628_s0 + $0x58] sm:$0xff]  ;;  %v4372_v16 = vld [vmem:[%s10628_s0 + $0xe0] sm:$0xff]  ;;  %v4357_v17 = vld [vmem:[%s10628_s0 + $0x68] sm:$0xff] }
 0x20a   : > { %8307 = vmatprep.subr.bf16.mxu1 %v8682_v21  ;;  %v4371_v21 = vld [vmem:[%s10628_s0 + $0xd8] sm:$0xff] }
 0x20c   : > { %8280 = vmatpush3.bf16.msra.mxu0 %v8683_v22  ;;  %v7743_v22 = vcombine.low %v4355_v20, %v4371_v21 }
 0x20d   : > { %8308 = vmatpush3.bf16.msra.mxu1 %v8684_v23  ;;  %8281 = vmatprep.subr.bf16.mxu0 %v8685_v24  ;;  %v7744_v23 = vcombine.high %v4355_v20, %v4371_v21  ;;  %v8725_v24 = vld [vmem:[%s9949_s15 + $0x678] sm:$0xff]  }
 0x20e   : > { %8309 = vmatprep.subr.bf16.mxu1 %v8686_v25  ;;  %v8726_v25 = vld [vmem:[%s9949_s15 + $0x6f8] sm:$0xff]  }
 0x210   : > { %8282 = vmatpush3.bf16.msra.mxu0 %v8687_v26  ;;  %v8727_v26 = vld [vmem:[%s9949_s15 + $0x638] sm:$0xff]  }
 0x211   : > { %8310 = vmatpush3.bf16.msra.mxu1 %v8688_v27  ;;  %8283 = vmatprep.subr.bf16.mxu0 %v8689_v28  ;;  %v8728_v27 = vld [vmem:[%s9949_s15 + $0x6b8] sm:$0xff]   ;;  %v8729_v28 = vld [vmem:[%s9949_s15 + $0x670] sm:$0xff]  }
 0x212   : > { %8311 = vmatprep.subr.bf16.mxu1 %v8690_v29  ;;  %v8730_v29 = vld [vmem:[%s9949_s15 + $0x6f0] sm:$0xff]  }
 0x214   : > { %8284 = vmatpush3.bf16.msra.mxu0 %v8691_v30  ;;  %v8731_v30 = vld [vmem:[%s9949_s15 + $0x630] sm:$0xff]  }
 0x215   : > { %8312 = vmatpush3.bf16.msra.mxu1 %v8692_v31  ;;  %8325 = vmatprep.subr.bf16.mxu0 %v8693_v40  ;;  %v8732_v31 = vld [vmem:[%s9949_s15 + $0x6b0] sm:$0xff]  }
 0x216   : > { %8353 = vmatprep.subr.bf16.mxu1 %v8694_v41  ;;  %v8735_v41 = vld [vmem:[%s9949_s15 + $0x628] sm:$0xff]  }
 0x217   : > { %7201 = vmatmul.mubr.bf16.vlgmr.msra.gmra.mxu0 %v7737_v36  ;;  %v8733_v36 = vld [vmem:[%s9949_s15 + $0x668] sm:$0xff]  }
 0x218   : > { %7250 = vmatmul.mubr.bf16.vlgmr.msra.gmra.mxu1 %v7739_v38  ;;  %8326 = vmatpush3.bf16.msra.mxu0 %v8695_v42  ;;  %v4387_v38 = vld [vmem:[%s10628_s0 + $0x158] sm:$0xff] }
 0x219   : > { %8354 = vmatpush3.bf16.msra.mxu1 %v8696_v43  ;;  %8327 = vmatprep.subr.bf16.mxu0 %v8697_v44  ;;  %v7776_v40 = vcombine.high %v4387_v38, %v4403_v39  ;;  %v7775_v42 = vcombine.low %v4387_v38, %v4403_v39  ;;  %v8736_v43 = vld [vmem:[%s9949_s15 + $0x6a8] sm:$0xff]   ;;  %v8737_v44 = vld [vmem:[%s9949_s15 + $0x660] sm:$0xff]   ;;  %v8761_v38 = vld [vmem:[%s9949_s15 + $0x770] sm:$0xff]  }
 0x21a   : > { %8355 = vmatprep.subr.bf16.mxu1 %v8698_v45  ;;  %7208 = vmatprep.mubr.bf16.mxu0 %v7770_v50  ;;  %v8738_v45 = vld [vmem:[%s9949_s15 + $0x6e0] sm:$0xff]   ;;  %v8743_v50 = vld [vmem:[%s9949_s15 + $0x618] sm:$0xff]  }
 0x21b   : > { %7257 = vmatprep.mubr.bf16.mxu1 %v7772_v56  ;;  %v8748_v56 = vld [vmem:[%s9949_s15 + $0x690] sm:$0xff]  }
 0x21c   : > { %8328 = vmatpush3.bf16.msra.mxu0 %v8699_v46  ;;  %v8739_v46 = vld [vmem:[%s9949_s15 + $0x620] sm:$0xff]  }
 0x21d   : > { %8356 = vmatpush3.bf16.msra.mxu1 %v8700_v47  ;;  %8329 = vmatprep.subr.bf16.mxu0 %v8701_v52  ;;  %v8740_v47 = vld [vmem:[%s9949_s15 + $0x6a0] sm:$0xff]   ;;  %v8745_v52 = vld [vmem:[%s9949_s15 + $0x650] sm:$0xff]  }
 0x21e   : > { %8357 = vmatprep.subr.bf16.mxu1 %v8702_v53  ;;  %v8746_v53 = vld [vmem:[%s9949_s15 + $0x6d0] sm:$0xff]  }
 0x21f   : > { %7209 = vmatmul.mubr.bf16.gmra.mxu0 %v7769_v51  ;;  %v8744_v51 = vld [vmem:[%s9949_s15 + $0x698] sm:$0xff]  }
 0x220   : > { %8330 = vmatpush3.bf16.msra.mxu0 %v8703_v57  ;;  %7258 = vmatmul.mubr.bf16.gmra.mxu1 %v7771_v58  ;;  %v8749_v58 = vld [vmem:[%s9949_s15 + $0x648] sm:$0xff]  }
 0x221   : > { %8358 = vmatpush3.bf16.msra.mxu1 %v8704_v59  ;;  %8331 = vmatprep.subr.bf16.mxu0 %v8705_v60  ;;  %v8750_v60 = vld [vmem:[%s9949_s15 + $0x6c8] sm:$0xff]  }
 0x222   : > { %8359 = vmatprep.subr.bf16.mxu1 %v8706_v61  ;;  %7298 = vmatprep.mubr.bf16.mxu0 %v7742_v19 }
 0x223   : > { %7347 = vmatprep.mubr.bf16.mxu1 %v7744_v23 }
 0x224   : > { %8332 = vmatpush3.bf16.msra.mxu0 %v8707_v62 }
 0x225   : > { %8360 = vmatpush3.bf16.msra.mxu1 %v8708_v63  ;;  %8333 = vmatprep.subr.bf16.mxu0 %v8709_v0  ;;  %v8751_v63 = vld [vmem:[%s9949_s15 + $0x608] sm:$0xff]  }
 0x226   : > { %8361 = vmatprep.subr.bf16.mxu1 %v8710_v1 }
 0x228   : > { %8334 = vmatpush3.bf16.msra.mxu0 %v8711_v2  ;;  %v8752_v2 = vld [vmem:[%s9949_s15 + $0x688] sm:$0xff]  }
 0x229   : > { %8362 = vmatpush3.bf16.msra.mxu1 %v8712_v3  ;;  %8335 = vmatprep.subr.bf16.mxu0 %v8713_v4  ;;  %v8753_v4 = vld [vmem:[%s9949_s15 + $0x640] sm:$0xff]  }
 0x22a   : > { %8363 = vmatprep.subr.bf16.mxu1 %v8714_v5 }
 0x22c   : > { %8336 = vmatpush3.bf16.msra.mxu0 %v8715_v6 }
 0x22d   : > { %8364 = vmatpush3.bf16.msra.mxu1 %v8716_v7  ;;  %8337 = vmatprep.subr.bf16.mxu0 %v8717_v8  ;;  %v8754_v7 = vld [vmem:[%s9949_s15 + $0x6c0] sm:$0xff]  }
 0x22e   : > { %8365 = vmatprep.subr.bf16.mxu1 %v8718_v9 }
 0x230   : > { %8338 = vmatpush3.bf16.msra.mxu0 %v8719_v10  ;;  %v8755_v10 = vld [vmem:[%s9949_s15 + $0x600] sm:$0xff]  }
 0x231   : > { %8366 = vmatpush3.bf16.msra.mxu1 %v8720_v11  ;;  %8339 = vmatprep.subr.bf16.mxu0 %v8721_v12 }
 0x232   : > { %8367 = vmatprep.subr.bf16.mxu1 %v8722_v13  ;;  %v8756_v13 = vld [vmem:[%s9949_s15 + $0x680] sm:$0xff]  }
 0x234   : > { %8340 = vmatpush3.bf16.msra.mxu0 %v8723_v14 }
 0x235   : > { %8368 = vmatpush3.bf16.msra.mxu1 %v8724_v15  ;;  %8381 = vmatprep.subr.bf16.mxu0 %v8725_v24  ;;  %v4356_v15 = vld [vmem:[%s10628_s0 + $0x60] sm:$0xff] }
 0x236   : > { %8409 = vmatprep.subr.bf16.mxu1 %v8726_v25  ;;  %v7745_v20 = vcombine.low %v4356_v15, %v4372_v16  ;;  %v7746_v21 = vcombine.high %v4356_v15, %v4372_v16  ;;  %v8783_v16 = vld [vmem:[%s9949_s15 + $0x708] sm:$0xff]  }
 0x237   : > { %7299 = vmatmul.mubr.bf16.vlgmr.msra.gmra.mxu0 %v7741_v18 }
 0x238   : > { %7348 = vmatmul.mubr.bf16.vlgmr.msra.gmra.mxu1 %v7743_v22  ;;  %8382 = vmatpush3.bf16.msra.mxu0 %v8727_v26  ;;  %v4373_v22 = vld [vmem:[%s10628_s0 + $0xe8] sm:$0xff] }
 0x239   : > { %8410 = vmatpush3.bf16.msra.mxu1 %v8728_v27  ;;  %8383 = vmatprep.subr.bf16.mxu0 %v8729_v28  ;;  %v7747_v25 = vcombine.low %v4357_v17, %v4373_v22  ;;  %v7748_v26 = vcombine.high %v4357_v17, %v4373_v22  ;;  %v8757_v27 = vld [vmem:[%s9949_s15 + $0x778] sm:$0xff]  }
 0x23a   : > { %8411 = vmatprep.subr.bf16.mxu1 %v8730_v29  ;;  %7306 = vmatprep.mubr.bf16.mxu0 %v7774_v34 }
 0x23b   : > { %7355 = vmatprep.mubr.bf16.mxu1 %v7776_v40  ;;  %v8762_v40 = vld [vmem:[%s9949_s15 + $0x7f0] sm:$0xff]  }
 0x23c   : > { %8384 = vmatpush3.bf16.msra.mxu0 %v8731_v30  ;;  %v8758_v30 = vld [vmem:[%s9949_s15 + $0x7f8] sm:$0xff]  }
 0x23d   : > { %8412 = vmatpush3.bf16.msra.mxu1 %v8732_v31  ;;  %8385 = vmatprep.subr.bf16.mxu0 %v8733_v36 }
 0x23e   : > { %8413 = vmatprep.subr.bf16.mxu1 %v8734_v37 }
 0x23f   : > { %7307 = vmatmul.mubr.bf16.gmra.mxu0 %v7773_v35  ;;  %v8760_v35 = vld [vmem:[%s9949_s15 + $0x7b8] sm:$0xff]  }
 0x240   : > { %8386 = vmatpush3.bf16.msra.mxu0 %v8735_v41  ;;  %7356 = vmatmul.mubr.bf16.gmra.mxu1 %v7775_v42  ;;  %v8763_v41 = vld [vmem:[%s9949_s15 + $0x730] sm:$0xff]  }
 0x241   : > { %8414 = vmatpush3.bf16.msra.mxu1 %v8736_v43  ;;  %8387 = vmatprep.subr.bf16.mxu0 %v8737_v44  ;;  %v8764_v43 = vld [vmem:[%s9949_s15 + $0x7b0] sm:$0xff]   ;;  %v4388_v44 = vld [vmem:[%s10628_s0 + $0x160] sm:$0xff] }
 0x242   : > { %8415 = vmatprep.subr.bf16.mxu1 %v8738_v45  ;;  %7396 = vmatprep.mubr.bf16.mxu0 %v7746_v21  ;;  %v4404_v45 = vld [vmem:[%s10628_s0 + $0x1e0] sm:$0xff] }
 0x243   : > { %7445 = vmatprep.mubr.bf16.mxu1 %v7748_v26 }
 0x244   : > { %8388 = vmatpush3.bf16.msra.mxu0 %v8739_v46  ;;  %v7778_v46 = vcombine.high %v4388_v44, %v4404_v45 }
 0x245   : > { %8416 = vmatpush3.bf16.msra.mxu1 %v8740_v47  ;;  %8389 = vmatprep.subr.bf16.mxu0 %v8741_v48  ;;  %v7777_v47 = vcombine.low %v4388_v44, %v4404_v45  ;;  %v8765_v48 = vld [vmem:[%s9949_s15 + $0x768] sm:$0xff]  }
 0x246   : > { %8417 = vmatprep.subr.bf16.mxu1 %v8742_v49  ;;  %v8766_v49 = vld [vmem:[%s9949_s15 + $0x7e8] sm:$0xff]  }
 0x248   : > { %8390 = vmatpush3.bf16.msra.mxu0 %v8743_v50  ;;  %v4389_v50 = vld [vmem:[%s10628_s0 + $0x168] sm:$0xff] }
 0x249   : > { %8418 = vmatpush3.bf16.msra.mxu1 %v8744_v51  ;;  %8391 = vmatprep.subr.bf16.mxu0 %v8745_v52  ;;  %v4405_v51 = vld [vmem:[%s10628_s0 + $0x1e8] sm:$0xff] }
 0x24a   : > { %8419 = vmatprep.subr.bf16.mxu1 %v8746_v53  ;;  %v7780_v52 = vcombine.high %v4389_v50, %v4405_v51  ;;  %v8767_v53 = vld [vmem:[%s9949_s15 + $0x728] sm:$0xff]  }
 0x24c   : > { %8392 = vmatpush3.bf16.msra.mxu0 %v8747_v54  ;;  %v7779_v54 = vcombine.low %v4389_v50, %v4405_v51 }
 0x24d   : > { %8420 = vmatpush3.bf16.msra.mxu1 %v8748_v56  ;;  %8393 = vmatprep.subr.bf16.mxu0 %v8749_v58  ;;  %v8769_v56 = vld [vmem:[%s9949_s15 + $0x760] sm:$0xff]  }
 0x24e   : > { %8421 = vmatprep.subr.bf16.mxu1 %v8750_v60  ;;  %v8771_v58 = vld [vmem:[%s9949_s15 + $0x720] sm:$0xff]   ;;  %v8773_v60 = vld [vmem:[%s9949_s15 + $0x758] sm:$0xff]  }
 0x250   : > { %8394 = vmatpush3.bf16.msra.mxu0 %v8751_v63  ;;  %v8776_v63 = vld [vmem:[%s9949_s15 + $0x798] sm:$0xff]  }
 0x251   : > { %8422 = vmatpush3.bf16.msra.mxu1 %v8752_v2  ;;  %8395 = vmatprep.subr.bf16.mxu0 %v8753_v4  ;;  %v8779_v4 = vld [vmem:[%s9949_s15 + $0x710] sm:$0xff]  }
 0x252   : > { %8423 = vmatprep.subr.bf16.mxu1 %v8754_v7 }
 0x254   : > { %8396 = vmatpush3.bf16.msra.mxu0 %v8755_v10 }
 0x255   : > { %8424 = vmatpush3.bf16.msra.mxu1 %v8756_v13  ;;  %8437 = vmatprep.subr.bf16.mxu0 %v8757_v27 }
 0x256   : > { %8465 = vmatprep.subr.bf16.mxu1 %v8758_v30 }
 0x257   : > { %v8061_v55 = vpop.f32.mrf.mxu0  ;;  %7397 = vmatmul.mubr.bf16.vlgmr.msra.gmra.mxu0 %v7745_v20  ;;  %v8784_v20 = vld [vmem:[%s9949_s15 + $0x788] sm:$0xff]  }
 0x258   : > { %v8089_v57 = vpop.f32.mrf.mxu1  ;;  %7446 = vmatmul.mubr.bf16.vlgmr.msra.gmra.mxu1 %v7747_v25  ;;  %8438 = vmatpush3.bf16.msra.mxu0 %v8759_v32  ;;  %v8786_v25 = vld [vmem:[%s9949_s15 + $0x7c0] sm:$0xff]   ;;  %v4374_v32 = vld [vmem:[%s10628_s0 + $0xf0] sm:$0xff] }
 0x259   : > { %v8062_v59 = vpop.f32.mrf.mxu0  ;;  %8466 = vmatpush3.bf16.msra.mxu1 %v8760_v35  ;;  %8439 = vmatprep.subr.bf16.mxu0 %v8761_v38 }
 0x25a   : > { %v8063_v61 = vadd.f32 %v8062_v59, %v8061_v55  ;;  %v8090_v62 = vpop.f32.mrf.mxu1  ;;  %8467 = vmatprep.subr.bf16.mxu1 %v8762_v40  ;;  %7404 = vmatprep.mubr.bf16.mxu0 %v7778_v46  ;;  %v8768_v55 = vld [vmem:[%s9949_s15 + $0x7a8] sm:$0xff]   ;;  %v8772_v59 = vld [vmem:[%s9949_s15 + $0x7a0] sm:$0xff]   ;;  %v4390_v40 = vld [vmem:[%s10628_s0 + $0x170] sm:$0xff] }
 0x25b   : > { %v8091_v0 = vadd.f32 %v8090_v62, %v8089_v57  ;;  %v8064_v1 = vpop.f32.mrf.mxu0  ;;  %7453 = vmatprep.mubr.bf16.mxu1 %v7780_v52  ;;  %v8770_v57 = vld [vmem:[%s9949_s15 + $0x7e0] sm:$0xff]   ;;  %v8775_v62 = vld [vmem:[%s9949_s15 + $0x718] sm:$0xff]  }
 0x25c   : > { %v8092_v3 = vpop.f32.mrf.mxu1  ;;  %8440 = vmatpush3.bf16.msra.mxu0 %v8763_v41  ;;  %v4406_v41 = vld [vmem:[%s10628_s0 + $0x1f0] sm:$0xff] }
 0x25d   : > { %v10308_v5 = vadd.f32 %v8091_v0, %v8063_v61  ;;  %v8065_v6 = vpop.f32.mrf.mxu0  ;;  %8468 = vmatpush3.bf16.msra.mxu1 %v8764_v43  ;;  %8441 = vmatprep.subr.bf16.mxu0 %v8765_v48  ;;  %v8774_v61 = vld [vmem:[%s9949_s15 + $0x7d8] sm:$0xff]   ;;  %v8777_v0 = vld [vmem:[%s9949_s15 + $0x750] sm:$0xff]   ;;  %v7782_v46 = vcombine.high %v4390_v40, %v4406_v41 }
 0x25e   : > { %v8066_v8 = vadd.f32 %v8065_v6, %v8064_v1  ;;  %v8093_v9 = vpop.f32.mrf.mxu1  ;;  %8469 = vmatprep.subr.bf16.mxu1 %v8766_v49  ;;  %v4391_v43 = vld [vmem:[%s10628_s0 + $0x178] sm:$0xff] }
 0x25f   : > { %v8094_v11 = vadd.f32 %v8093_v9, %v8092_v3  ;;  %v8067_v12 = vpop.f32.mrf.mxu0  ;;  %7405 = vmatmul.mubr.bf16.gmra.mxu0 %v7777_v47  ;;  %v8778_v3 = vld [vmem:[%s9949_s15 + $0x7d0] sm:$0xff]   ;;  %v4407_v47 = vld [vmem:[%s10628_s0 + $0x1f8] sm:$0xff] }
 0x260   : > { %v8095_v14 = vpop.f32.mrf.mxu1  ;;  %8442 = vmatpush3.bf16.msra.mxu0 %v8767_v53  ;;  %7454 = vmatmul.mubr.bf16.gmra.mxu1 %v7779_v54  ;;  %v7784_v49 = vcombine.high %v4391_v43, %v4407_v47 }
 0x261   : > { %v10322_v18 = vadd.f32 %v8094_v11, %v8066_v8  ;;  %v8068_v19 = vpop.f32.mrf.mxu0  ;;  %8470 = vmatpush3.bf16.msra.mxu1 %v8768_v55  ;;  %8443 = vmatprep.subr.bf16.mxu0 %v8769_v56  ;;  %v8780_v8 = vld [vmem:[%s9949_s15 + $0x790] sm:$0xff]   ;;  %v8781_v11 = vld [vmem:[%s9949_s15 + $0x748] sm:$0xff]  }
 0x262   : > { %v8069_v23 = vadd.f32 %v8068_v19, %v8067_v12  ;;  %v8096_v24 = vpop.f32.mrf.mxu1  ;;  %8471 = vmatprep.subr.bf16.mxu1 %v8770_v57 }
 0x263   : > { %v8097_v28 = vadd.f32 %v8096_v24, %v8095_v14  ;;  %v8070_v29 = vpop.f32.mrf.mxu0  ;;  %v8782_v14 = vld [vmem:[%s9949_s15 + $0x7c8] sm:$0xff]   ;;  %v8785_v24 = vld [vmem:[%s9949_s15 + $0x740] sm:$0xff]  }
 0x264   : > { %v8098_v31 = vpop.f32.mrf.mxu1  ;;  %8444 = vmatpush3.bf16.msra.mxu0 %v8771_v58  ;;  %v7781_v58 = vcombine.low %v4390_v40, %v4406_v41 }
 0x265   : > { %v10330_v33 = vadd.f32 %v8097_v28, %v8069_v23  ;;  %v8071_v34 = vpop.f32.mrf.mxu0  ;;  %8472 = vmatpush3.bf16.msra.mxu1 %v8772_v59  ;;  %8445 = vmatprep.subr.bf16.mxu0 %v8773_v60  ;;  %v8788_v28 = vld [vmem:[%s9949_s15 + $0x780] sm:$0xff]   ;;  %v7783_v59 = vcombine.low %v4391_v43, %v4407_v47 }
 0x266   : > { %v8072_v36 = vadd.f32 %v8071_v34, %v8070_v29  ;;  %v8099_v37 = vpop.f32.mrf.mxu1  ;;  %8473 = vmatprep.subr.bf16.mxu1 %v8774_v61  ;;  %v4358_v29 = vld [vmem:[%s10628_s0 + $0x70] sm:$0xff]  ;;  %v4375_v34 = vld [vmem:[%s10628_s0 + $0xf8] sm:$0xff] }
 0x267   : > { %v8100_v39 = vadd.f32 %v8099_v37, %v8098_v31  ;;  %v7750_v37 = vcombine.high %v4358_v29, %v4374_v32 }
 0x268   : > { %8446 = vmatpush3.bf16.msra.mxu0 %v8775_v62 }
 0x269   : > { %v10336_v42 = vadd.f32 %v8100_v39, %v8072_v36  ;;  %8474 = vmatpush3.bf16.msra.mxu1 %v8776_v63  ;;  %8447 = vmatprep.subr.bf16.mxu0 %v8777_v0  ;;  %v7749_v36 = vcombine.low %v4358_v29, %v4374_v32 }
 0x26a   : > { %8475 = vmatprep.subr.bf16.mxu1 %v8778_v3  ;;  %7494 = vmatprep.mubr.bf16.mxu0 %v7750_v37 }
 0x26c   : > { %8448 = vmatpush3.bf16.msra.mxu0 %v8779_v4 }
 0x26d   : > { %8476 = vmatpush3.bf16.msra.mxu1 %v8780_v8  ;;  %8449 = vmatprep.subr.bf16.mxu0 %v8781_v11 }
 0x26e   : > { %8477 = vmatprep.subr.bf16.mxu1 %v8782_v14 }
 0x270   : > { %8450 = vmatpush3.bf16.msra.mxu0 %v8783_v16 }
 0x271   : > { %8478 = vmatpush3.bf16.msra.mxu1 %v8784_v20  ;;  %8451 = vmatprep.subr.bf16.mxu0 %v8785_v24 }
 0x272   : > { %8479 = vmatprep.subr.bf16.mxu1 %v8786_v25 }
 0x275   : > { %8480 = vmatpush3.bf16.msra.mxu1 %v8788_v28 }
 0x277   : > { %v8117_v1 = vpop.f32.mrf.mxu0 }
 0x278   : > { %v8145_v2 = vpop.f32.mrf.mxu1 }
 0x279   : > { %v8118_v6 = vpop.f32.mrf.mxu0 }
 0x27a   : > { %v8146_v7 = vpop.f32.mrf.mxu1  ;;  %v8119_v9 = vadd.f32 %v8118_v6, %v8117_v1 }
 0x27b   : > { %v8147_v10 = vadd.f32 %v8146_v7, %v8145_v2  ;;  %v8120_v12 = vpop.f32.mrf.mxu0 }
 0x27c   : > { %v8148_v13 = vpop.f32.mrf.mxu1  ;;  %v6909_v15 = vadd.f32 %v8119_v9, %v10308_v5  ;;  %v8787_v5 = vld [vmem:[%s9949_s15 + $0x700] sm:$0xff]  }
 0x27d   : > { %v8121_v17 = vpop.f32.mrf.mxu0  ;;  %8452 = vmatpush3.bf16.msra.mxu0 %v8787_v5 }
 0x27e   : > { %v8149_v19 = vpop.f32.mrf.mxu1  ;;  %v10372_v21 = vadd.f32 %v8147_v10, %v6909_v15  ;;  %v8122_v22 = vadd.f32 %v8121_v17, %v8120_v12 }
 0x27f   : > { %v8150_v23 = vadd.f32 %v8149_v19, %v8148_v13  ;;  %v8123_v27 = vpop.f32.mrf.mxu0 }
 0x280   : > { %v6912_v26 = vadd.f32 %v8122_v22, %v10322_v18  ;;  %v4359_v18 = vld [vmem:[%s10628_s0 + $0x78] sm:$0xff]  ;;  %v8151_v44 = vpop.f32.mrf.mxu1  ;;  %7495 = vmatmul.mubr.bf16.vlgmr.msra.gmra.mxu0 %v7749_v36 }
 0x281   : > { %v8124_v31 = vpop.f32.mrf.mxu0  ;;  %v7751_v38 = vcombine.low %v4359_v18, %v4375_v34  ;;  %v7752_v39 = vcombine.high %v4359_v18, %v4375_v34  ;;  %7502 = vmatprep.mubr.bf16.mxu0 %v7782_v46 }
 0x282   : > { %v10382_v30 = vadd.f32 %v8150_v23, %v6912_v26  ;;  %v8125_v35 = vadd.f32 %v8124_v31, %v8123_v27  ;;  %v8152_v50 = vpop.f32.mrf.mxu1 }
 0x283   : > { %v8126_v45 = vpop.f32.mrf.mxu0  ;;  %7543 = vmatprep.mubr.bf16.mxu1 %v7752_v39  ;;  %v8153_v52 = vadd.f32 %v8152_v50, %v8151_v44 }
 0x284   : > { %v6917_v48 = vadd.f32 %v8125_v35, %v10330_v33  ;;  %7544 = vmatmul.mubr.bf16.vlgmr.msra.gmra.mxu1 %v7751_v38  ;;  %v8154_v54 = vpop.f32.mrf.mxu1 }
 0x285   : > { %v8127_v51 = vpop.f32.mrf.mxu0  ;;  %7551 = vmatprep.mubr.bf16.mxu1 %v7784_v49 }
 0x286   : > { %v8128_v53 = vadd.f32 %v8127_v51, %v8126_v45  ;;  %v10406_v55 = vadd.f32 %v8153_v52, %v6917_v48  ;;  %v8155_v57 = vpop.f32.mrf.mxu1 }
 0x287   : > { %v8156_v33 = vadd.f32 %v8155_v57, %v8154_v54 }
 0x288   : > { %v6920_v56 = vadd.f32 %v8128_v53, %v10336_v42  ;;  %7503 = vmatmul.mubr.bf16.gmra.mxu0 %v7781_v58 }
 0x28a   : > { %v10409_v60 = vadd.f32 %v8156_v33, %v6920_v56 }
 0x28c   : > { %7552 = vmatmul.mubr.bf16.gmra.mxu1 %v7783_v59 }
 0x297   : > { %v10411_v61 = vpop.f32.mrf.mxu0 }
 0x298   : > { %v10417_v0 = vpop.f32.mrf.mxu1 }
 0x299   : > { %v10413_v62 = vpop.f32.mrf.mxu0 }
 0x29a   : > { %v10421_v2 = vpop.f32.mrf.mxu1 }
 0x29b   : > { %v10415_v63 = vpop.f32.mrf.mxu0 }
 0x29c   : > { %v10425_v3 = vpop.f32.mrf.mxu1 }
 0x29d   : > { %v10419_v1 = vpop.f32.mrf.mxu0 }
 0x29e   : > { %v10429_v6 = vpop.f32.mrf.mxu1 }
 0x29f   : > { %v10423_v42 = vpop.f32.mrf.mxu0 }
 0x2a0   : > { %v10431_v7 = vpop.f32.mrf.mxu1 }
 0x2a1   : > { %v10427_v4 = vpop.f32.mrf.mxu0 }
 0x2a2   : > { %v10435_v9 = vpop.f32.mrf.mxu1 }
 0x2a3   : > { %v10433_v8 = vpop.f32.mrf.mxu0 }
 0x2a4   : > { %v10439_v12 = vpop.f32.mrf.mxu1 }
 0x2a5   : > { %v10437_v10 = vpop.f32.mrf.mxu0 }
 0x2a6   : > { %v10441_v14 = vpop.f32.mrf.mxu1 }
 0x2b7   : > { %v8229_v11 = vpop.f32.mrf.mxu0 }
 0x2b8   : > { %v8257_v15 = vpop.f32.mrf.mxu1 }
 0x2b9   : > { %v8230_v13 = vpop.f32.mrf.mxu0 }
 0x2ba   : > { %v8258_v17 = vpop.f32.mrf.mxu1 }
 0x2bb   : > { %v8232_v16 = vpop.f32.mrf.mxu0 }
 0x2bc   : > { %v10443_v20 = vpop.f32.mrf.mxu1 }
 0x2bd   : > { %v8233_v19 = vpop.f32.mrf.mxu0 }
 0x2be   : > { %v10447_v23 = vpop.f32.mrf.mxu1 }
 0x2bf   : > { %v10445_v22 = vpop.f32.mrf.mxu0 }
 0x2c0   : > { %v10451_v25 = vpop.f32.mrf.mxu1 }
 0x2c1   : > { %v10449_v24 = vpop.f32.mrf.mxu0 }
 0x2c2   : > { %v10455_v27 = vpop.f32.mrf.mxu1 }
 0x2c3   : > { %v10453_v26 = vpop.f32.mrf.mxu0 }
 0x2c4   : > { %v10459_v28 = vpop.f32.mrf.mxu1 }
 0x2c5   : > { %v10457_v5 = vpop.f32.mrf.mxu0 }
 0x2c6   : > { %v10461_v31 = vpop.f32.mrf.mxu1 }
 0x2d7   : > { %v8285_v29 = vpop.f32.mrf.mxu0 }
 0x2d8   : > { %v10463_v18 = vpop.f32.mrf.mxu1 }
 0x2d9   : > { %v8286_v32 = vpop.f32.mrf.mxu0 }
 0x2da   : > { %v10467_v35 = vpop.f32.mrf.mxu1 }
 0x2db   : > { %v10465_v34 = vpop.f32.mrf.mxu0 }
 0x2dc   : > { %v10471_v37 = vpop.f32.mrf.mxu1 }
 0x2dd   : > { %v10469_v36 = vpop.f32.mrf.mxu0 }
 0x2de   : > { %v10475_v39 = vpop.f32.mrf.mxu1 }
 0x2df   : > { %v10473_v38 = vpop.f32.mrf.mxu0 }
 0x2e0   : > { %v10479_v41 = vpop.f32.mrf.mxu1 }
 0x2e1   : > { %v10477_v40 = vpop.f32.mrf.mxu0 }
 0x2e2   : > { %v10483_v44 = vpop.f32.mrf.mxu1 }
 0x2e3   : > { %v10481_v43 = vpop.f32.mrf.mxu0  ;;  %10633 = vst [vmem:[#allocation5_spill] sm:$0xff] %v10483_v44 }
 0x2e4   : > { %10632 = vst [vmem:[#allocation4_spill] sm:$0xff] %v10481_v43  ;;  %v10487_v46 = vpop.f32.mrf.mxu1 }
 0x2e5   : > { %v10485_v45 = vpop.f32.mrf.mxu0  ;;  %10635 = vst [vmem:[#allocation7_spill] sm:$0xff] %v10487_v46 }
 0x2e6   : > { %10634 = vst [vmem:[#allocation6_spill] sm:$0xff] %v10485_v45  ;;  %v10489_v48 = vpop.f32.mrf.mxu1 }
 0x2e7   : > { %10636 = vst [vmem:[#allocation8_spill] sm:$0xff] %v10489_v48 }
 0x2f7   : > { %v8341_v47 = vpop.f32.mrf.mxu0 }
 0x2f8   : > { %v10491_v49 = vpop.f32.mrf.mxu1 }
 0x2f9   : > { %v8342_v50 = vpop.f32.mrf.mxu0 }
 0x2fa   : > { %v10493_v51 = vpop.f32.mrf.mxu1 }
 0x2fb   : > { %v10495_v52 = vpop.f32.mrf.mxu0 }
 0x2fc   : > { %v10497_v53 = vpop.f32.mrf.mxu1 }
 0x2fd   : > { %10637 = vst [vmem:[#allocation9_spill] sm:$0xff] %v10497_v53  ;;  %v10499_v54 = vpop.f32.mrf.mxu0 }
 0x2fe   : > { %v10501_v56 = vpop.f32.mrf.mxu1 }
 0x2ff   : > { %10638 = vst [vmem:[#allocation10_spill] sm:$0xff] %v10501_v56  ;;  %v10503_v57 = vpop.f32.mrf.mxu0  ;;  %v8175_v56 = vadd.f32 %v10413_v62, %v10411_v61 }
 0x300   : > { %10639 = vst [vmem:[#allocation11_spill] sm:$0xff] %v10503_v57  ;;  %v10505_v58 = vpop.f32.mrf.mxu1 }
 0x301   : > { %10640 = vst [vmem:[#allocation12_spill] sm:$0xff] %v10505_v58  ;;  %v10507_v59 = vpop.f32.mrf.mxu0  ;;  %v7007_v58 = vadd.f32 %v8175_v56, %v10372_v21  ;;  %v8206_v21 = vadd.f32 %v10429_v6, %v10425_v3  ;;  %v8234_v56 = vadd.f32 %v8233_v19, %v8232_v16  ;;  %v8290_v19 = vadd.f32 %v10469_v36, %v10465_v34 }
 0x302   : > { %10641 = vst [vmem:[#allocation13_spill] sm:$0xff] %v10507_v59  ;;  %v10509_v33 = vpop.f32.mrf.mxu1  ;;  %v8268_v34 = vadd.f32 %v10461_v31, %v10459_v28 }
 0x303   : > { %10642 = vst [vmem:[#allocation14_spill] sm:$0xff] %v10509_v33  ;;  %v10511_v48 = vpop.f32.mrf.mxu0  ;;  %v8203_v33 = vadd.f32 %v10421_v2, %v10417_v0  ;;  %v8259_v2 = vadd.f32 %v8258_v17, %v8257_v15  ;;  %v8315_v17 = vadd.f32 %v10467_v35, %v10463_v18 }
 0x304   : > { %10643 = vst [vmem:[#allocation15_spill] sm:$0xff] %v10511_v48  ;;  %v10513_v46 = vpop.f32.mrf.mxu1  ;;  %v8178_v48 = vadd.f32 %v10419_v1, %v10415_v63  ;;  %v8209_v1 = vadd.f32 %v10435_v9, %v10431_v7 }
 0x305   : > { %10644 = vst [vmem:[#allocation16_spill] sm:$0xff] %v10513_v46  ;;  %v10515_v45 = vpop.f32.mrf.mxu0  ;;  %v7056_v61 = vadd.f32 %v8203_v33, %v7007_v58 }
 0x306   : > { %10645 = vst [vmem:[#allocation17_spill] sm:$0xff] %v10515_v45  ;;  %v10517_v43 = vpop.f32.mrf.mxu1  ;;  %v8231_v45 = vadd.f32 %v8230_v13, %v8229_v11  ;;  %v7010_v62 = vadd.f32 %v8178_v48, %v10382_v30  ;;  %v8287_v13 = vadd.f32 %v8286_v32, %v8285_v29  ;;  %v8237_v30 = vadd.f32 %v10449_v24, %v10445_v22 }
 0x307   : > { %10646 = vst [vmem:[#allocation18_spill] sm:$0xff] %v10517_v43  ;;  %v8181_v43 = vadd.f32 %v10427_v4, %v10423_v42  ;;  %v8184_v42 = vadd.f32 %v10437_v10, %v10433_v8  ;;  %v8262_v8 = vadd.f32 %v10447_v23, %v10443_v20  ;;  %v8343_v24 = vadd.f32 %v8342_v50, %v8341_v47  ;;  %v10649_v47 = vld [vmem:[#allocation4_spill] sm:$0xff]  ;;  %v10650_v50 = vld [vmem:[#allocation6_spill] sm:$0xff] }
 0x308   : > { %v7105_v0 = vadd.f32 %v8231_v45, %v7056_v61  ;;  %v7059_v11 = vadd.f32 %v8206_v21, %v7010_v62  ;;  %v8293_v20 = vadd.f32 %v10477_v40, %v10473_v38  ;;  %v10648_v38 = vld [vmem:[#allocation5_spill] sm:$0xff]  ;;  %v8296_v58 = vadd.f32 %v10650_v50, %v10649_v47 }
 0x309   : > { %v7015_v63 = vadd.f32 %v8181_v43, %v10406_v55  ;;  %v7018_v16 = vadd.f32 %v8184_v42, %v10409_v60  ;;  %v8212_v55 = vadd.f32 %v10441_v14, %v10439_v12  ;;  %v8265_v60 = vadd.f32 %v10455_v27, %v10451_v25  ;;  %v10656_v42 = vld [vmem:[#allocation10_spill] sm:$0xff] }
 0x30a   : > { %v7154_v3 = vadd.f32 %v8259_v2, %v7105_v0  ;;  %v7108_v6 = vadd.f32 %v8234_v56, %v7059_v11  ;;  %v8240_v12 = vadd.f32 %v10457_v5, %v10453_v26  ;;  %v8318_v25 = vadd.f32 %v10475_v39, %v10471_v37  ;;  %v10651_v37 = vld [vmem:[#allocation11_spill] sm:$0xff]  ;;  %v10652_v39 = vld [vmem:[#allocation13_spill] sm:$0xff] }
 0x30b   : > { %v7064_v15 = vadd.f32 %v8209_v1, %v7015_v63  ;;  %v7067_v29 = vadd.f32 %v8212_v55, %v7018_v16  ;;  %v8371_v26 = vadd.f32 %v10493_v51, %v10491_v49  ;;  %v8346_v5 = vadd.f32 %v10499_v54, %v10495_v52  ;;  %v10653_v52 = vld [vmem:[#allocation7_spill] sm:$0xff]  ;;  %v10654_v54 = vld [vmem:[#allocation8_spill] sm:$0xff]  ;;  %v10655_v1 = vld [vmem:[#allocation9_spill] sm:$0xff] }
 0x30c   : > { %v7203_v10 = vadd.f32 %v8287_v13, %v7154_v3  ;;  %v7157_v14 = vadd.f32 %v8262_v8, %v7108_v6  ;;  %v8321_v40 = vadd.f32 %v10648_v38, %v10479_v41  ;;  %v8349_v21 = vadd.f32 %v10652_v39, %v10651_v37  ;;  %v10658_v6 = vld [vmem:[#allocation12_spill] sm:$0xff]  ;;  %v10660_v55 = vld [vmem:[#allocation15_spill] sm:$0xff] }
 0x30d   : > { %v7113_v22 = vadd.f32 %v8237_v30, %v7064_v15  ;;  %v7116_v45 = vadd.f32 %v8240_v12, %v7067_v29  ;;  %v8324_v56 = vadd.f32 %v10654_v54, %v10653_v52  ;;  %v8374_v11 = vadd.f32 %v10656_v42, %v10655_v1  ;;  %v10659_v15 = vld [vmem:[#allocation14_spill] sm:$0xff]  ;;  %v10661_v8 = vld [vmem:[#allocation17_spill] sm:$0xff] }
 0x30e   : > { %v7252_v43 = vadd.f32 %v8315_v17, %v7203_v10  ;;  %v7206_v18 = vadd.f32 %v8290_v19, %v7157_v14  ;;  %v8377_v16 = vadd.f32 %v10659_v15, %v10658_v6  ;;  %v8352_v10 = vadd.f32 %v10661_v8, %v10660_v55 }
 0x30f   : > { %v7162_v35 = vadd.f32 %v8265_v60, %v7113_v22  ;;  %v7165_v62 = vadd.f32 %v8268_v34, %v7116_v45  ;;  %v10663_v45 = vld [vmem:[#allocation18_spill] sm:$0xff] }
 0x310   : > { %v7301_v27 = vadd.f32 %v8343_v24, %v7252_v43  ;;  %v7255_v28 = vadd.f32 %v8318_v25, %v7206_v18 }
 0x311   : > { %v7211_v36 = vadd.f32 %v8293_v20, %v7162_v35  ;;  %v7214_v2 = vadd.f32 %v8296_v58, %v7165_v62  ;;  %v10662_v35 = vld [vmem:[#allocation16_spill] sm:$0xff] }
 0x312   : > { %v7350_v0 = vadd.f32 %v8371_v26, %v7301_v27  ;;  %v7304_v49 = vadd.f32 %v8346_v5, %v7255_v28  ;;  %v8380_v34 = vadd.f32 %v10663_v45, %v10662_v35 }
 0x313   : > { %v7260_v51 = vadd.f32 %v8321_v40, %v7211_v36  ;;  %v7263_v60 = vadd.f32 %v8324_v56, %v7214_v2 }
 0x314   : > { %v7353_v22 = vadd.f32 %v8374_v11, %v7304_v49 }
 0x315   : > { %v7309_v3 = vadd.f32 %v8349_v21, %v7260_v51 }
 0x317   : > { %v8397_v53 = vpop.f32.mrf.mxu0 }
 0x318   : > { %v10521_v44 = vpop.f32.mrf.mxu1 }
 0x319   : > { %10647 = vst [vmem:[#allocation19_spill] sm:$0xff] %v10521_v44  ;;  %v8398_v57 = vpop.f32.mrf.mxu0 }
 0x31a   : > { %v10528_v46 = vpop.f32.mrf.mxu1  ;;  %v8399_v31 = vadd.f32 %v8398_v57, %v8397_v53 }
 0x31b   : > { %v10532_v59 = vpop.f32.mrf.mxu0 }
 0x31c   : > { %v10535_v44 = vpop.f32.mrf.mxu1  ;;  %v7399_v13 = vadd.f32 %v8399_v31, %v7350_v0 }
 0x31d   : > { %v8401_v4 = vpop.f32.mrf.mxu0 }
 0x31e   : > { %v10546_v48 = vpop.f32.mrf.mxu1  ;;  %v8402_v57 = vadd.f32 %v8401_v4, %v10532_v59  ;;  %v7312_v59 = vadd.f32 %v8352_v10, %v7263_v60 }
 0x31f   : > { %v8403_v7 = vpop.f32.mrf.mxu0  ;;  %v8430_v25 = vadd.f32 %v10546_v48, %v10535_v44 }
 0x320   : > { %v10551_v9 = vpop.f32.mrf.mxu1  ;;  %v10657_v30 = vld [vmem:[#allocation19_spill] sm:$0xff]  ;;  %v7402_v20 = vadd.f32 %v8402_v57, %v7353_v22  ;;  %v7361_v31 = vadd.f32 %v8380_v34, %v7312_v59 }
 0x321   : > { %v8404_v23 = vpop.f32.mrf.mxu0  ;;  %v8427_v53 = vadd.f32 %v10528_v46, %v10657_v30  ;;  %v7358_v46 = vadd.f32 %v8377_v16, %v7309_v3 }
 0x322   : > { %v8432_v32 = vpop.f32.mrf.mxu1  ;;  %v8405_v12 = vadd.f32 %v8404_v23, %v8403_v7  ;;  %v7451_v38 = vadd.f32 %v8430_v25, %v7402_v20 }
 0x323   : > { %v8406_v33 = vpop.f32.mrf.mxu0  ;;  %v7448_v29 = vadd.f32 %v8427_v53, %v7399_v13  ;;  %v8433_v23 = vadd.f32 %v8432_v32, %v10551_v9 }
 0x324   : > { %v8434_v61 = vpop.f32.mrf.mxu1  ;;  %v7407_v7 = vadd.f32 %v8405_v12, %v7358_v46 }
 0x325   : > { %v8407_v63 = vpop.f32.mrf.mxu0 }
 0x326   : > { %v8435_v41 = vpop.f32.mrf.mxu1  ;;  %v8408_v40 = vadd.f32 %v8407_v63, %v8406_v33  ;;  %v7456_v62 = vadd.f32 %v8433_v23, %v7407_v7 }
 0x327   : > { %v8436_v39 = vadd.f32 %v8435_v41, %v8434_v61 }
 0x328   : > { %v7410_v32 = vadd.f32 %v8408_v40, %v7361_v31 }
 0x32a   : > { %v7459_v56 = vadd.f32 %v8436_v39, %v7410_v32 }
 0x340   : > { %v8453_v17 = vpop.f32.mrf.mxu0 }
 0x342   : > { %v8454_v14 = vpop.f32.mrf.mxu0 }
 0x343   : > { %v8455_v43 = vadd.f32 %v8454_v14, %v8453_v17 }
 0x344   : > { %v8481_v19 = vpop.f32.mrf.mxu1  ;;  %v8456_v4 = vpop.f32.mrf.mxu0 }
 0x345   : > { %v7497_v27 = vadd.f32 %v8455_v43, %v7448_v29 }
 0x346   : > { %v8482_v24 = vpop.f32.mrf.mxu1  ;;  %v8457_v5 = vpop.f32.mrf.mxu0 }
 0x347   : > { %v8483_v26 = vadd.f32 %v8482_v24, %v8481_v19  ;;  %v8458_v50 = vadd.f32 %v8457_v5, %v8456_v4 }
 0x348   : > { %v8484_v18 = vpop.f32.mrf.mxu1  ;;  %v8459_v58 = vpop.f32.mrf.mxu0 }
 0x349   : > { %v7546_v47 = vadd.f32 %v8483_v26, %v7497_v27  ;;  %v7500_v44 = vadd.f32 %v8458_v50, %v7451_v38 }
 0x34a   : > { %v8485_v36 = vpop.f32.mrf.mxu1  ;;  %v8460_v37 = vpop.f32.mrf.mxu0 }
 0x34b   : > { %7560 = vst [vmem:[%s10597_s9] sm:$0xff] %v7546_v47  ;;  %v8486_v48 = vadd.f32 %v8485_v36, %v8484_v18  ;;  %v8461_v33 = vadd.f32 %v8460_v37, %v8459_v58 }
 0x34c   : > { %v8487_v28 = vpop.f32.mrf.mxu1  ;;  %v8462_v0 = vpop.f32.mrf.mxu0 }
 0x34d   : > { %v7549_v21 = vadd.f32 %v8486_v48, %v7500_v44  ;;  %v7505_v51 = vadd.f32 %v8461_v33, %v7456_v62 }
 0x34e   : > { %v8488_v9 = vpop.f32.mrf.mxu1  ;;  %v8463_v52 = vpop.f32.mrf.mxu0 }
 0x34f   : > { %7561 = vst [vmem:[%s10597_s9 + $0x8] sm:$0xff] %v7549_v21  ;;  %v8489_v2 = vadd.f32 %v8488_v9, %v8487_v28  ;;  %v8464_v1 = vadd.f32 %v8463_v52, %v8462_v0 }
 0x350   : > { %v8490_v49 = vpop.f32.mrf.mxu1 }
 0x351   : > { %v7554_v63 = vadd.f32 %v8489_v2, %v7505_v51  ;;  %v7508_v42 = vadd.f32 %v8464_v1, %v7459_v56 }
 0x352   : > { %v8491_v54 = vpop.f32.mrf.mxu1  ;;  %v7610_v61 = vld [vmem:[%s10597_s9] sm:$0xff] (%p8879_p6) }
 0x353   : > { %7562 = vst [vmem:[%s10597_s9 + $0x10] sm:$0xff] %v7554_v63  ;;  %v8492_v11 = vadd.f32 %v8491_v54, %v8490_v49  ;;  %7570 = sbr.rel (!%p8879_p6) target bundleno = 864 (0x360), region = 84  ;;  %7611 = vst [vmem:[%s7575_s5] sm:$0xff] (%p8879_p6), %v7610_v61 }
 0x355   : > { %v7557_v13 = vadd.f32 %v8492_v11, %v7508_v42 }
 0x356   : > { %v7612_v41 = vld [vmem:[%s10597_s9 + $0x8] sm:$0xff] (%p8879_p6) }
 0x357   : > { %7563 = vst [vmem:[%s10597_s9 + $0x18] sm:$0xff] %v7557_v13  ;;  %7613 = vst [vmem:[%s7575_s5 + $0x20] sm:$0xff] (%p8879_p6), %v7612_v41 }
 0x35a   : > { %v7614_v30 = vld [vmem:[%s10597_s9 + $0x10] sm:$0xff] }
 0x35b   : > { %7615 = vst [vmem:[%s7575_s5 + $0x40] sm:$0xff] %v7614_v30 }
 0x35e   : > { %v7616_v53 = vld [vmem:[%s10597_s9 + $0x18] sm:$0xff] }
 0x35f   : > { %7617 = vst [vmem:[%s7575_s5 + $0x60] sm:$0xff] %v7616_v53 }
 0x360 PF: > { %s12_s13 = sadd.s32 1, %s8827_s13   ;;  %s10664_s9 = smov %s8815_s10 }
 0x361   : > { %p9_p11 = scmp.ge.s32.totalorder %s12_s13, 6   ;;  %s10665_s10 = smov %s8884_s19 }
 0x362   : > { %s10666_s11 = smov %s8823_s12  ;;  %s10667_s12 = smov %s10669_s14 }
 0x363   :  { %11 = sbr.rel (!%p9_p11) target bundleno = 3 (0x3), region = 160 }

// kernel: discriminator_forward.15
= control target key start
LH: loop header
LB: loop body
LE: loop exit
PB: predicated region body
PF: predicated region fallthrough
CT: control target
= control target key end

     0   :  { %v75_v0 = vlaneseq  ;;  %v1519_v10 = vmov 1983009808   ;;  %vm1371_vm0 = vcmask 1041408   ;;  %vm1507_vm1 = vcmask 1024   ;;  %s2500_s1 = inlined_call_operand.vmem [shape: bf16[1,8192], index: 1, kind: input, shape index: {}]   ;;  %s2501_s0 = inlined_call_operand.vmem [shape: bf16[2,8192], index: 0, kind: input, shape index: {}]   ;;  %s2502_s2 = inlined_call_operand.vmem [shape: f32[2,1], index: 2, kind: output, shape index: {}]  }
   0x1   :  { %v39_v1 = vld [vmem:[%s2500_s1 + $0x20] sm:$0xff]  ;;  %v40_v2 = vld [vmem:[%s2500_s1 + $0x28] sm:$0xff]  ;;  %v41_v4 = vld [vmem:[%s2500_s1 + $0x30] sm:$0xff]  ;;  %v1557_v11 = vunpack.c.l.s4 %v1519_v10 }
   0x2   :  { %v1541_v3 = vshrl.u32 %v75_v0, 7  ;;  %v42_v5 = vld [vmem:[%s2500_s1 + $0x38] sm:$0xff]  ;;  %v1549_v6 = vunpack.c.l.bf16 %v39_v1  ;;  %v1551_v7 = vunpack.c.h.bf16 %v39_v1  ;;  %v1553_v8 = vunpack.c.l.bf16 %v40_v2  ;;  %v1638_v48 = vld [vmem:[%s2501_s0] sm:$0xff]  ;;  %v1643_v49 = vld [vmem:[%s2501_s0 + $0x8] sm:$0xff] }
   0x3   :  { %v1555_v9 = vunpack.c.h.bf16 %v40_v2  ;;  %v1571_v16 = vunpack.c.l.bf16 %v41_v4  ;;  %v1573_v17 = vunpack.c.h.bf16 %v41_v4  ;;  %v1575_v18 = vunpack.c.l.bf16 %v42_v5  ;;  %2523 = vst [vmem:[#allocation4_spill] sm:$0xff] %v1638_v48  ;;  %2524 = vst [vmem:[#allocation5_spill] sm:$0xff] %v1643_v49  ;;  %v1656_v54 = vld [vmem:[%s2501_s0 + $0x20] sm:$0xff]  ;;  %v1664_v56 = vld [vmem:[%s2501_s0 + $0x28] sm:$0xff] }
   0x4   :  { %v1560_v12 = vsub.s32 0, %v1541_v3  ;;  %v1563_v13 = vsub.s32 2, %v1541_v3  ;;  %v1566_v14 = vsub.s32 4, %v1541_v3  ;;  %v1569_v15 = vsub.s32 6, %v1541_v3  ;;  %v35_v55 = vld [vmem:[%s2500_s1] sm:$0xff]  ;;  %v1669_v57 = vld [vmem:[%s2501_s0 + $0x30] sm:$0xff] }
   0x5   :  { %v1577_v19 = vunpack.c.h.bf16 %v42_v5  ;;  %2525 = vst [vmem:[#allocation6_spill] sm:$0xff] %v1669_v57  ;;  %v1674_v58 = vld [vmem:[%s2501_s0 + $0x38] sm:$0xff]  ;;  %v36_v0 = vld [vmem:[%s2500_s1 + $0x8] sm:$0xff]  ;;  %v37_v1 = vld [vmem:[%s2500_s1 + $0x10] sm:$0xff]  ;;  %v1687_v2 = vunpack.c.l.bf16 %v35_v55  ;;  %v719_v4 = vunpack.c.0.s8 %v1557_v11  ;;  %v1702_v11 = vunpack.c.h.bf16 %v35_v55 }
   0x6   :  { %2521 = vst [vmem:[#allocation2_spill] sm:$0xff] %v1563_v13  ;;  %2522 = vst [vmem:[#allocation3_spill] sm:$0xff] %v1566_v14  ;;  %v206_v20 = vrot.slane %v1549_v6, %v1560_v12  ;;  %v210_v21 = vrot.slane %v1549_v6, %v1563_v13  ;;  %v214_v22 = vrot.slane %v1549_v6, %v1566_v14  ;;  %v1697_v60 = vld [vmem:[%s2500_s1 + $0x18] sm:$0xff]  ;;  %v1704_v5 = vunpack.c.l.bf16 %v36_v0 }
   0x7   :  { %v218_v23 = vrot.slane %v1549_v6, %v1569_v15  ;;  %v222_v24 = vrot.slane %v1551_v7, %v1560_v12  ;;  %v226_v25 = vrot.slane %v1551_v7, %v1563_v13  ;;  %v230_v26 = vrot.slane %v1551_v7, %v1566_v14  ;;  %2526 = vst [vmem:[#allocation7_spill] sm:$0xff] %v1674_v58 }
   0x8   :  { %v234_v27 = vrot.slane %v1551_v7, %v1569_v15  ;;  %v238_v28 = vrot.slane %v1553_v8, %v1560_v12  ;;  %v242_v29 = vrot.slane %v1553_v8, %v1563_v13  ;;  %v246_v30 = vrot.slane %v1553_v8, %v1566_v14  ;;  %2527 = vst [vmem:[#allocation8_spill] sm:$0xff] %v1697_v60 }
   0x9   :  { %v250_v31 = vrot.slane %v1553_v8, %v1569_v15  ;;  %v254_v32 = vrot.slane %v1555_v9, %v1560_v12  ;;  %v258_v33 = vrot.slane %v1555_v9, %v1563_v13  ;;  %v262_v34 = vrot.slane %v1555_v9, %v1566_v14 }
   0xa   :  { %v266_v35 = vrot.slane %v1555_v9, %v1569_v15  ;;  %v270_v36 = vrot.slane %v1571_v16, %v1560_v12  ;;  %v274_v37 = vrot.slane %v1571_v16, %v1563_v13  ;;  %v278_v38 = vrot.slane %v1571_v16, %v1566_v14 }
   0xb   :  { %v282_v39 = vrot.slane %v1571_v16, %v1569_v15  ;;  %v286_v40 = vrot.slane %v1573_v17, %v1560_v12  ;;  %v290_v41 = vrot.slane %v1573_v17, %v1563_v13  ;;  %v294_v42 = vrot.slane %v1573_v17, %v1566_v14 }
   0xc   :  { %v298_v43 = vrot.slane %v1573_v17, %v1569_v15  ;;  %v302_v44 = vrot.slane %v1575_v18, %v1560_v12  ;;  %v306_v45 = vrot.slane %v1575_v18, %v1563_v13  ;;  %v310_v46 = vrot.slane %v1575_v18, %v1566_v14 }
   0xd   :  { %v314_v47 = vrot.slane %v1575_v18, %v1569_v15  ;;  %v318_v50 = vrot.slane %v1577_v19, %v1560_v12  ;;  %v322_v51 = vrot.slane %v1577_v19, %v1563_v13  ;;  %v1706_v10 = vunpack.c.h.bf16 %v36_v0 }
   0xe   :  { %v1708_v62 = vunpack.c.l.bf16 %v37_v1  ;;  %v1710_v61 = vunpack.c.h.bf16 %v37_v1  ;;  %v1713_v52 = vunpack.c.l.bf16 %v1697_v60  ;;  %v78_v59 = vrot.slane %v1687_v2, %v1560_v12 }
   0xf   :  { %v82_v63 = vrot.slane %v1687_v2, %v1563_v13  ;;  %v1720_v55 = vsub.s32 %v719_v4, %v1541_v3  ;;  %v1726_v0 = vrot.slane %v206_v20, %v1560_v12  ;;  %v1732_v1 = vrot.slane %v210_v21, %v1560_v12 }
  0x10   :  { %2528 = vst [vmem:[#allocation9_spill] sm:$0xff] %v1710_v61  ;;  %2529 = vst [vmem:[#allocation10_spill] sm:$0xff] %v1713_v52  ;;  %v1738_v53 = vrot.slane %v214_v22, %v1560_v12  ;;  %v1744_v3 = vrot.slane %v218_v23, %v1560_v12  ;;  %v1750_v20 = vrot.slane %v222_v24, %v1560_v12 }
  0x11   :  { %2530 = vst [vmem:[#allocation11_spill] sm:$0xff] %v1720_v55  ;;  %v1756_v21 = vrot.slane %v226_v25, %v1560_v12  ;;  %v1762_v22 = vrot.slane %v230_v26, %v1560_v12  ;;  %v1768_v6 = vrot.slane %v234_v27, %v1560_v12  ;;  %v1774_v23 = vrot.slane %v238_v28, %v1560_v12 }
  0x12   :  { %v1780_v24 = vrot.slane %v242_v29, %v1560_v12  ;;  %v1786_v25 = vrot.slane %v246_v30, %v1560_v12  ;;  %v1792_v7 = vrot.slane %v250_v31, %v1560_v12  ;;  %v1798_v26 = vrot.slane %v254_v32, %v1560_v12 }
  0x13   :  { %v1804_v27 = vrot.slane %v258_v33, %v1560_v12  ;;  %v1810_v28 = vrot.slane %v262_v34, %v1560_v12  ;;  %v1816_v8 = vrot.slane %v266_v35, %v1560_v12  ;;  %v1822_v29 = vrot.slane %v270_v36, %v1560_v12 }
  0x14   :  { %v1828_v30 = vrot.slane %v274_v37, %v1560_v12  ;;  %v1834_v31 = vrot.slane %v278_v38, %v1560_v12  ;;  %v1840_v9 = vrot.slane %v282_v39, %v1560_v12  ;;  %v1846_v32 = vrot.slane %v286_v40, %v1560_v12 }
  0x15   :  { %v1852_v33 = vrot.slane %v290_v41, %v1560_v12  ;;  %v1858_v34 = vrot.slane %v294_v42, %v1560_v12  ;;  %v1864_v16 = vrot.slane %v298_v43, %v1560_v12  ;;  %v1870_v35 = vrot.slane %v302_v44, %v1560_v12 }
  0x16   :  { %v1876_v36 = vrot.slane %v306_v45, %v1560_v12  ;;  %v1882_v37 = vrot.slane %v310_v46, %v1560_v12  ;;  %v1888_v17 = vrot.slane %v314_v47, %v1560_v12  ;;  %v1894_v38 = vrot.slane %v318_v50, %v1560_v12 }
  0x17   :  { %v1900_v39 = vrot.slane %v322_v51, %v1560_v12  ;;  %v2531_v40 = vrot.slane %v1577_v19, %v1566_v14  ;;  %v2532_v18 = vrot.slane %v1577_v19, %v1569_v15  ;;  %v86_v43 = vrot.slane %v1687_v2, %v1566_v14 }
  0x18   :  { %v90_v44 = vrot.slane %v1687_v2, %v1569_v15  ;;  %v94_v45 = vrot.slane %v1702_v11, %v1560_v12  ;;  %v98_v46 = vrot.slane %v1702_v11, %v1563_v13  ;;  %v102_v47 = vrot.slane %v1702_v11, %v1566_v14 }
  0x19   :  { %v1906_v41 = vrot.slane %v2531_v40, %v1560_v12  ;;  %v1912_v42 = vrot.slane %v2532_v18, %v1560_v12  ;;  %v106_v19 = vrot.slane %v1702_v11, %v1569_v15  ;;  %v110_v50 = vrot.slane %v1704_v5, %v1560_v12 }
  0x1a   :  { %v114_v51 = vrot.slane %v1704_v5, %v1563_v13  ;;  %v118_v2 = vrot.slane %v1704_v5, %v1566_v14  ;;  %v122_v4 = vrot.slane %v1704_v5, %v1569_v15  ;;  %v126_v40 = vrot.slane %v1706_v10, %v1560_v12 }
  0x1b   :  { %v130_v18 = vrot.slane %v1706_v10, %v1563_v13  ;;  %v134_v11 = vrot.slane %v1706_v10, %v1566_v14  ;;  %v138_v49 = vrot.slane %v1706_v10, %v1569_v15  ;;  %v142_v48 = vrot.slane %v1708_v62, %v1560_v12 }
  0x1c   :  { %v146_v60 = vrot.slane %v1708_v62, %v1563_v13  ;;  %v150_v5 = vrot.slane %v1708_v62, %v1566_v14  ;;  %v154_v52 = vrot.slane %v1708_v62, %v1569_v15  ;;  %v1951_v61 = vrot.slane %v78_v59, %v1560_v12 }
  0x1d   :  { %v1954_v58 = vrot.slane %v82_v63, %v1560_v12  ;;  %v1957_v10 = vrot.slane %v86_v43, %v1560_v12  ;;  %v1960_v57 = vrot.slane %v90_v44, %v1560_v12  ;;  %v1963_v13 = vrot.slane %v94_v45, %v1560_v12 }
  0x1e   :  { %v1966_v14 = vrot.slane %v98_v46, %v1560_v12  ;;  %v1969_v62 = vrot.slane %v102_v47, %v1560_v12  ;;  %v1972_v59 = vrot.slane %v106_v19, %v1560_v12  ;;  %v1975_v63 = vrot.slane %v110_v50, %v1560_v12 }
  0x1f   :  { %v1978_v43 = vrot.slane %v114_v51, %v1560_v12  ;;  %v1981_v44 = vrot.slane %v118_v2, %v1560_v12  ;;  %v1984_v45 = vrot.slane %v122_v4, %v1560_v12  ;;  %v1987_v46 = vrot.slane %v126_v40, %v1560_v12 }
  0x20   :  { %v1990_v47 = vrot.slane %v130_v18, %v1560_v12  ;;  %v1993_v19 = vrot.slane %v134_v11, %v1560_v12  ;;  %v1996_v50 = vrot.slane %v138_v49, %v1560_v12  ;;  %v1999_v51 = vrot.slane %v142_v48, %v1560_v12 }
  0x21   :  { %v851_v2 = vcombine.low %v1726_v0, %v1732_v1  ;;  %v2004_v4 = vrot.slane %v146_v60, %v1560_v12  ;;  %v2007_v40 = vrot.slane %v150_v5, %v1560_v12  ;;  %v2010_v18 = vrot.slane %v154_v52, %v1560_v12 }
  0x22   :  { %v852_v11 = vcombine.low %v1738_v53, %v1744_v3  ;;  %v715_v49 = vcombine.low %v1951_v61, %v1954_v58  ;;  %v868_v0 = vcombine.low %v1750_v20, %v1756_v21  ;;  %v869_v60 = vcombine.low %v1762_v22, %v1768_v6 }
  0x23   :  { %v859_v48 = vrot.slane %v851_v2, %v1720_v55  ;;  %v716_v1 = vcombine.low %v1957_v10, %v1960_v57  ;;  %v885_v5 = vcombine.low %v1774_v23, %v1780_v24  ;;  %v886_v53 = vcombine.low %v1786_v25, %v1792_v7 }
  0x24   :  { %v866_v52 = vrot.slane %v852_v11, %v1720_v55  ;;  %v876_v58 = vrot.slane %v868_v0, %v1720_v55  ;;  %v883_v61 = vrot.slane %v869_v60, %v1720_v55  ;;  %v902_v3 = vcombine.low %v1798_v26, %v1804_v27 }
  0x25   :  { %v903_v20 = vcombine.low %v1810_v28, %v1816_v8  ;;  %v893_v57 = vrot.slane %v885_v5, %v1720_v55  ;;  %v900_v22 = vrot.slane %v886_v53, %v1720_v55  ;;  %v919_v6 = vcombine.low %v1822_v29, %v1828_v30  ;;  %v2540_v5 = vld [vmem:[#allocation7_spill] sm:$0xff] }
  0x26   :  { %v867_v21 = vcombine.low %v859_v48, %v866_v52  ;;  %v884_v23 = vcombine.low %v876_v58, %v883_v61  ;;  %v910_v24 = vrot.slane %v902_v3, %v1720_v55  ;;  %v920_v7 = vcombine.low %v1834_v31, %v1840_v9 }
  0x27   :  { %v917_v25 = vrot.slane %v903_v20, %v1720_v55  ;;  %v901_v26 = vcombine.low %v893_v57, %v900_v22  ;;  %v927_v27 = vrot.slane %v919_v6, %v1720_v55  ;;  %v936_v28 = vcombine.low %v1846_v32, %v1852_v33  ;;  %v2544_v20 = vld [vmem:[#allocation2_spill] sm:$0xff]  ;;  %v2545_v6 = vld [vmem:[#allocation3_spill] sm:$0xff] }
  0x28   :  { %v937_v8 = vcombine.low %v1858_v34, %v1864_v16  ;;  %v934_v29 = vrot.slane %v920_v7, %v1720_v55  ;;  %v953_v30 = vcombine.low %v1870_v35, %v1876_v36  ;;  %v954_v2 = vcombine.low %v1882_v37, %v1888_v17 }
  0x29   :  { %v918_v10 = vcombine.low %v910_v24, %v917_v25  ;;  %v944_v31 = vrot.slane %v936_v28, %v1720_v55  ;;  %v970_v11 = vcombine.low %v1894_v38, %v1900_v39  ;;  %v971_v32 = vcombine.low %v1906_v41, %v1912_v42 }
  0x2a   :  { %v951_v9 = vrot.slane %v937_v8, %v1720_v55  ;;  %v732_v33 = vcombine.low %v1963_v13, %v1966_v14  ;;  %v935_v34 = vcombine.low %v927_v27, %v934_v29  ;;  %v961_v16 = vrot.slane %v953_v30, %v1720_v55  ;;  %v2125_v29 = vld [vmem:[%s2501_s0 + $0x10] sm:$0xff] }
  0x2b   :  { %v968_v35 = vrot.slane %v954_v2, %v1720_v55  ;;  %v733_v36 = vcombine.low %v1969_v62, %v1972_v59  ;;  %v978_v17 = vrot.slane %v970_v11, %v1720_v55  ;;  %v985_v48 = vrot.slane %v971_v32, %v1720_v55 }
  0x2c   :  { %v952_v37 = vcombine.low %v944_v31, %v951_v9  ;;  %v749_v38 = vcombine.low %v1975_v63, %v1978_v43  ;;  %v750_v39 = vcombine.low %v1981_v44, %v1984_v45  ;;  %v766_v13 = vcombine.low %v1987_v46, %v1990_v47 }
  0x2d   :  { %v969_v14 = vcombine.low %v961_v16, %v968_v35  ;;  %v723_v41 = vrot.slane %v715_v49, %v1720_v55  ;;  %v730_v42 = vrot.slane %v716_v1, %v1720_v55  ;;  %v767_v62 = vcombine.low %v1993_v19, %v1996_v50  ;;  %v2537_v49 = vld [vmem:[#allocation6_spill] sm:$0xff]  ;;  %v2547_v35 = vld [vmem:[#allocation8_spill] sm:$0xff] }
  0x2e   :  { %v986_v59 = vcombine.low %v978_v17, %v985_v48  ;;  %v2533_v0 = vunpack.c.l.bf16 %v1656_v54  ;;  %v2534_v63 = vunpack.c.h.bf16 %v1656_v54  ;;  %v2535_v44 = vunpack.c.l.bf16 %v1664_v56 }
  0x2f   :  { %v2536_v46 = vunpack.c.h.bf16 %v1664_v56  ;;  %v2538_v52 = vunpack.c.l.bf16 %v2537_v49  ;;  %v2539_v19 = vunpack.c.h.bf16 %v2537_v49  ;;  %v2541_v53 = vunpack.c.l.bf16 %v2540_v5  ;;  %v2543_v56 = vld [vmem:[#allocation9_spill] sm:$0xff] }
  0x30   :  { %v1011_v60 = vmul.f32 %v867_v21, %v2533_v0  ;;  %v1012_v43 = vmul.f32 %v884_v23, %v2534_v63  ;;  %v1013_v45 = vmul.f32 %v901_v26, %v2535_v44  ;;  %v2542_v54 = vunpack.c.h.bf16 %v2540_v5  ;;  %v2546_v26 = vld [vmem:[#allocation10_spill] sm:$0xff] }
  0x31   :  { %v2084_v47 = vmul.f32 %v918_v10, %v2536_v46  ;;  %v2088_v1 = vmul.f32 %v935_v34, %v2538_v52  ;;  %v2092_v50 = vmul.f32 %v952_v37, %v2539_v19  ;;  %v2096_v58 = vmul.f32 %v969_v14, %v2541_v53  ;;  %v2552_v19 = vld [vmem:[#allocation5_spill] sm:$0xff] }
  0x32   :  { %v2100_v61 = vmul.f32 %v986_v59, %v2542_v54  ;;  %v158_v3 = vrot.slane %v2543_v56, %v1560_v12  ;;  %v162_v21 = vrot.slane %v2543_v56, %v2544_v20  ;;  %v740_v57 = vrot.slane %v732_v33, %v1720_v55 }
  0x33   :  { %v747_v22 = vrot.slane %v733_v36, %v1720_v55  ;;  %v166_v23 = vrot.slane %v2543_v56, %v2545_v6  ;;  %v170_v24 = vrot.slane %v2543_v56, %v1569_v15  ;;  %v783_v25 = vcombine.low %v1999_v51, %v2004_v4 }
  0x34   :  { %v784_v7 = vcombine.low %v2007_v40, %v2010_v18  ;;  %v174_v27 = vrot.slane %v2546_v26, %v1560_v12  ;;  %v178_v28 = vrot.slane %v2546_v26, %v2544_v20  ;;  %v757_v8 = vrot.slane %v749_v38, %v1720_v55 }
  0x35   :  { %v764_v10 = vrot.slane %v750_v39, %v1720_v55  ;;  %v182_v51 = vrot.slane %v2546_v26, %v2545_v6  ;;  %v731_v4 = vcombine.low %v723_v41, %v730_v42  ;;  %v774_v40 = vrot.slane %v766_v13, %v1720_v55  ;;  %v2548_v13 = vld [vmem:[#allocation4_spill] sm:$0xff] }
  0x36   :  { %v781_v18 = vrot.slane %v767_v62, %v1720_v55  ;;  %v186_v30 = vrot.slane %v2546_v26, %v1569_v15  ;;  %v478_v2 = vrot.slane %v158_v3, %v1560_v12  ;;  %v482_v31 = vrot.slane %v162_v21, %v1560_v12 }
  0x37   :  { %v748_v9 = vcombine.low %v740_v57, %v747_v22  ;;  %v486_v11 = vrot.slane %v166_v23, %v1560_v12  ;;  %v490_v32 = vrot.slane %v170_v24, %v1560_v12  ;;  %v791_v33 = vrot.slane %v783_v25, %v1720_v55 }
  0x38   :  { %v798_v34 = vrot.slane %v784_v7, %v1720_v55  ;;  %v23_v16 = vunpack.c.l.bf16 %v2125_v29  ;;  %v2141_v36 = vunpack.c.h.bf16 %v2547_v35  ;;  %v2144_v37 = vrot.slane %v174_v27, %v1560_v12 }
  0x39   :  { %v765_v17 = vcombine.low %v757_v8, %v764_v10  ;;  %v2147_v48 = vrot.slane %v178_v28, %v1560_v12  ;;  %v2150_v38 = vrot.slane %v182_v51, %v1560_v12  ;;  %v782_v39 = vcombine.low %v774_v40, %v781_v18 }
  0x3a   :  { %v2549_v14 = vunpack.c.l.bf16 %v2548_v13  ;;  %v2155_v42 = vrot.slane %v186_v30, %v1560_v12  ;;  %v800_v62 = vcombine.low %v478_v2, %v482_v31  ;;  %v2550_v59 = vunpack.c.h.bf16 %v2548_v13 }
  0x3b   :  { %v1171_v63 = vcombine.high %v1011_v60, %v1011_v60  ;;  %v799_v44 = vcombine.low %v791_v33, %v798_v34  ;;  %v801_v46 = vcombine.low %v486_v11, %v490_v32  ;;  %v2160_v52 = vrot.slane %v1011_v60, %v1720_v55 }
  0x3c   :  { %v1003_v41 = vmul.f32 %v731_v4, %v2549_v14  ;;  %v1004_v0 = vmul.f32 %v748_v9, %v2550_v59  ;;  %v2553_v5 = vunpack.c.l.bf16 %v2552_v19  ;;  %v1188_v56 = vcombine.high %v1012_v43, %v1012_v43 }
  0x3d   :  { %2551 = vst [vmem:[#allocation6_spill] sm:$0xff] %v2160_v52  ;;  %v2165_v54 = vrot.slane %v1171_v63, %v1720_v55  ;;  %v2168_v3 = vrot.slane %v1012_v43, %v1720_v55  ;;  %v2554_v21 = vunpack.c.h.bf16 %v2552_v19  ;;  %v1205_v23 = vcombine.high %v1013_v45, %v1013_v45 }
  0x3e   :  { %v1035_v49 = vcombine.high %v1003_v41, %v1003_v41  ;;  %v1005_v53 = vmul.f32 %v765_v17, %v2553_v5  ;;  %v1042_v22 = vrot.slane %v1003_v41, %v1720_v55  ;;  %v2174_v24 = vrot.slane %v1013_v45, %v1720_v55 }
  0x3f   :  { %v1006_v57 = vmul.f32 %v782_v39, %v2554_v21  ;;  %v1052_v60 = vcombine.high %v1004_v0, %v1004_v0  ;;  %v1059_v25 = vrot.slane %v1004_v0, %v1720_v55  ;;  %v2178_v7 = vrot.slane %v1188_v56, %v1720_v55 }
  0x40   :  { %v1222_v26 = vcombine.high %v2084_v47, %v2084_v47  ;;  %v1049_v43 = vrot.slane %v1035_v49, %v1720_v55  ;;  %v2184_v27 = vrot.slane %v1205_v23, %v1720_v55  ;;  %v2188_v28 = vrot.slane %v2084_v47, %v1720_v55 }
  0x41   :  { %v1239_v45 = vcombine.high %v2088_v1, %v2088_v1  ;;  %v1069_v8 = vcombine.high %v1005_v53, %v1005_v53  ;;  %v2197_v51 = vrot.slane %v2088_v1, %v1720_v55  ;;  %v1256_v4 = vcombine.high %v2092_v50, %v2092_v50 }
  0x42   :  { %v2193_v10 = vrot.slane %v1222_v26, %v1720_v55  ;;  %v1050_v40 = vcombine.high %v1042_v22, %v1042_v22  ;;  %v1076_v18 = vrot.slane %v1005_v53, %v1720_v55  ;;  %v2207_v30 = vrot.slane %v2092_v50, %v1720_v55 }
  0x43   :  { %v2203_v47 = vrot.slane %v1239_v45, %v1720_v55  ;;  %v1086_v2 = vcombine.high %v1006_v57, %v1006_v57  ;;  %v2210_v31 = vrot.slane %v1006_v57, %v1720_v55  ;;  %v2213_v1 = vrot.slane %v1256_v4, %v1720_v55 }
  0x44   :  { %v1273_v9 = vcombine.high %v2096_v58, %v2096_v58  ;;  %v1051_v11 = vcombine.high %v1049_v43, %v1049_v43  ;;  %v1066_v32 = vrot.slane %v1052_v60, %v1720_v55  ;;  %v2220_v33 = vrot.slane %v2096_v58, %v1720_v55 }
  0x45   :  { %v1290_v50 = vcombine.high %v2100_v61, %v2100_v61  ;;  %v1083_v34 = vrot.slane %v1069_v8, %v1720_v55  ;;  %v2230_v17 = vrot.slane %v2100_v61, %v1720_v55  ;;  %v1372_v39 = vsel %vm1371_vm0, %v1042_v22, 0.0 }
  0x46   :  { %v2226_v35 = vrot.slane %v1273_v9, %v1720_v55  ;;  %v2234_v13 = vrot.slane %v800_v62, %v1720_v55  ;;  %v1373_v14 = vsel %vm1371_vm0, %v1050_v40, 0.0  ;;  %v1375_v41 = vsel %vm1371_vm0, %v1049_v43, 0.0 }
  0x47   :  { %v2237_v58 = vrot.slane %v1290_v50, %v1720_v55  ;;  %v2242_v59 = vrot.slane %v801_v46, %v1720_v55  ;;  %v2244_v0 = vmul.f32 %v799_v44, %v23_v16  ;;  %v1067_v63 = vcombine.high %v1059_v25, %v1059_v25 }
  0x48   :  { %v1374_v61 = vadd.f32 %v1373_v14, %v1372_v39  ;;  %v1084_v49 = vcombine.high %v1076_v18, %v1076_v18  ;;  %v2247_v19 = vrot.slane %v1086_v2, %v1720_v55  ;;  %v1377_v5 = vsel %vm1371_vm0, %v1051_v11, 0.0 }
  0x49   :  { %v1068_v53 = vcombine.high %v1066_v32, %v1066_v32  ;;  %v1085_v56 = vcombine.high %v1083_v34, %v1083_v34  ;;  %v1186_v21 = vcombine.high %v2160_v52, %v2160_v52  ;;  %v1187_v16 = vcombine.high %v2165_v54, %v2165_v54 }
  0x4a   :  { %v1376_v46 = vadd.f32 %v1375_v41, %v1374_v61  ;;  %v1203_v44 = vcombine.high %v2168_v3, %v2168_v3  ;;  %v1220_v57 = vcombine.high %v2174_v24, %v2174_v24  ;;  %v1379_v22 = vsel %vm1371_vm0, %v1059_v25, 0.0 }
  0x4b   :  { %v1204_v23 = vcombine.high %v2178_v7, %v2178_v7  ;;  %v1221_v60 = vcombine.high %v2184_v27, %v2184_v27  ;;  %v1237_v26 = vcombine.high %v2188_v28, %v2188_v28  ;;  %v1238_v45 = vcombine.high %v2193_v10, %v2193_v10 }
  0x4c   :  { %v1378_v43 = vadd.f32 %v1377_v5, %v1376_v46  ;;  %v1254_v8 = vcombine.high %v2197_v51, %v2197_v51  ;;  %v1255_v4 = vcombine.high %v2203_v47, %v2203_v47  ;;  %v1381_v25 = vsel %vm1371_vm0, %v1067_v63, 0.0 }
  0x4d   :  { %v1271_v40 = vcombine.high %v2207_v30, %v2207_v30  ;;  %v1272_v2 = vcombine.high %v2213_v1, %v2213_v1  ;;  %v1288_v9 = vcombine.high %v2220_v33, %v2220_v33  ;;  %v1289_v50 = vcombine.high %v2226_v35, %v2226_v35 }
  0x4e   :  { %v1380_v11 = vadd.f32 %v1379_v22, %v1378_v43  ;;  %v1305_v39 = vcombine.high %v2230_v17, %v2230_v17  ;;  %v1306_v14 = vcombine.high %v2237_v58, %v2237_v58  ;;  %v1383_v41 = vsel %vm1371_vm0, %v1066_v32, 0.0 }
  0x4f   :  { %v1385_v61 = vsel %vm1371_vm0, %v1068_v53, 0.0  ;;  %v1387_v5 = vsel %vm1371_vm0, %v1076_v18, 0.0  ;;  %v1389_v46 = vsel %vm1371_vm0, %v1084_v49, 0.0  ;;  %v1391_v22 = vsel %vm1371_vm0, %v1083_v34, 0.0 }
  0x50   :  { %v1382_v63 = vadd.f32 %v1381_v25, %v1380_v11  ;;  %v1393_v43 = vsel %vm1371_vm0, %v1085_v56, 0.0  ;;  %v2293_v62 = vsel %vm1371_vm0, %v1186_v21, 0.0  ;;  %v2297_v52 = vsel %vm1371_vm0, %v2165_v54, 0.0 }
  0x51   :  { %v2300_v32 = vsel %vm1371_vm0, %v1187_v16, 0.0  ;;  %v2304_v18 = vsel %vm1371_vm0, %v2168_v3, 0.0  ;;  %v2307_v49 = vsel %vm1371_vm0, %v1203_v44, 0.0  ;;  %v2311_v34 = vsel %vm1371_vm0, %v2178_v7, 0.0 }
  0x52   :  { %v1384_v55 = vadd.f32 %v1383_v41, %v1382_v63  ;;  %v2314_v53 = vsel %vm1371_vm0, %v1204_v23, 0.0  ;;  %v2318_v54 = vsel %vm1371_vm0, %v2174_v24, 0.0  ;;  %v2321_v56 = vsel %vm1371_vm0, %v1220_v57, 0.0 }
  0x53   :  { %v2325_v3 = vsel %vm1371_vm0, %v2184_v27, 0.0  ;;  %v2328_v16 = vsel %vm1371_vm0, %v1221_v60, 0.0  ;;  %v2332_v7 = vsel %vm1371_vm0, %v2188_v28, 0.0  ;;  %v2335_v44 = vsel %vm1371_vm0, %v1237_v26, 0.0 }
  0x54   :  { %v1386_v21 = vadd.f32 %v1385_v61, %v1384_v55  ;;  %v2339_v24 = vsel %vm1371_vm0, %v2193_v10, 0.0  ;;  %v2342_v55 = vsel %vm1371_vm0, %v1238_v45, 0.0  ;;  %v2346_v27 = vsel %vm1371_vm0, %v2197_v51, 0.0 }
  0x55   :  { %v2349_v23 = vsel %vm1371_vm0, %v1254_v8, 0.0  ;;  %v2353_v28 = vsel %vm1371_vm0, %v2203_v47, 0.0  ;;  %v2356_v60 = vsel %vm1371_vm0, %v1255_v4, 0.0  ;;  %v2360_v10 = vsel %vm1371_vm0, %v2207_v30, 0.0 }
  0x56   :  { %v1388_v57 = vadd.f32 %v1387_v5, %v1386_v21  ;;  %v2363_v26 = vsel %vm1371_vm0, %v1271_v40, 0.0  ;;  %v2367_v51 = vsel %vm1371_vm0, %v2213_v1, 0.0  ;;  %v2370_v45 = vsel %vm1371_vm0, %v1272_v2, 0.0  ;;  %v14_v5 = vld [vmem:[%s2501_s0 + $0x18] sm:$0xff] }
  0x57   :  { %v2374_v47 = vsel %vm1371_vm0, %v2220_v33, 0.0  ;;  %v2377_v4 = vsel %vm1371_vm0, %v1288_v9, 0.0  ;;  %v2381_v30 = vsel %vm1371_vm0, %v2226_v35, 0.0  ;;  %v2384_v25 = vsel %vm1371_vm0, %v1289_v50, 0.0 }
  0x58   :  { %v1390_v8 = vadd.f32 %v1389_v46, %v1388_v57  ;;  %v2388_v1 = vsel %vm1371_vm0, %v2230_v17, 0.0  ;;  %v2391_v40 = vsel %vm1371_vm0, %v1305_v39, 0.0  ;;  %v2395_v33 = vsel %vm1371_vm0, %v2237_v58, 0.0 }
  0x59   :  { %v24_v2 = vunpack.c.h.bf16 %v2125_v29  ;;  %v190_v35 = vrot.slane %v2141_v36, %v1560_v12  ;;  %v2401_v11 = vsel %vm1371_vm0, %v1306_v14, 0.0  ;;  %v194_v17 = vrot.slane %v2141_v36, %v2544_v20 }
  0x5a   :  { %v1392_v9 = vadd.f32 %v1391_v22, %v1390_v8  ;;  %v198_v50 = vrot.slane %v2141_v36, %v2545_v6  ;;  %v202_v39 = vrot.slane %v2141_v36, %v1569_v15  ;;  %v1395_v58 = vsel %vm1371_vm0, %v2210_v31, 0.0  ;;  %v2555_v15 = vld [vmem:[#allocation11_spill] sm:$0xff] }
  0x5b   :  { %v816_v29 = vcombine.low %v2234_v13, %v2242_v59  ;;  %v817_v41 = vcombine.low %v2144_v37, %v2147_v48  ;;  %v818_v14 = vcombine.low %v2150_v38, %v2155_v42  ;;  %v1102_v20 = vcombine.high %v2247_v19, %v2247_v19 }
  0x5c   :  { %v1394_v63 = vadd.f32 %v1393_v43, %v1392_v9  ;;  %v1103_v6 = vcombine.high %v2244_v0, %v2244_v0  ;;  %v1110_v36 = vrot.slane %v2244_v0, %v2555_v15  ;;  %v2556_v61 = vcombine.high %v2210_v31, %v2210_v31 }
  0x5d   :  { %v510_v37 = vrot.slane %v190_v35, %v1560_v12  ;;  %v514_v48 = vrot.slane %v194_v17, %v1560_v12  ;;  %v518_v38 = vrot.slane %v198_v50, %v1560_v12  ;;  %v1399_v42 = vsel %vm1371_vm0, %v2247_v19, 0.0 }
  0x5e   :  { %v1397_v13 = vsel %vm1371_vm0, %v2556_v61, 0.0  ;;  %v1396_v59 = vadd.f32 %v1395_v58, %v1394_v63  ;;  %v522_v0 = vrot.slane %v202_v39, %v1560_v12  ;;  %v825_v31 = vrot.slane %v817_v41, %v2555_v15 }
  0x5f   :  { %v832_v46 = vrot.slane %v818_v14, %v2555_v15  ;;  %v1008_v43 = vmul.f32 %v816_v29, %v24_v2  ;;  %v1117_v21 = vrot.slane %v1103_v6, %v2555_v15  ;;  %v1118_v57 = vcombine.high %v1110_v36, %v1110_v36 }
  0x60   :  { %v1398_v22 = vadd.f32 %v1397_v13, %v1396_v59  ;;  %v1401_v8 = vsel %vm1371_vm0, %v1102_v20, 0.0  ;;  %v25_v9 = vunpack.c.l.bf16 %v14_v5  ;;  %v1403_v19 = vsel %vm1371_vm0, %v1110_v36, 0.0 }
  0x61   :  { %v833_v17 = vcombine.low %v825_v31, %v832_v46  ;;  %v834_v50 = vcombine.low %v510_v37, %v514_v48  ;;  %v835_v58 = vcombine.low %v518_v38, %v522_v0  ;;  %v1119_v12 = vcombine.high %v1117_v21, %v1117_v21 }
  0x62   :  { %v1400_v35 = vadd.f32 %v1399_v42, %v1398_v22  ;;  %v1120_v39 = vcombine.high %v1008_v43, %v1008_v43  ;;  %v1127_v41 = vrot.slane %v1008_v43, %v2555_v15  ;;  %v1405_v14 = vsel %vm1371_vm0, %v1118_v57, 0.0 }
  0x63   :  { %v1407_v29 = vsel %vm1371_vm0, %v1117_v21, 0.0  ;;  %v842_v6 = vrot.slane %v834_v50, %v2555_v15  ;;  %v849_v20 = vrot.slane %v835_v58, %v2555_v15  ;;  %v1009_v13 = vmul.f32 %v833_v17, %v25_v9 }
  0x64   :  { %v1402_v63 = vadd.f32 %v1401_v8, %v1400_v35  ;;  %v1134_v36 = vrot.slane %v1120_v39, %v2555_v15  ;;  %v1135_v59 = vcombine.high %v1127_v41, %v1127_v41  ;;  %v1409_v37 = vsel %vm1371_vm0, %v1119_v12, 0.0 }
  0x65   :  { %v1411_v38 = vsel %vm1371_vm0, %v1127_v41, 0.0  ;;  %v26_v42 = vunpack.c.h.bf16 %v14_v5  ;;  %v850_v0 = vcombine.low %v842_v6, %v849_v20  ;;  %v1137_v22 = vcombine.high %v1009_v13, %v1009_v13 }
  0x66   :  { %v1404_v2 = vadd.f32 %v1403_v19, %v1402_v63  ;;  %v1136_v46 = vcombine.high %v1134_v36, %v1134_v36  ;;  %v1144_v43 = vrot.slane %v1009_v13, %v2555_v15  ;;  %v1413_v21 = vsel %vm1371_vm0, %v1135_v59, 0.0 }
  0x67   :  { %v1415_v8 = vsel %vm1371_vm0, %v1134_v36, 0.0  ;;  %v1010_v9 = vmul.f32 %v850_v0, %v26_v42  ;;  %v1151_v19 = vrot.slane %v1137_v22, %v2555_v15 }
  0x68   :  { %v1406_v61 = vadd.f32 %v1405_v14, %v1404_v2  ;;  %v1152_v17 = vcombine.high %v1144_v43, %v1144_v43  ;;  %v1417_v50 = vsel %vm1371_vm0, %v1136_v46, 0.0  ;;  %v1419_v5 = vsel %vm1371_vm0, %v1144_v43, 0.0  ;;  %v2557_v43 = vld [vmem:[#allocation6_spill] sm:$0xff] }
  0x69   :  { %v1153_v12 = vcombine.high %v1151_v19, %v1151_v19  ;;  %v1154_v39 = vcombine.high %v1010_v9, %v1010_v9  ;;  %v1161_v41 = vrot.slane %v1010_v9, %v2555_v15 }
  0x6a   :  { %v1408_v48 = vadd.f32 %v1407_v29, %v1406_v61  ;;  %v1421_v14 = vsel %vm1371_vm0, %v1152_v17, 0.0  ;;  %v1423_v29 = vsel %vm1371_vm0, %v1151_v19, 0.0 }
  0x6b   :  { %v1168_v20 = vrot.slane %v1154_v39, %v2555_v15  ;;  %v1169_v61 = vcombine.high %v1161_v41, %v1161_v41  ;;  %v1425_v13 = vsel %vm1371_vm0, %v1153_v12, 0.0  ;;  %v1427_v59 = vsel %vm1371_vm0, %v1161_v41, 0.0 }
  0x6c   :  { %v1410_v31 = vadd.f32 %v1409_v37, %v1408_v48  ;;  %v1435_v15 = vsel %vm1371_vm0, %v2557_v43, 0.0 }
  0x6d   :  { %v1170_v48 = vcombine.high %v1168_v20, %v1168_v20  ;;  %v1431_v0 = vsel %vm1371_vm0, %v1168_v20, 0.0 }
  0x6e   :  { %v1412_v57 = vadd.f32 %v1411_v38, %v1410_v31  ;;  %v1429_v38 = vsel %vm1371_vm0, %v1169_v61, 0.0 }
  0x6f   :  { %v1433_v46 = vsel %vm1371_vm0, %v1170_v48, 0.0 }
  0x70   :  { %v1414_v35 = vadd.f32 %v1413_v21, %v1412_v57 }
  0x72   :  { %v1416_v58 = vadd.f32 %v1415_v8, %v1414_v35 }
  0x74   :  { %v1418_v63 = vadd.f32 %v1417_v50, %v1416_v58 }
  0x76   :  { %v1420_v2 = vadd.f32 %v1419_v5, %v1418_v63 }
  0x78   :  { %v1422_v6 = vadd.f32 %v1421_v14, %v1420_v2 }
  0x7a   :  { %v1424_v36 = vadd.f32 %v1423_v29, %v1422_v6 }
  0x7c   :  { %v1426_v37 = vadd.f32 %v1425_v13, %v1424_v36 }
  0x7e   :  { %v1428_v42 = vadd.f32 %v1427_v59, %v1426_v37 }
  0x80   :  { %v1430_v31 = vadd.f32 %v1429_v38, %v1428_v42 }
  0x82   :  { %v1432_v22 = vadd.f32 %v1431_v0, %v1430_v31 }
  0x84   :  { %v1434_v21 = vadd.f32 %v1433_v46, %v1432_v22 }
  0x86   :  { %v1436_v57 = vadd.f32 %v1435_v15, %v1434_v21 }
  0x88   :  { %v1438_v8 = vadd.f32 %v2293_v62, %v1436_v57 }
  0x8a   :  { %v1440_v35 = vadd.f32 %v2297_v52, %v1438_v8 }
  0x8c   :  { %v1442_v9 = vadd.f32 %v2300_v32, %v1440_v35 }
  0x8e   :  { %v1444_v19 = vadd.f32 %v2304_v18, %v1442_v9 }
  0x90   :  { %v1446_v17 = vadd.f32 %v2307_v49, %v1444_v19 }
  0x92   :  { %v1448_v50 = vadd.f32 %v2311_v34, %v1446_v17 }
  0x94   :  { %v1450_v58 = vadd.f32 %v2314_v53, %v1448_v50 }
  0x96   :  { %v1452_v5 = vadd.f32 %v2318_v54, %v1450_v58 }
  0x98   :  { %v1454_v63 = vadd.f32 %v2321_v56, %v1452_v5 }
  0x9a   :  { %v1456_v12 = vadd.f32 %v2325_v3, %v1454_v63 }
  0x9c   :  { %v1458_v62 = vadd.f32 %v2328_v16, %v1456_v12 }
  0x9e   :  { %v1460_v52 = vadd.f32 %v2332_v7, %v1458_v62 }
  0xa0   :  { %v1462_v32 = vadd.f32 %v2335_v44, %v1460_v52 }
  0xa2   :  { %v1464_v18 = vadd.f32 %v2339_v24, %v1462_v32 }
  0xa4   :  { %v1466_v49 = vadd.f32 %v2342_v55, %v1464_v18 }
  0xa6   :  { %v1468_v34 = vadd.f32 %v2346_v27, %v1466_v49 }
  0xa8   :  { %v1470_v53 = vadd.f32 %v2349_v23, %v1468_v34 }
  0xaa   :  { %v1472_v54 = vadd.f32 %v2353_v28, %v1470_v53 }
  0xac   :  { %v1474_v56 = vadd.f32 %v2356_v60, %v1472_v54 }
  0xae   :  { %v1476_v3 = vadd.f32 %v2360_v10, %v1474_v56 }
  0xb0   :  { %v1478_v16 = vadd.f32 %v2363_v26, %v1476_v3 }
  0xb2   :  { %v1480_v7 = vadd.f32 %v2367_v51, %v1478_v16 }
  0xb4   :  { %v1482_v44 = vadd.f32 %v2370_v45, %v1480_v7 }
  0xb6   :  { %v1484_v24 = vadd.f32 %v2374_v47, %v1482_v44 }
  0xb8   :  { %v1486_v55 = vadd.f32 %v2377_v4, %v1484_v24 }
  0xba   :  { %v1488_v27 = vadd.f32 %v2381_v30, %v1486_v55 }
  0xbc   :  { %v1490_v23 = vadd.f32 %v2384_v25, %v1488_v27 }
  0xbe   :  { %v1492_v28 = vadd.f32 %v2388_v1, %v1490_v23 }
  0xc0   :  { %v1494_v60 = vadd.f32 %v2391_v40, %v1492_v28 }
  0xc2   :  { %v1496_v10 = vadd.f32 %v2395_v33, %v1494_v60 }
  0xc4   :  { %v1498_v26 = vadd.f32 %v2401_v11, %v1496_v10 }
  0xc6   :  { %1499 = vadd.xlane.f32.xlu0 %v1498_v26 }
 0x14f   :  { %v1500_v51 = vpop.xlane.xlu0 %1499 }
 0x150   :  { %v1513_v39 = vmul.f32 -1.442695, %v1500_v51 }
 0x152   :  { %1515 = vpow2.f32 %v1513_v39 }
 0x15f   :  { %v1516_v45 = vpop.eup %1515 }
 0x160   :  { %v1504_v47 = vadd.f32 1.0, %v1516_v45 }
 0x162   :  { %1517 = vrcp.f32 %v1504_v47 }
 0x16f   :  { %v1518_v4 = vpop.eup %1517 }
 0x170   :  { %1508 = vst.msk [vmem:[%s2502_s2] sm:$0x3] %vm1507_vm1, %v1518_v4 }

</bundles_post_ra>
